<compile_context>
chip_gen: v7x
topology: tpu7x:2x2x1
jax: 0.10.0
libtpu: 0.0.40
codegen_flags: <defaults>
</compile_context>

<pallas_src>
import math
import functools

import jax
import jax.numpy as jnp
from jax.experimental import pallas as pl
from jax.experimental.pallas import tpu as pltpu

# ----------------------------- configuration -------------------------------
D_MODEL = 32          # transformer.d_model
N_HEAD = 4
D_HEAD = D_MODEL // N_HEAD
D_FFN = 64
N_ENC_LAYERS = 1
N_DEC_LAYERS = 2
NUM_QUERIES = 8
BACKBONE_CH = 8       # backbone.num_channels
IMG_CH = 3
NEG_INF = -1e9
LN_EPS = 1e-5
ATTN_SCALE = 1.0 / math.sqrt(D_HEAD)
N_DATA_INPUTS = 3     # x, pos, bias


# ------------------------- shared math (kernel & reference) ------------------
# These helpers operate on plain arrays so the exact same code path is traced
# both inside the Pallas kernel and in the pure-JAX reference.

def _dot(a, b):
    """MXU matmul: bf16 operands, f32 accumulation."""
    return jnp.dot(a.astype(jnp.bfloat16), b.astype(jnp.bfloat16),
                   preferred_element_type=jnp.float32)


def _bdot(eq, a, b):
    """Batched-over-heads einsum on the MXU: bf16 operands, f32 accumulation."""
    return jnp.einsum(eq, a.astype(jnp.bfloat16), b.astype(jnp.bfloat16),
                      preferred_element_type=jnp.float32)


def _layer_norm(x, g, b):
    mu = jnp.mean(x, axis=-1, keepdims=True)
    var = jnp.mean(jnp.square(x - mu), axis=-1, keepdims=True)
    return (x - mu) * jax.lax.rsqrt(var + LN_EPS) * g + b


def _split_heads(x):
    """[L, D] -> [H, L, dh] via static lane slices + stack."""
    return jnp.stack(
        [x[:, h * D_HEAD:(h + 1) * D_HEAD] for h in range(N_HEAD)], axis=0)


def _merge_heads(x):
    """[H, L, dh] -> [L, D]."""
    return jnp.concatenate([x[h] for h in range(N_HEAD)], axis=-1)


def _mha(q_in, k_in, v_in, bias_row, p, recip):
    """Multi-head attention for one batch element.

    q_in: [Lq, D]   k_in/v_in: [Lk, D]   bias_row: [1, Lk] additive bias or None.
    """
    q = _split_heads(_dot(q_in, p["wq"]) + p["bq"])      # [H, Lq, dh]
    k = _split_heads(_dot(k_in, p["wk"]) + p["bk"])      # [H, Lk, dh]
    v = _split_heads(_dot(v_in, p["wv"]) + p["bv"])      # [H, Lk, dh]
    s = _bdot("hqd,hkd->hqk", q, k) * ATTN_SCALE         # [H, Lq, Lk]
    if bias_row is not None:
        s = s + bias_row[None]                           # broadcast once (hoisted)
    s = s - jnp.max(s, axis=-1, keepdims=True)
    pr = jnp.exp(s)
    pr = pr * recip(jnp.sum(pr, axis=-1, keepdims=True))
    o = _merge_heads(_bdot("hqk,hkd->hqd", pr, v))       # [Lq, D]
    return _dot(o, p["wo"]) + p["bo"]


def _ffn(x, p):
    h = jnp.maximum(_dot(x, p["f1w"]) + p["f1b"], 0.0)
    return _dot(h, p["f2w"]) + p["f2b"]


def _enc_layer(x, pos, bias_row, p, recip):
    qk = x + pos                                          # q = k = src + pos
    x = _layer_norm(x + _mha(qk, qk, x, bias_row, p["attn"], recip),
                    p["n1g"], p["n1b"])
    return _layer_norm(x + _ffn(x, p), p["n2g"], p["n2b"])


def _dec_layer(t, qpos, mem, pos, bias_row, p, recip):
    tq = t + qpos                                         # self-attn: no mask
    t = _layer_norm(t + _mha(tq, tq, t, None, p["self_attn"], recip),
                    p["n1g"], p["n1b"])
    t = _layer_norm(                                      # cross-attn: key pad mask
        t + _mha(t + qpos, mem + pos, mem, bias_row, p["cross_attn"], recip),
        p["n2g"], p["n2b"])
    return _layer_norm(t + _ffn(t, p), p["n3g"], p["n3b"])


def _forward_one(x, pos, bias_row, p, recip):
    """Whole POTR forward for ONE batch element.

    x: [S, C] pixels, pos: [S, D] sine pos-embed, bias_row: [1, S].
    Returns coords [Q, 3].
    """
    # TODO(synk): real POTR uses an external ResNet backbone; modeled here as a
    # 1x1 conv + ReLU fused with the 1x1-conv input_proj.
    h = jnp.maximum(_dot(x, p["backbone"]["w"]) + p["backbone"]["b"], 0.0)
    mem = _dot(h, p["input_proj"]["w"]) + p["input_proj"]["b"]      # [S, D]

    for lp in p["enc_layers"]:
        mem = _enc_layer(mem, pos, bias_row, lp, recip)

    qpos = p["query_embed"]                                         # [Q, D]
    t = jnp.zeros((NUM_QUERIES, D_MODEL), jnp.float32)
    for lp in p["dec_layers"]:
        t = _dec_layer(t, qpos, mem, pos, bias_row, lp, recip)

    # final decoder norm + coords head (reference returns outputs_coord[-1])
    t = _layer_norm(t, p["dec_norm_g"], p["dec_norm_b"])
    return _dot(t, p["coords"]["w"]) + p["coords"]["b"]             # [Q, 3]


# ----------------------------- positional encoding ---------------------------
def sine_pos_embed(mask, d_model):
    """DETR PositionEmbeddingSine. mask: [B, H, W] bool (True = pad) -> [B,H,W,d]."""
    not_mask = (~mask).astype(jnp.float32)
    y_embed = jnp.cumsum(not_mask, axis=1)
    x_embed = jnp.cumsum(not_mask, axis=2)
    eps = 1e-6
    scale = 2 * math.pi
    y_embed = y_embed / (y_embed[:, -1:, :] + eps) * scale
    x_embed = x_embed / (x_embed[:, :, -1:] + eps) * scale
    npf = d_model // 2
    dim_t = jnp.arange(npf, dtype=jnp.float32)
    dim_t = 10000.0 ** (2.0 * jnp.floor(dim_t / 2.0) / npf)
    pos_x = x_embed[..., None] / dim_t
    pos_y = y_embed[..., None] / dim_t
    B, H, W = mask.shape
    pos_x = jnp.stack([jnp.sin(pos_x[..., 0::2]), jnp.cos(pos_x[..., 1::2])],
                      axis=4).reshape(B, H, W, npf)
    pos_y = jnp.stack([jnp.sin(pos_y[..., 0::2]), jnp.cos(pos_y[..., 1::2])],
                      axis=4).reshape(B, H, W, npf)
    return jnp.concatenate([pos_y, pos_x], axis=3)


# ------------------------------ Pallas kernel --------------------------------
def _potr_kernel(treedef, *refs):
    """One grid step == one batch element.  Everything stays in VMEM."""
    o_ref = refs[-1]
    x_ref, pos_ref, bias_ref = refs[:N_DATA_INPUTS]
    leaves = [r[...] for r in refs[N_DATA_INPUTS:-1]]       # load all weights once
    p = jax.tree_util.tree_unflatten(treedef, leaves)
    recip = functools.partial(pl.reciprocal, approx=True)   # EUP slot
    coords = _forward_one(x_ref[0], pos_ref[0], bias_ref[0], p, recip)
    o_ref[0] = coords.astype(o_ref.dtype)


def potr_forward(params, samples_tensor, samples_mask):
    """samples_tensor: [B, 3, H, W] (NCHW); samples_mask: [B, H, W] bool."""
    B, C, H, W = samples_tensor.shape
    S = H * W

    # Wrapper-side precompute (fused by XLA under jit): NCHW -> tokens,
    # sine positional embedding, key-padding additive bias.
    x = samples_tensor.transpose(0, 2, 3, 1).reshape(B, S, C)
    pos = sine_pos_embed(samples_mask, D_MODEL).reshape(B, S, D_MODEL)
    bias = jnp.where(samples_mask.reshape(B, 1, S), NEG_INF, 0.0
                     ).astype(jnp.float32)

    leaves, treedef = jax.tree_util.tree_flatten(params)
    kernel = functools.partial(_potr_kernel, treedef)

    def batched_spec(shape):
        nd = len(shape)
        return pl.BlockSpec((1,) + tuple(shape[1:]),
                            lambda b, _nd=nd: (b,) + (0,) * (_nd - 1))

    def full_spec(arr):
        nd = arr.ndim
        return pl.BlockSpec(arr.shape, lambda b, _nd=nd: (0,) * _nd)

    in_specs = ([batched_spec(x.shape), batched_spec(pos.shape),
                 batched_spec(bias.shape)]
                + [full_spec(a) for a in leaves])
    out_specs = pl.BlockSpec((1, NUM_QUERIES, 3), lambda b: (b, 0, 0))

    return pl.pallas_call(
        kernel,
        out_shape=jax.ShapeDtypeStruct((B, NUM_QUERIES, 3), jnp.float32),
        grid=(B,),
        in_specs=in_specs,
        out_specs=out_specs,
        compiler_params=pltpu.CompilerParams(
            dimension_semantics=("parallel",)),  # 2 TCs on v7x; no-op on v5e/v6e
    )(x, pos, bias, *leaves)


# ----------------------------- pure-JAX reference ----------------------------
def potr_reference(params, samples_tensor, samples_mask):
    B, C, H, W = samples_tensor.shape
    S = H * W
    x = samples_tensor.transpose(0, 2, 3, 1).reshape(B, S, C)
    pos = sine_pos_embed(samples_mask, D_MODEL).reshape(B, S, D_MODEL)
    bias = jnp.where(samples_mask.reshape(B, 1, S), NEG_INF, 0.0
                     ).astype(jnp.float32)
    recip = lambda d: 1.0 / d                               # exact softmax denom
    outs = [_forward_one(x[b], pos[b], bias[b], params, recip)
            for b in range(B)]
    return jnp.stack(outs, axis=0)


# ------------------------------- parameter init -------------------------------
def _init_linear(key, fan_in, fan_out):
    k1, k2 = jax.random.split(key)
    bound = 1.0 / math.sqrt(fan_in)
    w = jax.random.uniform(k1, (fan_in, fan_out), jnp.float32, -bound, bound)
    b = jax.random.uniform(k2, (1, fan_out), jnp.float32, -bound, bound)
    return w, b


def _init_attn(key, d):
    ks = jax.random.split(key, 4)
    wq, bq = _init_linear(ks[0], d, d)
    wk, bk = _init_linear(ks[1], d, d)
    wv, bv = _init_linear(ks[2], d, d)
    wo, bo = _init_linear(ks[3], d, d)
    return {"wq": wq, "bq": bq, "wk": wk, "bk": bk,
            "wv": wv, "bv": bv, "wo": wo, "bo": bo}


def _ln_params():
    return (jnp.ones((1, D_MODEL), jnp.float32),
            jnp.zeros((1, D_MODEL), jnp.float32))


def _init_enc_layer(key):
    ks = jax.random.split(key, 3)
    f1w, f1b = _init_linear(ks[1], D_MODEL, D_FFN)
    f2w, f2b = _init_linear(ks[2], D_FFN, D_MODEL)
    n1g, n1b = _ln_params()
    n2g, n2b = _ln_params()
    return {"attn": _init_attn(ks[0], D_MODEL),
            "f1w": f1w, "f1b": f1b, "f2w": f2w, "f2b": f2b,
            "n1g": n1g, "n1b": n1b, "n2g": n2g, "n2b": n2b}


def _init_dec_layer(key):
    ks = jax.random.split(key, 4)
    f1w, f1b = _init_linear(ks[2], D_MODEL, D_FFN)
    f2w, f2b = _init_linear(ks[3], D_FFN, D_MODEL)
    n1g, n1b = _ln_params()
    n2g, n2b = _ln_params()
    n3g, n3b = _ln_params()
    return {"self_attn": _init_attn(ks[0], D_MODEL),
            "cross_attn": _init_attn(ks[1], D_MODEL),
            "f1w": f1w, "f1b": f1b, "f2w": f2w, "f2b": f2b,
            "n1g": n1g, "n1b": n1b, "n2g": n2g, "n2b": n2b,
            "n3g": n3g, "n3b": n3b}


def init_params(key):
    ks = jax.random.split(key, 4 + N_ENC_LAYERS + N_DEC_LAYERS)
    bb_w, bb_b = _init_linear(ks[0], IMG_CH, BACKBONE_CH)
    pj_w, pj_b = _init_linear(ks[1], BACKBONE_CH, D_MODEL)
    c_w, c_b = _init_linear(ks[2], D_MODEL, 3)
    ng, nb = _ln_params()
    return {
        "backbone": {"w": bb_w, "b": bb_b},
        "input_proj": {"w": pj_w, "b": pj_b},
        "coords": {"w": c_w, "b": c_b},
        "query_embed": jax.random.normal(ks[3], (NUM_QUERIES, D_MODEL),
                                         jnp.float32),
        "dec_norm_g": ng, "dec_norm_b": nb,
        "enc_layers": [_init_enc_layer(ks[4 + i]) for i in range(N_ENC_LAYERS)],
        "dec_layers": [_init_dec_layer(ks[4 + N_ENC_LAYERS + i])
                       for i in range(N_DEC_LAYERS)],
    }


# ------------------------------------ main ------------------------------------
if __name__ == "__main__":
    key = jax.random.PRNGKey(0)
    k_param, k_img = jax.random.split(key)

    B, H, W = 2, 8, 8
    params = init_params(k_param)
    samples = jax.random.normal(k_img, (B, IMG_CH, H, W), jnp.float32)
    # padding mask: batch 0 has no padding; batch 1 has last 2 columns padded
    col = jnp.arange(W)[None, None, :]
    valid_w = jnp.array([W, W - 2])[:, None, None]
    mask = jnp.broadcast_to(col >= valid_w, (B, H, W))

    out = jax.block_until_ready(jax.jit(potr_forward)(params, samples, mask))
    ref = jax.block_until_ready(jax.jit(potr_reference)(params, samples, mask))

    assert out.shape == (B, NUM_QUERIES, 3), out.shape
    assert bool(jnp.all(jnp.isfinite(out)))
    # Only intended deltas vs. the pure-JAX reference: approx reciprocal in the
    # softmax denominator and MXU accumulation order.
    assert bool(jnp.allclose(out, ref, atol=5e-2, rtol=5e-2)), (
        "max|diff|=%g" % float(jnp.max(jnp.abs(out - ref))))
    print("KERNEL_OK")
</pallas_src>

<mosaic_0001>
module attributes {stable_mosaic.version = 11 : i64} {
  func.func @_potr_kernel(%arg0: i32, %arg1: memref<1x64x3xf32, #tpu.memory_space<vmem>>, %arg2: memref<1x64x32xf32, #tpu.memory_space<vmem>>, %arg3: memref<1x1x64xf32, #tpu.memory_space<vmem>>, %arg4: memref<1x8xf32, #tpu.memory_space<vmem>>, %arg5: memref<3x8xf32, #tpu.memory_space<vmem>>, %arg6: memref<1x3xf32, #tpu.memory_space<vmem>>, %arg7: memref<32x3xf32, #tpu.memory_space<vmem>>, %arg8: memref<1x32xf32, #tpu.memory_space<vmem>>, %arg9: memref<1x32xf32, #tpu.memory_space<vmem>>, %arg10: memref<1x32xf32, #tpu.memory_space<vmem>>, %arg11: memref<1x32xf32, #tpu.memory_space<vmem>>, %arg12: memref<32x32xf32, #tpu.memory_space<vmem>>, %arg13: memref<32x32xf32, #tpu.memory_space<vmem>>, %arg14: memref<32x32xf32, #tpu.memory_space<vmem>>, %arg15: memref<32x32xf32, #tpu.memory_space<vmem>>, %arg16: memref<1x64xf32, #tpu.memory_space<vmem>>, %arg17: memref<32x64xf32, #tpu.memory_space<vmem>>, %arg18: memref<1x32xf32, #tpu.memory_space<vmem>>, %arg19: memref<64x32xf32, #tpu.memory_space<vmem>>, %arg20: memref<1x32xf32, #tpu.memory_space<vmem>>, %arg21: memref<1x32xf32, #tpu.memory_space<vmem>>, %arg22: memref<1x32xf32, #tpu.memory_space<vmem>>, %arg23: memref<1x32xf32, #tpu.memory_space<vmem>>, %arg24: memref<1x32xf32, #tpu.memory_space<vmem>>, %arg25: memref<1x32xf32, #tpu.memory_space<vmem>>, %arg26: memref<1x32xf32, #tpu.memory_space<vmem>>, %arg27: memref<1x32xf32, #tpu.memory_space<vmem>>, %arg28: memref<1x32xf32, #tpu.memory_space<vmem>>, %arg29: memref<1x32xf32, #tpu.memory_space<vmem>>, %arg30: memref<32x32xf32, #tpu.memory_space<vmem>>, %arg31: memref<32x32xf32, #tpu.memory_space<vmem>>, %arg32: memref<32x32xf32, #tpu.memory_space<vmem>>, %arg33: memref<32x32xf32, #tpu.memory_space<vmem>>, %arg34: memref<1x32xf32, #tpu.memory_space<vmem>>, %arg35: memref<1x32xf32, #tpu.memory_space<vmem>>, %arg36: memref<1x32xf32, #tpu.memory_space<vmem>>, %arg37: memref<1x32xf32, #tpu.memory_space<vmem>>, %arg38: memref<32x32xf32, #tpu.memory_space<vmem>>, %arg39: memref<32x32xf32, #tpu.memory_space<vmem>>, %arg40: memref<32x32xf32, #tpu.memory_space<vmem>>, %arg41: memref<32x32xf32, #tpu.memory_space<vmem>>, %arg42: memref<1x64xf32, #tpu.memory_space<vmem>>, %arg43: memref<32x64xf32, #tpu.memory_space<vmem>>, %arg44: memref<1x32xf32, #tpu.memory_space<vmem>>, %arg45: memref<64x32xf32, #tpu.memory_space<vmem>>, %arg46: memref<1x32xf32, #tpu.memory_space<vmem>>, %arg47: memref<1x32xf32, #tpu.memory_space<vmem>>, %arg48: memref<1x32xf32, #tpu.memory_space<vmem>>, %arg49: memref<1x32xf32, #tpu.memory_space<vmem>>, %arg50: memref<1x32xf32, #tpu.memory_space<vmem>>, %arg51: memref<1x32xf32, #tpu.memory_space<vmem>>, %arg52: memref<1x32xf32, #tpu.memory_space<vmem>>, %arg53: memref<1x32xf32, #tpu.memory_space<vmem>>, %arg54: memref<1x32xf32, #tpu.memory_space<vmem>>, %arg55: memref<1x32xf32, #tpu.memory_space<vmem>>, %arg56: memref<32x32xf32, #tpu.memory_space<vmem>>, %arg57: memref<32x32xf32, #tpu.memory_space<vmem>>, %arg58: memref<32x32xf32, #tpu.memory_space<vmem>>, %arg59: memref<32x32xf32, #tpu.memory_space<vmem>>, %arg60: memref<1x32xf32, #tpu.memory_space<vmem>>, %arg61: memref<1x32xf32, #tpu.memory_space<vmem>>, %arg62: memref<1x32xf32, #tpu.memory_space<vmem>>, %arg63: memref<1x32xf32, #tpu.memory_space<vmem>>, %arg64: memref<1x32xf32, #tpu.memory_space<vmem>>, %arg65: memref<1x32xf32, #tpu.memory_space<vmem>>, %arg66: memref<32x32xf32, #tpu.memory_space<vmem>>, %arg67: memref<32x32xf32, #tpu.memory_space<vmem>>, %arg68: memref<32x32xf32, #tpu.memory_space<vmem>>, %arg69: memref<32x32xf32, #tpu.memory_space<vmem>>, %arg70: memref<1x64xf32, #tpu.memory_space<vmem>>, %arg71: memref<32x64xf32, #tpu.memory_space<vmem>>, %arg72: memref<1x32xf32, #tpu.memory_space<vmem>>, %arg73: memref<64x32xf32, #tpu.memory_space<vmem>>, %arg74: memref<1x32xf32, #tpu.memory_space<vmem>>, %arg75: memref<1x32xf32, #tpu.memory_space<vmem>>, %arg76: memref<1x32xf32, #tpu.memory_space<vmem>>, %arg77: memref<1x32xf32, #tpu.memory_space<vmem>>, %arg78: memref<1x32xf32, #tpu.memory_space<vmem>>, %arg79: memref<8x32xf32, #tpu.memory_space<vmem>>, %arg80: memref<8x32xf32, #tpu.memory_space<vmem>>, %arg81: memref<1x8x3xf32, #tpu.memory_space<vmem>>) attributes {dimension_semantics = [#tpu.dimension_semantics<parallel>], iteration_bounds = array<i64: 2>, scalar_prefetch = 0 : i64, scratch_operands = 0 : i64, tpu.core_type = #tpu.core_type<tc>, window_params = [{transform_indices = @transform_0, window_bounds = array<i64: 1, 64, 3>}, {transform_indices = @transform_1, window_bounds = array<i64: 1, 64, 32>}, {transform_indices = @transform_2, window_bounds = array<i64: 1, 1, 64>}, {pipeline_mode = #tpu.pipeline_mode<synchronous>, transform_indices = @transform_3, window_bounds = array<i64: 1, 8>}, {pipeline_mode = #tpu.pipeline_mode<synchronous>, transform_indices = @transform_4, window_bounds = array<i64: 3, 8>}, {pipeline_mode = #tpu.pipeline_mode<synchronous>, transform_indices = @transform_5, window_bounds = array<i64: 1, 3>}, {pipeline_mode = #tpu.pipeline_mode<synchronous>, transform_indices = @transform_6, window_bounds = array<i64: 32, 3>}, {pipeline_mode = #tpu.pipeline_mode<synchronous>, transform_indices = @transform_7, window_bounds = array<i64: 1, 32>}, {pipeline_mode = #tpu.pipeline_mode<synchronous>, transform_indices = @transform_8, window_bounds = array<i64: 1, 32>}, {pipeline_mode = #tpu.pipeline_mode<synchronous>, transform_indices = @transform_9, window_bounds = array<i64: 1, 32>}, {pipeline_mode = #tpu.pipeline_mode<synchronous>, transform_indices = @transform_10, window_bounds = array<i64: 1, 32>}, {pipeline_mode = #tpu.pipeline_mode<synchronous>, transform_indices = @transform_11, window_bounds = array<i64: 32, 32>}, {pipeline_mode = #tpu.pipeline_mode<synchronous>, transform_indices = @transform_12, window_bounds = array<i64: 32, 32>}, {pipeline_mode = #tpu.pipeline_mode<synchronous>, transform_indices = @transform_13, window_bounds = array<i64: 32, 32>}, {pipeline_mode = #tpu.pipeline_mode<synchronous>, transform_indices = @transform_14, window_bounds = array<i64: 32, 32>}, {pipeline_mode = #tpu.pipeline_mode<synchronous>, transform_indices = @transform_15, window_bounds = array<i64: 1, 64>}, {pipeline_mode = #tpu.pipeline_mode<synchronous>, transform_indices = @transform_16, window_bounds = array<i64: 32, 64>}, {pipeline_mode = #tpu.pipeline_mode<synchronous>, transform_indices = @transform_17, window_bounds = array<i64: 1, 32>}, {pipeline_mode = #tpu.pipeline_mode<synchronous>, transform_indices = @transform_18, window_bounds = array<i64: 64, 32>}, {pipeline_mode = #tpu.pipeline_mode<synchronous>, transform_indices = @transform_19, window_bounds = array<i64: 1, 32>}, {pipeline_mode = #tpu.pipeline_mode<synchronous>, transform_indices = @transform_20, window_bounds = array<i64: 1, 32>}, {pipeline_mode = #tpu.pipeline_mode<synchronous>, transform_indices = @transform_21, window_bounds = array<i64: 1, 32>}, {pipeline_mode = #tpu.pipeline_mode<synchronous>, transform_indices = @transform_22, window_bounds = array<i64: 1, 32>}, {pipeline_mode = #tpu.pipeline_mode<synchronous>, transform_indices = @transform_23, window_bounds = array<i64: 1, 32>}, {pipeline_mode = #tpu.pipeline_mode<synchronous>, transform_indices = @transform_24, window_bounds = array<i64: 1, 32>}, {pipeline_mode = #tpu.pipeline_mode<synchronous>, transform_indices = @transform_25, window_bounds = array<i64: 1, 32>}, {pipeline_mode = #tpu.pipeline_mode<synchronous>, transform_indices = @transform_26, window_bounds = array<i64: 1, 32>}, {pipeline_mode = #tpu.pipeline_mode<synchronous>, transform_indices = @transform_27, window_bounds = array<i64: 1, 32>}, {pipeline_mode = #tpu.pipeline_mode<synchronous>, transform_indices = @transform_28, window_bounds = array<i64: 1, 32>}, {pipeline_mode = #tpu.pipeline_mode<synchronous>, transform_indices = @transform_29, window_bounds = array<i64: 32, 32>}, {pipeline_mode = #tpu.pipeline_mode<synchronous>, transform_indices = @transform_30, window_bounds = array<i64: 32, 32>}, {pipeline_mode = #tpu.pipeline_mode<synchronous>, transform_indices = @transform_31, window_bounds = array<i64: 32, 32>}, {pipeline_mode = #tpu.pipeline_mode<synchronous>, transform_indices = @transform_32, window_bounds = array<i64: 32, 32>}, {pipeline_mode = #tpu.pipeline_mode<synchronous>, transform_indices = @transform_33, window_bounds = array<i64: 1, 32>}, {pipeline_mode = #tpu.pipeline_mode<synchronous>, transform_indices = @transform_34, window_bounds = array<i64: 1, 32>}, {pipeline_mode = #tpu.pipeline_mode<synchronous>, transform_indices = @transform_35, window_bounds = array<i64: 1, 32>}, {pipeline_mode = #tpu.pipeline_mode<synchronous>, transform_indices = @transform_36, window_bounds = array<i64: 1, 32>}, {pipeline_mode = #tpu.pipeline_mode<synchronous>, transform_indices = @transform_37, window_bounds = array<i64: 32, 32>}, {pipeline_mode = #tpu.pipeline_mode<synchronous>, transform_indices = @transform_38, window_bounds = array<i64: 32, 32>}, {pipeline_mode = #tpu.pipeline_mode<synchronous>, transform_indices = @transform_39, window_bounds = array<i64: 32, 32>}, {pipeline_mode = #tpu.pipeline_mode<synchronous>, transform_indices = @transform_40, window_bounds = array<i64: 32, 32>}, {pipeline_mode = #tpu.pipeline_mode<synchronous>, transform_indices = @transform_41, window_bounds = array<i64: 1, 64>}, {pipeline_mode = #tpu.pipeline_mode<synchronous>, transform_indices = @transform_42, window_bounds = array<i64: 32, 64>}, {pipeline_mode = #tpu.pipeline_mode<synchronous>, transform_indices = @transform_43, window_bounds = array<i64: 1, 32>}, {pipeline_mode = #tpu.pipeline_mode<synchronous>, transform_indices = @transform_44, window_bounds = array<i64: 64, 32>}, {pipeline_mode = #tpu.pipeline_mode<synchronous>, transform_indices = @transform_45, window_bounds = array<i64: 1, 32>}, {pipeline_mode = #tpu.pipeline_mode<synchronous>, transform_indices = @transform_46, window_bounds = array<i64: 1, 32>}, {pipeline_mode = #tpu.pipeline_mode<synchronous>, transform_indices = @transform_47, window_bounds = array<i64: 1, 32>}, {pipeline_mode = #tpu.pipeline_mode<synchronous>, transform_indices = @transform_48, window_bounds = array<i64: 1, 32>}, {pipeline_mode = #tpu.pipeline_mode<synchronous>, transform_indices = @transform_49, window_bounds = array<i64: 1, 32>}, {pipeline_mode = #tpu.pipeline_mode<synchronous>, transform_indices = @transform_50, window_bounds = array<i64: 1, 32>}, {pipeline_mode = #tpu.pipeline_mode<synchronous>, transform_indices = @transform_51, window_bounds = array<i64: 1, 32>}, {pipeline_mode = #tpu.pipeline_mode<synchronous>, transform_indices = @transform_52, window_bounds = array<i64: 1, 32>}, {pipeline_mode = #tpu.pipeline_mode<synchronous>, transform_indices = @transform_53, window_bounds = array<i64: 1, 32>}, {pipeline_mode = #tpu.pipeline_mode<synchronous>, transform_indices = @transform_54, window_bounds = array<i64: 1, 32>}, {pipeline_mode = #tpu.pipeline_mode<synchronous>, transform_indices = @transform_55, window_bounds = array<i64: 32, 32>}, {pipeline_mode = #tpu.pipeline_mode<synchronous>, transform_indices = @transform_56, window_bounds = array<i64: 32, 32>}, {pipeline_mode = #tpu.pipeline_mode<synchronous>, transform_indices = @transform_57, window_bounds = array<i64: 32, 32>}, {pipeline_mode = #tpu.pipeline_mode<synchronous>, transform_indices = @transform_58, window_bounds = array<i64: 32, 32>}, {pipeline_mode = #tpu.pipeline_mode<synchronous>, transform_indices = @transform_59, window_bounds = array<i64: 1, 32>}, {pipeline_mode = #tpu.pipeline_mode<synchronous>, transform_indices = @transform_60, window_bounds = array<i64: 1, 32>}, {pipeline_mode = #tpu.pipeline_mode<synchronous>, transform_indices = @transform_61, window_bounds = array<i64: 1, 32>}, {pipeline_mode = #tpu.pipeline_mode<synchronous>, transform_indices = @transform_62, window_bounds = array<i64: 1, 32>}, {pipeline_mode = #tpu.pipeline_mode<synchronous>, transform_indices = @transform_63, window_bounds = array<i64: 1, 32>}, {pipeline_mode = #tpu.pipeline_mode<synchronous>, transform_indices = @transform_64, window_bounds = array<i64: 1, 32>}, {pipeline_mode = #tpu.pipeline_mode<synchronous>, transform_indices = @transform_65, window_bounds = array<i64: 32, 32>}, {pipeline_mode = #tpu.pipeline_mode<synchronous>, transform_indices = @transform_66, window_bounds = array<i64: 32, 32>}, {pipeline_mode = #tpu.pipeline_mode<synchronous>, transform_indices = @transform_67, window_bounds = array<i64: 32, 32>}, {pipeline_mode = #tpu.pipeline_mode<synchronous>, transform_indices = @transform_68, window_bounds = array<i64: 32, 32>}, {pipeline_mode = #tpu.pipeline_mode<synchronous>, transform_indices = @transform_69, window_bounds = array<i64: 1, 64>}, {pipeline_mode = #tpu.pipeline_mode<synchronous>, transform_indices = @transform_70, window_bounds = array<i64: 32, 64>}, {pipeline_mode = #tpu.pipeline_mode<synchronous>, transform_indices = @transform_71, window_bounds = array<i64: 1, 32>}, {pipeline_mode = #tpu.pipeline_mode<synchronous>, transform_indices = @transform_72, window_bounds = array<i64: 64, 32>}, {pipeline_mode = #tpu.pipeline_mode<synchronous>, transform_indices = @transform_73, window_bounds = array<i64: 1, 32>}, {pipeline_mode = #tpu.pipeline_mode<synchronous>, transform_indices = @transform_74, window_bounds = array<i64: 1, 32>}, {pipeline_mode = #tpu.pipeline_mode<synchronous>, transform_indices = @transform_75, window_bounds = array<i64: 1, 32>}, {pipeline_mode = #tpu.pipeline_mode<synchronous>, transform_indices = @transform_76, window_bounds = array<i64: 1, 32>}, {pipeline_mode = #tpu.pipeline_mode<synchronous>, transform_indices = @transform_77, window_bounds = array<i64: 1, 32>}, {pipeline_mode = #tpu.pipeline_mode<synchronous>, transform_indices = @transform_78, window_bounds = array<i64: 8, 32>}, {pipeline_mode = #tpu.pipeline_mode<synchronous>, transform_indices = @transform_79, window_bounds = array<i64: 8, 32>}, {transform_indices = @transform_80, window_bounds = array<i64: 1, 8, 3>}]} {
    %c0 = arith.constant 0 : index
    %c0_0 = arith.constant 0 : index
    %0 = vector.load %arg4[%c0, %c0_0] : memref<1x8xf32, #tpu.memory_space<vmem>>, vector<1x8xf32>
    %c0_1 = arith.constant 0 : index
    %c0_2 = arith.constant 0 : index
    %1 = vector.load %arg5[%c0_1, %c0_2] : memref<3x8xf32, #tpu.memory_space<vmem>>, vector<3x8xf32>
    %c0_3 = arith.constant 0 : index
    %c0_4 = arith.constant 0 : index
    %2 = vector.load %arg6[%c0_3, %c0_4] : memref<1x3xf32, #tpu.memory_space<vmem>>, vector<1x3xf32>
    %c0_5 = arith.constant 0 : index
    %c0_6 = arith.constant 0 : index
    %3 = vector.load %arg7[%c0_5, %c0_6] : memref<32x3xf32, #tpu.memory_space<vmem>>, vector<32x3xf32>
    %c0_7 = arith.constant 0 : index
    %c0_8 = arith.constant 0 : index
    %4 = vector.load %arg8[%c0_7, %c0_8] : memref<1x32xf32, #tpu.memory_space<vmem>>, vector<1x32xf32>
    %c0_9 = arith.constant 0 : index
    %c0_10 = arith.constant 0 : index
    %5 = vector.load %arg9[%c0_9, %c0_10] : memref<1x32xf32, #tpu.memory_space<vmem>>, vector<1x32xf32>
    %c0_11 = arith.constant 0 : index
    %c0_12 = arith.constant 0 : index
    %6 = vector.load %arg10[%c0_11, %c0_12] : memref<1x32xf32, #tpu.memory_space<vmem>>, vector<1x32xf32>
    %c0_13 = arith.constant 0 : index
    %c0_14 = arith.constant 0 : index
    %7 = vector.load %arg11[%c0_13, %c0_14] : memref<1x32xf32, #tpu.memory_space<vmem>>, vector<1x32xf32>
    %c0_15 = arith.constant 0 : index
    %c0_16 = arith.constant 0 : index
    %8 = vector.load %arg12[%c0_15, %c0_16] : memref<32x32xf32, #tpu.memory_space<vmem>>, vector<32x32xf32>
    %c0_17 = arith.constant 0 : index
    %c0_18 = arith.constant 0 : index
    %9 = vector.load %arg13[%c0_17, %c0_18] : memref<32x32xf32, #tpu.memory_space<vmem>>, vector<32x32xf32>
    %c0_19 = arith.constant 0 : index
    %c0_20 = arith.constant 0 : index
    %10 = vector.load %arg14[%c0_19, %c0_20] : memref<32x32xf32, #tpu.memory_space<vmem>>, vector<32x32xf32>
    %c0_21 = arith.constant 0 : index
    %c0_22 = arith.constant 0 : index
    %11 = vector.load %arg15[%c0_21, %c0_22] : memref<32x32xf32, #tpu.memory_space<vmem>>, vector<32x32xf32>
    %c0_23 = arith.constant 0 : index
    %c0_24 = arith.constant 0 : index
    %12 = vector.load %arg16[%c0_23, %c0_24] : memref<1x64xf32, #tpu.memory_space<vmem>>, vector<1x64xf32>
    %c0_25 = arith.constant 0 : index
    %c0_26 = arith.constant 0 : index
    %13 = vector.load %arg17[%c0_25, %c0_26] : memref<32x64xf32, #tpu.memory_space<vmem>>, vector<32x64xf32>
    %c0_27 = arith.constant 0 : index
    %c0_28 = arith.constant 0 : index
    %14 = vector.load %arg18[%c0_27, %c0_28] : memref<1x32xf32, #tpu.memory_space<vmem>>, vector<1x32xf32>
    %c0_29 = arith.constant 0 : index
    %c0_30 = arith.constant 0 : index
    %15 = vector.load %arg19[%c0_29, %c0_30] : memref<64x32xf32, #tpu.memory_space<vmem>>, vector<64x32xf32>
    %c0_31 = arith.constant 0 : index
    %c0_32 = arith.constant 0 : index
    %16 = vector.load %arg20[%c0_31, %c0_32] : memref<1x32xf32, #tpu.memory_space<vmem>>, vector<1x32xf32>
    %c0_33 = arith.constant 0 : index
    %c0_34 = arith.constant 0 : index
    %17 = vector.load %arg21[%c0_33, %c0_34] : memref<1x32xf32, #tpu.memory_space<vmem>>, vector<1x32xf32>
    %c0_35 = arith.constant 0 : index
    %c0_36 = arith.constant 0 : index
    %18 = vector.load %arg22[%c0_35, %c0_36] : memref<1x32xf32, #tpu.memory_space<vmem>>, vector<1x32xf32>
    %c0_37 = arith.constant 0 : index
    %c0_38 = arith.constant 0 : index
    %19 = vector.load %arg23[%c0_37, %c0_38] : memref<1x32xf32, #tpu.memory_space<vmem>>, vector<1x32xf32>
    %c0_39 = arith.constant 0 : index
    %c0_40 = arith.constant 0 : index
    %20 = vector.load %arg24[%c0_39, %c0_40] : memref<1x32xf32, #tpu.memory_space<vmem>>, vector<1x32xf32>
    %c0_41 = arith.constant 0 : index
    %c0_42 = arith.constant 0 : index
    %21 = vector.load %arg25[%c0_41, %c0_42] : memref<1x32xf32, #tpu.memory_space<vmem>>, vector<1x32xf32>
    %c0_43 = arith.constant 0 : index
    %c0_44 = arith.constant 0 : index
    %22 = vector.load %arg26[%c0_43, %c0_44] : memref<1x32xf32, #tpu.memory_space<vmem>>, vector<1x32xf32>
    %c0_45 = arith.constant 0 : index
    %c0_46 = arith.constant 0 : index
    %23 = vector.load %arg27[%c0_45, %c0_46] : memref<1x32xf32, #tpu.memory_space<vmem>>, vector<1x32xf32>
    %c0_47 = arith.constant 0 : index
    %c0_48 = arith.constant 0 : index
    %24 = vector.load %arg28[%c0_47, %c0_48] : memref<1x32xf32, #tpu.memory_space<vmem>>, vector<1x32xf32>
    %c0_49 = arith.constant 0 : index
    %c0_50 = arith.constant 0 : index
    %25 = vector.load %arg29[%c0_49, %c0_50] : memref<1x32xf32, #tpu.memory_space<vmem>>, vector<1x32xf32>
    %c0_51 = arith.constant 0 : index
    %c0_52 = arith.constant 0 : index
    %26 = vector.load %arg30[%c0_51, %c0_52] : memref<32x32xf32, #tpu.memory_space<vmem>>, vector<32x32xf32>
    %c0_53 = arith.constant 0 : index
    %c0_54 = arith.constant 0 : index
    %27 = vector.load %arg31[%c0_53, %c0_54] : memref<32x32xf32, #tpu.memory_space<vmem>>, vector<32x32xf32>
    %c0_55 = arith.constant 0 : index
    %c0_56 = arith.constant 0 : index
    %28 = vector.load %arg32[%c0_55, %c0_56] : memref<32x32xf32, #tpu.memory_space<vmem>>, vector<32x32xf32>
    %c0_57 = arith.constant 0 : index
    %c0_58 = arith.constant 0 : index
    %29 = vector.load %arg33[%c0_57, %c0_58] : memref<32x32xf32, #tpu.memory_space<vmem>>, vector<32x32xf32>
    %c0_59 = arith.constant 0 : index
    %c0_60 = arith.constant 0 : index
    %30 = vector.load %arg34[%c0_59, %c0_60] : memref<1x32xf32, #tpu.memory_space<vmem>>, vector<1x32xf32>
    %c0_61 = arith.constant 0 : index
    %c0_62 = arith.constant 0 : index
    %31 = vector.load %arg35[%c0_61, %c0_62] : memref<1x32xf32, #tpu.memory_space<vmem>>, vector<1x32xf32>
    %c0_63 = arith.constant 0 : index
    %c0_64 = arith.constant 0 : index
    %32 = vector.load %arg36[%c0_63, %c0_64] : memref<1x32xf32, #tpu.memory_space<vmem>>, vector<1x32xf32>
    %c0_65 = arith.constant 0 : index
    %c0_66 = arith.constant 0 : index
    %33 = vector.load %arg37[%c0_65, %c0_66] : memref<1x32xf32, #tpu.memory_space<vmem>>, vector<1x32xf32>
    %c0_67 = arith.constant 0 : index
    %c0_68 = arith.constant 0 : index
    %34 = vector.load %arg38[%c0_67, %c0_68] : memref<32x32xf32, #tpu.memory_space<vmem>>, vector<32x32xf32>
    %c0_69 = arith.constant 0 : index
    %c0_70 = arith.constant 0 : index
    %35 = vector.load %arg39[%c0_69, %c0_70] : memref<32x32xf32, #tpu.memory_space<vmem>>, vector<32x32xf32>
    %c0_71 = arith.constant 0 : index
    %c0_72 = arith.constant 0 : index
    %36 = vector.load %arg40[%c0_71, %c0_72] : memref<32x32xf32, #tpu.memory_space<vmem>>, vector<32x32xf32>
    %c0_73 = arith.constant 0 : index
    %c0_74 = arith.constant 0 : index
    %37 = vector.load %arg41[%c0_73, %c0_74] : memref<32x32xf32, #tpu.memory_space<vmem>>, vector<32x32xf32>
    %c0_75 = arith.constant 0 : index
    %c0_76 = arith.constant 0 : index
    %38 = vector.load %arg42[%c0_75, %c0_76] : memref<1x64xf32, #tpu.memory_space<vmem>>, vector<1x64xf32>
    %c0_77 = arith.constant 0 : index
    %c0_78 = arith.constant 0 : index
    %39 = vector.load %arg43[%c0_77, %c0_78] : memref<32x64xf32, #tpu.memory_space<vmem>>, vector<32x64xf32>
    %c0_79 = arith.constant 0 : index
    %c0_80 = arith.constant 0 : index
    %40 = vector.load %arg44[%c0_79, %c0_80] : memref<1x32xf32, #tpu.memory_space<vmem>>, vector<1x32xf32>
    %c0_81 = arith.constant 0 : index
    %c0_82 = arith.constant 0 : index
    %41 = vector.load %arg45[%c0_81, %c0_82] : memref<64x32xf32, #tpu.memory_space<vmem>>, vector<64x32xf32>
    %c0_83 = arith.constant 0 : index
    %c0_84 = arith.constant 0 : index
    %42 = vector.load %arg46[%c0_83, %c0_84] : memref<1x32xf32, #tpu.memory_space<vmem>>, vector<1x32xf32>
    %c0_85 = arith.constant 0 : index
    %c0_86 = arith.constant 0 : index
    %43 = vector.load %arg47[%c0_85, %c0_86] : memref<1x32xf32, #tpu.memory_space<vmem>>, vector<1x32xf32>
    %c0_87 = arith.constant 0 : index
    %c0_88 = arith.constant 0 : index
    %44 = vector.load %arg48[%c0_87, %c0_88] : memref<1x32xf32, #tpu.memory_space<vmem>>, vector<1x32xf32>
    %c0_89 = arith.constant 0 : index
    %c0_90 = arith.constant 0 : index
    %45 = vector.load %arg49[%c0_89, %c0_90] : memref<1x32xf32, #tpu.memory_space<vmem>>, vector<1x32xf32>
    %c0_91 = arith.constant 0 : index
    %c0_92 = arith.constant 0 : index
    %46 = vector.load %arg50[%c0_91, %c0_92] : memref<1x32xf32, #tpu.memory_space<vmem>>, vector<1x32xf32>
    %c0_93 = arith.constant 0 : index
    %c0_94 = arith.constant 0 : index
    %47 = vector.load %arg51[%c0_93, %c0_94] : memref<1x32xf32, #tpu.memory_space<vmem>>, vector<1x32xf32>
    %c0_95 = arith.constant 0 : index
    %c0_96 = arith.constant 0 : index
    %48 = vector.load %arg52[%c0_95, %c0_96] : memref<1x32xf32, #tpu.memory_space<vmem>>, vector<1x32xf32>
    %c0_97 = arith.constant 0 : index
    %c0_98 = arith.constant 0 : index
    %49 = vector.load %arg53[%c0_97, %c0_98] : memref<1x32xf32, #tpu.memory_space<vmem>>, vector<1x32xf32>
    %c0_99 = arith.constant 0 : index
    %c0_100 = arith.constant 0 : index
    %50 = vector.load %arg54[%c0_99, %c0_100] : memref<1x32xf32, #tpu.memory_space<vmem>>, vector<1x32xf32>
    %c0_101 = arith.constant 0 : index
    %c0_102 = arith.constant 0 : index
    %51 = vector.load %arg55[%c0_101, %c0_102] : memref<1x32xf32, #tpu.memory_space<vmem>>, vector<1x32xf32>
    %c0_103 = arith.constant 0 : index
    %c0_104 = arith.constant 0 : index
    %52 = vector.load %arg56[%c0_103, %c0_104] : memref<32x32xf32, #tpu.memory_space<vmem>>, vector<32x32xf32>
    %c0_105 = arith.constant 0 : index
    %c0_106 = arith.constant 0 : index
    %53 = vector.load %arg57[%c0_105, %c0_106] : memref<32x32xf32, #tpu.memory_space<vmem>>, vector<32x32xf32>
    %c0_107 = arith.constant 0 : index
    %c0_108 = arith.constant 0 : index
    %54 = vector.load %arg58[%c0_107, %c0_108] : memref<32x32xf32, #tpu.memory_space<vmem>>, vector<32x32xf32>
    %c0_109 = arith.constant 0 : index
    %c0_110 = arith.constant 0 : index
    %55 = vector.load %arg59[%c0_109, %c0_110] : memref<32x32xf32, #tpu.memory_space<vmem>>, vector<32x32xf32>
    %c0_111 = arith.constant 0 : index
    %c0_112 = arith.constant 0 : index
    %56 = vector.load %arg60[%c0_111, %c0_112] : memref<1x32xf32, #tpu.memory_space<vmem>>, vector<1x32xf32>
    %c0_113 = arith.constant 0 : index
    %c0_114 = arith.constant 0 : index
    %57 = vector.load %arg61[%c0_113, %c0_114] : memref<1x32xf32, #tpu.memory_space<vmem>>, vector<1x32xf32>
    %c0_115 = arith.constant 0 : index
    %c0_116 = arith.constant 0 : index
    %58 = vector.load %arg62[%c0_115, %c0_116] : memref<1x32xf32, #tpu.memory_space<vmem>>, vector<1x32xf32>
    %c0_117 = arith.constant 0 : index
    %c0_118 = arith.constant 0 : index
    %59 = vector.load %arg63[%c0_117, %c0_118] : memref<1x32xf32, #tpu.memory_space<vmem>>, vector<1x32xf32>
    %c0_119 = arith.constant 0 : index
    %c0_120 = arith.constant 0 : index
    %60 = vector.load %arg64[%c0_119, %c0_120] : memref<1x32xf32, #tpu.memory_space<vmem>>, vector<1x32xf32>
    %c0_121 = arith.constant 0 : index
    %c0_122 = arith.constant 0 : index
    %61 = vector.load %arg65[%c0_121, %c0_122] : memref<1x32xf32, #tpu.memory_space<vmem>>, vector<1x32xf32>
    %c0_123 = arith.constant 0 : index
    %c0_124 = arith.constant 0 : index
    %62 = vector.load %arg66[%c0_123, %c0_124] : memref<32x32xf32, #tpu.memory_space<vmem>>, vector<32x32xf32>
    %c0_125 = arith.constant 0 : index
    %c0_126 = arith.constant 0 : index
    %63 = vector.load %arg67[%c0_125, %c0_126] : memref<32x32xf32, #tpu.memory_space<vmem>>, vector<32x32xf32>
    %c0_127 = arith.constant 0 : index
    %c0_128 = arith.constant 0 : index
    %64 = vector.load %arg68[%c0_127, %c0_128] : memref<32x32xf32, #tpu.memory_space<vmem>>, vector<32x32xf32>
    %c0_129 = arith.constant 0 : index
    %c0_130 = arith.constant 0 : index
    %65 = vector.load %arg69[%c0_129, %c0_130] : memref<32x32xf32, #tpu.memory_space<vmem>>, vector<32x32xf32>
    %c0_131 = arith.constant 0 : index
    %c0_132 = arith.constant 0 : index
    %66 = vector.load %arg70[%c0_131, %c0_132] : memref<1x64xf32, #tpu.memory_space<vmem>>, vector<1x64xf32>
    %c0_133 = arith.constant 0 : index
    %c0_134 = arith.constant 0 : index
    %67 = vector.load %arg71[%c0_133, %c0_134] : memref<32x64xf32, #tpu.memory_space<vmem>>, vector<32x64xf32>
    %c0_135 = arith.constant 0 : index
    %c0_136 = arith.constant 0 : index
    %68 = vector.load %arg72[%c0_135, %c0_136] : memref<1x32xf32, #tpu.memory_space<vmem>>, vector<1x32xf32>
    %c0_137 = arith.constant 0 : index
    %c0_138 = arith.constant 0 : index
    %69 = vector.load %arg73[%c0_137, %c0_138] : memref<64x32xf32, #tpu.memory_space<vmem>>, vector<64x32xf32>
    %c0_139 = arith.constant 0 : index
    %c0_140 = arith.constant 0 : index
    %70 = vector.load %arg74[%c0_139, %c0_140] : memref<1x32xf32, #tpu.memory_space<vmem>>, vector<1x32xf32>
    %c0_141 = arith.constant 0 : index
    %c0_142 = arith.constant 0 : index
    %71 = vector.load %arg75[%c0_141, %c0_142] : memref<1x32xf32, #tpu.memory_space<vmem>>, vector<1x32xf32>
    %c0_143 = arith.constant 0 : index
    %c0_144 = arith.constant 0 : index
    %72 = vector.load %arg76[%c0_143, %c0_144] : memref<1x32xf32, #tpu.memory_space<vmem>>, vector<1x32xf32>
    %c0_145 = arith.constant 0 : index
    %c0_146 = arith.constant 0 : index
    %73 = vector.load %arg77[%c0_145, %c0_146] : memref<1x32xf32, #tpu.memory_space<vmem>>, vector<1x32xf32>
    %c0_147 = arith.constant 0 : index
    %c0_148 = arith.constant 0 : index
    %74 = vector.load %arg78[%c0_147, %c0_148] : memref<1x32xf32, #tpu.memory_space<vmem>>, vector<1x32xf32>
    %c0_149 = arith.constant 0 : index
    %c0_150 = arith.constant 0 : index
    %75 = vector.load %arg79[%c0_149, %c0_150] : memref<8x32xf32, #tpu.memory_space<vmem>>, vector<8x32xf32>
    %c0_151 = arith.constant 0 : index
    %c0_152 = arith.constant 0 : index
    %76 = vector.load %arg80[%c0_151, %c0_152] : memref<8x32xf32, #tpu.memory_space<vmem>>, vector<8x32xf32>
    %c0_153 = arith.constant 0 : index
    %c0_154 = arith.constant 0 : index
    %c0_155 = arith.constant 0 : index
    %77 = vector.load %arg1[%c0_153, %c0_154, %c0_155] : memref<1x64x3xf32, #tpu.memory_space<vmem>>, vector<1x64x3xf32>
    %78 = vector.shape_cast %77 : vector<1x64x3xf32> to vector<64x3xf32>
    %c0_156 = arith.constant 0 : index
    %c0_157 = arith.constant 0 : index
    %c0_158 = arith.constant 0 : index
    %79 = vector.load %arg2[%c0_156, %c0_157, %c0_158] : memref<1x64x32xf32, #tpu.memory_space<vmem>>, vector<1x64x32xf32>
    %80 = vector.shape_cast %79 : vector<1x64x32xf32> to vector<64x32xf32>
    %c0_159 = arith.constant 0 : index
    %c0_160 = arith.constant 0 : index
    %c0_161 = arith.constant 0 : index
    %81 = vector.load %arg3[%c0_159, %c0_160, %c0_161] : memref<1x1x64xf32, #tpu.memory_space<vmem>>, vector<1x1x64xf32>
    %82 = vector.shape_cast %81 : vector<1x1x64xf32> to vector<1x64xf32>
    %83 = arith.truncf %78 : vector<64x3xf32> to vector<64x3xbf16>
    %84 = arith.truncf %1 : vector<3x8xf32> to vector<3x8xbf16>
    %cst = arith.constant dense<0.000000e+00> : vector<64x8xf32>
    %85 = tpu.matmul %83, %84, %cst {dimension_numbers = #tpu.dot_dimension_numbers<[1], [0], [0], [1], [0, 0, 1, 1], [], []>} : vector<64x3xbf16>, vector<3x8xbf16>, vector<64x8xf32> -> vector<64x8xf32>
    %86 = vector.broadcast %0 : vector<1x8xf32> to vector<64x8xf32>
    %87 = arith.addf %85, %86 : vector<64x8xf32>
    %cst_162 = arith.constant 0.000000e+00 : f32
    %88 = vector.broadcast %cst_162 : f32 to vector<64x8xf32>
    %89 = arith.maximumf %87, %88 : vector<64x8xf32>
    %90 = arith.truncf %89 : vector<64x8xf32> to vector<64x8xbf16>
    %91 = arith.truncf %75 : vector<8x32xf32> to vector<8x32xbf16>
    %cst_163 = arith.constant dense<0.000000e+00> : vector<64x32xf32>
    %92 = tpu.matmul %90, %91, %cst_163 {dimension_numbers = #tpu.dot_dimension_numbers<[1], [0], [0], [1], [0, 0, 1, 1], [], []>} : vector<64x8xbf16>, vector<8x32xbf16>, vector<64x32xf32> -> vector<64x32xf32>
    %93 = vector.broadcast %74 : vector<1x32xf32> to vector<64x32xf32>
    %94 = arith.addf %92, %93 : vector<64x32xf32>
    %95 = arith.addf %94, %80 : vector<64x32xf32>
    %96 = arith.truncf %95 : vector<64x32xf32> to vector<64x32xbf16>
    %97 = arith.truncf %64 : vector<32x32xf32> to vector<32x32xbf16>
    %cst_164 = arith.constant dense<0.000000e+00> : vector<64x32xf32>
    %98 = tpu.matmul %96, %97, %cst_164 {dimension_numbers = #tpu.dot_dimension_numbers<[1], [0], [0], [1], [0, 0, 1, 1], [], []>} : vector<64x32xbf16>, vector<32x32xbf16>, vector<64x32xf32> -> vector<64x32xf32>
    %99 = vector.broadcast %60 : vector<1x32xf32> to vector<64x32xf32>
    %100 = arith.addf %98, %99 : vector<64x32xf32>
    %101 = vector.extract_strided_slice %100 {offsets = [0, 0], sizes = [64, 8], strides = [1, 1]} : vector<64x32xf32> to vector<64x8xf32>
    %102 = vector.extract_strided_slice %100 {offsets = [0, 8], sizes = [64, 8], strides = [1, 1]} : vector<64x32xf32> to vector<64x8xf32>
    %103 = vector.extract_strided_slice %100 {offsets = [0, 16], sizes = [64, 8], strides = [1, 1]} : vector<64x32xf32> to vector<64x8xf32>
    %104 = vector.extract_strided_slice %100 {offsets = [0, 24], sizes = [64, 8], strides = [1, 1]} : vector<64x32xf32> to vector<64x8xf32>
    %105 = vector.shape_cast %101 : vector<64x8xf32> to vector<1x64x8xf32>
    %106 = vector.shape_cast %102 : vector<64x8xf32> to vector<1x64x8xf32>
    %107 = vector.shape_cast %103 : vector<64x8xf32> to vector<1x64x8xf32>
    %108 = vector.shape_cast %104 : vector<64x8xf32> to vector<1x64x8xf32>
    %109 = tpu.concatenate %105, %106, %107, %108 in 0 : vector<1x64x8xf32>, vector<1x64x8xf32>, vector<1x64x8xf32>, vector<1x64x8xf32> -> vector<4x64x8xf32>
    %110 = arith.truncf %95 : vector<64x32xf32> to vector<64x32xbf16>
    %111 = arith.truncf %62 : vector<32x32xf32> to vector<32x32xbf16>
    %cst_165 = arith.constant dense<0.000000e+00> : vector<64x32xf32>
    %112 = tpu.matmul %110, %111, %cst_165 {dimension_numbers = #tpu.dot_dimension_numbers<[1], [0], [0], [1], [0, 0, 1, 1], [], []>} : vector<64x32xbf16>, vector<32x32xbf16>, vector<64x32xf32> -> vector<64x32xf32>
    %113 = vector.broadcast %58 : vector<1x32xf32> to vector<64x32xf32>
    %114 = arith.addf %112, %113 : vector<64x32xf32>
    %115 = vector.extract_strided_slice %114 {offsets = [0, 0], sizes = [64, 8], strides = [1, 1]} : vector<64x32xf32> to vector<64x8xf32>
    %116 = vector.extract_strided_slice %114 {offsets = [0, 8], sizes = [64, 8], strides = [1, 1]} : vector<64x32xf32> to vector<64x8xf32>
    %117 = vector.extract_strided_slice %114 {offsets = [0, 16], sizes = [64, 8], strides = [1, 1]} : vector<64x32xf32> to vector<64x8xf32>
    %118 = vector.extract_strided_slice %114 {offsets = [0, 24], sizes = [64, 8], strides = [1, 1]} : vector<64x32xf32> to vector<64x8xf32>
    %119 = vector.shape_cast %115 : vector<64x8xf32> to vector<1x64x8xf32>
    %120 = vector.shape_cast %116 : vector<64x8xf32> to vector<1x64x8xf32>
    %121 = vector.shape_cast %117 : vector<64x8xf32> to vector<1x64x8xf32>
    %122 = vector.shape_cast %118 : vector<64x8xf32> to vector<1x64x8xf32>
    %123 = tpu.concatenate %119, %120, %121, %122 in 0 : vector<1x64x8xf32>, vector<1x64x8xf32>, vector<1x64x8xf32>, vector<1x64x8xf32> -> vector<4x64x8xf32>
    %124 = arith.truncf %94 : vector<64x32xf32> to vector<64x32xbf16>
    %125 = arith.truncf %65 : vector<32x32xf32> to vector<32x32xbf16>
    %cst_166 = arith.constant dense<0.000000e+00> : vector<64x32xf32>
    %126 = tpu.matmul %124, %125, %cst_166 {dimension_numbers = #tpu.dot_dimension_numbers<[1], [0], [0], [1], [0, 0, 1, 1], [], []>} : vector<64x32xbf16>, vector<32x32xbf16>, vector<64x32xf32> -> vector<64x32xf32>
    %127 = vector.broadcast %61 : vector<1x32xf32> to vector<64x32xf32>
    %128 = arith.addf %126, %127 : vector<64x32xf32>
    %129 = vector.extract_strided_slice %128 {offsets = [0, 0], sizes = [64, 8], strides = [1, 1]} : vector<64x32xf32> to vector<64x8xf32>
    %130 = vector.extract_strided_slice %128 {offsets = [0, 8], sizes = [64, 8], strides = [1, 1]} : vector<64x32xf32> to vector<64x8xf32>
    %131 = vector.extract_strided_slice %128 {offsets = [0, 16], sizes = [64, 8], strides = [1, 1]} : vector<64x32xf32> to vector<64x8xf32>
    %132 = vector.extract_strided_slice %128 {offsets = [0, 24], sizes = [64, 8], strides = [1, 1]} : vector<64x32xf32> to vector<64x8xf32>
    %133 = vector.shape_cast %129 : vector<64x8xf32> to vector<1x64x8xf32>
    %134 = vector.shape_cast %130 : vector<64x8xf32> to vector<1x64x8xf32>
    %135 = vector.shape_cast %131 : vector<64x8xf32> to vector<1x64x8xf32>
    %136 = vector.shape_cast %132 : vector<64x8xf32> to vector<1x64x8xf32>
    %137 = tpu.concatenate %133, %134, %135, %136 in 0 : vector<1x64x8xf32>, vector<1x64x8xf32>, vector<1x64x8xf32>, vector<1x64x8xf32> -> vector<4x64x8xf32>
    %138 = arith.truncf %109 : vector<4x64x8xf32> to vector<4x64x8xbf16>
    %139 = arith.truncf %123 : vector<4x64x8xf32> to vector<4x64x8xbf16>
    "tpu.trace_start"() <{level = 10 : i32, message = "hqd,hkd->hqk"}> : () -> ()
    %cst_167 = arith.constant dense<0.000000e+00> : vector<4x64x64xf32>
    %140 = tpu.matmul %138, %139, %cst_167 {dimension_numbers = #tpu.dot_dimension_numbers<[2], [2], [1], [1], [0, 0, 0, 1, 1, 1], [0], [0]>} : vector<4x64x8xbf16>, vector<4x64x8xbf16>, vector<4x64x64xf32> -> vector<4x64x64xf32>
    "tpu.trace_stop"() : () -> ()
    %cst_168 = arith.constant 0.353553385 : f32
    %141 = vector.broadcast %cst_168 : f32 to vector<4x64x64xf32>
    %142 = arith.mulf %140, %141 : vector<4x64x64xf32>
    %143 = vector.shape_cast %82 : vector<1x64xf32> to vector<1x1x64xf32>
    %144 = vector.broadcast %143 : vector<1x1x64xf32> to vector<4x64x64xf32>
    %145 = arith.addf %142, %144 : vector<4x64x64xf32>
    %cst_169 = arith.constant dense<0xFF800000> : vector<4x64xf32>
    %146 = vector.multi_reduction <maximumf>, %145, %cst_169 [2] : vector<4x64x64xf32> to vector<4x64xf32>
    %147 = vector.shape_cast %146 : vector<4x64xf32> to vector<4x64x1xf32>
    %148 = vector.broadcast %147 : vector<4x64x1xf32> to vector<4x64x64xf32>
    %149 = arith.subf %145, %148 : vector<4x64x64xf32>
    %150 = math.exp %149 : vector<4x64x64xf32>
    %cst_170 = arith.constant dense<0.000000e+00> : vector<4x64xf32>
    %151 = vector.multi_reduction <add>, %150, %cst_170 [2] : vector<4x64x64xf32> to vector<4x64xf32>
    %152 = vector.shape_cast %151 : vector<4x64xf32> to vector<4x64x1xf32>
    %153 = tpu.reciprocal %152 {approx = true} : vector<4x64x1xf32> -> vector<4x64x1xf32>
    %154 = vector.broadcast %153 : vector<4x64x1xf32> to vector<4x64x64xf32>
    %155 = arith.mulf %150, %154 : vector<4x64x64xf32>
    %156 = arith.truncf %155 : vector<4x64x64xf32> to vector<4x64x64xbf16>
    %157 = arith.truncf %137 : vector<4x64x8xf32> to vector<4x64x8xbf16>
    "tpu.trace_start"() <{level = 10 : i32, message = "hqk,hkd->hqd"}> : () -> ()
    %cst_171 = arith.constant dense<0.000000e+00> : vector<4x64x8xf32>
    %158 = tpu.matmul %156, %157, %cst_171 {dimension_numbers = #tpu.dot_dimension_numbers<[2], [1], [1], [2], [0, 0, 0, 1, 1, 2], [0], [0]>} : vector<4x64x64xbf16>, vector<4x64x8xbf16>, vector<4x64x8xf32> -> vector<4x64x8xf32>
    "tpu.trace_stop"() : () -> ()
    %159 = vector.extract_strided_slice %158 {offsets = [0, 0, 0], sizes = [1, 64, 8], strides = [1, 1, 1]} : vector<4x64x8xf32> to vector<1x64x8xf32>
    %160 = vector.shape_cast %159 : vector<1x64x8xf32> to vector<64x8xf32>
    %161 = vector.extract_strided_slice %158 {offsets = [1, 0, 0], sizes = [1, 64, 8], strides = [1, 1, 1]} : vector<4x64x8xf32> to vector<1x64x8xf32>
    %162 = vector.shape_cast %161 : vector<1x64x8xf32> to vector<64x8xf32>
    %163 = vector.extract_strided_slice %158 {offsets = [2, 0, 0], sizes = [1, 64, 8], strides = [1, 1, 1]} : vector<4x64x8xf32> to vector<1x64x8xf32>
    %164 = vector.shape_cast %163 : vector<1x64x8xf32> to vector<64x8xf32>
    %165 = vector.extract_strided_slice %158 {offsets = [3, 0, 0], sizes = [1, 64, 8], strides = [1, 1, 1]} : vector<4x64x8xf32> to vector<1x64x8xf32>
    %166 = vector.shape_cast %165 : vector<1x64x8xf32> to vector<64x8xf32>
    %167 = tpu.concatenate %160, %162, %164, %166 in 1 : vector<64x8xf32>, vector<64x8xf32>, vector<64x8xf32>, vector<64x8xf32> -> vector<64x32xf32>
    %168 = arith.truncf %167 : vector<64x32xf32> to vector<64x32xbf16>
    %169 = arith.truncf %63 : vector<32x32xf32> to vector<32x32xbf16>
    %cst_172 = arith.constant dense<0.000000e+00> : vector<64x32xf32>
    %170 = tpu.matmul %168, %169, %cst_172 {dimension_numbers = #tpu.dot_dimension_numbers<[1], [0], [0], [1], [0, 0, 1, 1], [], []>} : vector<64x32xbf16>, vector<32x32xbf16>, vector<64x32xf32> -> vector<64x32xf32>
    %171 = vector.broadcast %59 : vector<1x32xf32> to vector<64x32xf32>
    %172 = arith.addf %170, %171 : vector<64x32xf32>
    %173 = arith.addf %94, %172 : vector<64x32xf32>
    %cst_173 = arith.constant dense<0.000000e+00> : vector<64xf32>
    %174 = vector.multi_reduction <add>, %173, %cst_173 [1] : vector<64x32xf32> to vector<64xf32>
    %175 = vector.shape_cast %174 : vector<64xf32> to vector<64x1xf32>
    %cst_174 = arith.constant 3.200000e+01 : f32
    %176 = vector.broadcast %cst_174 : f32 to vector<64x1xf32>
    %177 = arith.divf %175, %176 : vector<64x1xf32>
    %178 = vector.broadcast %177 : vector<64x1xf32> to vector<64x32xf32>
    %179 = arith.subf %173, %178 : vector<64x32xf32>
    %180 = arith.mulf %179, %179 : vector<64x32xf32>
    %cst_175 = arith.constant dense<0.000000e+00> : vector<64xf32>
    %181 = vector.multi_reduction <add>, %180, %cst_175 [1] : vector<64x32xf32> to vector<64xf32>
    %182 = vector.shape_cast %181 : vector<64xf32> to vector<64x1xf32>
    %cst_176 = arith.constant 3.200000e+01 : f32
    %183 = vector.broadcast %cst_176 : f32 to vector<64x1xf32>
    %184 = arith.divf %182, %183 : vector<64x1xf32>
    %185 = vector.broadcast %177 : vector<64x1xf32> to vector<64x32xf32>
    %186 = arith.subf %173, %185 : vector<64x32xf32>
    %cst_177 = arith.constant 9.99999974E-6 : f32
    %187 = vector.broadcast %cst_177 : f32 to vector<64x1xf32>
    %188 = arith.addf %184, %187 : vector<64x1xf32>
    %189 = math.rsqrt %188 : vector<64x1xf32>
    %190 = vector.broadcast %189 : vector<64x1xf32> to vector<64x32xf32>
    %191 = arith.mulf %186, %190 : vector<64x32xf32>
    %192 = vector.broadcast %71 : vector<1x32xf32> to vector<64x32xf32>
    %193 = arith.mulf %191, %192 : vector<64x32xf32>
    %194 = vector.broadcast %70 : vector<1x32xf32> to vector<64x32xf32>
    %195 = arith.addf %193, %194 : vector<64x32xf32>
    %196 = arith.truncf %195 : vector<64x32xf32> to vector<64x32xbf16>
    %197 = arith.truncf %67 : vector<32x64xf32> to vector<32x64xbf16>
    %cst_178 = arith.constant dense<0.000000e+00> : vector<64x64xf32>
    %198 = tpu.matmul %196, %197, %cst_178 {dimension_numbers = #tpu.dot_dimension_numbers<[1], [0], [0], [1], [0, 0, 1, 1], [], []>} : vector<64x32xbf16>, vector<32x64xbf16>, vector<64x64xf32> -> vector<64x64xf32>
    %199 = vector.broadcast %66 : vector<1x64xf32> to vector<64x64xf32>
    %200 = arith.addf %198, %199 : vector<64x64xf32>
    %cst_179 = arith.constant 0.000000e+00 : f32
    %201 = vector.broadcast %cst_179 : f32 to vector<64x64xf32>
    %202 = arith.maximumf %200, %201 : vector<64x64xf32>
    %203 = arith.truncf %202 : vector<64x64xf32> to vector<64x64xbf16>
    %204 = arith.truncf %69 : vector<64x32xf32> to vector<64x32xbf16>
    %cst_180 = arith.constant dense<0.000000e+00> : vector<64x32xf32>
    %205 = tpu.matmul %203, %204, %cst_180 {dimension_numbers = #tpu.dot_dimension_numbers<[1], [0], [0], [1], [0, 0, 1, 1], [], []>} : vector<64x64xbf16>, vector<64x32xbf16>, vector<64x32xf32> -> vector<64x32xf32>
    %206 = vector.broadcast %68 : vector<1x32xf32> to vector<64x32xf32>
    %207 = arith.addf %205, %206 : vector<64x32xf32>
    %208 = arith.addf %195, %207 : vector<64x32xf32>
    %cst_181 = arith.constant dense<0.000000e+00> : vector<64xf32>
    %209 = vector.multi_reduction <add>, %208, %cst_181 [1] : vector<64x32xf32> to vector<64xf32>
    %210 = vector.shape_cast %209 : vector<64xf32> to vector<64x1xf32>
    %cst_182 = arith.constant 3.200000e+01 : f32
    %211 = vector.broadcast %cst_182 : f32 to vector<64x1xf32>
    %212 = arith.divf %210, %211 : vector<64x1xf32>
    %213 = vector.broadcast %212 : vector<64x1xf32> to vector<64x32xf32>
    %214 = arith.subf %208, %213 : vector<64x32xf32>
    %215 = arith.mulf %214, %214 : vector<64x32xf32>
    %cst_183 = arith.constant dense<0.000000e+00> : vector<64xf32>
    %216 = vector.multi_reduction <add>, %215, %cst_183 [1] : vector<64x32xf32> to vector<64xf32>
    %217 = vector.shape_cast %216 : vector<64xf32> to vector<64x1xf32>
    %cst_184 = arith.constant 3.200000e+01 : f32
    %218 = vector.broadcast %cst_184 : f32 to vector<64x1xf32>
    %219 = arith.divf %217, %218 : vector<64x1xf32>
    %220 = vector.broadcast %212 : vector<64x1xf32> to vector<64x32xf32>
    %221 = arith.subf %208, %220 : vector<64x32xf32>
    %cst_185 = arith.constant 9.99999974E-6 : f32
    %222 = vector.broadcast %cst_185 : f32 to vector<64x1xf32>
    %223 = arith.addf %219, %222 : vector<64x1xf32>
    %224 = math.rsqrt %223 : vector<64x1xf32>
    %225 = vector.broadcast %224 : vector<64x1xf32> to vector<64x32xf32>
    %226 = arith.mulf %221, %225 : vector<64x32xf32>
    %227 = vector.broadcast %73 : vector<1x32xf32> to vector<64x32xf32>
    %228 = arith.mulf %226, %227 : vector<64x32xf32>
    %229 = vector.broadcast %72 : vector<1x32xf32> to vector<64x32xf32>
    %230 = arith.addf %228, %229 : vector<64x32xf32>
    %cst_186 = arith.constant 0.000000e+00 : f32
    %231 = vector.broadcast %cst_186 : f32 to vector<8x32xf32>
    %232 = arith.addf %231, %76 : vector<8x32xf32>
    %233 = arith.truncf %232 : vector<8x32xf32> to vector<8x32xbf16>
    %234 = arith.truncf %28 : vector<32x32xf32> to vector<32x32xbf16>
    %cst_187 = arith.constant dense<0.000000e+00> : vector<8x32xf32>
    %235 = tpu.matmul %233, %234, %cst_187 {dimension_numbers = #tpu.dot_dimension_numbers<[1], [0], [0], [1], [0, 0, 1, 1], [], []>} : vector<8x32xbf16>, vector<32x32xbf16>, vector<8x32xf32> -> vector<8x32xf32>
    %236 = vector.broadcast %24 : vector<1x32xf32> to vector<8x32xf32>
    %237 = arith.addf %235, %236 : vector<8x32xf32>
    %238 = vector.extract_strided_slice %237 {offsets = [0, 0], sizes = [8, 8], strides = [1, 1]} : vector<8x32xf32> to vector<8x8xf32>
    %239 = vector.extract_strided_slice %237 {offsets = [0, 8], sizes = [8, 8], strides = [1, 1]} : vector<8x32xf32> to vector<8x8xf32>
    %240 = vector.extract_strided_slice %237 {offsets = [0, 16], sizes = [8, 8], strides = [1, 1]} : vector<8x32xf32> to vector<8x8xf32>
    %241 = vector.extract_strided_slice %237 {offsets = [0, 24], sizes = [8, 8], strides = [1, 1]} : vector<8x32xf32> to vector<8x8xf32>
    %242 = vector.shape_cast %238 : vector<8x8xf32> to vector<1x8x8xf32>
    %243 = vector.shape_cast %239 : vector<8x8xf32> to vector<1x8x8xf32>
    %244 = vector.shape_cast %240 : vector<8x8xf32> to vector<1x8x8xf32>
    %245 = vector.shape_cast %241 : vector<8x8xf32> to vector<1x8x8xf32>
    %246 = tpu.concatenate %242, %243, %244, %245 in 0 : vector<1x8x8xf32>, vector<1x8x8xf32>, vector<1x8x8xf32>, vector<1x8x8xf32> -> vector<4x8x8xf32>
    %247 = arith.truncf %232 : vector<8x32xf32> to vector<8x32xbf16>
    %248 = arith.truncf %26 : vector<32x32xf32> to vector<32x32xbf16>
    %cst_188 = arith.constant dense<0.000000e+00> : vector<8x32xf32>
    %249 = tpu.matmul %247, %248, %cst_188 {dimension_numbers = #tpu.dot_dimension_numbers<[1], [0], [0], [1], [0, 0, 1, 1], [], []>} : vector<8x32xbf16>, vector<32x32xbf16>, vector<8x32xf32> -> vector<8x32xf32>
    %250 = vector.broadcast %22 : vector<1x32xf32> to vector<8x32xf32>
    %251 = arith.addf %249, %250 : vector<8x32xf32>
    %252 = vector.extract_strided_slice %251 {offsets = [0, 0], sizes = [8, 8], strides = [1, 1]} : vector<8x32xf32> to vector<8x8xf32>
    %253 = vector.extract_strided_slice %251 {offsets = [0, 8], sizes = [8, 8], strides = [1, 1]} : vector<8x32xf32> to vector<8x8xf32>
    %254 = vector.extract_strided_slice %251 {offsets = [0, 16], sizes = [8, 8], strides = [1, 1]} : vector<8x32xf32> to vector<8x8xf32>
    %255 = vector.extract_strided_slice %251 {offsets = [0, 24], sizes = [8, 8], strides = [1, 1]} : vector<8x32xf32> to vector<8x8xf32>
    %256 = vector.shape_cast %252 : vector<8x8xf32> to vector<1x8x8xf32>
    %257 = vector.shape_cast %253 : vector<8x8xf32> to vector<1x8x8xf32>
    %258 = vector.shape_cast %254 : vector<8x8xf32> to vector<1x8x8xf32>
    %259 = vector.shape_cast %255 : vector<8x8xf32> to vector<1x8x8xf32>
    %260 = tpu.concatenate %256, %257, %258, %259 in 0 : vector<1x8x8xf32>, vector<1x8x8xf32>, vector<1x8x8xf32>, vector<1x8x8xf32> -> vector<4x8x8xf32>
    %261 = arith.truncf %231 : vector<8x32xf32> to vector<8x32xbf16>
    %262 = arith.truncf %29 : vector<32x32xf32> to vector<32x32xbf16>
    %cst_189 = arith.constant dense<0.000000e+00> : vector<8x32xf32>
    %263 = tpu.matmul %261, %262, %cst_189 {dimension_numbers = #tpu.dot_dimension_numbers<[1], [0], [0], [1], [0, 0, 1, 1], [], []>} : vector<8x32xbf16>, vector<32x32xbf16>, vector<8x32xf32> -> vector<8x32xf32>
    %264 = vector.broadcast %25 : vector<1x32xf32> to vector<8x32xf32>
    %265 = arith.addf %263, %264 : vector<8x32xf32>
    %266 = vector.extract_strided_slice %265 {offsets = [0, 0], sizes = [8, 8], strides = [1, 1]} : vector<8x32xf32> to vector<8x8xf32>
    %267 = vector.extract_strided_slice %265 {offsets = [0, 8], sizes = [8, 8], strides = [1, 1]} : vector<8x32xf32> to vector<8x8xf32>
    %268 = vector.extract_strided_slice %265 {offsets = [0, 16], sizes = [8, 8], strides = [1, 1]} : vector<8x32xf32> to vector<8x8xf32>
    %269 = vector.extract_strided_slice %265 {offsets = [0, 24], sizes = [8, 8], strides = [1, 1]} : vector<8x32xf32> to vector<8x8xf32>
    %270 = vector.shape_cast %266 : vector<8x8xf32> to vector<1x8x8xf32>
    %271 = vector.shape_cast %267 : vector<8x8xf32> to vector<1x8x8xf32>
    %272 = vector.shape_cast %268 : vector<8x8xf32> to vector<1x8x8xf32>
    %273 = vector.shape_cast %269 : vector<8x8xf32> to vector<1x8x8xf32>
    %274 = tpu.concatenate %270, %271, %272, %273 in 0 : vector<1x8x8xf32>, vector<1x8x8xf32>, vector<1x8x8xf32>, vector<1x8x8xf32> -> vector<4x8x8xf32>
    %275 = arith.truncf %246 : vector<4x8x8xf32> to vector<4x8x8xbf16>
    %276 = arith.truncf %260 : vector<4x8x8xf32> to vector<4x8x8xbf16>
    "tpu.trace_start"() <{level = 10 : i32, message = "hqd,hkd->hqk"}> : () -> ()
    %cst_190 = arith.constant dense<0.000000e+00> : vector<4x8x8xf32>
    %277 = tpu.matmul %275, %276, %cst_190 {dimension_numbers = #tpu.dot_dimension_numbers<[2], [2], [1], [1], [0, 0, 0, 1, 1, 1], [0], [0]>} : vector<4x8x8xbf16>, vector<4x8x8xbf16>, vector<4x8x8xf32> -> vector<4x8x8xf32>
    "tpu.trace_stop"() : () -> ()
    %cst_191 = arith.constant 0.353553385 : f32
    %278 = vector.broadcast %cst_191 : f32 to vector<4x8x8xf32>
    %279 = arith.mulf %277, %278 : vector<4x8x8xf32>
    %cst_192 = arith.constant dense<0xFF800000> : vector<4x8xf32>
    %280 = vector.multi_reduction <maximumf>, %279, %cst_192 [2] : vector<4x8x8xf32> to vector<4x8xf32>
    %281 = vector.shape_cast %280 : vector<4x8xf32> to vector<4x8x1xf32>
    %282 = vector.broadcast %281 : vector<4x8x1xf32> to vector<4x8x8xf32>
    %283 = arith.subf %279, %282 : vector<4x8x8xf32>
    %284 = math.exp %283 : vector<4x8x8xf32>
    %cst_193 = arith.constant dense<0.000000e+00> : vector<4x8xf32>
    %285 = vector.multi_reduction <add>, %284, %cst_193 [2] : vector<4x8x8xf32> to vector<4x8xf32>
    %286 = vector.shape_cast %285 : vector<4x8xf32> to vector<4x8x1xf32>
    %287 = tpu.reciprocal %286 {approx = true} : vector<4x8x1xf32> -> vector<4x8x1xf32>
    %288 = vector.broadcast %287 : vector<4x8x1xf32> to vector<4x8x8xf32>
    %289 = arith.mulf %284, %288 : vector<4x8x8xf32>
    %290 = arith.truncf %289 : vector<4x8x8xf32> to vector<4x8x8xbf16>
    %291 = arith.truncf %274 : vector<4x8x8xf32> to vector<4x8x8xbf16>
    "tpu.trace_start"() <{level = 10 : i32, message = "hqk,hkd->hqd"}> : () -> ()
    %cst_194 = arith.constant dense<0.000000e+00> : vector<4x8x8xf32>
    %292 = tpu.matmul %290, %291, %cst_194 {dimension_numbers = #tpu.dot_dimension_numbers<[2], [1], [1], [2], [0, 0, 0, 1, 1, 2], [0], [0]>} : vector<4x8x8xbf16>, vector<4x8x8xbf16>, vector<4x8x8xf32> -> vector<4x8x8xf32>
    "tpu.trace_stop"() : () -> ()
    %293 = vector.extract_strided_slice %292 {offsets = [0, 0, 0], sizes = [1, 8, 8], strides = [1, 1, 1]} : vector<4x8x8xf32> to vector<1x8x8xf32>
    %294 = vector.shape_cast %293 : vector<1x8x8xf32> to vector<8x8xf32>
    %295 = vector.extract_strided_slice %292 {offsets = [1, 0, 0], sizes = [1, 8, 8], strides = [1, 1, 1]} : vector<4x8x8xf32> to vector<1x8x8xf32>
    %296 = vector.shape_cast %295 : vector<1x8x8xf32> to vector<8x8xf32>
    %297 = vector.extract_strided_slice %292 {offsets = [2, 0, 0], sizes = [1, 8, 8], strides = [1, 1, 1]} : vector<4x8x8xf32> to vector<1x8x8xf32>
    %298 = vector.shape_cast %297 : vector<1x8x8xf32> to vector<8x8xf32>
    %299 = vector.extract_strided_slice %292 {offsets = [3, 0, 0], sizes = [1, 8, 8], strides = [1, 1, 1]} : vector<4x8x8xf32> to vector<1x8x8xf32>
    %300 = vector.shape_cast %299 : vector<1x8x8xf32> to vector<8x8xf32>
    %301 = tpu.concatenate %294, %296, %298, %300 in 1 : vector<8x8xf32>, vector<8x8xf32>, vector<8x8xf32>, vector<8x8xf32> -> vector<8x32xf32>
    %302 = arith.truncf %301 : vector<8x32xf32> to vector<8x32xbf16>
    %303 = arith.truncf %27 : vector<32x32xf32> to vector<32x32xbf16>
    %cst_195 = arith.constant dense<0.000000e+00> : vector<8x32xf32>
    %304 = tpu.matmul %302, %303, %cst_195 {dimension_numbers = #tpu.dot_dimension_numbers<[1], [0], [0], [1], [0, 0, 1, 1], [], []>} : vector<8x32xbf16>, vector<32x32xbf16>, vector<8x32xf32> -> vector<8x32xf32>
    %305 = vector.broadcast %23 : vector<1x32xf32> to vector<8x32xf32>
    %306 = arith.addf %304, %305 : vector<8x32xf32>
    %307 = arith.addf %231, %306 : vector<8x32xf32>
    %cst_196 = arith.constant dense<0.000000e+00> : vector<8xf32>
    %308 = vector.multi_reduction <add>, %307, %cst_196 [1] : vector<8x32xf32> to vector<8xf32>
    %309 = vector.shape_cast %308 : vector<8xf32> to vector<8x1xf32>
    %cst_197 = arith.constant 3.200000e+01 : f32
    %310 = vector.broadcast %cst_197 : f32 to vector<8x1xf32>
    %311 = arith.divf %309, %310 : vector<8x1xf32>
    %312 = vector.broadcast %311 : vector<8x1xf32> to vector<8x32xf32>
    %313 = arith.subf %307, %312 : vector<8x32xf32>
    %314 = arith.mulf %313, %313 : vector<8x32xf32>
    %cst_198 = arith.constant dense<0.000000e+00> : vector<8xf32>
    %315 = vector.multi_reduction <add>, %314, %cst_198 [1] : vector<8x32xf32> to vector<8xf32>
    %316 = vector.shape_cast %315 : vector<8xf32> to vector<8x1xf32>
    %cst_199 = arith.constant 3.200000e+01 : f32
    %317 = vector.broadcast %cst_199 : f32 to vector<8x1xf32>
    %318 = arith.divf %316, %317 : vector<8x1xf32>
    %319 = vector.broadcast %311 : vector<8x1xf32> to vector<8x32xf32>
    %320 = arith.subf %307, %319 : vector<8x32xf32>
    %cst_200 = arith.constant 9.99999974E-6 : f32
    %321 = vector.broadcast %cst_200 : f32 to vector<8x1xf32>
    %322 = arith.addf %318, %321 : vector<8x1xf32>
    %323 = math.rsqrt %322 : vector<8x1xf32>
    %324 = vector.broadcast %323 : vector<8x1xf32> to vector<8x32xf32>
    %325 = arith.mulf %320, %324 : vector<8x32xf32>
    %326 = vector.broadcast %17 : vector<1x32xf32> to vector<8x32xf32>
    %327 = arith.mulf %325, %326 : vector<8x32xf32>
    %328 = vector.broadcast %16 : vector<1x32xf32> to vector<8x32xf32>
    %329 = arith.addf %327, %328 : vector<8x32xf32>
    %330 = arith.addf %329, %76 : vector<8x32xf32>
    %331 = arith.addf %230, %80 : vector<64x32xf32>
    %332 = arith.truncf %330 : vector<8x32xf32> to vector<8x32xbf16>
    %333 = arith.truncf %10 : vector<32x32xf32> to vector<32x32xbf16>
    %cst_201 = arith.constant dense<0.000000e+00> : vector<8x32xf32>
    %334 = tpu.matmul %332, %333, %cst_201 {dimension_numbers = #tpu.dot_dimension_numbers<[1], [0], [0], [1], [0, 0, 1, 1], [], []>} : vector<8x32xbf16>, vector<32x32xbf16>, vector<8x32xf32> -> vector<8x32xf32>
    %335 = vector.broadcast %6 : vector<1x32xf32> to vector<8x32xf32>
    %336 = arith.addf %334, %335 : vector<8x32xf32>
    %337 = vector.extract_strided_slice %336 {offsets = [0, 0], sizes = [8, 8], strides = [1, 1]} : vector<8x32xf32> to vector<8x8xf32>
    %338 = vector.extract_strided_slice %336 {offsets = [0, 8], sizes = [8, 8], strides = [1, 1]} : vector<8x32xf32> to vector<8x8xf32>
    %339 = vector.extract_strided_slice %336 {offsets = [0, 16], sizes = [8, 8], strides = [1, 1]} : vector<8x32xf32> to vector<8x8xf32>
    %340 = vector.extract_strided_slice %336 {offsets = [0, 24], sizes = [8, 8], strides = [1, 1]} : vector<8x32xf32> to vector<8x8xf32>
    %341 = vector.shape_cast %337 : vector<8x8xf32> to vector<1x8x8xf32>
    %342 = vector.shape_cast %338 : vector<8x8xf32> to vector<1x8x8xf32>
    %343 = vector.shape_cast %339 : vector<8x8xf32> to vector<1x8x8xf32>
    %344 = vector.shape_cast %340 : vector<8x8xf32> to vector<1x8x8xf32>
    %345 = tpu.concatenate %341, %342, %343, %344 in 0 : vector<1x8x8xf32>, vector<1x8x8xf32>, vector<1x8x8xf32>, vector<1x8x8xf32> -> vector<4x8x8xf32>
    %346 = arith.truncf %331 : vector<64x32xf32> to vector<64x32xbf16>
    %347 = arith.truncf %8 : vector<32x32xf32> to vector<32x32xbf16>
    %cst_202 = arith.constant dense<0.000000e+00> : vector<64x32xf32>
    %348 = tpu.matmul %346, %347, %cst_202 {dimension_numbers = #tpu.dot_dimension_numbers<[1], [0], [0], [1], [0, 0, 1, 1], [], []>} : vector<64x32xbf16>, vector<32x32xbf16>, vector<64x32xf32> -> vector<64x32xf32>
    %349 = vector.broadcast %4 : vector<1x32xf32> to vector<64x32xf32>
    %350 = arith.addf %348, %349 : vector<64x32xf32>
    %351 = vector.extract_strided_slice %350 {offsets = [0, 0], sizes = [64, 8], strides = [1, 1]} : vector<64x32xf32> to vector<64x8xf32>
    %352 = vector.extract_strided_slice %350 {offsets = [0, 8], sizes = [64, 8], strides = [1, 1]} : vector<64x32xf32> to vector<64x8xf32>
    %353 = vector.extract_strided_slice %350 {offsets = [0, 16], sizes = [64, 8], strides = [1, 1]} : vector<64x32xf32> to vector<64x8xf32>
    %354 = vector.extract_strided_slice %350 {offsets = [0, 24], sizes = [64, 8], strides = [1, 1]} : vector<64x32xf32> to vector<64x8xf32>
    %355 = vector.shape_cast %351 : vector<64x8xf32> to vector<1x64x8xf32>
    %356 = vector.shape_cast %352 : vector<64x8xf32> to vector<1x64x8xf32>
    %357 = vector.shape_cast %353 : vector<64x8xf32> to vector<1x64x8xf32>
    %358 = vector.shape_cast %354 : vector<64x8xf32> to vector<1x64x8xf32>
    %359 = tpu.concatenate %355, %356, %357, %358 in 0 : vector<1x64x8xf32>, vector<1x64x8xf32>, vector<1x64x8xf32>, vector<1x64x8xf32> -> vector<4x64x8xf32>
    %360 = arith.truncf %230 : vector<64x32xf32> to vector<64x32xbf16>
    %361 = arith.truncf %11 : vector<32x32xf32> to vector<32x32xbf16>
    %cst_203 = arith.constant dense<0.000000e+00> : vector<64x32xf32>
    %362 = tpu.matmul %360, %361, %cst_203 {dimension_numbers = #tpu.dot_dimension_numbers<[1], [0], [0], [1], [0, 0, 1, 1], [], []>} : vector<64x32xbf16>, vector<32x32xbf16>, vector<64x32xf32> -> vector<64x32xf32>
    %363 = vector.broadcast %7 : vector<1x32xf32> to vector<64x32xf32>
    %364 = arith.addf %362, %363 : vector<64x32xf32>
    %365 = vector.extract_strided_slice %364 {offsets = [0, 0], sizes = [64, 8], strides = [1, 1]} : vector<64x32xf32> to vector<64x8xf32>
    %366 = vector.extract_strided_slice %364 {offsets = [0, 8], sizes = [64, 8], strides = [1, 1]} : vector<64x32xf32> to vector<64x8xf32>
    %367 = vector.extract_strided_slice %364 {offsets = [0, 16], sizes = [64, 8], strides = [1, 1]} : vector<64x32xf32> to vector<64x8xf32>
    %368 = vector.extract_strided_slice %364 {offsets = [0, 24], sizes = [64, 8], strides = [1, 1]} : vector<64x32xf32> to vector<64x8xf32>
    %369 = vector.shape_cast %365 : vector<64x8xf32> to vector<1x64x8xf32>
    %370 = vector.shape_cast %366 : vector<64x8xf32> to vector<1x64x8xf32>
    %371 = vector.shape_cast %367 : vector<64x8xf32> to vector<1x64x8xf32>
    %372 = vector.shape_cast %368 : vector<64x8xf32> to vector<1x64x8xf32>
    %373 = tpu.concatenate %369, %370, %371, %372 in 0 : vector<1x64x8xf32>, vector<1x64x8xf32>, vector<1x64x8xf32>, vector<1x64x8xf32> -> vector<4x64x8xf32>
    %374 = arith.truncf %345 : vector<4x8x8xf32> to vector<4x8x8xbf16>
    %375 = arith.truncf %359 : vector<4x64x8xf32> to vector<4x64x8xbf16>
    "tpu.trace_start"() <{level = 10 : i32, message = "hqd,hkd->hqk"}> : () -> ()
    %cst_204 = arith.constant dense<0.000000e+00> : vector<4x8x64xf32>
    %376 = tpu.matmul %374, %375, %cst_204 {dimension_numbers = #tpu.dot_dimension_numbers<[2], [2], [1], [1], [0, 0, 0, 1, 1, 1], [0], [0]>} : vector<4x8x8xbf16>, vector<4x64x8xbf16>, vector<4x8x64xf32> -> vector<4x8x64xf32>
    "tpu.trace_stop"() : () -> ()
    %cst_205 = arith.constant 0.353553385 : f32
    %377 = vector.broadcast %cst_205 : f32 to vector<4x8x64xf32>
    %378 = arith.mulf %376, %377 : vector<4x8x64xf32>
    %379 = vector.shape_cast %82 : vector<1x64xf32> to vector<1x1x64xf32>
    %380 = vector.broadcast %379 : vector<1x1x64xf32> to vector<4x8x64xf32>
    %381 = arith.addf %378, %380 : vector<4x8x64xf32>
    %cst_206 = arith.constant dense<0xFF800000> : vector<4x8xf32>
    %382 = vector.multi_reduction <maximumf>, %381, %cst_206 [2] : vector<4x8x64xf32> to vector<4x8xf32>
    %383 = vector.shape_cast %382 : vector<4x8xf32> to vector<4x8x1xf32>
    %384 = vector.broadcast %383 : vector<4x8x1xf32> to vector<4x8x64xf32>
    %385 = arith.subf %381, %384 : vector<4x8x64xf32>
    %386 = math.exp %385 : vector<4x8x64xf32>
    %cst_207 = arith.constant dense<0.000000e+00> : vector<4x8xf32>
    %387 = vector.multi_reduction <add>, %386, %cst_207 [2] : vector<4x8x64xf32> to vector<4x8xf32>
    %388 = vector.shape_cast %387 : vector<4x8xf32> to vector<4x8x1xf32>
    %389 = tpu.reciprocal %388 {approx = true} : vector<4x8x1xf32> -> vector<4x8x1xf32>
    %390 = vector.broadcast %389 : vector<4x8x1xf32> to vector<4x8x64xf32>
    %391 = arith.mulf %386, %390 : vector<4x8x64xf32>
    %392 = arith.truncf %391 : vector<4x8x64xf32> to vector<4x8x64xbf16>
    %393 = arith.truncf %373 : vector<4x64x8xf32> to vector<4x64x8xbf16>
    "tpu.trace_start"() <{level = 10 : i32, message = "hqk,hkd->hqd"}> : () -> ()
    %cst_208 = arith.constant dense<0.000000e+00> : vector<4x8x8xf32>
    %394 = tpu.matmul %392, %393, %cst_208 {dimension_numbers = #tpu.dot_dimension_numbers<[2], [1], [1], [2], [0, 0, 0, 1, 1, 2], [0], [0]>} : vector<4x8x64xbf16>, vector<4x64x8xbf16>, vector<4x8x8xf32> -> vector<4x8x8xf32>
    "tpu.trace_stop"() : () -> ()
    %395 = vector.extract_strided_slice %394 {offsets = [0, 0, 0], sizes = [1, 8, 8], strides = [1, 1, 1]} : vector<4x8x8xf32> to vector<1x8x8xf32>
    %396 = vector.shape_cast %395 : vector<1x8x8xf32> to vector<8x8xf32>
    %397 = vector.extract_strided_slice %394 {offsets = [1, 0, 0], sizes = [1, 8, 8], strides = [1, 1, 1]} : vector<4x8x8xf32> to vector<1x8x8xf32>
    %398 = vector.shape_cast %397 : vector<1x8x8xf32> to vector<8x8xf32>
    %399 = vector.extract_strided_slice %394 {offsets = [2, 0, 0], sizes = [1, 8, 8], strides = [1, 1, 1]} : vector<4x8x8xf32> to vector<1x8x8xf32>
    %400 = vector.shape_cast %399 : vector<1x8x8xf32> to vector<8x8xf32>
    %401 = vector.extract_strided_slice %394 {offsets = [3, 0, 0], sizes = [1, 8, 8], strides = [1, 1, 1]} : vector<4x8x8xf32> to vector<1x8x8xf32>
    %402 = vector.shape_cast %401 : vector<1x8x8xf32> to vector<8x8xf32>
    %403 = tpu.concatenate %396, %398, %400, %402 in 1 : vector<8x8xf32>, vector<8x8xf32>, vector<8x8xf32>, vector<8x8xf32> -> vector<8x32xf32>
    %404 = arith.truncf %403 : vector<8x32xf32> to vector<8x32xbf16>
    %405 = arith.truncf %9 : vector<32x32xf32> to vector<32x32xbf16>
    %cst_209 = arith.constant dense<0.000000e+00> : vector<8x32xf32>
    %406 = tpu.matmul %404, %405, %cst_209 {dimension_numbers = #tpu.dot_dimension_numbers<[1], [0], [0], [1], [0, 0, 1, 1], [], []>} : vector<8x32xbf16>, vector<32x32xbf16>, vector<8x32xf32> -> vector<8x32xf32>
    %407 = vector.broadcast %5 : vector<1x32xf32> to vector<8x32xf32>
    %408 = arith.addf %406, %407 : vector<8x32xf32>
    %409 = arith.addf %329, %408 : vector<8x32xf32>
    %cst_210 = arith.constant dense<0.000000e+00> : vector<8xf32>
    %410 = vector.multi_reduction <add>, %409, %cst_210 [1] : vector<8x32xf32> to vector<8xf32>
    %411 = vector.shape_cast %410 : vector<8xf32> to vector<8x1xf32>
    %cst_211 = arith.constant 3.200000e+01 : f32
    %412 = vector.broadcast %cst_211 : f32 to vector<8x1xf32>
    %413 = arith.divf %411, %412 : vector<8x1xf32>
    %414 = vector.broadcast %413 : vector<8x1xf32> to vector<8x32xf32>
    %415 = arith.subf %409, %414 : vector<8x32xf32>
    %416 = arith.mulf %415, %415 : vector<8x32xf32>
    %cst_212 = arith.constant dense<0.000000e+00> : vector<8xf32>
    %417 = vector.multi_reduction <add>, %416, %cst_212 [1] : vector<8x32xf32> to vector<8xf32>
    %418 = vector.shape_cast %417 : vector<8xf32> to vector<8x1xf32>
    %cst_213 = arith.constant 3.200000e+01 : f32
    %419 = vector.broadcast %cst_213 : f32 to vector<8x1xf32>
    %420 = arith.divf %418, %419 : vector<8x1xf32>
    %421 = vector.broadcast %413 : vector<8x1xf32> to vector<8x32xf32>
    %422 = arith.subf %409, %421 : vector<8x32xf32>
    %cst_214 = arith.constant 9.99999974E-6 : f32
    %423 = vector.broadcast %cst_214 : f32 to vector<8x1xf32>
    %424 = arith.addf %420, %423 : vector<8x1xf32>
    %425 = math.rsqrt %424 : vector<8x1xf32>
    %426 = vector.broadcast %425 : vector<8x1xf32> to vector<8x32xf32>
    %427 = arith.mulf %422, %426 : vector<8x32xf32>
    %428 = vector.broadcast %19 : vector<1x32xf32> to vector<8x32xf32>
    %429 = arith.mulf %427, %428 : vector<8x32xf32>
    %430 = vector.broadcast %18 : vector<1x32xf32> to vector<8x32xf32>
    %431 = arith.addf %429, %430 : vector<8x32xf32>
    %432 = arith.truncf %431 : vector<8x32xf32> to vector<8x32xbf16>
    %433 = arith.truncf %13 : vector<32x64xf32> to vector<32x64xbf16>
    %cst_215 = arith.constant dense<0.000000e+00> : vector<8x64xf32>
    %434 = tpu.matmul %432, %433, %cst_215 {dimension_numbers = #tpu.dot_dimension_numbers<[1], [0], [0], [1], [0, 0, 1, 1], [], []>} : vector<8x32xbf16>, vector<32x64xbf16>, vector<8x64xf32> -> vector<8x64xf32>
    %435 = vector.broadcast %12 : vector<1x64xf32> to vector<8x64xf32>
    %436 = arith.addf %434, %435 : vector<8x64xf32>
    %cst_216 = arith.constant 0.000000e+00 : f32
    %437 = vector.broadcast %cst_216 : f32 to vector<8x64xf32>
    %438 = arith.maximumf %436, %437 : vector<8x64xf32>
    %439 = arith.truncf %438 : vector<8x64xf32> to vector<8x64xbf16>
    %440 = arith.truncf %15 : vector<64x32xf32> to vector<64x32xbf16>
    %cst_217 = arith.constant dense<0.000000e+00> : vector<8x32xf32>
    %441 = tpu.matmul %439, %440, %cst_217 {dimension_numbers = #tpu.dot_dimension_numbers<[1], [0], [0], [1], [0, 0, 1, 1], [], []>} : vector<8x64xbf16>, vector<64x32xbf16>, vector<8x32xf32> -> vector<8x32xf32>
    %442 = vector.broadcast %14 : vector<1x32xf32> to vector<8x32xf32>
    %443 = arith.addf %441, %442 : vector<8x32xf32>
    %444 = arith.addf %431, %443 : vector<8x32xf32>
    %cst_218 = arith.constant dense<0.000000e+00> : vector<8xf32>
    %445 = vector.multi_reduction <add>, %444, %cst_218 [1] : vector<8x32xf32> to vector<8xf32>
    %446 = vector.shape_cast %445 : vector<8xf32> to vector<8x1xf32>
    %cst_219 = arith.constant 3.200000e+01 : f32
    %447 = vector.broadcast %cst_219 : f32 to vector<8x1xf32>
    %448 = arith.divf %446, %447 : vector<8x1xf32>
    %449 = vector.broadcast %448 : vector<8x1xf32> to vector<8x32xf32>
    %450 = arith.subf %444, %449 : vector<8x32xf32>
    %451 = arith.mulf %450, %450 : vector<8x32xf32>
    %cst_220 = arith.constant dense<0.000000e+00> : vector<8xf32>
    %452 = vector.multi_reduction <add>, %451, %cst_220 [1] : vector<8x32xf32> to vector<8xf32>
    %453 = vector.shape_cast %452 : vector<8xf32> to vector<8x1xf32>
    %cst_221 = arith.constant 3.200000e+01 : f32
    %454 = vector.broadcast %cst_221 : f32 to vector<8x1xf32>
    %455 = arith.divf %453, %454 : vector<8x1xf32>
    %456 = vector.broadcast %448 : vector<8x1xf32> to vector<8x32xf32>
    %457 = arith.subf %444, %456 : vector<8x32xf32>
    %cst_222 = arith.constant 9.99999974E-6 : f32
    %458 = vector.broadcast %cst_222 : f32 to vector<8x1xf32>
    %459 = arith.addf %455, %458 : vector<8x1xf32>
    %460 = math.rsqrt %459 : vector<8x1xf32>
    %461 = vector.broadcast %460 : vector<8x1xf32> to vector<8x32xf32>
    %462 = arith.mulf %457, %461 : vector<8x32xf32>
    %463 = vector.broadcast %21 : vector<1x32xf32> to vector<8x32xf32>
    %464 = arith.mulf %462, %463 : vector<8x32xf32>
    %465 = vector.broadcast %20 : vector<1x32xf32> to vector<8x32xf32>
    %466 = arith.addf %464, %465 : vector<8x32xf32>
    %467 = arith.addf %466, %76 : vector<8x32xf32>
    %468 = arith.truncf %467 : vector<8x32xf32> to vector<8x32xbf16>
    %469 = arith.truncf %54 : vector<32x32xf32> to vector<32x32xbf16>
    %cst_223 = arith.constant dense<0.000000e+00> : vector<8x32xf32>
    %470 = tpu.matmul %468, %469, %cst_223 {dimension_numbers = #tpu.dot_dimension_numbers<[1], [0], [0], [1], [0, 0, 1, 1], [], []>} : vector<8x32xbf16>, vector<32x32xbf16>, vector<8x32xf32> -> vector<8x32xf32>
    %471 = vector.broadcast %50 : vector<1x32xf32> to vector<8x32xf32>
    %472 = arith.addf %470, %471 : vector<8x32xf32>
    %473 = vector.extract_strided_slice %472 {offsets = [0, 0], sizes = [8, 8], strides = [1, 1]} : vector<8x32xf32> to vector<8x8xf32>
    %474 = vector.extract_strided_slice %472 {offsets = [0, 8], sizes = [8, 8], strides = [1, 1]} : vector<8x32xf32> to vector<8x8xf32>
    %475 = vector.extract_strided_slice %472 {offsets = [0, 16], sizes = [8, 8], strides = [1, 1]} : vector<8x32xf32> to vector<8x8xf32>
    %476 = vector.extract_strided_slice %472 {offsets = [0, 24], sizes = [8, 8], strides = [1, 1]} : vector<8x32xf32> to vector<8x8xf32>
    %477 = vector.shape_cast %473 : vector<8x8xf32> to vector<1x8x8xf32>
    %478 = vector.shape_cast %474 : vector<8x8xf32> to vector<1x8x8xf32>
    %479 = vector.shape_cast %475 : vector<8x8xf32> to vector<1x8x8xf32>
    %480 = vector.shape_cast %476 : vector<8x8xf32> to vector<1x8x8xf32>
    %481 = tpu.concatenate %477, %478, %479, %480 in 0 : vector<1x8x8xf32>, vector<1x8x8xf32>, vector<1x8x8xf32>, vector<1x8x8xf32> -> vector<4x8x8xf32>
    %482 = arith.truncf %467 : vector<8x32xf32> to vector<8x32xbf16>
    %483 = arith.truncf %52 : vector<32x32xf32> to vector<32x32xbf16>
    %cst_224 = arith.constant dense<0.000000e+00> : vector<8x32xf32>
    %484 = tpu.matmul %482, %483, %cst_224 {dimension_numbers = #tpu.dot_dimension_numbers<[1], [0], [0], [1], [0, 0, 1, 1], [], []>} : vector<8x32xbf16>, vector<32x32xbf16>, vector<8x32xf32> -> vector<8x32xf32>
    %485 = vector.broadcast %48 : vector<1x32xf32> to vector<8x32xf32>
    %486 = arith.addf %484, %485 : vector<8x32xf32>
    %487 = vector.extract_strided_slice %486 {offsets = [0, 0], sizes = [8, 8], strides = [1, 1]} : vector<8x32xf32> to vector<8x8xf32>
    %488 = vector.extract_strided_slice %486 {offsets = [0, 8], sizes = [8, 8], strides = [1, 1]} : vector<8x32xf32> to vector<8x8xf32>
    %489 = vector.extract_strided_slice %486 {offsets = [0, 16], sizes = [8, 8], strides = [1, 1]} : vector<8x32xf32> to vector<8x8xf32>
    %490 = vector.extract_strided_slice %486 {offsets = [0, 24], sizes = [8, 8], strides = [1, 1]} : vector<8x32xf32> to vector<8x8xf32>
    %491 = vector.shape_cast %487 : vector<8x8xf32> to vector<1x8x8xf32>
    %492 = vector.shape_cast %488 : vector<8x8xf32> to vector<1x8x8xf32>
    %493 = vector.shape_cast %489 : vector<8x8xf32> to vector<1x8x8xf32>
    %494 = vector.shape_cast %490 : vector<8x8xf32> to vector<1x8x8xf32>
    %495 = tpu.concatenate %491, %492, %493, %494 in 0 : vector<1x8x8xf32>, vector<1x8x8xf32>, vector<1x8x8xf32>, vector<1x8x8xf32> -> vector<4x8x8xf32>
    %496 = arith.truncf %466 : vector<8x32xf32> to vector<8x32xbf16>
    %497 = arith.truncf %55 : vector<32x32xf32> to vector<32x32xbf16>
    %cst_225 = arith.constant dense<0.000000e+00> : vector<8x32xf32>
    %498 = tpu.matmul %496, %497, %cst_225 {dimension_numbers = #tpu.dot_dimension_numbers<[1], [0], [0], [1], [0, 0, 1, 1], [], []>} : vector<8x32xbf16>, vector<32x32xbf16>, vector<8x32xf32> -> vector<8x32xf32>
    %499 = vector.broadcast %51 : vector<1x32xf32> to vector<8x32xf32>
    %500 = arith.addf %498, %499 : vector<8x32xf32>
    %501 = vector.extract_strided_slice %500 {offsets = [0, 0], sizes = [8, 8], strides = [1, 1]} : vector<8x32xf32> to vector<8x8xf32>
    %502 = vector.extract_strided_slice %500 {offsets = [0, 8], sizes = [8, 8], strides = [1, 1]} : vector<8x32xf32> to vector<8x8xf32>
    %503 = vector.extract_strided_slice %500 {offsets = [0, 16], sizes = [8, 8], strides = [1, 1]} : vector<8x32xf32> to vector<8x8xf32>
    %504 = vector.extract_strided_slice %500 {offsets = [0, 24], sizes = [8, 8], strides = [1, 1]} : vector<8x32xf32> to vector<8x8xf32>
    %505 = vector.shape_cast %501 : vector<8x8xf32> to vector<1x8x8xf32>
    %506 = vector.shape_cast %502 : vector<8x8xf32> to vector<1x8x8xf32>
    %507 = vector.shape_cast %503 : vector<8x8xf32> to vector<1x8x8xf32>
    %508 = vector.shape_cast %504 : vector<8x8xf32> to vector<1x8x8xf32>
    %509 = tpu.concatenate %505, %506, %507, %508 in 0 : vector<1x8x8xf32>, vector<1x8x8xf32>, vector<1x8x8xf32>, vector<1x8x8xf32> -> vector<4x8x8xf32>
    %510 = arith.truncf %481 : vector<4x8x8xf32> to vector<4x8x8xbf16>
    %511 = arith.truncf %495 : vector<4x8x8xf32> to vector<4x8x8xbf16>
    "tpu.trace_start"() <{level = 10 : i32, message = "hqd,hkd->hqk"}> : () -> ()
    %cst_226 = arith.constant dense<0.000000e+00> : vector<4x8x8xf32>
    %512 = tpu.matmul %510, %511, %cst_226 {dimension_numbers = #tpu.dot_dimension_numbers<[2], [2], [1], [1], [0, 0, 0, 1, 1, 1], [0], [0]>} : vector<4x8x8xbf16>, vector<4x8x8xbf16>, vector<4x8x8xf32> -> vector<4x8x8xf32>
    "tpu.trace_stop"() : () -> ()
    %cst_227 = arith.constant 0.353553385 : f32
    %513 = vector.broadcast %cst_227 : f32 to vector<4x8x8xf32>
    %514 = arith.mulf %512, %513 : vector<4x8x8xf32>
    %cst_228 = arith.constant dense<0xFF800000> : vector<4x8xf32>
    %515 = vector.multi_reduction <maximumf>, %514, %cst_228 [2] : vector<4x8x8xf32> to vector<4x8xf32>
    %516 = vector.shape_cast %515 : vector<4x8xf32> to vector<4x8x1xf32>
    %517 = vector.broadcast %516 : vector<4x8x1xf32> to vector<4x8x8xf32>
    %518 = arith.subf %514, %517 : vector<4x8x8xf32>
    %519 = math.exp %518 : vector<4x8x8xf32>
    %cst_229 = arith.constant dense<0.000000e+00> : vector<4x8xf32>
    %520 = vector.multi_reduction <add>, %519, %cst_229 [2] : vector<4x8x8xf32> to vector<4x8xf32>
    %521 = vector.shape_cast %520 : vector<4x8xf32> to vector<4x8x1xf32>
    %522 = tpu.reciprocal %521 {approx = true} : vector<4x8x1xf32> -> vector<4x8x1xf32>
    %523 = vector.broadcast %522 : vector<4x8x1xf32> to vector<4x8x8xf32>
    %524 = arith.mulf %519, %523 : vector<4x8x8xf32>
    %525 = arith.truncf %524 : vector<4x8x8xf32> to vector<4x8x8xbf16>
    %526 = arith.truncf %509 : vector<4x8x8xf32> to vector<4x8x8xbf16>
    "tpu.trace_start"() <{level = 10 : i32, message = "hqk,hkd->hqd"}> : () -> ()
    %cst_230 = arith.constant dense<0.000000e+00> : vector<4x8x8xf32>
    %527 = tpu.matmul %525, %526, %cst_230 {dimension_numbers = #tpu.dot_dimension_numbers<[2], [1], [1], [2], [0, 0, 0, 1, 1, 2], [0], [0]>} : vector<4x8x8xbf16>, vector<4x8x8xbf16>, vector<4x8x8xf32> -> vector<4x8x8xf32>
    "tpu.trace_stop"() : () -> ()
    %528 = vector.extract_strided_slice %527 {offsets = [0, 0, 0], sizes = [1, 8, 8], strides = [1, 1, 1]} : vector<4x8x8xf32> to vector<1x8x8xf32>
    %529 = vector.shape_cast %528 : vector<1x8x8xf32> to vector<8x8xf32>
    %530 = vector.extract_strided_slice %527 {offsets = [1, 0, 0], sizes = [1, 8, 8], strides = [1, 1, 1]} : vector<4x8x8xf32> to vector<1x8x8xf32>
    %531 = vector.shape_cast %530 : vector<1x8x8xf32> to vector<8x8xf32>
    %532 = vector.extract_strided_slice %527 {offsets = [2, 0, 0], sizes = [1, 8, 8], strides = [1, 1, 1]} : vector<4x8x8xf32> to vector<1x8x8xf32>
    %533 = vector.shape_cast %532 : vector<1x8x8xf32> to vector<8x8xf32>
    %534 = vector.extract_strided_slice %527 {offsets = [3, 0, 0], sizes = [1, 8, 8], strides = [1, 1, 1]} : vector<4x8x8xf32> to vector<1x8x8xf32>
    %535 = vector.shape_cast %534 : vector<1x8x8xf32> to vector<8x8xf32>
    %536 = tpu.concatenate %529, %531, %533, %535 in 1 : vector<8x8xf32>, vector<8x8xf32>, vector<8x8xf32>, vector<8x8xf32> -> vector<8x32xf32>
    %537 = arith.truncf %536 : vector<8x32xf32> to vector<8x32xbf16>
    %538 = arith.truncf %53 : vector<32x32xf32> to vector<32x32xbf16>
    %cst_231 = arith.constant dense<0.000000e+00> : vector<8x32xf32>
    %539 = tpu.matmul %537, %538, %cst_231 {dimension_numbers = #tpu.dot_dimension_numbers<[1], [0], [0], [1], [0, 0, 1, 1], [], []>} : vector<8x32xbf16>, vector<32x32xbf16>, vector<8x32xf32> -> vector<8x32xf32>
    %540 = vector.broadcast %49 : vector<1x32xf32> to vector<8x32xf32>
    %541 = arith.addf %539, %540 : vector<8x32xf32>
    %542 = arith.addf %466, %541 : vector<8x32xf32>
    %cst_232 = arith.constant dense<0.000000e+00> : vector<8xf32>
    %543 = vector.multi_reduction <add>, %542, %cst_232 [1] : vector<8x32xf32> to vector<8xf32>
    %544 = vector.shape_cast %543 : vector<8xf32> to vector<8x1xf32>
    %cst_233 = arith.constant 3.200000e+01 : f32
    %545 = vector.broadcast %cst_233 : f32 to vector<8x1xf32>
    %546 = arith.divf %544, %545 : vector<8x1xf32>
    %547 = vector.broadcast %546 : vector<8x1xf32> to vector<8x32xf32>
    %548 = arith.subf %542, %547 : vector<8x32xf32>
    %549 = arith.mulf %548, %548 : vector<8x32xf32>
    %cst_234 = arith.constant dense<0.000000e+00> : vector<8xf32>
    %550 = vector.multi_reduction <add>, %549, %cst_234 [1] : vector<8x32xf32> to vector<8xf32>
    %551 = vector.shape_cast %550 : vector<8xf32> to vector<8x1xf32>
    %cst_235 = arith.constant 3.200000e+01 : f32
    %552 = vector.broadcast %cst_235 : f32 to vector<8x1xf32>
    %553 = arith.divf %551, %552 : vector<8x1xf32>
    %554 = vector.broadcast %546 : vector<8x1xf32> to vector<8x32xf32>
    %555 = arith.subf %542, %554 : vector<8x32xf32>
    %cst_236 = arith.constant 9.99999974E-6 : f32
    %556 = vector.broadcast %cst_236 : f32 to vector<8x1xf32>
    %557 = arith.addf %553, %556 : vector<8x1xf32>
    %558 = math.rsqrt %557 : vector<8x1xf32>
    %559 = vector.broadcast %558 : vector<8x1xf32> to vector<8x32xf32>
    %560 = arith.mulf %555, %559 : vector<8x32xf32>
    %561 = vector.broadcast %43 : vector<1x32xf32> to vector<8x32xf32>
    %562 = arith.mulf %560, %561 : vector<8x32xf32>
    %563 = vector.broadcast %42 : vector<1x32xf32> to vector<8x32xf32>
    %564 = arith.addf %562, %563 : vector<8x32xf32>
    %565 = arith.addf %564, %76 : vector<8x32xf32>
    %566 = arith.addf %230, %80 : vector<64x32xf32>
    %567 = arith.truncf %565 : vector<8x32xf32> to vector<8x32xbf16>
    %568 = arith.truncf %36 : vector<32x32xf32> to vector<32x32xbf16>
    %cst_237 = arith.constant dense<0.000000e+00> : vector<8x32xf32>
    %569 = tpu.matmul %567, %568, %cst_237 {dimension_numbers = #tpu.dot_dimension_numbers<[1], [0], [0], [1], [0, 0, 1, 1], [], []>} : vector<8x32xbf16>, vector<32x32xbf16>, vector<8x32xf32> -> vector<8x32xf32>
    %570 = vector.broadcast %32 : vector<1x32xf32> to vector<8x32xf32>
    %571 = arith.addf %569, %570 : vector<8x32xf32>
    %572 = vector.extract_strided_slice %571 {offsets = [0, 0], sizes = [8, 8], strides = [1, 1]} : vector<8x32xf32> to vector<8x8xf32>
    %573 = vector.extract_strided_slice %571 {offsets = [0, 8], sizes = [8, 8], strides = [1, 1]} : vector<8x32xf32> to vector<8x8xf32>
    %574 = vector.extract_strided_slice %571 {offsets = [0, 16], sizes = [8, 8], strides = [1, 1]} : vector<8x32xf32> to vector<8x8xf32>
    %575 = vector.extract_strided_slice %571 {offsets = [0, 24], sizes = [8, 8], strides = [1, 1]} : vector<8x32xf32> to vector<8x8xf32>
    %576 = vector.shape_cast %572 : vector<8x8xf32> to vector<1x8x8xf32>
    %577 = vector.shape_cast %573 : vector<8x8xf32> to vector<1x8x8xf32>
    %578 = vector.shape_cast %574 : vector<8x8xf32> to vector<1x8x8xf32>
    %579 = vector.shape_cast %575 : vector<8x8xf32> to vector<1x8x8xf32>
    %580 = tpu.concatenate %576, %577, %578, %579 in 0 : vector<1x8x8xf32>, vector<1x8x8xf32>, vector<1x8x8xf32>, vector<1x8x8xf32> -> vector<4x8x8xf32>
    %581 = arith.truncf %566 : vector<64x32xf32> to vector<64x32xbf16>
    %582 = arith.truncf %34 : vector<32x32xf32> to vector<32x32xbf16>
    %cst_238 = arith.constant dense<0.000000e+00> : vector<64x32xf32>
    %583 = tpu.matmul %581, %582, %cst_238 {dimension_numbers = #tpu.dot_dimension_numbers<[1], [0], [0], [1], [0, 0, 1, 1], [], []>} : vector<64x32xbf16>, vector<32x32xbf16>, vector<64x32xf32> -> vector<64x32xf32>
    %584 = vector.broadcast %30 : vector<1x32xf32> to vector<64x32xf32>
    %585 = arith.addf %583, %584 : vector<64x32xf32>
    %586 = vector.extract_strided_slice %585 {offsets = [0, 0], sizes = [64, 8], strides = [1, 1]} : vector<64x32xf32> to vector<64x8xf32>
    %587 = vector.extract_strided_slice %585 {offsets = [0, 8], sizes = [64, 8], strides = [1, 1]} : vector<64x32xf32> to vector<64x8xf32>
    %588 = vector.extract_strided_slice %585 {offsets = [0, 16], sizes = [64, 8], strides = [1, 1]} : vector<64x32xf32> to vector<64x8xf32>
    %589 = vector.extract_strided_slice %585 {offsets = [0, 24], sizes = [64, 8], strides = [1, 1]} : vector<64x32xf32> to vector<64x8xf32>
    %590 = vector.shape_cast %586 : vector<64x8xf32> to vector<1x64x8xf32>
    %591 = vector.shape_cast %587 : vector<64x8xf32> to vector<1x64x8xf32>
    %592 = vector.shape_cast %588 : vector<64x8xf32> to vector<1x64x8xf32>
    %593 = vector.shape_cast %589 : vector<64x8xf32> to vector<1x64x8xf32>
    %594 = tpu.concatenate %590, %591, %592, %593 in 0 : vector<1x64x8xf32>, vector<1x64x8xf32>, vector<1x64x8xf32>, vector<1x64x8xf32> -> vector<4x64x8xf32>
    %595 = arith.truncf %230 : vector<64x32xf32> to vector<64x32xbf16>
    %596 = arith.truncf %37 : vector<32x32xf32> to vector<32x32xbf16>
    %cst_239 = arith.constant dense<0.000000e+00> : vector<64x32xf32>
    %597 = tpu.matmul %595, %596, %cst_239 {dimension_numbers = #tpu.dot_dimension_numbers<[1], [0], [0], [1], [0, 0, 1, 1], [], []>} : vector<64x32xbf16>, vector<32x32xbf16>, vector<64x32xf32> -> vector<64x32xf32>
    %598 = vector.broadcast %33 : vector<1x32xf32> to vector<64x32xf32>
    %599 = arith.addf %597, %598 : vector<64x32xf32>
    %600 = vector.extract_strided_slice %599 {offsets = [0, 0], sizes = [64, 8], strides = [1, 1]} : vector<64x32xf32> to vector<64x8xf32>
    %601 = vector.extract_strided_slice %599 {offsets = [0, 8], sizes = [64, 8], strides = [1, 1]} : vector<64x32xf32> to vector<64x8xf32>
    %602 = vector.extract_strided_slice %599 {offsets = [0, 16], sizes = [64, 8], strides = [1, 1]} : vector<64x32xf32> to vector<64x8xf32>
    %603 = vector.extract_strided_slice %599 {offsets = [0, 24], sizes = [64, 8], strides = [1, 1]} : vector<64x32xf32> to vector<64x8xf32>
    %604 = vector.shape_cast %600 : vector<64x8xf32> to vector<1x64x8xf32>
    %605 = vector.shape_cast %601 : vector<64x8xf32> to vector<1x64x8xf32>
    %606 = vector.shape_cast %602 : vector<64x8xf32> to vector<1x64x8xf32>
    %607 = vector.shape_cast %603 : vector<64x8xf32> to vector<1x64x8xf32>
    %608 = tpu.concatenate %604, %605, %606, %607 in 0 : vector<1x64x8xf32>, vector<1x64x8xf32>, vector<1x64x8xf32>, vector<1x64x8xf32> -> vector<4x64x8xf32>
    %609 = arith.truncf %580 : vector<4x8x8xf32> to vector<4x8x8xbf16>
    %610 = arith.truncf %594 : vector<4x64x8xf32> to vector<4x64x8xbf16>
    "tpu.trace_start"() <{level = 10 : i32, message = "hqd,hkd->hqk"}> : () -> ()
    %cst_240 = arith.constant dense<0.000000e+00> : vector<4x8x64xf32>
    %611 = tpu.matmul %609, %610, %cst_240 {dimension_numbers = #tpu.dot_dimension_numbers<[2], [2], [1], [1], [0, 0, 0, 1, 1, 1], [0], [0]>} : vector<4x8x8xbf16>, vector<4x64x8xbf16>, vector<4x8x64xf32> -> vector<4x8x64xf32>
    "tpu.trace_stop"() : () -> ()
    %cst_241 = arith.constant 0.353553385 : f32
    %612 = vector.broadcast %cst_241 : f32 to vector<4x8x64xf32>
    %613 = arith.mulf %611, %612 : vector<4x8x64xf32>
    %614 = vector.shape_cast %82 : vector<1x64xf32> to vector<1x1x64xf32>
    %615 = vector.broadcast %614 : vector<1x1x64xf32> to vector<4x8x64xf32>
    %616 = arith.addf %613, %615 : vector<4x8x64xf32>
    %cst_242 = arith.constant dense<0xFF800000> : vector<4x8xf32>
    %617 = vector.multi_reduction <maximumf>, %616, %cst_242 [2] : vector<4x8x64xf32> to vector<4x8xf32>
    %618 = vector.shape_cast %617 : vector<4x8xf32> to vector<4x8x1xf32>
    %619 = vector.broadcast %618 : vector<4x8x1xf32> to vector<4x8x64xf32>
    %620 = arith.subf %616, %619 : vector<4x8x64xf32>
    %621 = math.exp %620 : vector<4x8x64xf32>
    %cst_243 = arith.constant dense<0.000000e+00> : vector<4x8xf32>
    %622 = vector.multi_reduction <add>, %621, %cst_243 [2] : vector<4x8x64xf32> to vector<4x8xf32>
    %623 = vector.shape_cast %622 : vector<4x8xf32> to vector<4x8x1xf32>
    %624 = tpu.reciprocal %623 {approx = true} : vector<4x8x1xf32> -> vector<4x8x1xf32>
    %625 = vector.broadcast %624 : vector<4x8x1xf32> to vector<4x8x64xf32>
    %626 = arith.mulf %621, %625 : vector<4x8x64xf32>
    %627 = arith.truncf %626 : vector<4x8x64xf32> to vector<4x8x64xbf16>
    %628 = arith.truncf %608 : vector<4x64x8xf32> to vector<4x64x8xbf16>
    "tpu.trace_start"() <{level = 10 : i32, message = "hqk,hkd->hqd"}> : () -> ()
    %cst_244 = arith.constant dense<0.000000e+00> : vector<4x8x8xf32>
    %629 = tpu.matmul %627, %628, %cst_244 {dimension_numbers = #tpu.dot_dimension_numbers<[2], [1], [1], [2], [0, 0, 0, 1, 1, 2], [0], [0]>} : vector<4x8x64xbf16>, vector<4x64x8xbf16>, vector<4x8x8xf32> -> vector<4x8x8xf32>
    "tpu.trace_stop"() : () -> ()
    %630 = vector.extract_strided_slice %629 {offsets = [0, 0, 0], sizes = [1, 8, 8], strides = [1, 1, 1]} : vector<4x8x8xf32> to vector<1x8x8xf32>
    %631 = vector.shape_cast %630 : vector<1x8x8xf32> to vector<8x8xf32>
    %632 = vector.extract_strided_slice %629 {offsets = [1, 0, 0], sizes = [1, 8, 8], strides = [1, 1, 1]} : vector<4x8x8xf32> to vector<1x8x8xf32>
    %633 = vector.shape_cast %632 : vector<1x8x8xf32> to vector<8x8xf32>
    %634 = vector.extract_strided_slice %629 {offsets = [2, 0, 0], sizes = [1, 8, 8], strides = [1, 1, 1]} : vector<4x8x8xf32> to vector<1x8x8xf32>
    %635 = vector.shape_cast %634 : vector<1x8x8xf32> to vector<8x8xf32>
    %636 = vector.extract_strided_slice %629 {offsets = [3, 0, 0], sizes = [1, 8, 8], strides = [1, 1, 1]} : vector<4x8x8xf32> to vector<1x8x8xf32>
    %637 = vector.shape_cast %636 : vector<1x8x8xf32> to vector<8x8xf32>
    %638 = tpu.concatenate %631, %633, %635, %637 in 1 : vector<8x8xf32>, vector<8x8xf32>, vector<8x8xf32>, vector<8x8xf32> -> vector<8x32xf32>
    %639 = arith.truncf %638 : vector<8x32xf32> to vector<8x32xbf16>
    %640 = arith.truncf %35 : vector<32x32xf32> to vector<32x32xbf16>
    %cst_245 = arith.constant dense<0.000000e+00> : vector<8x32xf32>
    %641 = tpu.matmul %639, %640, %cst_245 {dimension_numbers = #tpu.dot_dimension_numbers<[1], [0], [0], [1], [0, 0, 1, 1], [], []>} : vector<8x32xbf16>, vector<32x32xbf16>, vector<8x32xf32> -> vector<8x32xf32>
    %642 = vector.broadcast %31 : vector<1x32xf32> to vector<8x32xf32>
    %643 = arith.addf %641, %642 : vector<8x32xf32>
    %644 = arith.addf %564, %643 : vector<8x32xf32>
    %cst_246 = arith.constant dense<0.000000e+00> : vector<8xf32>
    %645 = vector.multi_reduction <add>, %644, %cst_246 [1] : vector<8x32xf32> to vector<8xf32>
    %646 = vector.shape_cast %645 : vector<8xf32> to vector<8x1xf32>
    %cst_247 = arith.constant 3.200000e+01 : f32
    %647 = vector.broadcast %cst_247 : f32 to vector<8x1xf32>
    %648 = arith.divf %646, %647 : vector<8x1xf32>
    %649 = vector.broadcast %648 : vector<8x1xf32> to vector<8x32xf32>
    %650 = arith.subf %644, %649 : vector<8x32xf32>
    %651 = arith.mulf %650, %650 : vector<8x32xf32>
    %cst_248 = arith.constant dense<0.000000e+00> : vector<8xf32>
    %652 = vector.multi_reduction <add>, %651, %cst_248 [1] : vector<8x32xf32> to vector<8xf32>
    %653 = vector.shape_cast %652 : vector<8xf32> to vector<8x1xf32>
    %cst_249 = arith.constant 3.200000e+01 : f32
    %654 = vector.broadcast %cst_249 : f32 to vector<8x1xf32>
    %655 = arith.divf %653, %654 : vector<8x1xf32>
    %656 = vector.broadcast %648 : vector<8x1xf32> to vector<8x32xf32>
    %657 = arith.subf %644, %656 : vector<8x32xf32>
    %cst_250 = arith.constant 9.99999974E-6 : f32
    %658 = vector.broadcast %cst_250 : f32 to vector<8x1xf32>
    %659 = arith.addf %655, %658 : vector<8x1xf32>
    %660 = math.rsqrt %659 : vector<8x1xf32>
    %661 = vector.broadcast %660 : vector<8x1xf32> to vector<8x32xf32>
    %662 = arith.mulf %657, %661 : vector<8x32xf32>
    %663 = vector.broadcast %45 : vector<1x32xf32> to vector<8x32xf32>
    %664 = arith.mulf %662, %663 : vector<8x32xf32>
    %665 = vector.broadcast %44 : vector<1x32xf32> to vector<8x32xf32>
    %666 = arith.addf %664, %665 : vector<8x32xf32>
    %667 = arith.truncf %666 : vector<8x32xf32> to vector<8x32xbf16>
    %668 = arith.truncf %39 : vector<32x64xf32> to vector<32x64xbf16>
    %cst_251 = arith.constant dense<0.000000e+00> : vector<8x64xf32>
    %669 = tpu.matmul %667, %668, %cst_251 {dimension_numbers = #tpu.dot_dimension_numbers<[1], [0], [0], [1], [0, 0, 1, 1], [], []>} : vector<8x32xbf16>, vector<32x64xbf16>, vector<8x64xf32> -> vector<8x64xf32>
    %670 = vector.broadcast %38 : vector<1x64xf32> to vector<8x64xf32>
    %671 = arith.addf %669, %670 : vector<8x64xf32>
    %cst_252 = arith.constant 0.000000e+00 : f32
    %672 = vector.broadcast %cst_252 : f32 to vector<8x64xf32>
    %673 = arith.maximumf %671, %672 : vector<8x64xf32>
    %674 = arith.truncf %673 : vector<8x64xf32> to vector<8x64xbf16>
    %675 = arith.truncf %41 : vector<64x32xf32> to vector<64x32xbf16>
    %cst_253 = arith.constant dense<0.000000e+00> : vector<8x32xf32>
    %676 = tpu.matmul %674, %675, %cst_253 {dimension_numbers = #tpu.dot_dimension_numbers<[1], [0], [0], [1], [0, 0, 1, 1], [], []>} : vector<8x64xbf16>, vector<64x32xbf16>, vector<8x32xf32> -> vector<8x32xf32>
    %677 = vector.broadcast %40 : vector<1x32xf32> to vector<8x32xf32>
    %678 = arith.addf %676, %677 : vector<8x32xf32>
    %679 = arith.addf %666, %678 : vector<8x32xf32>
    %cst_254 = arith.constant dense<0.000000e+00> : vector<8xf32>
    %680 = vector.multi_reduction <add>, %679, %cst_254 [1] : vector<8x32xf32> to vector<8xf32>
    %681 = vector.shape_cast %680 : vector<8xf32> to vector<8x1xf32>
    %cst_255 = arith.constant 3.200000e+01 : f32
    %682 = vector.broadcast %cst_255 : f32 to vector<8x1xf32>
    %683 = arith.divf %681, %682 : vector<8x1xf32>
    %684 = vector.broadcast %683 : vector<8x1xf32> to vector<8x32xf32>
    %685 = arith.subf %679, %684 : vector<8x32xf32>
    %686 = arith.mulf %685, %685 : vector<8x32xf32>
    %cst_256 = arith.constant dense<0.000000e+00> : vector<8xf32>
    %687 = vector.multi_reduction <add>, %686, %cst_256 [1] : vector<8x32xf32> to vector<8xf32>
    %688 = vector.shape_cast %687 : vector<8xf32> to vector<8x1xf32>
    %cst_257 = arith.constant 3.200000e+01 : f32
    %689 = vector.broadcast %cst_257 : f32 to vector<8x1xf32>
    %690 = arith.divf %688, %689 : vector<8x1xf32>
    %691 = vector.broadcast %683 : vector<8x1xf32> to vector<8x32xf32>
    %692 = arith.subf %679, %691 : vector<8x32xf32>
    %cst_258 = arith.constant 9.99999974E-6 : f32
    %693 = vector.broadcast %cst_258 : f32 to vector<8x1xf32>
    %694 = arith.addf %690, %693 : vector<8x1xf32>
    %695 = math.rsqrt %694 : vector<8x1xf32>
    %696 = vector.broadcast %695 : vector<8x1xf32> to vector<8x32xf32>
    %697 = arith.mulf %692, %696 : vector<8x32xf32>
    %698 = vector.broadcast %47 : vector<1x32xf32> to vector<8x32xf32>
    %699 = arith.mulf %697, %698 : vector<8x32xf32>
    %700 = vector.broadcast %46 : vector<1x32xf32> to vector<8x32xf32>
    %701 = arith.addf %699, %700 : vector<8x32xf32>
    %cst_259 = arith.constant dense<0.000000e+00> : vector<8xf32>
    %702 = vector.multi_reduction <add>, %701, %cst_259 [1] : vector<8x32xf32> to vector<8xf32>
    %703 = vector.shape_cast %702 : vector<8xf32> to vector<8x1xf32>
    %cst_260 = arith.constant 3.200000e+01 : f32
    %704 = vector.broadcast %cst_260 : f32 to vector<8x1xf32>
    %705 = arith.divf %703, %704 : vector<8x1xf32>
    %706 = vector.broadcast %705 : vector<8x1xf32> to vector<8x32xf32>
    %707 = arith.subf %701, %706 : vector<8x32xf32>
    %708 = arith.mulf %707, %707 : vector<8x32xf32>
    %cst_261 = arith.constant dense<0.000000e+00> : vector<8xf32>
    %709 = vector.multi_reduction <add>, %708, %cst_261 [1] : vector<8x32xf32> to vector<8xf32>
    %710 = vector.shape_cast %709 : vector<8xf32> to vector<8x1xf32>
    %cst_262 = arith.constant 3.200000e+01 : f32
    %711 = vector.broadcast %cst_262 : f32 to vector<8x1xf32>
    %712 = arith.divf %710, %711 : vector<8x1xf32>
    %713 = vector.broadcast %705 : vector<8x1xf32> to vector<8x32xf32>
    %714 = arith.subf %701, %713 : vector<8x32xf32>
    %cst_263 = arith.constant 9.99999974E-6 : f32
    %715 = vector.broadcast %cst_263 : f32 to vector<8x1xf32>
    %716 = arith.addf %712, %715 : vector<8x1xf32>
    %717 = math.rsqrt %716 : vector<8x1xf32>
    %718 = vector.broadcast %717 : vector<8x1xf32> to vector<8x32xf32>
    %719 = arith.mulf %714, %718 : vector<8x32xf32>
    %720 = vector.broadcast %57 : vector<1x32xf32> to vector<8x32xf32>
    %721 = arith.mulf %719, %720 : vector<8x32xf32>
    %722 = vector.broadcast %56 : vector<1x32xf32> to vector<8x32xf32>
    %723 = arith.addf %721, %722 : vector<8x32xf32>
    %724 = arith.truncf %723 : vector<8x32xf32> to vector<8x32xbf16>
    %725 = arith.truncf %3 : vector<32x3xf32> to vector<32x3xbf16>
    %cst_264 = arith.constant dense<0.000000e+00> : vector<8x3xf32>
    %726 = tpu.matmul %724, %725, %cst_264 {dimension_numbers = #tpu.dot_dimension_numbers<[1], [0], [0], [1], [0, 0, 1, 1], [], []>} : vector<8x32xbf16>, vector<32x3xbf16>, vector<8x3xf32> -> vector<8x3xf32>
    %727 = vector.broadcast %2 : vector<1x3xf32> to vector<8x3xf32>
    %728 = arith.addf %726, %727 : vector<8x3xf32>
    %c0_265 = arith.constant 0 : index
    %c0_266 = arith.constant 0 : index
    %c0_267 = arith.constant 0 : index
    %729 = vector.load %arg81[%c0_265, %c0_266, %c0_267] : memref<1x8x3xf32, #tpu.memory_space<vmem>>, vector<1x8x3xf32>
    %730 = vector.shape_cast %729 : vector<1x8x3xf32> to vector<8x3xf32>
    %731 = vector.shape_cast %728 : vector<8x3xf32> to vector<1x8x3xf32>
    tpu.vector_store %arg81[%c0_265, %c0_266, %c0_267], %731 {strides = array<i32>} : memref<1x8x3xf32, #tpu.memory_space<vmem>>, vector<1x8x3xf32>,
    return
  }
  func.func @transform_0(%arg0: i32) -> (i32, i32, i32) {
    %c0_i32 = arith.constant 0 : i32
    %c0_i32_0 = arith.constant 0 : i32
    %c0_i32_1 = arith.constant 0 : i32
    return %arg0, %c0_i32, %c0_i32_0 : i32, i32, i32
  }
  func.func @transform_1(%arg0: i32) -> (i32, i32, i32) {
    %c0_i32 = arith.constant 0 : i32
    %c0_i32_0 = arith.constant 0 : i32
    %c0_i32_1 = arith.constant 0 : i32
    return %arg0, %c0_i32, %c0_i32_0 : i32, i32, i32
  }
  func.func @transform_2(%arg0: i32) -> (i32, i32, i32) {
    %c0_i32 = arith.constant 0 : i32
    %c0_i32_0 = arith.constant 0 : i32
    %c0_i32_1 = arith.constant 0 : i32
    return %arg0, %c0_i32, %c0_i32_0 : i32, i32, i32
  }
  func.func @transform_3(%arg0: i32) -> (i32, i32) {
    %c0_i32 = arith.constant 0 : i32
    %c0_i32_0 = arith.constant 0 : i32
    %c0_i32_1 = arith.constant 0 : i32
    return %c0_i32, %c0_i32_0 : i32, i32
  }
  func.func @transform_4(%arg0: i32) -> (i32, i32) {
    %c0_i32 = arith.constant 0 : i32
    %c0_i32_0 = arith.constant 0 : i32
    %c0_i32_1 = arith.constant 0 : i32
    return %c0_i32, %c0_i32_0 : i32, i32
  }
  func.func @transform_5(%arg0: i32) -> (i32, i32) {
    %c0_i32 = arith.constant 0 : i32
    %c0_i32_0 = arith.constant 0 : i32
    %c0_i32_1 = arith.constant 0 : i32
    return %c0_i32, %c0_i32_0 : i32, i32
  }
  func.func @transform_6(%arg0: i32) -> (i32, i32) {
    %c0_i32 = arith.constant 0 : i32
    %c0_i32_0 = arith.constant 0 : i32
    %c0_i32_1 = arith.constant 0 : i32
    return %c0_i32, %c0_i32_0 : i32, i32
  }
  func.func @transform_7(%arg0: i32) -> (i32, i32) {
    %c0_i32 = arith.constant 0 : i32
    %c0_i32_0 = arith.constant 0 : i32
    %c0_i32_1 = arith.constant 0 : i32
    return %c0_i32, %c0_i32_0 : i32, i32
  }
  func.func @transform_8(%arg0: i32) -> (i32, i32) {
    %c0_i32 = arith.constant 0 : i32
    %c0_i32_0 = arith.constant 0 : i32
    %c0_i32_1 = arith.constant 0 : i32
    return %c0_i32, %c0_i32_0 : i32, i32
  }
  func.func @transform_9(%arg0: i32) -> (i32, i32) {
    %c0_i32 = arith.constant 0 : i32
    %c0_i32_0 = arith.constant 0 : i32
    %c0_i32_1 = arith.constant 0 : i32
    return %c0_i32, %c0_i32_0 : i32, i32
  }
  func.func @transform_10(%arg0: i32) -> (i32, i32) {
    %c0_i32 = arith.constant 0 : i32
    %c0_i32_0 = arith.constant 0 : i32
    %c0_i32_1 = arith.constant 0 : i32
    return %c0_i32, %c0_i32_0 : i32, i32
  }
  func.func @transform_11(%arg0: i32) -> (i32, i32) {
    %c0_i32 = arith.constant 0 : i32
    %c0_i32_0 = arith.constant 0 : i32
    %c0_i32_1 = arith.constant 0 : i32
    return %c0_i32, %c0_i32_0 : i32, i32
  }
  func.func @transform_12(%arg0: i32) -> (i32, i32) {
    %c0_i32 = arith.constant 0 : i32
    %c0_i32_0 = arith.constant 0 : i32
    %c0_i32_1 = arith.constant 0 : i32
    return %c0_i32, %c0_i32_0 : i32, i32
  }
  func.func @transform_13(%arg0: i32) -> (i32, i32) {
    %c0_i32 = arith.constant 0 : i32
    %c0_i32_0 = arith.constant 0 : i32
    %c0_i32_1 = arith.constant 0 : i32
    return %c0_i32, %c0_i32_0 : i32, i32
  }
  func.func @transform_14(%arg0: i32) -> (i32, i32) {
    %c0_i32 = arith.constant 0 : i32
    %c0_i32_0 = arith.constant 0 : i32
    %c0_i32_1 = arith.constant 0 : i32
    return %c0_i32, %c0_i32_0 : i32, i32
  }
  func.func @transform_15(%arg0: i32) -> (i32, i32) {
    %c0_i32 = arith.constant 0 : i32
    %c0_i32_0 = arith.constant 0 : i32
    %c0_i32_1 = arith.constant 0 : i32
    return %c0_i32, %c0_i32_0 : i32, i32
  }
  func.func @transform_16(%arg0: i32) -> (i32, i32) {
    %c0_i32 = arith.constant 0 : i32
    %c0_i32_0 = arith.constant 0 : i32
    %c0_i32_1 = arith.constant 0 : i32
    return %c0_i32, %c0_i32_0 : i32, i32
  }
  func.func @transform_17(%arg0: i32) -> (i32, i32) {
    %c0_i32 = arith.constant 0 : i32
    %c0_i32_0 = arith.constant 0 : i32
    %c0_i32_1 = arith.constant 0 : i32
    return %c0_i32, %c0_i32_0 : i32, i32
  }
  func.func @transform_18(%arg0: i32) -> (i32, i32) {
    %c0_i32 = arith.constant 0 : i32
    %c0_i32_0 = arith.constant 0 : i32
    %c0_i32_1 = arith.constant 0 : i32
    return %c0_i32, %c0_i32_0 : i32, i32
  }
  func.func @transform_19(%arg0: i32) -> (i32, i32) {
    %c0_i32 = arith.constant 0 : i32
    %c0_i32_0 = arith.constant 0 : i32
    %c0_i32_1 = arith.constant 0 : i32
    return %c0_i32, %c0_i32_0 : i32, i32
  }
  func.func @transform_20(%arg0: i32) -> (i32, i32) {
    %c0_i32 = arith.constant 0 : i32
    %c0_i32_0 = arith.constant 0 : i32
    %c0_i32_1 = arith.constant 0 : i32
    return %c0_i32, %c0_i32_0 : i32, i32
  }
  func.func @transform_21(%arg0: i32) -> (i32, i32) {
    %c0_i32 = arith.constant 0 : i32
    %c0_i32_0 = arith.constant 0 : i32
    %c0_i32_1 = arith.constant 0 : i32
    return %c0_i32, %c0_i32_0 : i32, i32
  }
  func.func @transform_22(%arg0: i32) -> (i32, i32) {
    %c0_i32 = arith.constant 0 : i32
    %c0_i32_0 = arith.constant 0 : i32
    %c0_i32_1 = arith.constant 0 : i32
    return %c0_i32, %c0_i32_0 : i32, i32
  }
  func.func @transform_23(%arg0: i32) -> (i32, i32) {
    %c0_i32 = arith.constant 0 : i32
    %c0_i32_0 = arith.constant 0 : i32
    %c0_i32_1 = arith.constant 0 : i32
    return %c0_i32, %c0_i32_0 : i32, i32
  }
  func.func @transform_24(%arg0: i32) -> (i32, i32) {
    %c0_i32 = arith.constant 0 : i32
    %c0_i32_0 = arith.constant 0 : i32
    %c0_i32_1 = arith.constant 0 : i32
    return %c0_i32, %c0_i32_0 : i32, i32
  }
  func.func @transform_25(%arg0: i32) -> (i32, i32) {
    %c0_i32 = arith.constant 0 : i32
    %c0_i32_0 = arith.constant 0 : i32
    %c0_i32_1 = arith.constant 0 : i32
    return %c0_i32, %c0_i32_0 : i32, i32
  }
  func.func @transform_26(%arg0: i32) -> (i32, i32) {
    %c0_i32 = arith.constant 0 : i32
    %c0_i32_0 = arith.constant 0 : i32
    %c0_i32_1 = arith.constant 0 : i32
    return %c0_i32, %c0_i32_0 : i32, i32
  }
  func.func @transform_27(%arg0: i32) -> (i32, i32) {
    %c0_i32 = arith.constant 0 : i32
    %c0_i32_0 = arith.constant 0 : i32
    %c0_i32_1 = arith.constant 0 : i32
    return %c0_i32, %c0_i32_0 : i32, i32
  }
  func.func @transform_28(%arg0: i32) -> (i32, i32) {
    %c0_i32 = arith.constant 0 : i32
    %c0_i32_0 = arith.constant 0 : i32
    %c0_i32_1 = arith.constant 0 : i32
    return %c0_i32, %c0_i32_0 : i32, i32
  }
  func.func @transform_29(%arg0: i32) -> (i32, i32) {
    %c0_i32 = arith.constant 0 : i32
    %c0_i32_0 = arith.constant 0 : i32
    %c0_i32_1 = arith.constant 0 : i32
    return %c0_i32, %c0_i32_0 : i32, i32
  }
  func.func @transform_30(%arg0: i32) -> (i32, i32) {
    %c0_i32 = arith.constant 0 : i32
    %c0_i32_0 = arith.constant 0 : i32
    %c0_i32_1 = arith.constant 0 : i32
    return %c0_i32, %c0_i32_0 : i32, i32
  }
  func.func @transform_31(%arg0: i32) -> (i32, i32) {
    %c0_i32 = arith.constant 0 : i32
    %c0_i32_0 = arith.constant 0 : i32
    %c0_i32_1 = arith.constant 0 : i32
    return %c0_i32, %c0_i32_0 : i32, i32
  }
  func.func @transform_32(%arg0: i32) -> (i32, i32) {
    %c0_i32 = arith.constant 0 : i32
    %c0_i32_0 = arith.constant 0 : i32
    %c0_i32_1 = arith.constant 0 : i32
    return %c0_i32, %c0_i32_0 : i32, i32
  }
  func.func @transform_33(%arg0: i32) -> (i32, i32) {
    %c0_i32 = arith.constant 0 : i32
    %c0_i32_0 = arith.constant 0 : i32
    %c0_i32_1 = arith.constant 0 : i32
    return %c0_i32, %c0_i32_0 : i32, i32
  }
  func.func @transform_34(%arg0: i32) -> (i32, i32) {
    %c0_i32 = arith.constant 0 : i32
    %c0_i32_0 = arith.constant 0 : i32
    %c0_i32_1 = arith.constant 0 : i32
    return %c0_i32, %c0_i32_0 : i32, i32
  }
  func.func @transform_35(%arg0: i32) -> (i32, i32) {
    %c0_i32 = arith.constant 0 : i32
    %c0_i32_0 = arith.constant 0 : i32
    %c0_i32_1 = arith.constant 0 : i32
    return %c0_i32, %c0_i32_0 : i32, i32
  }
  func.func @transform_36(%arg0: i32) -> (i32, i32) {
    %c0_i32 = arith.constant 0 : i32
    %c0_i32_0 = arith.constant 0 : i32
    %c0_i32_1 = arith.constant 0 : i32
    return %c0_i32, %c0_i32_0 : i32, i32
  }
  func.func @transform_37(%arg0: i32) -> (i32, i32) {
    %c0_i32 = arith.constant 0 : i32
    %c0_i32_0 = arith.constant 0 : i32
    %c0_i32_1 = arith.constant 0 : i32
    return %c0_i32, %c0_i32_0 : i32, i32
  }
  func.func @transform_38(%arg0: i32) -> (i32, i32) {
    %c0_i32 = arith.constant 0 : i32
    %c0_i32_0 = arith.constant 0 : i32
    %c0_i32_1 = arith.constant 0 : i32
    return %c0_i32, %c0_i32_0 : i32, i32
  }
  func.func @transform_39(%arg0: i32) -> (i32, i32) {
    %c0_i32 = arith.constant 0 : i32
    %c0_i32_0 = arith.constant 0 : i32
    %c0_i32_1 = arith.constant 0 : i32
    return %c0_i32, %c0_i32_0 : i32, i32
  }
  func.func @transform_40(%arg0: i32) -> (i32, i32) {
    %c0_i32 = arith.constant 0 : i32
    %c0_i32_0 = arith.constant 0 : i32
    %c0_i32_1 = arith.constant 0 : i32
    return %c0_i32, %c0_i32_0 : i32, i32
  }
  func.func @transform_41(%arg0: i32) -> (i32, i32) {
    %c0_i32 = arith.constant 0 : i32
    %c0_i32_0 = arith.constant 0 : i32
    %c0_i32_1 = arith.constant 0 : i32
    return %c0_i32, %c0_i32_0 : i32, i32
  }
  func.func @transform_42(%arg0: i32) -> (i32, i32) {
    %c0_i32 = arith.constant 0 : i32
    %c0_i32_0 = arith.constant 0 : i32
    %c0_i32_1 = arith.constant 0 : i32
    return %c0_i32, %c0_i32_0 : i32, i32
  }
  func.func @transform_43(%arg0: i32) -> (i32, i32) {
    %c0_i32 = arith.constant 0 : i32
    %c0_i32_0 = arith.constant 0 : i32
    %c0_i32_1 = arith.constant 0 : i32
    return %c0_i32, %c0_i32_0 : i32, i32
  }
  func.func @transform_44(%arg0: i32) -> (i32, i32) {
    %c0_i32 = arith.constant 0 : i32
    %c0_i32_0 = arith.constant 0 : i32
    %c0_i32_1 = arith.constant 0 : i32
    return %c0_i32, %c0_i32_0 : i32, i32
  }
  func.func @transform_45(%arg0: i32) -> (i32, i32) {
    %c0_i32 = arith.constant 0 : i32
    %c0_i32_0 = arith.constant 0 : i32
    %c0_i32_1 = arith.constant 0 : i32
    return %c0_i32, %c0_i32_0 : i32, i32
  }
  func.func @transform_46(%arg0: i32) -> (i32, i32) {
    %c0_i32 = arith.constant 0 : i32
    %c0_i32_0 = arith.constant 0 : i32
    %c0_i32_1 = arith.constant 0 : i32
    return %c0_i32, %c0_i32_0 : i32, i32
  }
  func.func @transform_47(%arg0: i32) -> (i32, i32) {
    %c0_i32 = arith.constant 0 : i32
    %c0_i32_0 = arith.constant 0 : i32
    %c0_i32_1 = arith.constant 0 : i32
    return %c0_i32, %c0_i32_0 : i32, i32
  }
  func.func @transform_48(%arg0: i32) -> (i32, i32) {
    %c0_i32 = arith.constant 0 : i32
    %c0_i32_0 = arith.constant 0 : i32
    %c0_i32_1 = arith.constant 0 : i32
    return %c0_i32, %c0_i32_0 : i32, i32
  }
  func.func @transform_49(%arg0: i32) -> (i32, i32) {
    %c0_i32 = arith.constant 0 : i32
    %c0_i32_0 = arith.constant 0 : i32
    %c0_i32_1 = arith.constant 0 : i32
    return %c0_i32, %c0_i32_0 : i32, i32
  }
  func.func @transform_50(%arg0: i32) -> (i32, i32) {
    %c0_i32 = arith.constant 0 : i32
    %c0_i32_0 = arith.constant 0 : i32
    %c0_i32_1 = arith.constant 0 : i32
    return %c0_i32, %c0_i32_0 : i32, i32
  }
  func.func @transform_51(%arg0: i32) -> (i32, i32) {
    %c0_i32 = arith.constant 0 : i32
    %c0_i32_0 = arith.constant 0 : i32
    %c0_i32_1 = arith.constant 0 : i32
    return %c0_i32, %c0_i32_0 : i32, i32
  }
  func.func @transform_52(%arg0: i32) -> (i32, i32) {
    %c0_i32 = arith.constant 0 : i32
    %c0_i32_0 = arith.constant 0 : i32
    %c0_i32_1 = arith.constant 0 : i32
    return %c0_i32, %c0_i32_0 : i32, i32
  }
  func.func @transform_53(%arg0: i32) -> (i32, i32) {
    %c0_i32 = arith.constant 0 : i32
    %c0_i32_0 = arith.constant 0 : i32
    %c0_i32_1 = arith.constant 0 : i32
    return %c0_i32, %c0_i32_0 : i32, i32
  }
  func.func @transform_54(%arg0: i32) -> (i32, i32) {
    %c0_i32 = arith.constant 0 : i32
    %c0_i32_0 = arith.constant 0 : i32
    %c0_i32_1 = arith.constant 0 : i32
    return %c0_i32, %c0_i32_0 : i32, i32
  }
  func.func @transform_55(%arg0: i32) -> (i32, i32) {
    %c0_i32 = arith.constant 0 : i32
    %c0_i32_0 = arith.constant 0 : i32
    %c0_i32_1 = arith.constant 0 : i32
    return %c0_i32, %c0_i32_0 : i32, i32
  }
  func.func @transform_56(%arg0: i32) -> (i32, i32) {
    %c0_i32 = arith.constant 0 : i32
    %c0_i32_0 = arith.constant 0 : i32
    %c0_i32_1 = arith.constant 0 : i32
    return %c0_i32, %c0_i32_0 : i32, i32
  }
  func.func @transform_57(%arg0: i32) -> (i32, i32) {
    %c0_i32 = arith.constant 0 : i32
    %c0_i32_0 = arith.constant 0 : i32
    %c0_i32_1 = arith.constant 0 : i32
    return %c0_i32, %c0_i32_0 : i32, i32
  }
  func.func @transform_58(%arg0: i32) -> (i32, i32) {
    %c0_i32 = arith.constant 0 : i32
    %c0_i32_0 = arith.constant 0 : i32
    %c0_i32_1 = arith.constant 0 : i32
    return %c0_i32, %c0_i32_0 : i32, i32
  }
  func.func @transform_59(%arg0: i32) -> (i32, i32) {
    %c0_i32 = arith.constant 0 : i32
    %c0_i32_0 = arith.constant 0 : i32
    %c0_i32_1 = arith.constant 0 : i32
    return %c0_i32, %c0_i32_0 : i32, i32
  }
  func.func @transform_60(%arg0: i32) -> (i32, i32) {
    %c0_i32 = arith.constant 0 : i32
    %c0_i32_0 = arith.constant 0 : i32
    %c0_i32_1 = arith.constant 0 : i32
    return %c0_i32, %c0_i32_0 : i32, i32
  }
  func.func @transform_61(%arg0: i32) -> (i32, i32) {
    %c0_i32 = arith.constant 0 : i32
    %c0_i32_0 = arith.constant 0 : i32
    %c0_i32_1 = arith.constant 0 : i32
    return %c0_i32, %c0_i32_0 : i32, i32
  }
  func.func @transform_62(%arg0: i32) -> (i32, i32) {
    %c0_i32 = arith.constant 0 : i32
    %c0_i32_0 = arith.constant 0 : i32
    %c0_i32_1 = arith.constant 0 : i32
    return %c0_i32, %c0_i32_0 : i32, i32
  }
  func.func @transform_63(%arg0: i32) -> (i32, i32) {
    %c0_i32 = arith.constant 0 : i32
    %c0_i32_0 = arith.constant 0 : i32
    %c0_i32_1 = arith.constant 0 : i32
    return %c0_i32, %c0_i32_0 : i32, i32
  }
  func.func @transform_64(%arg0: i32) -> (i32, i32) {
    %c0_i32 = arith.constant 0 : i32
    %c0_i32_0 = arith.constant 0 : i32
    %c0_i32_1 = arith.constant 0 : i32
    return %c0_i32, %c0_i32_0 : i32, i32
  }
  func.func @transform_65(%arg0: i32) -> (i32, i32) {
    %c0_i32 = arith.constant 0 : i32
    %c0_i32_0 = arith.constant 0 : i32
    %c0_i32_1 = arith.constant 0 : i32
    return %c0_i32, %c0_i32_0 : i32, i32
  }
  func.func @transform_66(%arg0: i32) -> (i32, i32) {
    %c0_i32 = arith.constant 0 : i32
    %c0_i32_0 = arith.constant 0 : i32
    %c0_i32_1 = arith.constant 0 : i32
    return %c0_i32, %c0_i32_0 : i32, i32
  }
  func.func @transform_67(%arg0: i32) -> (i32, i32) {
    %c0_i32 = arith.constant 0 : i32
    %c0_i32_0 = arith.constant 0 : i32
    %c0_i32_1 = arith.constant 0 : i32
    return %c0_i32, %c0_i32_0 : i32, i32
  }
  func.func @transform_68(%arg0: i32) -> (i32, i32) {
    %c0_i32 = arith.constant 0 : i32
    %c0_i32_0 = arith.constant 0 : i32
    %c0_i32_1 = arith.constant 0 : i32
    return %c0_i32, %c0_i32_0 : i32, i32
  }
  func.func @transform_69(%arg0: i32) -> (i32, i32) {
    %c0_i32 = arith.constant 0 : i32
    %c0_i32_0 = arith.constant 0 : i32
    %c0_i32_1 = arith.constant 0 : i32
    return %c0_i32, %c0_i32_0 : i32, i32
  }
  func.func @transform_70(%arg0: i32) -> (i32, i32) {
    %c0_i32 = arith.constant 0 : i32
    %c0_i32_0 = arith.constant 0 : i32
    %c0_i32_1 = arith.constant 0 : i32
    return %c0_i32, %c0_i32_0 : i32, i32
  }
  func.func @transform_71(%arg0: i32) -> (i32, i32) {
    %c0_i32 = arith.constant 0 : i32
    %c0_i32_0 = arith.constant 0 : i32
    %c0_i32_1 = arith.constant 0 : i32
    return %c0_i32, %c0_i32_0 : i32, i32
  }
  func.func @transform_72(%arg0: i32) -> (i32, i32) {
    %c0_i32 = arith.constant 0 : i32
    %c0_i32_0 = arith.constant 0 : i32
    %c0_i32_1 = arith.constant 0 : i32
    return %c0_i32, %c0_i32_0 : i32, i32
  }
  func.func @transform_73(%arg0: i32) -> (i32, i32) {
    %c0_i32 = arith.constant 0 : i32
    %c0_i32_0 = arith.constant 0 : i32
    %c0_i32_1 = arith.constant 0 : i32
    return %c0_i32, %c0_i32_0 : i32, i32
  }
  func.func @transform_74(%arg0: i32) -> (i32, i32) {
    %c0_i32 = arith.constant 0 : i32
    %c0_i32_0 = arith.constant 0 : i32
    %c0_i32_1 = arith.constant 0 : i32
    return %c0_i32, %c0_i32_0 : i32, i32
  }
  func.func @transform_75(%arg0: i32) -> (i32, i32) {
    %c0_i32 = arith.constant 0 : i32
    %c0_i32_0 = arith.constant 0 : i32
    %c0_i32_1 = arith.constant 0 : i32
    return %c0_i32, %c0_i32_0 : i32, i32
  }
  func.func @transform_76(%arg0: i32) -> (i32, i32) {
    %c0_i32 = arith.constant 0 : i32
    %c0_i32_0 = arith.constant 0 : i32
    %c0_i32_1 = arith.constant 0 : i32
    return %c0_i32, %c0_i32_0 : i32, i32
  }
  func.func @transform_77(%arg0: i32) -> (i32, i32) {
    %c0_i32 = arith.constant 0 : i32
    %c0_i32_0 = arith.constant 0 : i32
    %c0_i32_1 = arith.constant 0 : i32
    return %c0_i32, %c0_i32_0 : i32, i32
  }
  func.func @transform_78(%arg0: i32) -> (i32, i32) {
    %c0_i32 = arith.constant 0 : i32
    %c0_i32_0 = arith.constant 0 : i32
    %c0_i32_1 = arith.constant 0 : i32
    return %c0_i32, %c0_i32_0 : i32, i32
  }
  func.func @transform_79(%arg0: i32) -> (i32, i32) {
    %c0_i32 = arith.constant 0 : i32
    %c0_i32_0 = arith.constant 0 : i32
    %c0_i32_1 = arith.constant 0 : i32
    return %c0_i32, %c0_i32_0 : i32, i32
  }
  func.func @transform_80(%arg0: i32) -> (i32, i32, i32) {
    %c0_i32 = arith.constant 0 : i32
    %c0_i32_0 = arith.constant 0 : i32
    %c0_i32_1 = arith.constant 0 : i32
    return %arg0, %c0_i32, %c0_i32_0 : i32, i32, i32
  }
}

</mosaic_0001>

<bundles_post_ra>
// kernel: potr_forward.1
= control target key start
LH: loop header
LB: loop body
LE: loop exit
PB: predicated region body
PF: predicated region fallthrough
CT: control target
= control target key end

     0   :  { %s13237_s6 = smov 1   ;;  %s13238_s10 = smov 2   ;;  %s16023_s0 = inlined_call_operand.smem [shape: u32[81], index: -1, kind: input, shape index: {}] }
   0x1   :  { %s13373_s5 = sld [smem:[%s16023_s0]]   ;;  %s13239_s14 = smov 3  }
   0x2   :  { %s13378_s9 = sld [smem:[%s16023_s0 + %s13237_s6]]   ;;  %s13240_s18 = smov 4  }
   0x3   :  { %s13383_s13 = sld [smem:[%s16023_s0 + %s13238_s10]]   ;;  %s13241_s22 = smov 5  }
   0x4   :  { %s13388_s17 = sld [smem:[%s16023_s0 + %s13239_s14]]   ;;  %s13242_s26 = smov 6  }
   0x5   :  { %s13393_s21 = sld [smem:[%s16023_s0 + %s13240_s18]]   ;;  %s13243_s30 = smov 7  }
   0x6   :  { %s13398_s25 = sld [smem:[%s16023_s0 + %s13241_s22]]   ;;  %s13244_s4 = smov 8  }
   0x7   :  { %16127 = sst [smem:[#allocation80_spill]] %s13373_s5  ;;  %s13245_s10 = smov 9  }
   0x8   :  { %16128 = sst [smem:[#allocation81_spill]] %s13378_s9  ;;  %s13246_s15 = smov 10  }
   0x9   :  { %16129 = sst [smem:[#allocation82_spill]] %s13383_s13  ;;  %s13247_s20 = smov 11  }
   0xa   :  { %16130 = sst [smem:[#allocation83_spill]] %s13388_s17  ;;  %s13249_s1 = smov 13  }
   0xb   :  { %16131 = sst [smem:[#allocation84_spill]] %s13393_s21  ;;  %s13250_s7 = smov 14  }
   0xc   :  { %16132 = sst [smem:[#allocation85_spill]] %s13398_s25  ;;  %s13252_s22 = smov 16  }
   0xd   :  { %s13403_s29 = sld [smem:[%s16023_s0 + %s13242_s26]]   ;;  %s13248_s26 = smov 12  }
   0xe   :  { %s13408_s3 = sld [smem:[%s16023_s0 + %s13243_s30]]   ;;  %s13253_s28 = smov 17  }
   0xf   :  { %s13413_s8 = sld [smem:[%s16023_s0 + %s13244_s4]]  }
  0x10   :  { %s13418_s14 = sld [smem:[%s16023_s0 + %s13245_s10]]  }
  0x11   :  { %s13423_s19 = sld [smem:[%s16023_s0 + %s13246_s15]]   ;;  %s13251_s15 = smov 15  }
  0x12   :  { %s13428_s24 = sld [smem:[%s16023_s0 + %s13247_s20]]  }
  0x13   :  { %16133 = sst [smem:[#allocation86_spill]] %s13403_s29 }
  0x14   :  { %16134 = sst [smem:[#allocation87_spill]] %s13408_s3 }
  0x15   :  { %16135 = sst [smem:[#allocation88_spill]] %s13413_s8 }
  0x16   :  { %16136 = sst [smem:[#allocation89_spill]] %s13418_s14 }
  0x17   :  { %16137 = sst [smem:[#allocation90_spill]] %s13423_s19 }
  0x18   :  { %16138 = sst [smem:[#allocation91_spill]] %s13428_s24 }
  0x19   :  { %s13433_s30 = sld [smem:[%s16023_s0 + %s13248_s26]]  }
  0x1a   :  { %s13438_s6 = sld [smem:[%s16023_s0 + %s13249_s1]]  }
  0x1b   :  { %s13443_s12 = sld [smem:[%s16023_s0 + %s13250_s7]]   ;;  %s13254_s7 = smov 18  }
  0x1c   :  { %s13448_s20 = sld [smem:[%s16023_s0 + %s13251_s15]]   ;;  %s13255_s15 = smov 19  }
  0x1d   :  { %s13453_s27 = sld [smem:[%s16023_s0 + %s13252_s22]]   ;;  %s13256_s22 = smov 20  }
  0x1e   :  { %s13458_s4 = sld [smem:[%s16023_s0 + %s13253_s28]]   ;;  %s13257_s28 = smov 21  }
  0x1f   :  { %16139 = sst [smem:[#allocation92_spill]] %s13433_s30 }
  0x20   :  { %16140 = sst [smem:[#allocation93_spill]] %s13438_s6 }
  0x21   :  { %16141 = sst [smem:[#allocation94_spill]] %s13443_s12 }
  0x22   :  { %16142 = sst [smem:[#allocation95_spill]] %s13448_s20 }
  0x23   :  { %16143 = sst [smem:[#allocation96_spill]] %s13453_s27 }
  0x24   :  { %16144 = sst [smem:[#allocation97_spill]] %s13458_s4 }
  0x25   :  { %s13463_s25 = sld [smem:[%s16023_s0 + %s13254_s7]]   ;;  %s13258_s7 = smov 22  }
  0x26   :  { %s13468_s29 = sld [smem:[%s16023_s0 + %s13255_s15]]   ;;  %s13259_s15 = smov 23  }
  0x27   :  { %s13473_s20 = sld [smem:[%s16023_s0 + %s13256_s22]]   ;;  %s13260_s22 = smov 24  }
  0x28   :  { %s13478_s4 = sld [smem:[%s16023_s0 + %s13257_s28]]   ;;  %s13261_s28 = smov 25  }
  0x29   :  { %s13488_s27 = sld [smem:[%s16023_s0 + %s13259_s15]]   ;;  %s13263_s15 = smov 27  }
  0x2a   :  { %s13493_s8 = sld [smem:[%s16023_s0 + %s13260_s22]]   ;;  %s13264_s22 = smov 28  }
  0x2b   :  { %16145 = sst [smem:[#allocation98_spill]] %s13463_s25 }
  0x2c   :  { %16146 = sst [smem:[#allocation99_spill]] %s13468_s29 }
  0x2d   :  { %16147 = sst [smem:[#allocation100_spill]] %s13473_s20 }
  0x2e   :  { %16148 = sst [smem:[#allocation101_spill]] %s13478_s4 }
  0x2f   :  { %s13483_s25 = sld [smem:[%s16023_s0 + %s13258_s7]]   ;;  %s13262_s7 = smov 26  }
  0x30   :  { %16150 = sst [smem:[#allocation103_spill]] %s13493_s8 }
  0x31   :  { %s13498_s30 = sld [smem:[%s16023_s0 + %s13261_s28]]   ;;  %s13265_s28 = smov 29  }
  0x32   :  { %s13503_s19 = sld [smem:[%s16023_s0 + %s13262_s7]]   ;;  %s13266_s7 = smov 30  }
  0x33   :  { %s13508_s14 = sld [smem:[%s16023_s0 + %s13263_s15]]   ;;  %s13267_s15 = smov 31  }
  0x34   :  { %s13513_s3 = sld [smem:[%s16023_s0 + %s13264_s22]]   ;;  %s13268_s22 = smov 32  }
  0x35   :  { %16149 = sst [smem:[#allocation102_spill]] %s13483_s25 }
  0x36   :  { %s13518_s29 = sld [smem:[%s16023_s0 + %s13265_s28]]   ;;  %s13269_s28 = smov 33  }
  0x37   :  { %s13523_s12 = sld [smem:[%s16023_s0 + %s13266_s7]]   ;;  %s13270_s7 = smov 34  }
  0x38   :  { %16151 = sst [smem:[#allocation104_spill]] %s13503_s19 }
  0x39   :  { %s13528_s6 = sld [smem:[%s16023_s0 + %s13267_s15]]   ;;  %s13271_s15 = smov 35  }
  0x3a   :  { %16152 = sst [smem:[#allocation105_spill]] %s13513_s3 }
  0x3b   :  { %s13533_s24 = sld [smem:[%s16023_s0 + %s13268_s22]]   ;;  %s13272_s22 = smov 36  }
  0x3c   :  { %16153 = sst [smem:[#allocation106_spill]] %s13518_s29 }
  0x3d   :  { %16154 = sst [smem:[#allocation107_spill]] %s13523_s12 }
  0x3e   :  { %s13538_s29 = sld [smem:[%s16023_s0 + %s13269_s28]]   ;;  %s13273_s28 = smov 37  }
  0x3f   :  { %16155 = sst [smem:[#allocation108_spill]] %s13528_s6 }
  0x40   :  { %s13543_s12 = sld [smem:[%s16023_s0 + %s13270_s7]]   ;;  %s13274_s7 = smov 38  }
  0x41   :  { %16156 = sst [smem:[#allocation109_spill]] %s13533_s24 }
  0x42   :  { %s13548_s6 = sld [smem:[%s16023_s0 + %s13271_s15]]   ;;  %s13275_s15 = smov 39  }
  0x43   :  { %s13553_s24 = sld [smem:[%s16023_s0 + %s13272_s22]]   ;;  %s13276_s22 = smov 40  }
  0x44   :  { %s13558_s13 = sld [smem:[%s16023_s0 + %s13273_s28]]   ;;  %s13277_s28 = smov 41  }
  0x45   :  { %s13563_s9 = sld [smem:[%s16023_s0 + %s13274_s7]]   ;;  %s13278_s7 = smov 42  }
  0x46   :  { %16157 = sst [smem:[#allocation110_spill]] %s13543_s12 }
  0x47   :  { %s13568_s17 = sld [smem:[%s16023_s0 + %s13275_s15]]   ;;  %s13279_s15 = smov 43  }
  0x48   :  { %16158 = sst [smem:[#allocation111_spill]] %s13548_s6 }
  0x49   :  { %16159 = sst [smem:[#allocation112_spill]] %s13553_s24 }
  0x4a   :  { %16160 = sst [smem:[#allocation113_spill]] %s13558_s13 }
  0x4b   :  { %16161 = sst [smem:[#allocation114_spill]] %s13563_s9 }
  0x4c   :  { %s13573_s21 = sld [smem:[%s16023_s0 + %s13276_s22]]   ;;  %s13280_s22 = smov 44  }
  0x4d   :  { %16162 = sst [smem:[#allocation115_spill]] %s13568_s17 }
  0x4e   :  { %s13578_s13 = sld [smem:[%s16023_s0 + %s13277_s28]]   ;;  %s13281_s28 = smov 45  }
  0x4f   :  { %s13583_s9 = sld [smem:[%s16023_s0 + %s13278_s7]]   ;;  %s13282_s7 = smov 46  }
  0x50   :  { %s13588_s17 = sld [smem:[%s16023_s0 + %s13279_s15]]   ;;  %s13283_s15 = smov 47  }
  0x51   :  { %s13598_s5 = sld [smem:[%s16023_s0 + %s13281_s28]]   ;;  %s13285_s28 = smov 49  }
  0x52   :  { %16163 = sst [smem:[#allocation116_spill]] %s13573_s21 }
  0x53   :  { %s13593_s21 = sld [smem:[%s16023_s0 + %s13280_s22]]   ;;  %s13284_s22 = smov 48  }
  0x54   :  { %s13618_s24 = sld [smem:[%s16023_s0 + %s13285_s28]]   ;;  %s13289_s28 = smov 53  }
  0x55   :  { %16164 = sst [smem:[#allocation117_spill]] %s13583_s9 }
  0x56   :  { %16165 = sst [smem:[#allocation118_spill]] %s13588_s17 }
  0x57   :  { %16167 = sst [smem:[#allocation120_spill]] %s13598_s5 }
  0x58   :  { %s13603_s9 = sld [smem:[%s16023_s0 + %s13282_s7]]   ;;  %s13286_s7 = smov 50  }
  0x59   :  { %16166 = sst [smem:[#allocation119_spill]] %s13593_s21 }
  0x5a   :  { %s13608_s17 = sld [smem:[%s16023_s0 + %s13283_s15]]   ;;  %s13287_s15 = smov 51  }
  0x5b   :  { %s13613_s21 = sld [smem:[%s16023_s0 + %s13284_s22]]   ;;  %s13288_s22 = smov 52  }
  0x5c   :  { %s13628_s12 = sld [smem:[%s16023_s0 + %s13287_s15]]   ;;  %s13291_s15 = smov 55  }
  0x5d   :  { %s13638_s3 = sld [smem:[%s16023_s0 + %s13289_s28]]   ;;  %s13293_s28 = smov 57  }
  0x5e   :  { %16168 = sst [smem:[#allocation121_spill]] %s13603_s9 }
  0x5f   :  { %s13623_s9 = sld [smem:[%s16023_s0 + %s13286_s7]]   ;;  %s13290_s7 = smov 54  }
  0x60   :  { %s13648_s19 = sld [smem:[%s16023_s0 + %s13291_s15]]   ;;  %s13295_s15 = smov 59  }
  0x61   :  { %16169 = sst [smem:[#allocation122_spill]] %s13613_s21 }
  0x62   :  { %s13633_s21 = sld [smem:[%s16023_s0 + %s13288_s22]]   ;;  %s13292_s22 = smov 56  }
  0x63   :  { %16172 = sst [smem:[#allocation125_spill]] %s13638_s3 }
  0x64   :  { %s13658_s8 = sld [smem:[%s16023_s0 + %s13293_s28]]   ;;  %s13297_s28 = smov 61  }
  0x65   :  { %16170 = sst [smem:[#allocation123_spill]] %s13623_s9 }
  0x66   :  { %s13643_s9 = sld [smem:[%s16023_s0 + %s13290_s7]]   ;;  %s13294_s7 = smov 58  }
  0x67   :  { %16174 = sst [smem:[#allocation127_spill]] %s13648_s19 }
  0x68   :  { %16171 = sst [smem:[#allocation124_spill]] %s13633_s21 }
  0x69   :  { %s13653_s21 = sld [smem:[%s16023_s0 + %s13292_s22]]   ;;  %s13296_s22 = smov 60  }
  0x6a   :  { %16176 = sst [smem:[#allocation129_spill]] %s13658_s8 }
  0x6b   :  { %s13668_s19 = sld [smem:[%s16023_s0 + %s13295_s15]]   ;;  %s13299_s15 = smov 63  }
  0x6c   :  { %16173 = sst [smem:[#allocation126_spill]] %s13643_s9 }
  0x6d   :  { %s13663_s9 = sld [smem:[%s16023_s0 + %s13294_s7]]   ;;  %s13298_s7 = smov 62  }
  0x6e   :  { %s13678_s8 = sld [smem:[%s16023_s0 + %s13297_s28]]   ;;  %s13301_s28 = smov 65  }
  0x6f   :  { %16175 = sst [smem:[#allocation128_spill]] %s13653_s21 }
  0x70   :  { %s13673_s21 = sld [smem:[%s16023_s0 + %s13296_s22]]   ;;  %s13300_s22 = smov 64  }
  0x71   :  { %s13688_s25 = sld [smem:[%s16023_s0 + %s13299_s15]]   ;;  %s13303_s15 = smov 67  }
  0x72   :  { %s13698_s20 = sld [smem:[%s16023_s0 + %s13301_s28]]   ;;  %s13305_s28 = smov 69  }
  0x73   :  { %16177 = sst [smem:[#allocation130_spill]] %s13663_s9 }
  0x74   :  { %16179 = sst [smem:[#allocation132_spill]] %s13678_s8 }
  0x75   :  { %s13683_s9 = sld [smem:[%s16023_s0 + %s13298_s7]]   ;;  %s13302_s7 = smov 66  }
  0x76   :  { %16178 = sst [smem:[#allocation131_spill]] %s13673_s21 }
  0x77   :  { %16181 = sst [smem:[#allocation134_spill]] %s13688_s25 }
  0x78   :  { %s13693_s21 = sld [smem:[%s16023_s0 + %s13300_s22]]   ;;  %s13304_s22 = smov 68  }
  0x79   :  { %16183 = sst [smem:[#allocation136_spill]] %s13698_s20 }
  0x7a   :  { %s13708_s25 = sld [smem:[%s16023_s0 + %s13303_s15]]   ;;  %s13307_s15 = smov 71  }
  0x7b   :  { %16180 = sst [smem:[#allocation133_spill]] %s13683_s9 }
  0x7c   :  { %s13703_s9 = sld [smem:[%s16023_s0 + %s13302_s7]]   ;;  %s13306_s7 = smov 70  }
  0x7d   :  { %s13718_s20 = sld [smem:[%s16023_s0 + %s13305_s28]]   ;;  %s13309_s28 = smov 73  }
  0x7e   :  { %16182 = sst [smem:[#allocation135_spill]] %s13693_s21 }
  0x7f   :  { %s13713_s21 = sld [smem:[%s16023_s0 + %s13304_s22]]   ;;  %s13308_s22 = smov 72  }
  0x80   :  { %16185 = sst [smem:[#allocation138_spill]] %s13708_s25 }
  0x81   :  { %s13728_s25 = sld [smem:[%s16023_s0 + %s13307_s15]]   ;;  %s13311_s15 = smov 75  }
  0x82   :  { %16184 = sst [smem:[#allocation137_spill]] %s13703_s9 }
  0x83   :  { %16187 = sst [smem:[#allocation140_spill]] %s13718_s20 }
  0x84   :  { %s13723_s9 = sld [smem:[%s16023_s0 + %s13306_s7]]   ;;  %s13310_s7 = smov 74  }
  0x85   :  { %16186 = sst [smem:[#allocation139_spill]] %s13713_s21 }
  0x86   :  { %s13733_s21 = sld [smem:[%s16023_s0 + %s13308_s22]]   ;;  %s13312_s22 = smov 76  }
  0x87   :  { %16189 = sst [smem:[#allocation142_spill]] %s13728_s25 }
  0x88   :  { %s13738_s20 = sld [smem:[%s16023_s0 + %s13309_s28]]   ;;  %s13313_s28 = smov 77  }
  0x89   :  { %s13748_s25 = sld [smem:[%s16023_s0 + %s13311_s15]]   ;;  %s13315_s15 = smov 79  }
  0x8a   :  { %16188 = sst [smem:[#allocation141_spill]] %s13723_s9 }
  0x8b   :  { %s13743_s9 = sld [smem:[%s16023_s0 + %s13310_s7]]   ;;  %s13314_s7 = smov 78  }
  0x8c   :  { %16190 = sst [smem:[#allocation143_spill]] %s13733_s21 }
  0x8d   :  { %s13753_s21 = sld [smem:[%s16023_s0 + %s13312_s22]]   ;;  %s13316_s22 = smov 80  }
  0x8e   :  { %16191 = sst [smem:[#allocation144_spill]] %s13738_s20 }
  0x8f   :  { %16193 = sst [smem:[#allocation146_spill]] %s13748_s25 }
  0x90   :  { %s13758_s20 = sld [smem:[%s16023_s0 + %s13313_s28]]  }
  0x91   :  { %16192 = sst [smem:[#allocation145_spill]] %s13743_s9 }
  0x92   :  { %s13763_s9 = sld [smem:[%s16023_s0 + %s13314_s7]]  }
  0x93   :  { %16194 = sst [smem:[#allocation147_spill]] %s13753_s21 }
  0x94   :  { %s13768_s25 = sld [smem:[%s16023_s0 + %s13315_s15]]  }
  0x95   :  { %s13773_s21 = sld [smem:[%s16023_s0 + %s13316_s22]]  }
  0x98   :  { %16195 = sst [smem:[#allocation148_spill]] %s13763_s9 }
  0x99   :  { %166 = vsyncpa [#allocation3], 0 }
  0x9a   :  { %167 = vsyncpa [#allocation5], 0 }
  0x9b   :  { %168 = vsyncpa [#allocation8], 0 }
  0x9c   :  { %169 = vsyncpa [#allocation11], 0 }
  0x9d   :  { %170 = vsyncpa [#allocation14], 0 }
  0x9e   :  { %171 = vsyncpa [#allocation17], 0 }
  0x9f   :  { %172 = vsyncpa [#allocation20], 0 }
  0xa0   :  { %173 = vsyncpa [#allocation23], 0 }
  0xa1   :  { %174 = vsyncpa [#allocation26], 0 }
  0xa2   :  { %175 = vsyncpa [#allocation29], 0 }
  0xa3   :  { %176 = vsyncpa [#allocation32], 0 }
  0xa4   :  { %177 = vsyncpa [#allocation35], 0 }
  0xa5   :  { %178 = vsyncpa [#allocation38], 0 }
  0xa6   :  { %179 = vsyncpa [#allocation41], 0 }
  0xa7   :  { %180 = vsyncpa [#allocation44], 0 }
  0xa8   :  { %181 = vsyncpa [#allocation47], 0 }
  0xa9   :  { %182 = vsyncpa [#allocation50], 0 }
  0xaa   :  { %183 = vsyncpa [#allocation53], 0 }
  0xab   :  { %184 = vsyncpa [#allocation56], 0 }
  0xac   :  { %185 = vsyncpa [#allocation59], 0  ;;  %s13775_s0 = smov 0  }
  0xad LB: > { %s16196_s8 = sld [smem:[#allocation132_spill]]  ;;  %s16197_s6 = sld [smem:[#allocation111_spill]]  ;;  %s13235_s0 = sphi %s13775_s0, %s191_s0  }
  0xae   : > { %s16198_s5 = sld [smem:[#allocation120_spill]]  ;;  %s16199_s4 = sld [smem:[#allocation101_spill]] }
  0xaf   : > { %s16200_s3 = sld [smem:[#allocation125_spill]]  ;;  %s13781_s28 = sadd.s32 4294967295, %s13235_s0  }
  0xb0   : > { %p9780_p0 = scmp.ge.s32.totalorder %s13235_s0, 1  ;;  %p1917_p1 = scmp.lt.s32.totalorder %s13235_s0, 3 }
  0xb2   : > { %p13785_p2 = pnand %p9780_p0, %p1917_p1 }
  0xb3   : > { %p11220_p3 = scmp.eq.s32.totalorder (!%p13785_p2), %s13781_s28, 0  ;;  %s13317_s2 = smov (!%p13785_p2), [#allocation4]  }
  0xb4   : > { %1921 = sbr.rel (%p13785_p2) target bundleno = 1106 (0x452), region = 12  ;;  %s1992_s7 = sshll.u32 (!%p13785_p2), %s13317_s2, 4  ;;  %s1993_s7 = int_to_ptr.vmem [resolvable:$true] %s1992_s7 }
  0xb5   : > { %s13318_s10 = smov (!%p13785_p2), [#allocation7]   ;;  %s12161_s15 = scalar_lea.hbm (!%p13785_p2), %s16199_s4, 16 }
  0xb6   : > { %s2014_s11 = sshll.u32 (!%p13785_p2), %s13318_s10, 4  ;;  %p12162_p4 = scmp.ne.s32.totalorder (!%p13785_p2), %s16199_s4, %s12161_s15  ;;  %s2015_s11 = int_to_ptr.vmem [resolvable:$true] %s2014_s11 }
  0xb7   : > { %p12167_p7 = scmp.lt.u32.totalorder (!%p13785_p2), %s12161_s15, %s16199_s4 }
  0xb8   : > { %p12163_p5 = pnand (!%p13785_p2), %p12162_p4, %p11220_p3 }
  0xba   : > { %p12164_p6 = pneg (!%p13785_p2), %p12163_p5 }
  0xbc   : > { %p12169_p8 = pnand %p12167_p7, %p12164_p6 }
  0xbe   : > { %12172 = shalt.err (!%p12169_p8)
}
  0xbf   : > { %s12173_s16 = scalar_lea.vmem %s1993_s7, 16  ;;  %s12179_s18 = scalar_lea.vmem %s1993_s7, 32 }
  0xc0   : > { %p12174_p9 = scmp.ne.s32.totalorder %s1993_s7, %s12173_s16  ;;  %p12180_p12 = scmp.lt.s32.totalorder %s1993_s7, %s1993_s7 }
  0xc1   : > { %p12181_p13 = scmp.lt.s32.totalorder %s12179_s18, %s12173_s16 }
  0xc2   : > { %p12175_p10 = pnand %p12174_p9, %p11220_p3 }
  0xc3   : > { %p12182_p0 = por %p12181_p13, %p12180_p12 }
  0xc4   : > { %p12176_p11 = pneg %p12175_p10 }
  0xc6   : > { %p12183_p1 = pnand %p12182_p0, %p12176_p11 }
  0xc8   : > { %12186 = shalt.err (!%p12183_p1)
}
  0xc9   : > { %11071 = dma.hbm_to_vmem [thread:$0]  (%p11220_p3), %s16199_s4, 16, %s1993_s7, [#allocation5]  }
  0xca   : > { %s12187_s22 = scalar_lea.hbm %s13488_s27, 16 }
  0xcb   : > { %p12188_p4 = scmp.ne.s32.totalorder %s13488_s27, %s12187_s22  ;;  %p12193_p7 = scmp.lt.u32.totalorder %s12187_s22, %s13488_s27 }
  0xcd   : > { %p12189_p5 = pnand %p12188_p4, %p11220_p3 }
  0xcf   : > { %p12190_p6 = pneg %p12189_p5 }
  0xd1   : > { %p12195_p8 = pnand %p12193_p7, %p12190_p6 }
  0xd3   : > { %12198 = shalt.err (!%p12195_p8)
}
  0xd4   : > { %s12199_s23 = scalar_lea.vmem %s2015_s11, 16  ;;  %s12205_s26 = scalar_lea.vmem %s2015_s11, 32 }
  0xd5   : > { %p12200_p9 = scmp.ne.s32.totalorder %s2015_s11, %s12199_s23  ;;  %p12206_p12 = scmp.lt.s32.totalorder %s2015_s11, %s2015_s11 }
  0xd6   : > { %p12207_p13 = scmp.lt.s32.totalorder %s12205_s26, %s12199_s23 }
  0xd7   : > { %p12201_p10 = pnand %p12200_p9, %p11220_p3 }
  0xd8   : > { %p12208_p0 = por %p12207_p13, %p12206_p12 }
  0xd9   : > { %p12202_p11 = pneg %p12201_p10 }
  0xdb   : > { %p12209_p1 = pnand %p12208_p0, %p12202_p11 }
  0xdd   : > { %12212 = shalt.err (!%p12209_p1)
}
  0xde   : > { %11075 = dma.hbm_to_vmem [thread:$0]  (%p11220_p3), %s13488_s27, 16, %s2015_s11, [#allocation8]  }
  0xdf   : > { %s13319_s2 = smov [#allocation10]   ;;  %s13320_s10 = smov [#allocation13]  }
  0xe0   : > { %s2036_s7 = sshll.u32 %s13319_s2, 4  ;;  %s2058_s15 = sshll.u32 %s13320_s10, 4  ;;  %s2037_s7 = int_to_ptr.vmem [resolvable:$true] %s2036_s7  ;;  %s2059_s15 = int_to_ptr.vmem [resolvable:$true] %s2058_s15 }
  0xe1   : > { %s12213_s16 = scalar_lea.hbm %s13498_s30, 16 }
  0xe2   : > { %p12214_p4 = scmp.ne.s32.totalorder %s13498_s30, %s12213_s16  ;;  %p12219_p7 = scmp.lt.u32.totalorder %s12213_s16, %s13498_s30 }
  0xe4   : > { %p12215_p5 = pnand %p12214_p4, %p11220_p3 }
  0xe6   : > { %p12216_p6 = pneg %p12215_p5 }
  0xe8   : > { %p12221_p8 = pnand %p12219_p7, %p12216_p6 }
  0xea   : > { %12224 = shalt.err (!%p12221_p8)
}
  0xeb   : > { %s12225_s18 = scalar_lea.vmem %s2037_s7, 16  ;;  %s12231_s11 = scalar_lea.vmem %s2037_s7, 32 }
  0xec   : > { %p12226_p9 = scmp.ne.s32.totalorder %s2037_s7, %s12225_s18  ;;  %p12232_p12 = scmp.lt.s32.totalorder %s2037_s7, %s2037_s7 }
  0xed   : > { %p12233_p13 = scmp.lt.s32.totalorder %s12231_s11, %s12225_s18 }
  0xee   : > { %p12227_p10 = pnand %p12226_p9, %p11220_p3 }
  0xef   : > { %p12234_p0 = por %p12233_p13, %p12232_p12 }
  0xf0   : > { %p12228_p11 = pneg %p12227_p10 }
  0xf2   : > { %p12235_p1 = pnand %p12234_p0, %p12228_p11 }
  0xf4   : > { %12238 = shalt.err (!%p12235_p1)
}
  0xf5   : > { %11079 = dma.hbm_to_vmem [thread:$0]  (%p11220_p3), %s13498_s30, 16, %s2037_s7, [#allocation11]  }
  0xf6   : > { %s12239_s22 = scalar_lea.hbm %s13508_s14, 16 }
  0xf7   : > { %p12240_p4 = scmp.ne.s32.totalorder %s13508_s14, %s12239_s22  ;;  %p12245_p7 = scmp.lt.u32.totalorder %s12239_s22, %s13508_s14 }
  0xf9   : > { %p12241_p5 = pnand %p12240_p4, %p11220_p3 }
  0xfb   : > { %p12242_p6 = pneg %p12241_p5 }
  0xfd   : > { %p12247_p8 = pnand %p12245_p7, %p12242_p6 }
  0xff   : > { %12250 = shalt.err (!%p12247_p8)
}
 0x100   : > { %s12251_s23 = scalar_lea.vmem %s2059_s15, 16  ;;  %s12257_s26 = scalar_lea.vmem %s2059_s15, 32 }
 0x101   : > { %p12252_p9 = scmp.ne.s32.totalorder %s2059_s15, %s12251_s23  ;;  %p12258_p12 = scmp.lt.s32.totalorder %s2059_s15, %s2059_s15 }
 0x102   : > { %p12259_p13 = scmp.lt.s32.totalorder %s12257_s26, %s12251_s23 }
 0x103   : > { %p12253_p10 = pnand %p12252_p9, %p11220_p3 }
 0x104   : > { %p12260_p0 = por %p12259_p13, %p12258_p12 }
 0x105   : > { %p12254_p11 = pneg %p12253_p10 }
 0x107   : > { %p12261_p1 = pnand %p12260_p0, %p12254_p11 }
 0x109   : > { %12264 = shalt.err (!%p12261_p1)
}
 0x10a   : > { %11083 = dma.hbm_to_vmem [thread:$0]  (%p11220_p3), %s13508_s14, 16, %s2059_s15, [#allocation14]  }
 0x10b   : > { %s13321_s2 = smov [#allocation16]   ;;  %s13322_s10 = smov [#allocation19]  }
 0x10c   : > { %s2092_s7 = sshll.u32 %s13321_s2, 4  ;;  %s2114_s16 = sshll.u32 %s13322_s10, 4  ;;  %s2093_s7 = int_to_ptr.vmem [resolvable:$true] %s2092_s7  ;;  %s2115_s16 = int_to_ptr.vmem [resolvable:$true] %s2114_s16 }
 0x10d   : > { %s12265_s18 = scalar_lea.hbm %s13538_s29, 16 }
 0x10e   : > { %p12266_p4 = scmp.ne.s32.totalorder %s13538_s29, %s12265_s18  ;;  %p12271_p7 = scmp.lt.u32.totalorder %s12265_s18, %s13538_s29 }
 0x110   : > { %p12267_p5 = pnand %p12266_p4, %p11220_p3 }
 0x112   : > { %p12268_p6 = pneg %p12267_p5 }
 0x114   : > { %p12273_p8 = pnand %p12271_p7, %p12268_p6 }
 0x116   : > { %12276 = shalt.err (!%p12273_p8)
}
 0x117   : > { %s12277_s11 = scalar_lea.vmem %s2093_s7, 16  ;;  %s12283_s15 = scalar_lea.vmem %s2093_s7, 32 }
 0x118   : > { %p12278_p9 = scmp.ne.s32.totalorder %s2093_s7, %s12277_s11  ;;  %p12284_p12 = scmp.lt.s32.totalorder %s2093_s7, %s2093_s7 }
 0x119   : > { %p12285_p13 = scmp.lt.s32.totalorder %s12283_s15, %s12277_s11 }
 0x11a   : > { %p12279_p10 = pnand %p12278_p9, %p11220_p3 }
 0x11b   : > { %p12286_p0 = por %p12285_p13, %p12284_p12 }
 0x11c   : > { %p12280_p11 = pneg %p12279_p10 }
 0x11e   : > { %p12287_p1 = pnand %p12286_p0, %p12280_p11 }
 0x120   : > { %12290 = shalt.err (!%p12287_p1)
}
 0x121   : > { %11087 = dma.hbm_to_vmem [thread:$0]  (%p11220_p3), %s13538_s29, 16, %s2093_s7, [#allocation17]  }
 0x122   : > { %s12291_s22 = scalar_lea.hbm %s16197_s6, 16 }
 0x123   : > { %p12292_p4 = scmp.ne.s32.totalorder %s16197_s6, %s12291_s22  ;;  %p12297_p7 = scmp.lt.u32.totalorder %s12291_s22, %s16197_s6 }
 0x125   : > { %p12293_p5 = pnand %p12292_p4, %p11220_p3 }
 0x127   : > { %p12294_p6 = pneg %p12293_p5 }
 0x129   : > { %p12299_p8 = pnand %p12297_p7, %p12294_p6 }
 0x12b   : > { %12302 = shalt.err (!%p12299_p8)
}
 0x12c   : > { %s12303_s23 = scalar_lea.vmem %s2115_s16, 16  ;;  %s12309_s26 = scalar_lea.vmem %s2115_s16, 32 }
 0x12d   : > { %p12304_p9 = scmp.ne.s32.totalorder %s2115_s16, %s12303_s23  ;;  %p12310_p12 = scmp.lt.s32.totalorder %s2115_s16, %s2115_s16 }
 0x12e   : > { %p12311_p13 = scmp.lt.s32.totalorder %s12309_s26, %s12303_s23 }
 0x12f   : > { %p12305_p10 = pnand %p12304_p9, %p11220_p3 }
 0x130   : > { %p12312_p0 = por %p12311_p13, %p12310_p12 }
 0x131   : > { %p12306_p11 = pneg %p12305_p10 }
 0x133   : > { %p12313_p1 = pnand %p12312_p0, %p12306_p11 }
 0x135   : > { %12316 = shalt.err (!%p12313_p1)
}
 0x136   : > { %11091 = dma.hbm_to_vmem [thread:$0]  (%p11220_p3), %s16197_s6, 16, %s2115_s16, [#allocation20]  }
 0x137   : > { %s13323_s2 = smov [#allocation22]   ;;  %s13324_s10 = smov [#allocation25]  }
 0x138   : > { %s2148_s7 = sshll.u32 %s13323_s2, 4  ;;  %s2176_s18 = sshll.u32 %s13324_s10, 4  ;;  %s2149_s7 = int_to_ptr.vmem [resolvable:$true] %s2148_s7  ;;  %s2177_s18 = int_to_ptr.vmem [resolvable:$true] %s2176_s18 }
 0x139   : > { %s12317_s11 = scalar_lea.hbm %s13578_s13, 16 }
 0x13a   : > { %p12318_p4 = scmp.ne.s32.totalorder %s13578_s13, %s12317_s11  ;;  %p12323_p7 = scmp.lt.u32.totalorder %s12317_s11, %s13578_s13 }
 0x13c   : > { %p12319_p5 = pnand %p12318_p4, %p11220_p3 }
 0x13e   : > { %p12320_p6 = pneg %p12319_p5 }
 0x140   : > { %p12325_p8 = pnand %p12323_p7, %p12320_p6 }
 0x142   : > { %12328 = shalt.err (!%p12325_p8)
}
 0x143   : > { %s12329_s15 = scalar_lea.vmem %s2149_s7, 16  ;;  %s12335_s16 = scalar_lea.vmem %s2149_s7, 32 }
 0x144   : > { %p12330_p9 = scmp.ne.s32.totalorder %s2149_s7, %s12329_s15  ;;  %p12336_p12 = scmp.lt.s32.totalorder %s2149_s7, %s2149_s7 }
 0x145   : > { %p12337_p13 = scmp.lt.s32.totalorder %s12335_s16, %s12329_s15 }
 0x146   : > { %p12331_p10 = pnand %p12330_p9, %p11220_p3 }
 0x147   : > { %p12338_p0 = por %p12337_p13, %p12336_p12 }
 0x148   : > { %p12332_p11 = pneg %p12331_p10 }
 0x14a   : > { %p12339_p1 = pnand %p12338_p0, %p12332_p11 }
 0x14c   : > { %12342 = shalt.err (!%p12339_p1)
}
 0x14d   : > { %11095 = dma.hbm_to_vmem [thread:$0]  (%p11220_p3), %s13578_s13, 16, %s2149_s7, [#allocation23]  }
 0x14e   : > { %s12343_s22 = scalar_lea.hbm %s16198_s5, 16 }
 0x14f   : > { %p12344_p4 = scmp.ne.s32.totalorder %s16198_s5, %s12343_s22  ;;  %p12349_p7 = scmp.lt.u32.totalorder %s12343_s22, %s16198_s5 }
 0x151   : > { %p12345_p5 = pnand %p12344_p4, %p11220_p3 }
 0x153   : > { %p12346_p6 = pneg %p12345_p5 }
 0x155   : > { %p12351_p8 = pnand %p12349_p7, %p12346_p6 }
 0x157   : > { %12354 = shalt.err (!%p12351_p8)
}
 0x158   : > { %s12355_s23 = scalar_lea.vmem %s2177_s18, 16  ;;  %s12361_s26 = scalar_lea.vmem %s2177_s18, 32 }
 0x159   : > { %p12356_p9 = scmp.ne.s32.totalorder %s2177_s18, %s12355_s23  ;;  %p12362_p12 = scmp.lt.s32.totalorder %s2177_s18, %s2177_s18 }
 0x15a   : > { %p12363_p13 = scmp.lt.s32.totalorder %s12361_s26, %s12355_s23 }
 0x15b   : > { %p12357_p10 = pnand %p12356_p9, %p11220_p3 }
 0x15c   : > { %p12364_p0 = por %p12363_p13, %p12362_p12 }
 0x15d   : > { %p12358_p11 = pneg %p12357_p10 }
 0x15f   : > { %p12365_p1 = pnand %p12364_p0, %p12358_p11 }
 0x161   : > { %12368 = shalt.err (!%p12365_p1)
}
 0x162   : > { %11099 = dma.hbm_to_vmem [thread:$0]  (%p11220_p3), %s16198_s5, 16, %s2177_s18, [#allocation26]  }
 0x163   : > { %s13325_s2 = smov [#allocation28]   ;;  %s13326_s10 = smov [#allocation31]  }
 0x164   : > { %s2198_s7 = sshll.u32 %s13325_s2, 4  ;;  %s2220_s11 = sshll.u32 %s13326_s10, 4  ;;  %s2199_s7 = int_to_ptr.vmem [resolvable:$true] %s2198_s7  ;;  %s2221_s11 = int_to_ptr.vmem [resolvable:$true] %s2220_s11 }
 0x165   : > { %s12369_s15 = scalar_lea.hbm %s13608_s17, 16 }
 0x166   : > { %p12370_p4 = scmp.ne.s32.totalorder %s13608_s17, %s12369_s15  ;;  %p12375_p7 = scmp.lt.u32.totalorder %s12369_s15, %s13608_s17 }
 0x168   : > { %p12371_p5 = pnand %p12370_p4, %p11220_p3 }
 0x16a   : > { %p12372_p6 = pneg %p12371_p5 }
 0x16c   : > { %p12377_p8 = pnand %p12375_p7, %p12372_p6 }
 0x16e   : > { %12380 = shalt.err (!%p12377_p8)
}
 0x16f   : > { %s12381_s16 = scalar_lea.vmem %s2199_s7, 16  ;;  %s12387_s18 = scalar_lea.vmem %s2199_s7, 32 }
 0x170   : > { %p12382_p9 = scmp.ne.s32.totalorder %s2199_s7, %s12381_s16  ;;  %p12388_p12 = scmp.lt.s32.totalorder %s2199_s7, %s2199_s7 }
 0x171   : > { %p12389_p13 = scmp.lt.s32.totalorder %s12387_s18, %s12381_s16 }
 0x172   : > { %p12383_p10 = pnand %p12382_p9, %p11220_p3 }
 0x173   : > { %p12390_p0 = por %p12389_p13, %p12388_p12 }
 0x174   : > { %p12384_p11 = pneg %p12383_p10 }
 0x176   : > { %p12391_p1 = pnand %p12390_p0, %p12384_p11 }
 0x178   : > { %12394 = shalt.err (!%p12391_p1)
}
 0x179   : > { %11103 = dma.hbm_to_vmem [thread:$0]  (%p11220_p3), %s13608_s17, 16, %s2199_s7, [#allocation29]  }
 0x17a   : > { %s12395_s22 = scalar_lea.hbm %s13618_s24, 16 }
 0x17b   : > { %p12396_p4 = scmp.ne.s32.totalorder %s13618_s24, %s12395_s22  ;;  %p12401_p7 = scmp.lt.u32.totalorder %s12395_s22, %s13618_s24 }
 0x17d   : > { %p12397_p5 = pnand %p12396_p4, %p11220_p3 }
 0x17f   : > { %p12398_p6 = pneg %p12397_p5 }
 0x181   : > { %p12403_p8 = pnand %p12401_p7, %p12398_p6 }
 0x183   : > { %12406 = shalt.err (!%p12403_p8)
}
 0x184   : > { %s12407_s23 = scalar_lea.vmem %s2221_s11, 16  ;;  %s12413_s26 = scalar_lea.vmem %s2221_s11, 32 }
 0x185   : > { %p12408_p9 = scmp.ne.s32.totalorder %s2221_s11, %s12407_s23  ;;  %p12414_p12 = scmp.lt.s32.totalorder %s2221_s11, %s2221_s11 }
 0x186   : > { %p12415_p13 = scmp.lt.s32.totalorder %s12413_s26, %s12407_s23 }
 0x187   : > { %p12409_p10 = pnand %p12408_p9, %p11220_p3 }
 0x188   : > { %p12416_p0 = por %p12415_p13, %p12414_p12 }
 0x189   : > { %p12410_p11 = pneg %p12409_p10 }
 0x18b   : > { %p12417_p1 = pnand %p12416_p0, %p12410_p11 }
 0x18d   : > { %12420 = shalt.err (!%p12417_p1)
}
 0x18e   : > { %11107 = dma.hbm_to_vmem [thread:$0]  (%p11220_p3), %s13618_s24, 16, %s2221_s11, [#allocation32]  }
 0x18f   : > { %s13327_s2 = smov [#allocation34]   ;;  %s13328_s10 = smov [#allocation37]  }
 0x190   : > { %s2242_s7 = sshll.u32 %s13327_s2, 4  ;;  %s2264_s15 = sshll.u32 %s13328_s10, 4  ;;  %s2243_s7 = int_to_ptr.vmem [resolvable:$true] %s2242_s7  ;;  %s2265_s15 = int_to_ptr.vmem [resolvable:$true] %s2264_s15 }
 0x191   : > { %s12421_s16 = scalar_lea.hbm %s13628_s12, 16 }
 0x192   : > { %p12422_p4 = scmp.ne.s32.totalorder %s13628_s12, %s12421_s16  ;;  %p12427_p7 = scmp.lt.u32.totalorder %s12421_s16, %s13628_s12 }
 0x194   : > { %p12423_p5 = pnand %p12422_p4, %p11220_p3 }
 0x196   : > { %p12424_p6 = pneg %p12423_p5 }
 0x198   : > { %p12429_p8 = pnand %p12427_p7, %p12424_p6 }
 0x19a   : > { %12432 = shalt.err (!%p12429_p8)
}
 0x19b   : > { %s12433_s18 = scalar_lea.vmem %s2243_s7, 16  ;;  %s12439_s11 = scalar_lea.vmem %s2243_s7, 32 }
 0x19c   : > { %p12434_p9 = scmp.ne.s32.totalorder %s2243_s7, %s12433_s18  ;;  %p12440_p12 = scmp.lt.s32.totalorder %s2243_s7, %s2243_s7 }
 0x19d   : > { %p12441_p13 = scmp.lt.s32.totalorder %s12439_s11, %s12433_s18 }
 0x19e   : > { %p12435_p10 = pnand %p12434_p9, %p11220_p3 }
 0x19f   : > { %p12442_p0 = por %p12441_p13, %p12440_p12 }
 0x1a0   : > { %p12436_p11 = pneg %p12435_p10 }
 0x1a2   : > { %p12443_p1 = pnand %p12442_p0, %p12436_p11 }
 0x1a4   : > { %12446 = shalt.err (!%p12443_p1)
}
 0x1a5   : > { %11111 = dma.hbm_to_vmem [thread:$0]  (%p11220_p3), %s13628_s12, 16, %s2243_s7, [#allocation35]  }
 0x1a6   : > { %s12447_s22 = scalar_lea.hbm %s16200_s3, 16 }
 0x1a7   : > { %p12448_p4 = scmp.ne.s32.totalorder %s16200_s3, %s12447_s22  ;;  %p12453_p7 = scmp.lt.u32.totalorder %s12447_s22, %s16200_s3 }
 0x1a9   : > { %p12449_p5 = pnand %p12448_p4, %p11220_p3 }
 0x1ab   : > { %p12450_p6 = pneg %p12449_p5 }
 0x1ad   : > { %p12455_p8 = pnand %p12453_p7, %p12450_p6 }
 0x1af   : > { %12458 = shalt.err (!%p12455_p8)
}
 0x1b0   : > { %s12459_s23 = scalar_lea.vmem %s2265_s15, 16  ;;  %s12465_s26 = scalar_lea.vmem %s2265_s15, 32 }
 0x1b1   : > { %p12460_p9 = scmp.ne.s32.totalorder %s2265_s15, %s12459_s23  ;;  %p12466_p12 = scmp.lt.s32.totalorder %s2265_s15, %s2265_s15 }
 0x1b2   : > { %p12467_p13 = scmp.lt.s32.totalorder %s12465_s26, %s12459_s23 }
 0x1b3   : > { %p12461_p10 = pnand %p12460_p9, %p11220_p3 }
 0x1b4   : > { %p12468_p0 = por %p12467_p13, %p12466_p12 }
 0x1b5   : > { %p12462_p11 = pneg %p12461_p10 }
 0x1b7   : > { %p12469_p1 = pnand %p12468_p0, %p12462_p11 }
 0x1b9   : > { %12472 = shalt.err (!%p12469_p1)
}
 0x1ba   : > { %11115 = dma.hbm_to_vmem [thread:$0]  (%p11220_p3), %s16200_s3, 16, %s2265_s15, [#allocation38]  }
 0x1bb   : > { %s13329_s2 = smov [#allocation40]   ;;  %s13330_s10 = smov [#allocation43]  }
 0x1bc   : > { %s2298_s7 = sshll.u32 %s13329_s2, 4  ;;  %s2320_s16 = sshll.u32 %s13330_s10, 4  ;;  %s2299_s7 = int_to_ptr.vmem [resolvable:$true] %s2298_s7  ;;  %s2321_s16 = int_to_ptr.vmem [resolvable:$true] %s2320_s16 }
 0x1bd   : > { %s12473_s18 = scalar_lea.hbm %s13668_s19, 16 }
 0x1be   : > { %p12474_p4 = scmp.ne.s32.totalorder %s13668_s19, %s12473_s18  ;;  %p12479_p7 = scmp.lt.u32.totalorder %s12473_s18, %s13668_s19 }
 0x1c0   : > { %p12475_p5 = pnand %p12474_p4, %p11220_p3 }
 0x1c2   : > { %p12476_p6 = pneg %p12475_p5 }
 0x1c4   : > { %p12481_p8 = pnand %p12479_p7, %p12476_p6 }
 0x1c6   : > { %12484 = shalt.err (!%p12481_p8)
}
 0x1c7   : > { %s12485_s11 = scalar_lea.vmem %s2299_s7, 16  ;;  %s12491_s15 = scalar_lea.vmem %s2299_s7, 32 }
 0x1c8   : > { %p12486_p9 = scmp.ne.s32.totalorder %s2299_s7, %s12485_s11  ;;  %p12492_p12 = scmp.lt.s32.totalorder %s2299_s7, %s2299_s7 }
 0x1c9   : > { %p12493_p13 = scmp.lt.s32.totalorder %s12491_s15, %s12485_s11 }
 0x1ca   : > { %p12487_p10 = pnand %p12486_p9, %p11220_p3 }
 0x1cb   : > { %p12494_p0 = por %p12493_p13, %p12492_p12 }
 0x1cc   : > { %p12488_p11 = pneg %p12487_p10 }
 0x1ce   : > { %p12495_p1 = pnand %p12494_p0, %p12488_p11 }
 0x1d0   : > { %12498 = shalt.err (!%p12495_p1)
}
 0x1d1   : > { %11119 = dma.hbm_to_vmem [thread:$0]  (%p11220_p3), %s13668_s19, 16, %s2299_s7, [#allocation41]  }
 0x1d2   : > { %s12499_s22 = scalar_lea.hbm %s16196_s8, 16 }
 0x1d3   : > { %p12500_p4 = scmp.ne.s32.totalorder %s16196_s8, %s12499_s22  ;;  %p12505_p7 = scmp.lt.u32.totalorder %s12499_s22, %s16196_s8 }
 0x1d5   : > { %p12501_p5 = pnand %p12500_p4, %p11220_p3 }
 0x1d7   : > { %p12502_p6 = pneg %p12501_p5 }
 0x1d9   : > { %p12507_p8 = pnand %p12505_p7, %p12502_p6 }
 0x1db   : > { %12510 = shalt.err (!%p12507_p8)
}
 0x1dc   : > { %s12511_s23 = scalar_lea.vmem %s2321_s16, 16  ;;  %s12517_s26 = scalar_lea.vmem %s2321_s16, 32 }
 0x1dd   : > { %p12512_p9 = scmp.ne.s32.totalorder %s2321_s16, %s12511_s23  ;;  %p12518_p12 = scmp.lt.s32.totalorder %s2321_s16, %s2321_s16 }
 0x1de   : > { %p12519_p13 = scmp.lt.s32.totalorder %s12517_s26, %s12511_s23 }
 0x1df   : > { %p12513_p10 = pnand %p12512_p9, %p11220_p3 }
 0x1e0   : > { %p12520_p0 = por %p12519_p13, %p12518_p12 }
 0x1e1   : > { %p12514_p11 = pneg %p12513_p10 }
 0x1e3   : > { %p12521_p1 = pnand %p12520_p0, %p12514_p11 }
 0x1e5   : > { %12524 = shalt.err (!%p12521_p1)
}
 0x1e6   : > { %s16202_s2 = sld [smem:[#allocation134_spill]]  ;;  %s13331_s7 = smov [#allocation46]  }
 0x1e7   : > { %11123 = dma.hbm_to_vmem [thread:$0]  (%p11220_p3), %s16196_s8, 16, %s2321_s16, [#allocation44]  }
 0x1e8   : > { %s2342_s10 = sshll.u32 %s13331_s7, 4  ;;  %s13332_s18 = smov [#allocation49]   ;;  %s2343_s10 = int_to_ptr.vmem [resolvable:$true] %s2342_s10 }
 0x1e9   : > { %s2376_s11 = sshll.u32 %s13332_s18, 4  ;;  %s2377_s11 = int_to_ptr.vmem [resolvable:$true] %s2376_s11 }
 0x1ec   : > { %s12525_s15 = scalar_lea.hbm %s16202_s2, 16 }
 0x1ed   : > { %p12526_p4 = scmp.ne.s32.totalorder %s16202_s2, %s12525_s15  ;;  %p12531_p7 = scmp.lt.u32.totalorder %s12525_s15, %s16202_s2 }
 0x1ef   : > { %p12527_p5 = pnand %p12526_p4, %p11220_p3 }
 0x1f1   : > { %p12528_p6 = pneg %p12527_p5 }
 0x1f3   : > { %p12533_p8 = pnand %p12531_p7, %p12528_p6 }
 0x1f5   : > { %12536 = shalt.err (!%p12533_p8)
}
 0x1f6   : > { %s12537_s22 = scalar_lea.vmem %s2343_s10, 16  ;;  %s12543_s16 = scalar_lea.vmem %s2343_s10, 32 }
 0x1f7   : > { %p12538_p9 = scmp.ne.s32.totalorder %s2343_s10, %s12537_s22  ;;  %p12544_p12 = scmp.lt.s32.totalorder %s2343_s10, %s2343_s10 }
 0x1f8   : > { %p12545_p13 = scmp.lt.s32.totalorder %s12543_s16, %s12537_s22 }
 0x1f9   : > { %p12539_p10 = pnand %p12538_p9, %p11220_p3 }
 0x1fa   : > { %p12546_p0 = por %p12545_p13, %p12544_p12 }
 0x1fb   : > { %p12540_p11 = pneg %p12539_p10 }
 0x1fd   : > { %p12547_p1 = pnand %p12546_p0, %p12540_p11 }
 0x1ff   : > { %12550 = shalt.err (!%p12547_p1)
}
 0x200   : > { %s16203_s23 = sld [smem:[#allocation140_spill]] }
 0x201   : > { %11127 = dma.hbm_to_vmem [thread:$0]  (%p11220_p3), %s16202_s2, 16, %s2343_s10, [#allocation47]  }
 0x206   : > { %s12551_s26 = scalar_lea.hbm %s16203_s23, 16 }
 0x207   : > { %p12552_p4 = scmp.ne.s32.totalorder %s16203_s23, %s12551_s26  ;;  %p12557_p7 = scmp.lt.u32.totalorder %s12551_s26, %s16203_s23 }
 0x209   : > { %p12553_p5 = pnand %p12552_p4, %p11220_p3 }
 0x20b   : > { %p12554_p6 = pneg %p12553_p5 }
 0x20d   : > { %p12559_p8 = pnand %p12557_p7, %p12554_p6 }
 0x20f   : > { %12562 = shalt.err (!%p12559_p8)
}
 0x210   : > { %s12563_s7 = scalar_lea.vmem %s2377_s11, 16  ;;  %s12569_s18 = scalar_lea.vmem %s2377_s11, 32 }
 0x211   : > { %p12564_p9 = scmp.ne.s32.totalorder %s2377_s11, %s12563_s7  ;;  %p12570_p12 = scmp.lt.s32.totalorder %s2377_s11, %s2377_s11 }
 0x212   : > { %p12571_p13 = scmp.lt.s32.totalorder %s12569_s18, %s12563_s7 }
 0x213   : > { %p12565_p10 = pnand %p12564_p9, %p11220_p3 }
 0x214   : > { %p12572_p0 = por %p12571_p13, %p12570_p12 }
 0x215   : > { %p12566_p11 = pneg %p12565_p10 }
 0x217   : > { %p12573_p1 = pnand %p12572_p0, %p12566_p11 }
 0x219   : > { %12576 = shalt.err (!%p12573_p1)
}
 0x21a   : > { %s16204_s10 = sld [smem:[#allocation144_spill]]  ;;  %s13333_s15 = smov [#allocation52]  }
 0x21b   : > { %11131 = dma.hbm_to_vmem [thread:$0]  (%p11220_p3), %s16203_s23, 16, %s2377_s11, [#allocation50]  }
 0x21c   : > { %s2404_s22 = sshll.u32 %s13333_s15, 4  ;;  %s13334_s16 = smov [#allocation55]   ;;  %s2405_s22 = int_to_ptr.vmem [resolvable:$true] %s2404_s22 }
 0x21d   : > { %s2426_s26 = sshll.u32 %s13334_s16, 4  ;;  %s2427_s26 = int_to_ptr.vmem [resolvable:$true] %s2426_s26 }
 0x220   : > { %s12577_s2 = scalar_lea.hbm %s16204_s10, 16 }
 0x221   : > { %p12578_p4 = scmp.ne.s32.totalorder %s16204_s10, %s12577_s2  ;;  %p12583_p7 = scmp.lt.u32.totalorder %s12577_s2, %s16204_s10 }
 0x223   : > { %p12579_p5 = pnand %p12578_p4, %p11220_p3 }
 0x225   : > { %p12580_p6 = pneg %p12579_p5 }
 0x227   : > { %p12585_p8 = pnand %p12583_p7, %p12580_p6 }
 0x229   : > { %12588 = shalt.err (!%p12585_p8)
}
 0x22a   : > { %s12589_s7 = scalar_lea.vmem %s2405_s22, 16  ;;  %s12595_s11 = scalar_lea.vmem %s2405_s22, 32 }
 0x22b   : > { %p12590_p9 = scmp.ne.s32.totalorder %s2405_s22, %s12589_s7  ;;  %p12596_p12 = scmp.lt.s32.totalorder %s2405_s22, %s2405_s22 }
 0x22c   : > { %p12597_p13 = scmp.lt.s32.totalorder %s12595_s11, %s12589_s7 }
 0x22d   : > { %p12591_p10 = pnand %p12590_p9, %p11220_p3 }
 0x22e   : > { %p12598_p0 = por %p12597_p13, %p12596_p12 }
 0x22f   : > { %p12592_p11 = pneg %p12591_p10 }
 0x231   : > { %p12599_p1 = pnand %p12598_p0, %p12592_p11 }
 0x233   : > { %12602 = shalt.err (!%p12599_p1)
}
 0x234   : > { %s16205_s18 = sld [smem:[#allocation146_spill]] }
 0x235   : > { %11135 = dma.hbm_to_vmem [thread:$0]  (%p11220_p3), %s16204_s10, 16, %s2405_s22, [#allocation53]  }
 0x23a   : > { %s12603_s2 = scalar_lea.hbm %s16205_s18, 16 }
 0x23b   : > { %p12604_p4 = scmp.ne.s32.totalorder %s16205_s18, %s12603_s2  ;;  %p12609_p7 = scmp.lt.u32.totalorder %s12603_s2, %s16205_s18 }
 0x23d   : > { %p12605_p5 = pnand %p12604_p4, %p11220_p3 }
 0x23f   : > { %p12606_p6 = pneg %p12605_p5 }
 0x241   : > { %p12611_p8 = pnand %p12609_p7, %p12606_p6 }
 0x243   : > { %12614 = shalt.err (!%p12611_p8)
}
 0x244   : > { %s12615_s15 = scalar_lea.vmem %s2427_s26, 16  ;;  %s12621_s16 = scalar_lea.vmem %s2427_s26, 32 }
 0x245   : > { %p12616_p9 = scmp.ne.s32.totalorder %s2427_s26, %s12615_s15  ;;  %p12622_p12 = scmp.lt.s32.totalorder %s2427_s26, %s2427_s26 }
 0x246   : > { %p12623_p13 = scmp.lt.s32.totalorder %s12621_s16, %s12615_s15 }
 0x247   : > { %p12617_p10 = pnand %p12616_p9, %p11220_p3 }
 0x248   : > { %p12624_p0 = por %p12623_p13, %p12622_p12 }
 0x249   : > { %p12618_p11 = pneg %p12617_p10 }
 0x24b   : > { %p12625_p1 = pnand %p12624_p0, %p12618_p11 }
 0x24d   : > { %12628 = shalt.err (!%p12625_p1)
}
 0x24e   : > { %s16206_s22 = sld [smem:[#allocation100_spill]]  ;;  %s13335_s7 = smov [#allocation2]  }
 0x24f   : > { %11139 = dma.hbm_to_vmem [thread:$0]  (%p11220_p3), %s16205_s18, 16, %s2427_s26, [#allocation56]  }
 0x250   : > { %s1981_s11 = sshll.u32 %s13335_s7, 4  ;;  %s13336_s2 = smov [#allocation6]   ;;  %s1982_s11 = int_to_ptr.vmem [resolvable:$true] %s1981_s11 }
 0x251   : > { %s2003_s3 = sshll.u32 %s13336_s2, 4  ;;  %s13972_s3 = int_to_ptr.vmem [resolvable:$true] %s2003_s3 }
 0x254   : > { %s12629_s4 = scalar_lea.hbm %s16206_s22, 16 }
 0x255   : > { %p12630_p4 = scmp.ne.s32.totalorder %s16206_s22, %s12629_s4  ;;  %p12635_p7 = scmp.lt.u32.totalorder %s12629_s4, %s16206_s22 }
 0x257   : > { %p12631_p5 = pnand %p12630_p4, %p11220_p3 }
 0x259   : > { %p12632_p6 = pneg %p12631_p5 }
 0x25b   : > { %p12637_p8 = pnand %p12635_p7, %p12632_p6 }
 0x25d   : > { %12640 = shalt.err (!%p12637_p8)
}
 0x25e   : > { %s12641_s15 = scalar_lea.vmem %s1982_s11, 16  ;;  %s12647_s26 = scalar_lea.vmem %s1982_s11, 32 }
 0x25f   : > { %p12642_p9 = scmp.ne.s32.totalorder %s1982_s11, %s12641_s15  ;;  %p12648_p12 = scmp.lt.s32.totalorder %s1982_s11, %s1982_s11 }
 0x260   : > { %p12649_p13 = scmp.lt.s32.totalorder %s12647_s26, %s12641_s15 }
 0x261   : > { %p12643_p10 = pnand %p12642_p9, %p11220_p3 }
 0x262   : > { %p12650_p0 = por %p12649_p13, %p12648_p12 }
 0x263   : > { %p12644_p11 = pneg %p12643_p10 }
 0x265   : > { %p12651_p1 = pnand %p12650_p0, %p12644_p11 }
 0x267   : > { %12654 = shalt.err (!%p12651_p1)
}
 0x268   : > { %s16207_s16 = sld [smem:[#allocation102_spill]] }
 0x269   : > { %11069 = dma.hbm_to_vmem [thread:$0]  (%p11220_p3), %s16206_s22, 16, %s1982_s11, [#allocation3]  }
 0x26e   : > { %s12655_s4 = scalar_lea.hbm %s16207_s16, 16 }
 0x26f   : > { %p12656_p4 = scmp.ne.s32.totalorder %s16207_s16, %s12655_s4  ;;  %p12661_p7 = scmp.lt.u32.totalorder %s12655_s4, %s16207_s16 }
 0x271   : > { %p12657_p5 = pnand %p12656_p4, %p11220_p3 }
 0x273   : > { %p12658_p6 = pneg %p12657_p5 }
 0x275   : > { %p12663_p8 = pnand %p12661_p7, %p12658_p6 }
 0x277   : > { %12666 = shalt.err (!%p12663_p8)
}
 0x278   : > { %s12667_s7 = scalar_lea.vmem %s13972_s3, 16  ;;  %s12673_s2 = scalar_lea.vmem %s13972_s3, 32 }
 0x279   : > { %p12668_p9 = scmp.ne.s32.totalorder %s13972_s3, %s12667_s7  ;;  %p12674_p12 = scmp.lt.s32.totalorder %s13972_s3, %s13972_s3 }
 0x27a   : > { %p12675_p13 = scmp.lt.s32.totalorder %s12673_s2, %s12667_s7 }
 0x27b   : > { %p12669_p10 = pnand %p12668_p9, %p11220_p3 }
 0x27c   : > { %p12676_p0 = por %p12675_p13, %p12674_p12 }
 0x27d   : > { %p12670_p11 = pneg %p12669_p10 }
 0x27f   : > { %p12677_p1 = pnand %p12676_p0, %p12670_p11 }
 0x281   : > { %12680 = shalt.err (!%p12677_p1)
}
 0x282   : > { %s16208_s11 = sld [smem:[#allocation103_spill]]  ;;  %s13337_s15 = smov [#allocation9]  }
 0x283   : > { %11073 = dma.hbm_to_vmem [thread:$0]  (%p11220_p3), %s16207_s16, 16, %s13972_s3, [#allocation5]  }
 0x284   : > { %s2025_s26 = sshll.u32 %s13337_s15, 4  ;;  %s13338_s4 = smov [#allocation12]   ;;  %s2026_s26 = int_to_ptr.vmem [resolvable:$true] %s2025_s26 }
 0x285   : > { %s2047_s5 = sshll.u32 %s13338_s4, 4  ;;  %s14000_s5 = int_to_ptr.vmem [resolvable:$true] %s2047_s5 }
 0x288   : > { %s12681_s7 = scalar_lea.hbm %s16208_s11, 16 }
 0x289   : > { %p12682_p4 = scmp.ne.s32.totalorder %s16208_s11, %s12681_s7  ;;  %p12687_p7 = scmp.lt.u32.totalorder %s12681_s7, %s16208_s11 }
 0x28b   : > { %p12683_p5 = pnand %p12682_p4, %p11220_p3 }
 0x28d   : > { %p12684_p6 = pneg %p12683_p5 }
 0x28f   : > { %p12689_p8 = pnand %p12687_p7, %p12684_p6 }
 0x291   : > { %12692 = shalt.err (!%p12689_p8)
}
 0x292   : > { %s12693_s2 = scalar_lea.vmem %s2026_s26, 16  ;;  %s12699_s3 = scalar_lea.vmem %s2026_s26, 32 }
 0x293   : > { %p12694_p9 = scmp.ne.s32.totalorder %s2026_s26, %s12693_s2  ;;  %p12700_p12 = scmp.lt.s32.totalorder %s2026_s26, %s2026_s26 }
 0x294   : > { %p12701_p13 = scmp.lt.s32.totalorder %s12699_s3, %s12693_s2 }
 0x295   : > { %p12695_p10 = pnand %p12694_p9, %p11220_p3 }
 0x296   : > { %p12702_p0 = por %p12701_p13, %p12700_p12 }
 0x297   : > { %p12696_p11 = pneg %p12695_p10 }
 0x299   : > { %p12703_p1 = pnand %p12702_p0, %p12696_p11 }
 0x29b   : > { %12706 = shalt.err (!%p12703_p1)
}
 0x29c   : > { %s16209_s15 = sld [smem:[#allocation104_spill]] }
 0x29d   : > { %11077 = dma.hbm_to_vmem [thread:$0]  (%p11220_p3), %s16208_s11, 16, %s2026_s26, [#allocation8]  }
 0x2a2   : > { %s12707_s4 = scalar_lea.hbm %s16209_s15, 16 }
 0x2a3   : > { %p12708_p4 = scmp.ne.s32.totalorder %s16209_s15, %s12707_s4  ;;  %p12713_p7 = scmp.lt.u32.totalorder %s12707_s4, %s16209_s15 }
 0x2a5   : > { %p12709_p5 = pnand %p12708_p4, %p11220_p3 }
 0x2a7   : > { %p12710_p6 = pneg %p12709_p5 }
 0x2a9   : > { %p12715_p8 = pnand %p12713_p7, %p12710_p6 }
 0x2ab   : > { %12718 = shalt.err (!%p12715_p8)
}
 0x2ac   : > { %s12719_s7 = scalar_lea.vmem %s14000_s5, 16  ;;  %s12725_s2 = scalar_lea.vmem %s14000_s5, 32 }
 0x2ad   : > { %p12720_p9 = scmp.ne.s32.totalorder %s14000_s5, %s12719_s7  ;;  %p12726_p12 = scmp.lt.s32.totalorder %s14000_s5, %s14000_s5 }
 0x2ae   : > { %p12727_p13 = scmp.lt.s32.totalorder %s12725_s2, %s12719_s7 }
 0x2af   : > { %p12721_p10 = pnand %p12720_p9, %p11220_p3 }
 0x2b0   : > { %p12728_p0 = por %p12727_p13, %p12726_p12 }
 0x2b1   : > { %p12722_p11 = pneg %p12721_p10 }
 0x2b3   : > { %p12729_p1 = pnand %p12728_p0, %p12722_p11 }
 0x2b5   : > { %12732 = shalt.err (!%p12729_p1)
}
 0x2b6   : > { %s16210_s26 = sld [smem:[#allocation105_spill]]  ;;  %s13339_s3 = smov [#allocation15]  }
 0x2b7   : > { %11081 = dma.hbm_to_vmem [thread:$0]  (%p11220_p3), %s16209_s15, 16, %s14000_s5, [#allocation11]  }
 0x2b8   : > { %s2069_s4 = sshll.u32 %s13339_s3, 4  ;;  %s13340_s6 = smov [#allocation18]   ;;  %s2070_s4 = int_to_ptr.vmem [resolvable:$true] %s2069_s4 }
 0x2b9   : > { %s2103_s8 = sshll.u32 %s13340_s6, 4  ;;  %s14028_s8 = int_to_ptr.vmem [resolvable:$true] %s2103_s8 }
 0x2bc   : > { %s12733_s7 = scalar_lea.hbm %s16210_s26, 16 }
 0x2bd   : > { %p12734_p4 = scmp.ne.s32.totalorder %s16210_s26, %s12733_s7  ;;  %p12739_p7 = scmp.lt.u32.totalorder %s12733_s7, %s16210_s26 }
 0x2bf   : > { %p12735_p5 = pnand %p12734_p4, %p11220_p3 }
 0x2c1   : > { %p12736_p6 = pneg %p12735_p5 }
 0x2c3   : > { %p12741_p8 = pnand %p12739_p7, %p12736_p6 }
 0x2c5   : > { %12744 = shalt.err (!%p12741_p8)
}
 0x2c6   : > { %s12745_s2 = scalar_lea.vmem %s2070_s4, 16  ;;  %s12751_s5 = scalar_lea.vmem %s2070_s4, 32 }
 0x2c7   : > { %p12746_p9 = scmp.ne.s32.totalorder %s2070_s4, %s12745_s2  ;;  %p12752_p12 = scmp.lt.s32.totalorder %s2070_s4, %s2070_s4 }
 0x2c8   : > { %p12753_p13 = scmp.lt.s32.totalorder %s12751_s5, %s12745_s2 }
 0x2c9   : > { %p12747_p10 = pnand %p12746_p9, %p11220_p3 }
 0x2ca   : > { %p12754_p0 = por %p12753_p13, %p12752_p12 }
 0x2cb   : > { %p12748_p11 = pneg %p12747_p10 }
 0x2cd   : > { %p12755_p1 = pnand %p12754_p0, %p12748_p11 }
 0x2cf   : > { %12758 = shalt.err (!%p12755_p1)
}
 0x2d0   : > { %s16211_s6 = sld [smem:[#allocation110_spill]] }
 0x2d1   : > { %11085 = dma.hbm_to_vmem [thread:$0]  (%p11220_p3), %s16210_s26, 16, %s2070_s4, [#allocation14]  }
 0x2d6   : > { %s12759_s3 = scalar_lea.hbm %s16211_s6, 16 }
 0x2d7   : > { %p12760_p4 = scmp.ne.s32.totalorder %s16211_s6, %s12759_s3  ;;  %p12765_p7 = scmp.lt.u32.totalorder %s12759_s3, %s16211_s6 }
 0x2d9   : > { %p12761_p5 = pnand %p12760_p4, %p11220_p3 }
 0x2db   : > { %p12762_p6 = pneg %p12761_p5 }
 0x2dd   : > { %p12767_p8 = pnand %p12765_p7, %p12762_p6 }
 0x2df   : > { %12770 = shalt.err (!%p12767_p8)
}
 0x2e0   : > { %s12771_s7 = scalar_lea.vmem %s14028_s8, 16  ;;  %s12777_s2 = scalar_lea.vmem %s14028_s8, 32 }
 0x2e1   : > { %p12772_p9 = scmp.ne.s32.totalorder %s14028_s8, %s12771_s7  ;;  %p12778_p12 = scmp.lt.s32.totalorder %s14028_s8, %s14028_s8 }
 0x2e2   : > { %p12779_p13 = scmp.lt.s32.totalorder %s12777_s2, %s12771_s7 }
 0x2e3   : > { %p12773_p10 = pnand %p12772_p9, %p11220_p3 }
 0x2e4   : > { %p12780_p0 = por %p12779_p13, %p12778_p12 }
 0x2e5   : > { %p12774_p11 = pneg %p12773_p10 }
 0x2e7   : > { %p12781_p1 = pnand %p12780_p0, %p12774_p11 }
 0x2e9   : > { %12784 = shalt.err (!%p12781_p1)
}
 0x2ea   : > { %s16212_s4 = sld [smem:[#allocation112_spill]]  ;;  %s13341_s5 = smov [#allocation21]  }
 0x2eb   : > { %11089 = dma.hbm_to_vmem [thread:$0]  (%p11220_p3), %s16211_s6, 16, %s14028_s8, [#allocation17]  }
 0x2ec   : > { %s2125_s3 = sshll.u32 %s13341_s5, 4  ;;  %s13342_s10 = smov [#allocation24]   ;;  %s2126_s3 = int_to_ptr.vmem [resolvable:$true] %s2125_s3 }
 0x2ed   : > { %s2162_s11 = sshll.u32 %s13342_s10, 4  ;;  %s14056_s11 = int_to_ptr.vmem [resolvable:$true] %s2162_s11 }
 0x2f0   : > { %s12785_s7 = scalar_lea.hbm %s16212_s4, 16 }
 0x2f1   : > { %p12786_p4 = scmp.ne.s32.totalorder %s16212_s4, %s12785_s7  ;;  %p12791_p7 = scmp.lt.u32.totalorder %s12785_s7, %s16212_s4 }
 0x2f3   : > { %p12787_p5 = pnand %p12786_p4, %p11220_p3 }
 0x2f5   : > { %p12788_p6 = pneg %p12787_p5 }
 0x2f7   : > { %p12793_p8 = pnand %p12791_p7, %p12788_p6 }
 0x2f9   : > { %12796 = shalt.err (!%p12793_p8)
}
 0x2fa   : > { %s12797_s2 = scalar_lea.vmem %s2126_s3, 16  ;;  %s12803_s8 = scalar_lea.vmem %s2126_s3, 32 }
 0x2fb   : > { %p12798_p9 = scmp.ne.s32.totalorder %s2126_s3, %s12797_s2  ;;  %p12804_p12 = scmp.lt.s32.totalorder %s2126_s3, %s2126_s3 }
 0x2fc   : > { %p12805_p13 = scmp.lt.s32.totalorder %s12803_s8, %s12797_s2 }
 0x2fd   : > { %p12799_p10 = pnand %p12798_p9, %p11220_p3 }
 0x2fe   : > { %p12806_p0 = por %p12805_p13, %p12804_p12 }
 0x2ff   : > { %p12800_p11 = pneg %p12799_p10 }
 0x301   : > { %p12807_p1 = pnand %p12806_p0, %p12800_p11 }
 0x303   : > { %12810 = shalt.err (!%p12807_p1)
}
 0x304   : > { %s16213_s10 = sld [smem:[#allocation118_spill]] }
 0x305   : > { %11093 = dma.hbm_to_vmem [thread:$0]  (%p11220_p3), %s16212_s4, 16, %s2126_s3, [#allocation20]  }
 0x30a   : > { %s12811_s5 = scalar_lea.hbm %s16213_s10, 16 }
 0x30b   : > { %p12812_p4 = scmp.ne.s32.totalorder %s16213_s10, %s12811_s5  ;;  %p12817_p7 = scmp.lt.u32.totalorder %s12811_s5, %s16213_s10 }
 0x30d   : > { %p12813_p5 = pnand %p12812_p4, %p11220_p3 }
 0x30f   : > { %p12814_p6 = pneg %p12813_p5 }
 0x311   : > { %p12819_p8 = pnand %p12817_p7, %p12814_p6 }
 0x313   : > { %12822 = shalt.err (!%p12819_p8)
}
 0x314   : > { %s12823_s7 = scalar_lea.vmem %s14056_s11, 16  ;;  %s12829_s2 = scalar_lea.vmem %s14056_s11, 32 }
 0x315   : > { %p12824_p9 = scmp.ne.s32.totalorder %s14056_s11, %s12823_s7  ;;  %p12830_p12 = scmp.lt.s32.totalorder %s14056_s11, %s14056_s11 }
 0x316   : > { %p12831_p13 = scmp.lt.s32.totalorder %s12829_s2, %s12823_s7 }
 0x317   : > { %p12825_p10 = pnand %p12824_p9, %p11220_p3 }
 0x318   : > { %p12832_p0 = por %p12831_p13, %p12830_p12 }
 0x319   : > { %p12826_p11 = pneg %p12825_p10 }
 0x31b   : > { %p12833_p1 = pnand %p12832_p0, %p12826_p11 }
 0x31d   : > { %12836 = shalt.err (!%p12833_p1)
}
 0x31e   : > { %s16214_s3 = sld [smem:[#allocation121_spill]]  ;;  %s13343_s8 = smov [#allocation27]  }
 0x31f   : > { %11097 = dma.hbm_to_vmem [thread:$0]  (%p11220_p3), %s16213_s10, 16, %s14056_s11, [#allocation23]  }
 0x320   : > { %s2187_s5 = sshll.u32 %s13343_s8, 4  ;;  %s13344_s4 = smov [#allocation30]   ;;  %s2188_s5 = int_to_ptr.vmem [resolvable:$true] %s2187_s5 }
 0x321   : > { %s2209_s6 = sshll.u32 %s13344_s4, 4  ;;  %s14084_s6 = int_to_ptr.vmem [resolvable:$true] %s2209_s6 }
 0x324   : > { %s12837_s7 = scalar_lea.hbm %s16214_s3, 16 }
 0x325   : > { %p12838_p4 = scmp.ne.s32.totalorder %s16214_s3, %s12837_s7  ;;  %p12843_p7 = scmp.lt.u32.totalorder %s12837_s7, %s16214_s3 }
 0x327   : > { %p12839_p5 = pnand %p12838_p4, %p11220_p3 }
 0x329   : > { %p12840_p6 = pneg %p12839_p5 }
 0x32b   : > { %p12845_p8 = pnand %p12843_p7, %p12840_p6 }
 0x32d   : > { %12848 = shalt.err (!%p12845_p8)
}
 0x32e   : > { %s12849_s2 = scalar_lea.vmem %s2188_s5, 16  ;;  %s12855_s11 = scalar_lea.vmem %s2188_s5, 32 }
 0x32f   : > { %p12850_p9 = scmp.ne.s32.totalorder %s2188_s5, %s12849_s2  ;;  %p12856_p12 = scmp.lt.s32.totalorder %s2188_s5, %s2188_s5 }
 0x330   : > { %p12857_p13 = scmp.lt.s32.totalorder %s12855_s11, %s12849_s2 }
 0x331   : > { %p12851_p10 = pnand %p12850_p9, %p11220_p3 }
 0x332   : > { %p12858_p0 = por %p12857_p13, %p12856_p12 }
 0x333   : > { %p12852_p11 = pneg %p12851_p10 }
 0x335   : > { %p12859_p1 = pnand %p12858_p0, %p12852_p11 }
 0x337   : > { %12862 = shalt.err (!%p12859_p1)
}
 0x338   : > { %s16215_s4 = sld [smem:[#allocation122_spill]] }
 0x339   : > { %11101 = dma.hbm_to_vmem [thread:$0]  (%p11220_p3), %s16214_s3, 16, %s2188_s5, [#allocation26]  }
 0x33e   : > { %s12863_s8 = scalar_lea.hbm %s16215_s4, 16 }
 0x33f   : > { %p12864_p4 = scmp.ne.s32.totalorder %s16215_s4, %s12863_s8  ;;  %p12869_p7 = scmp.lt.u32.totalorder %s12863_s8, %s16215_s4 }
 0x341   : > { %p12865_p5 = pnand %p12864_p4, %p11220_p3 }
 0x343   : > { %p12866_p6 = pneg %p12865_p5 }
 0x345   : > { %p12871_p8 = pnand %p12869_p7, %p12866_p6 }
 0x347   : > { %12874 = shalt.err (!%p12871_p8)
}
 0x348   : > { %s12875_s7 = scalar_lea.vmem %s14084_s6, 16  ;;  %s12881_s2 = scalar_lea.vmem %s14084_s6, 32 }
 0x349   : > { %p12876_p9 = scmp.ne.s32.totalorder %s14084_s6, %s12875_s7  ;;  %p12882_p12 = scmp.lt.s32.totalorder %s14084_s6, %s14084_s6 }
 0x34a   : > { %p12883_p13 = scmp.lt.s32.totalorder %s12881_s2, %s12875_s7 }
 0x34b   : > { %p12877_p10 = pnand %p12876_p9, %p11220_p3 }
 0x34c   : > { %p12884_p0 = por %p12883_p13, %p12882_p12 }
 0x34d   : > { %p12878_p11 = pneg %p12877_p10 }
 0x34f   : > { %p12885_p1 = pnand %p12884_p0, %p12878_p11 }
 0x351   : > { %12888 = shalt.err (!%p12885_p1)
}
 0x352   : > { %s16216_s5 = sld [smem:[#allocation123_spill]]  ;;  %s13345_s11 = smov [#allocation33]  }
 0x353   : > { %11105 = dma.hbm_to_vmem [thread:$0]  (%p11220_p3), %s16215_s4, 16, %s14084_s6, [#allocation29]  }
 0x354   : > { %s2231_s8 = sshll.u32 %s13345_s11, 4  ;;  %s13346_s3 = smov [#allocation36]   ;;  %s2232_s8 = int_to_ptr.vmem [resolvable:$true] %s2231_s8 }
 0x355   : > { %s2253_s10 = sshll.u32 %s13346_s3, 4  ;;  %s14112_s10 = int_to_ptr.vmem [resolvable:$true] %s2253_s10 }
 0x358   : > { %s12889_s7 = scalar_lea.hbm %s16216_s5, 16 }
 0x359   : > { %p12890_p4 = scmp.ne.s32.totalorder %s16216_s5, %s12889_s7  ;;  %p12895_p7 = scmp.lt.u32.totalorder %s12889_s7, %s16216_s5 }
 0x35b   : > { %p12891_p5 = pnand %p12890_p4, %p11220_p3 }
 0x35d   : > { %p12892_p6 = pneg %p12891_p5 }
 0x35f   : > { %p12897_p8 = pnand %p12895_p7, %p12892_p6 }
 0x361   : > { %12900 = shalt.err (!%p12897_p8)
}
 0x362   : > { %s12901_s2 = scalar_lea.vmem %s2232_s8, 16  ;;  %s12907_s6 = scalar_lea.vmem %s2232_s8, 32 }
 0x363   : > { %p12902_p9 = scmp.ne.s32.totalorder %s2232_s8, %s12901_s2  ;;  %p12908_p12 = scmp.lt.s32.totalorder %s2232_s8, %s2232_s8 }
 0x364   : > { %p12909_p13 = scmp.lt.s32.totalorder %s12907_s6, %s12901_s2 }
 0x365   : > { %p12903_p10 = pnand %p12902_p9, %p11220_p3 }
 0x366   : > { %p12910_p0 = por %p12909_p13, %p12908_p12 }
 0x367   : > { %p12904_p11 = pneg %p12903_p10 }
 0x369   : > { %p12911_p1 = pnand %p12910_p0, %p12904_p11 }
 0x36b   : > { %12914 = shalt.err (!%p12911_p1)
}
 0x36c   : > { %s16217_s3 = sld [smem:[#allocation124_spill]] }
 0x36d   : > { %11109 = dma.hbm_to_vmem [thread:$0]  (%p11220_p3), %s16216_s5, 16, %s2232_s8, [#allocation32]  }
 0x372   : > { %s12915_s11 = scalar_lea.hbm %s16217_s3, 16 }
 0x373   : > { %p12916_p4 = scmp.ne.s32.totalorder %s16217_s3, %s12915_s11  ;;  %p12921_p7 = scmp.lt.u32.totalorder %s12915_s11, %s16217_s3 }
 0x375   : > { %p12917_p5 = pnand %p12916_p4, %p11220_p3 }
 0x377   : > { %p12918_p6 = pneg %p12917_p5 }
 0x379   : > { %p12923_p8 = pnand %p12921_p7, %p12918_p6 }
 0x37b   : > { %12926 = shalt.err (!%p12923_p8)
}
 0x37c   : > { %s12927_s7 = scalar_lea.vmem %s14112_s10, 16  ;;  %s12933_s2 = scalar_lea.vmem %s14112_s10, 32 }
 0x37d   : > { %p12928_p9 = scmp.ne.s32.totalorder %s14112_s10, %s12927_s7  ;;  %p12934_p12 = scmp.lt.s32.totalorder %s14112_s10, %s14112_s10 }
 0x37e   : > { %p12935_p13 = scmp.lt.s32.totalorder %s12933_s2, %s12927_s7 }
 0x37f   : > { %p12929_p10 = pnand %p12928_p9, %p11220_p3 }
 0x380   : > { %p12936_p0 = por %p12935_p13, %p12934_p12 }
 0x381   : > { %p12930_p11 = pneg %p12929_p10 }
 0x383   : > { %p12937_p1 = pnand %p12936_p0, %p12930_p11 }
 0x385   : > { %12940 = shalt.err (!%p12937_p1)
}
 0x386   : > { %s16218_s8 = sld [smem:[#allocation126_spill]]  ;;  %s13347_s6 = smov [#allocation39]  }
 0x387   : > { %11113 = dma.hbm_to_vmem [thread:$0]  (%p11220_p3), %s16217_s3, 16, %s14112_s10, [#allocation35]  }
 0x388   : > { %s2275_s11 = sshll.u32 %s13347_s6, 4  ;;  %s13348_s4 = smov [#allocation42]   ;;  %s2276_s11 = int_to_ptr.vmem [resolvable:$true] %s2275_s11 }
 0x389   : > { %s2309_s5 = sshll.u32 %s13348_s4, 4  ;;  %s14140_s5 = int_to_ptr.vmem [resolvable:$true] %s2309_s5 }
 0x38c   : > { %s12941_s7 = scalar_lea.hbm %s16218_s8, 16 }
 0x38d   : > { %p12942_p4 = scmp.ne.s32.totalorder %s16218_s8, %s12941_s7  ;;  %p12947_p7 = scmp.lt.u32.totalorder %s12941_s7, %s16218_s8 }
 0x38f   : > { %p12943_p5 = pnand %p12942_p4, %p11220_p3 }
 0x391   : > { %p12944_p6 = pneg %p12943_p5 }
 0x393   : > { %p12949_p8 = pnand %p12947_p7, %p12944_p6 }
 0x395   : > { %12952 = shalt.err (!%p12949_p8)
}
 0x396   : > { %s12953_s2 = scalar_lea.vmem %s2276_s11, 16  ;;  %s12959_s10 = scalar_lea.vmem %s2276_s11, 32 }
 0x397   : > { %p12954_p9 = scmp.ne.s32.totalorder %s2276_s11, %s12953_s2  ;;  %p12960_p12 = scmp.lt.s32.totalorder %s2276_s11, %s2276_s11 }
 0x398   : > { %p12961_p13 = scmp.lt.s32.totalorder %s12959_s10, %s12953_s2 }
 0x399   : > { %p12955_p10 = pnand %p12954_p9, %p11220_p3 }
 0x39a   : > { %p12962_p0 = por %p12961_p13, %p12960_p12 }
 0x39b   : > { %p12956_p11 = pneg %p12955_p10 }
 0x39d   : > { %p12963_p1 = pnand %p12962_p0, %p12956_p11 }
 0x39f   : > { %12966 = shalt.err (!%p12963_p1)
}
 0x3a0   : > { %s16219_s4 = sld [smem:[#allocation131_spill]] }
 0x3a1   : > { %11117 = dma.hbm_to_vmem [thread:$0]  (%p11220_p3), %s16218_s8, 16, %s2276_s11, [#allocation38]  }
 0x3a6   : > { %s12967_s6 = scalar_lea.hbm %s16219_s4, 16 }
 0x3a7   : > { %p12968_p4 = scmp.ne.s32.totalorder %s16219_s4, %s12967_s6  ;;  %p12973_p7 = scmp.lt.u32.totalorder %s12967_s6, %s16219_s4 }
 0x3a9   : > { %p12969_p5 = pnand %p12968_p4, %p11220_p3 }
 0x3ab   : > { %p12970_p6 = pneg %p12969_p5 }
 0x3ad   : > { %p12975_p8 = pnand %p12973_p7, %p12970_p6 }
 0x3af   : > { %12978 = shalt.err (!%p12975_p8)
}
 0x3b0   : > { %s12979_s7 = scalar_lea.vmem %s14140_s5, 16  ;;  %s12985_s2 = scalar_lea.vmem %s14140_s5, 32 }
 0x3b1   : > { %p12980_p9 = scmp.ne.s32.totalorder %s14140_s5, %s12979_s7  ;;  %p12986_p12 = scmp.lt.s32.totalorder %s14140_s5, %s14140_s5 }
 0x3b2   : > { %p12987_p13 = scmp.lt.s32.totalorder %s12985_s2, %s12979_s7 }
 0x3b3   : > { %p12981_p10 = pnand %p12980_p9, %p11220_p3 }
 0x3b4   : > { %p12988_p0 = por %p12987_p13, %p12986_p12 }
 0x3b5   : > { %p12982_p11 = pneg %p12981_p10 }
 0x3b7   : > { %p12989_p1 = pnand %p12988_p0, %p12982_p11 }
 0x3b9   : > { %12992 = shalt.err (!%p12989_p1)
}
 0x3ba   : > { %s16220_s11 = sld [smem:[#allocation133_spill]]  ;;  %s13349_s10 = smov [#allocation45]  }
 0x3bb   : > { %11121 = dma.hbm_to_vmem [thread:$0]  (%p11220_p3), %s16219_s4, 16, %s14140_s5, [#allocation41]  }
 0x3bc   : > { %s2331_s6 = sshll.u32 %s13349_s10, 4  ;;  %s13350_s3 = smov [#allocation48]   ;;  %s2332_s6 = int_to_ptr.vmem [resolvable:$true] %s2331_s6 }
 0x3bd   : > { %s2353_s8 = sshll.u32 %s13350_s3, 4  ;;  %s14168_s8 = int_to_ptr.vmem [resolvable:$true] %s2353_s8 }
 0x3c0   : > { %s12993_s7 = scalar_lea.hbm %s16220_s11, 16 }
 0x3c1   : > { %p12994_p4 = scmp.ne.s32.totalorder %s16220_s11, %s12993_s7  ;;  %p12999_p7 = scmp.lt.u32.totalorder %s12993_s7, %s16220_s11 }
 0x3c3   : > { %p12995_p5 = pnand %p12994_p4, %p11220_p3 }
 0x3c5   : > { %p12996_p6 = pneg %p12995_p5 }
 0x3c7   : > { %p13001_p8 = pnand %p12999_p7, %p12996_p6 }
 0x3c9   : > { %13004 = shalt.err (!%p13001_p8)
}
 0x3ca   : > { %s13005_s2 = scalar_lea.vmem %s2332_s6, 16  ;;  %s13011_s5 = scalar_lea.vmem %s2332_s6, 32 }
 0x3cb   : > { %p13006_p9 = scmp.ne.s32.totalorder %s2332_s6, %s13005_s2  ;;  %p13012_p12 = scmp.lt.s32.totalorder %s2332_s6, %s2332_s6 }
 0x3cc   : > { %p13013_p13 = scmp.lt.s32.totalorder %s13011_s5, %s13005_s2 }
 0x3cd   : > { %p13007_p10 = pnand %p13006_p9, %p11220_p3 }
 0x3ce   : > { %p13014_p0 = por %p13013_p13, %p13012_p12 }
 0x3cf   : > { %p13008_p11 = pneg %p13007_p10 }
 0x3d1   : > { %p13015_p1 = pnand %p13014_p0, %p13008_p11 }
 0x3d3   : > { %13018 = shalt.err (!%p13015_p1)
}
 0x3d4   : > { %s16221_s3 = sld [smem:[#allocation135_spill]] }
 0x3d5   : > { %11125 = dma.hbm_to_vmem [thread:$0]  (%p11220_p3), %s16220_s11, 16, %s2332_s6, [#allocation44]  }
 0x3da   : > { %s13019_s10 = scalar_lea.hbm %s16221_s3, 16 }
 0x3db   : > { %p13020_p4 = scmp.ne.s32.totalorder %s16221_s3, %s13019_s10  ;;  %p13025_p7 = scmp.lt.u32.totalorder %s13019_s10, %s16221_s3 }
 0x3dd   : > { %p13021_p5 = pnand %p13020_p4, %p11220_p3 }
 0x3df   : > { %p13022_p6 = pneg %p13021_p5 }
 0x3e1   : > { %p13027_p8 = pnand %p13025_p7, %p13022_p6 }
 0x3e3   : > { %13030 = shalt.err (!%p13027_p8)
}
 0x3e4   : > { %s13031_s7 = scalar_lea.vmem %s14168_s8, 16  ;;  %s13037_s2 = scalar_lea.vmem %s14168_s8, 32 }
 0x3e5   : > { %p13032_p9 = scmp.ne.s32.totalorder %s14168_s8, %s13031_s7  ;;  %p13038_p12 = scmp.lt.s32.totalorder %s14168_s8, %s14168_s8 }
 0x3e6   : > { %p13039_p13 = scmp.lt.s32.totalorder %s13037_s2, %s13031_s7 }
 0x3e7   : > { %p13033_p10 = pnand %p13032_p9, %p11220_p3 }
 0x3e8   : > { %p13040_p0 = por %p13039_p13, %p13038_p12 }
 0x3e9   : > { %p13034_p11 = pneg %p13033_p10 }
 0x3eb   : > { %p13041_p1 = pnand %p13040_p0, %p13034_p11 }
 0x3ed   : > { %13044 = shalt.err (!%p13041_p1)
}
 0x3ee   : > { %s16222_s6 = sld [smem:[#allocation142_spill]]  ;;  %s13351_s5 = smov [#allocation51]  }
 0x3ef   : > { %11129 = dma.hbm_to_vmem [thread:$0]  (%p11220_p3), %s16221_s3, 16, %s14168_s8, [#allocation47]  }
 0x3f0   : > { %s2390_s10 = sshll.u32 %s13351_s5, 4  ;;  %s13352_s4 = smov [#allocation54]   ;;  %s2391_s10 = int_to_ptr.vmem [resolvable:$true] %s2390_s10 }
 0x3f1   : > { %s2415_s11 = sshll.u32 %s13352_s4, 4  ;;  %s14196_s11 = int_to_ptr.vmem [resolvable:$true] %s2415_s11 }
 0x3f4   : > { %s13045_s7 = scalar_lea.hbm %s16222_s6, 16 }
 0x3f5   : > { %p13046_p4 = scmp.ne.s32.totalorder %s16222_s6, %s13045_s7  ;;  %p13051_p7 = scmp.lt.u32.totalorder %s13045_s7, %s16222_s6 }
 0x3f7   : > { %p13047_p5 = pnand %p13046_p4, %p11220_p3 }
 0x3f9   : > { %p13048_p6 = pneg %p13047_p5 }
 0x3fb   : > { %p13053_p8 = pnand %p13051_p7, %p13048_p6 }
 0x3fd   : > { %13056 = shalt.err (!%p13053_p8)
}
 0x3fe   : > { %s13057_s2 = scalar_lea.vmem %s2391_s10, 16  ;;  %s13063_s8 = scalar_lea.vmem %s2391_s10, 32 }
 0x3ff   : > { %p13058_p9 = scmp.ne.s32.totalorder %s2391_s10, %s13057_s2  ;;  %p13064_p12 = scmp.lt.s32.totalorder %s2391_s10, %s2391_s10 }
 0x400   : > { %p13065_p13 = scmp.lt.s32.totalorder %s13063_s8, %s13057_s2 }
 0x401   : > { %p13059_p10 = pnand %p13058_p9, %p11220_p3 }
 0x402   : > { %p13066_p0 = por %p13065_p13, %p13064_p12 }
 0x403   : > { %p13060_p11 = pneg %p13059_p10 }
 0x405   : > { %p13067_p1 = pnand %p13066_p0, %p13060_p11 }
 0x407   : > { %13070 = shalt.err (!%p13067_p1)
}
 0x408   : > { %s16223_s4 = sld [smem:[#allocation145_spill]] }
 0x409   : > { %11133 = dma.hbm_to_vmem [thread:$0]  (%p11220_p3), %s16222_s6, 16, %s2391_s10, [#allocation50]  }
 0x40e   : > { %s13071_s5 = scalar_lea.hbm %s16223_s4, 16 }
 0x40f   : > { %p13072_p4 = scmp.ne.s32.totalorder %s16223_s4, %s13071_s5  ;;  %p13077_p7 = scmp.lt.u32.totalorder %s13071_s5, %s16223_s4 }
 0x411   : > { %p13073_p5 = pnand %p13072_p4, %p11220_p3 }
 0x413   : > { %p13074_p6 = pneg %p13073_p5 }
 0x415   : > { %p13079_p8 = pnand %p13077_p7, %p13074_p6 }
 0x417   : > { %13082 = shalt.err (!%p13079_p8)
}
 0x418   : > { %s13083_s7 = scalar_lea.vmem %s14196_s11, 16  ;;  %s13089_s2 = scalar_lea.vmem %s14196_s11, 32 }
 0x419   : > { %p13084_p9 = scmp.ne.s32.totalorder %s14196_s11, %s13083_s7  ;;  %p13090_p12 = scmp.lt.s32.totalorder %s14196_s11, %s14196_s11 }
 0x41a   : > { %p13091_p13 = scmp.lt.s32.totalorder %s13089_s2, %s13083_s7 }
 0x41b   : > { %p13085_p10 = pnand %p13084_p9, %p11220_p3 }
 0x41c   : > { %p13092_p0 = por %p13091_p13, %p13090_p12 }
 0x41d   : > { %p13086_p11 = pneg %p13085_p10 }
 0x41f   : > { %p13093_p1 = pnand %p13092_p0, %p13086_p11 }
 0x421   : > { %13096 = shalt.err (!%p13093_p1)
}
 0x422   : > { %s16224_s10 = sld [smem:[#allocation147_spill]]  ;;  %s13353_s8 = smov [#allocation57]  }
 0x423   : > { %11137 = dma.hbm_to_vmem [thread:$0]  (%p11220_p3), %s16223_s4, 16, %s14196_s11, [#allocation53]  }
 0x424   : > { %s2437_s5 = sshll.u32 %s13353_s8, 4  ;;  %s13354_s3 = smov [#allocation58]   ;;  %s2438_s5 = int_to_ptr.vmem [resolvable:$true] %s2437_s5 }
 0x425   : > { %s2448_s6 = sshll.u32 %s13354_s3, 4  ;;  %s14224_s6 = int_to_ptr.vmem [resolvable:$true] %s2448_s6 }
 0x428   : > { %s13097_s7 = scalar_lea.hbm %s16224_s10, 16 }
 0x429   : > { %p13098_p4 = scmp.ne.s32.totalorder %s16224_s10, %s13097_s7  ;;  %p13103_p7 = scmp.lt.u32.totalorder %s13097_s7, %s16224_s10 }
 0x42b   : > { %p13099_p5 = pnand %p13098_p4, %p11220_p3 }
 0x42d   : > { %p13100_p6 = pneg %p13099_p5 }
 0x42f   : > { %p13105_p8 = pnand %p13103_p7, %p13100_p6 }
 0x431   : > { %13108 = shalt.err (!%p13105_p8)
}
 0x432   : > { %s13109_s2 = scalar_lea.vmem %s2438_s5, 16  ;;  %s13115_s11 = scalar_lea.vmem %s2438_s5, 32 }
 0x433   : > { %p13110_p9 = scmp.ne.s32.totalorder %s2438_s5, %s13109_s2  ;;  %p13116_p12 = scmp.lt.s32.totalorder %s2438_s5, %s2438_s5 }
 0x434   : > { %p13117_p13 = scmp.lt.s32.totalorder %s13115_s11, %s13109_s2 }
 0x435   : > { %p13111_p10 = pnand %p13110_p9, %p11220_p3 }
 0x436   : > { %p13118_p0 = por %p13117_p13, %p13116_p12 }
 0x437   : > { %p13112_p11 = pneg %p13111_p10 }
 0x439   : > { %p13119_p1 = pnand %p13118_p0, %p13112_p11 }
 0x43b   : > { %13122 = shalt.err (!%p13119_p1)
}
 0x43c   : > { %11141 = dma.hbm_to_vmem [thread:$0]  (%p11220_p3), %s16224_s10, 16, %s2438_s5, [#allocation56]  }
 0x43d   : > { %s13123_s3 = scalar_lea.hbm %s13758_s20, 16 }
 0x43e   : > { %p13124_p4 = scmp.ne.s32.totalorder %s13758_s20, %s13123_s3  ;;  %p13129_p7 = scmp.lt.u32.totalorder %s13123_s3, %s13758_s20 }
 0x440   : > { %p13125_p5 = pnand %p13124_p4, %p11220_p3 }
 0x442   : > { %p13126_p6 = pneg %p13125_p5 }
 0x444   : > { %p13131_p8 = pnand %p13129_p7, %p13126_p6 }
 0x446   : > { %13134 = shalt.err (!%p13131_p8)
}
 0x447   : > { %s13135_s8 = scalar_lea.vmem %s14224_s6, 16  ;;  %s13141_s7 = scalar_lea.vmem %s14224_s6, 32 }
 0x448   : > { %p13136_p9 = scmp.ne.s32.totalorder %s14224_s6, %s13135_s8  ;;  %p13142_p12 = scmp.lt.s32.totalorder %s14224_s6, %s14224_s6 }
 0x449   : > { %p13143_p13 = scmp.lt.s32.totalorder %s13141_s7, %s13135_s8 }
 0x44a   : > { %p13137_p10 = pnand %p13136_p9, %p11220_p3 }
 0x44b   : > { %p13144_p0 = por %p13143_p13, %p13142_p12 }
 0x44c   : > { %p13138_p11 = pneg %p13137_p10 }
 0x44e   : > { %p13145_p1 = pnand %p13144_p0, %p13138_p11 }
 0x450   : > { %13148 = shalt.err (!%p13145_p1)
}
 0x451   : > { %11143 = dma.hbm_to_vmem [thread:$0]  (%p11220_p3), %s13758_s20, 16, %s14224_s6, [#allocation59]  }
 0x452 PF: > { %2489 = sbr.rel (%p13785_p2) target bundleno = 12793 (0x31f9), region = 340  ;;  %p11258_p4 = scmp.eq.s32.totalorder (!%p13785_p2), %s13781_s28, 0 }
 0x459   : > { %13154 = dma.done.wait (%p11258_p4), [#allocation3], 16  }
 0x45a   : > { %13156 = vsyncadd (%p11258_p4), [#allocation3], 4294967280 }
 0x45b   : > { %13158 = dma.done.wait (%p11258_p4), [#allocation5], 32  }
 0x45c   : > { %13160 = vsyncadd (%p11258_p4), [#allocation5], 4294967264 }
 0x45d   : > { %13162 = dma.done.wait (%p11258_p4), [#allocation8], 32  }
 0x45e   : > { %13164 = vsyncadd (%p11258_p4), [#allocation8], 4294967264 }
 0x45f   : > { %13166 = dma.done.wait (%p11258_p4), [#allocation11], 32  }
 0x460   : > { %13168 = vsyncadd (%p11258_p4), [#allocation11], 4294967264 }
 0x461   : > { %13170 = dma.done.wait (%p11258_p4), [#allocation14], 32  }
 0x462   : > { %13172 = vsyncadd (%p11258_p4), [#allocation14], 4294967264 }
 0x463   : > { %13174 = dma.done.wait (%p11258_p4), [#allocation17], 32  }
 0x464   : > { %13176 = vsyncadd (%p11258_p4), [#allocation17], 4294967264 }
 0x465   : > { %13178 = dma.done.wait (%p11258_p4), [#allocation20], 32  }
 0x466   : > { %13180 = vsyncadd (%p11258_p4), [#allocation20], 4294967264 }
 0x467   : > { %13182 = dma.done.wait (%p11258_p4), [#allocation23], 32  }
 0x468   : > { %13184 = vsyncadd (%p11258_p4), [#allocation23], 4294967264 }
 0x469   : > { %13186 = dma.done.wait (%p11258_p4), [#allocation26], 32  }
 0x46a   : > { %13188 = vsyncadd (%p11258_p4), [#allocation26], 4294967264 }
 0x46b   : > { %13190 = dma.done.wait (%p11258_p4), [#allocation29], 32  }
 0x46c   : > { %13192 = vsyncadd (%p11258_p4), [#allocation29], 4294967264 }
 0x46d   : > { %13194 = dma.done.wait (%p11258_p4), [#allocation32], 32  }
 0x46e   : > { %13196 = vsyncadd (%p11258_p4), [#allocation32], 4294967264 }
 0x46f   : > { %13198 = dma.done.wait (%p11258_p4), [#allocation35], 32  }
 0x470   : > { %13200 = vsyncadd (%p11258_p4), [#allocation35], 4294967264 }
 0x471   : > { %13202 = dma.done.wait (%p11258_p4), [#allocation38], 32  }
 0x472   : > { %13204 = vsyncadd (%p11258_p4), [#allocation38], 4294967264 }
 0x473   : > { %13206 = dma.done.wait (%p11258_p4), [#allocation41], 32  }
 0x474   : > { %13208 = vsyncadd (%p11258_p4), [#allocation41], 4294967264 }
 0x475   : > { %13210 = dma.done.wait (%p11258_p4), [#allocation44], 32  }
 0x476   : > { %13212 = vsyncadd (%p11258_p4), [#allocation44], 4294967264 }
 0x477   : > { %13214 = dma.done.wait (%p11258_p4), [#allocation47], 32  }
 0x478   : > { %13216 = vsyncadd (%p11258_p4), [#allocation47], 4294967264 }
 0x479   : > { %13218 = dma.done.wait (%p11258_p4), [#allocation50], 32  }
 0x47a   : > { %13220 = vsyncadd (%p11258_p4), [#allocation50], 4294967264 }
 0x47b   : > { %13222 = dma.done.wait (%p11258_p4), [#allocation53], 32  }
 0x47c   : > { %13224 = vsyncadd (%p11258_p4), [#allocation53], 4294967264 }
 0x47d   : > { %13226 = dma.done.wait (%p11258_p4), [#allocation56], 32  }
 0x47e   : > { %13228 = vsyncadd (%p11258_p4), [#allocation56], 4294967264 }
 0x47f   : > { %13230 = dma.done.wait (%p11258_p4), [#allocation59], 16  }
 0x480   : > { %13232 = vsyncadd (%p11258_p4), [#allocation59], 4294967280  ;;  %s16225_s1 = sld [smem:[#allocation80_spill]]  ;;  %s16226_s6 = sld [smem:[#allocation84_spill]]  ;;  %vm3051_vm0 = vcmask 1040384   ;;  %vm3052_vm1 = vcmask 1041408  }
 0x481   : > { %p2822_p2 = scmp.lt.s32.totalorder %s13781_s28, 1  ;;  %v13355_v0 = vmov 65535   ;;  %vm3038_vm2 = vcmask 23552   ;;  %s16227_s9 = sld [smem:[#allocation148_spill]]  ;;  %vm3155_vm3 = vcmask 1043456   ;;  %vm3142_vm4 = vcmask 64512  }
 0x482   : > { %v3053_v1 = vsel %vm3051_vm0, 4294967295, %v13355_v0  ;;  %s16228_s11 = sld [smem:[#allocation136_spill]]  ;;  %s16229_s3 = sld [smem:[#allocation83_spill]]  ;;  %vm3244_vm5 = vcmask 261120   ;;  %vm4182_vm6 = vcmask 523264   ;;  %vm4979_vm7 = vcmask 130048  }
 0x483   : > { %s16273_s28 = smov (!%p2822_p2, %s13781_s28), 1  ;;  %v3054_v3 = vsel %vm3052_vm1, %v3053_v1, 0  ;;  %s16230_s8 = sld [smem:[#allocation138_spill]]  ;;  %v9869_v1 = vld [vmem:[#allocation58] ss:$0 sm:$0xff]  ;;  %vm4988_vm8 = vcmask 195584  }
 0x484   : > { %s10042_s5 = sshll.u32 %s16273_s28, 6  ;;  %s16231_s7 = sld [smem:[#allocation139_spill]]  ;;  %vm13363_vm9 = vmmov 0  }
 0x485   : > { %s16243_s4 = sld [smem:[#allocation107_spill]]  ;;  %s16249_s10 = sld [smem:[#allocation94_spill]] }
 0x486   : > { %s2826_s2 = scalar_lea.vmem %s16225_s1, %s10042_s5  ;;  %v2841_v2 = vld [vmem:[%s16226_s6] sm:$0x7]  ;;  %s16232_s1 = sld [smem:[#allocation81_spill]] }
 0x487   : > { %v3010_v4 = vld [vmem:[%s2826_s2] sm:$0xff]  ;;  %v3011_v5 = vld [vmem:[%s2826_s2 + $0x8] sm:$0xff]  ;;  %v3031_v6 = vpack.c.bf16 %v2841_v2, %v2841_v2  ;;  %v3012_v8 = vld [vmem:[%s2826_s2 + $0x10] sm:$0xff] }
 0x488   : > { %v3027_v7 = vpack.c.bf16 %v3011_v5, %v3010_v4  ;;  %v3013_v9 = vld [vmem:[%s2826_s2 + $0x18] sm:$0xff]  ;;  %v3014_v11 = vld [vmem:[%s2826_s2 + $0x20] sm:$0xff]  ;;  %v3015_v12 = vld [vmem:[%s2826_s2 + $0x28] sm:$0xff] }
 0x489   : > { %v3056_v10 = vand.u32 %v3054_v3, %v3031_v6  ;;  %v3028_v13 = vpack.c.bf16 %v3013_v9, %v3012_v8  ;;  %v3029_v14 = vpack.c.bf16 %v3015_v12, %v3014_v11  ;;  %v3016_v15 = vld [vmem:[%s2826_s2 + $0x30] sm:$0xff]  ;;  %v3017_v16 = vld [vmem:[%s2826_s2 + $0x38] sm:$0xff]  ;;  %v3008_v18 = vld [vmem:[%s16227_s9] sm:$0xff]  ;;  %s16098_s2 = smov 112   ;;  %s16246_s9 = smov 24  }
 0x48a   : > { %10349 = vmatprep.mubr.msk.bf16.mxu0 %vm3038_vm2, %v3027_v7  ;;  %v3030_v17 = vpack.c.bf16 %v3017_v16, %v3016_v15  ;;  %v3135_v19 = vpack.c.bf16 %v3008_v18, %v3008_v18  ;;  %v2973_v21 = vld [vmem:[%s16228_s11] sm:$0xff]  ;;  %v2974_v22 = vld [vmem:[%s16228_s11 + $0x8] sm:$0xff]  ;;  %v2975_v56 = vld [vmem:[%s16228_s11 + $0x10] sm:$0xff] }
 0x48b   : > { %10347 = vmatprep.subr.bf16.mxu0 %v3056_v10  ;;  %v3402_v23 = vpack.c.bf16 %v2974_v22, %v2973_v21  ;;  %v9864_v24 = vld [vmem:[%s16229_s3] ss:$0 sm:$0xff]  ;;  %v2982_v54 = vld [vmem:[%s16230_s8 + $0x8] sm:$0xff]  ;;  %v2976_v57 = vld [vmem:[%s16228_s11 + $0x18] sm:$0xff]  ;;  %s16096_s3 = smov 104   ;;  %s16250_s11 = sld [smem:[#allocation99_spill]] }
 0x48c   : > { %10348 = vmatpush3.bf16.msra.mxu0 %v3056_v10  ;;  %11051 = vmatprep.subr.msk.bf16.mxu1 %vm3155_vm3, %v3135_v19  ;;  %v3157_v20 = vsel %vm3155_vm3, %v3135_v19, 0  ;;  %v2981_v53 = vld [vmem:[%s16230_s8] sm:$0xff]  ;;  %v3403_v58 = vpack.c.bf16 %v2976_v57, %v2975_v56  ;;  %v2983_v59 = vld [vmem:[%s16230_s8 + $0x10] sm:$0xff]  ;;  %v2984_v60 = vld [vmem:[%s16230_s8 + $0x18] sm:$0xff]  ;;  %s14369_s6 = scalar_lea.vmem %s16232_s1, %s10042_s5  ;;  %s16094_s5 = smov 120  }
 0x48d   : > { %10358 = vmatpush3.bf16.msra.mxu1 %v3157_v20  ;;  %v3236_v55 = vpack.c.bf16 %v2982_v54, %v2981_v53  ;;  %v3237_v61 = vpack.c.bf16 %v2984_v60, %v2983_v59  ;;  %v2985_v62 = vld [vmem:[%s16231_s7] sm:$0xff]  ;;  %v2986_v63 = vld [vmem:[%s16231_s7 + $0x8] sm:$0xff]  ;;  %v3021_v5 = vld [vmem:[%s14369_s6 + $0x18] sm:$0xff]  ;;  %s16233_s1 = sld [smem:[#allocation82_spill]]  ;;  %s16245_s8 = smov 16  }
 0x48e   : > { %10379 = vmatprep.subr.bf16.mxu1 %v3402_v23  ;;  %v3559_v0 = vpack.c.bf16 %v2986_v63, %v2985_v62  ;;  %v3018_v8 = vld [vmem:[%s14369_s6] sm:$0xff]  ;;  %v3019_v10 = vld [vmem:[%s14369_s6 + $0x8] sm:$0xff]  ;;  %v3020_v12 = vld [vmem:[%s14369_s6 + $0x10] sm:$0xff] }
 0x48f   : > { %10350 = vmatmul.mubr.msk.bf16.vlgmr.msra.gmra.mrb[0].mxu0 %vm3038_vm2, %v3028_v13  ;;  %10367 = vmatprep.subr.bf16.mxu0 %v3236_v55  ;;  %v2988_v18 = vld [vmem:[%s16231_s7 + $0x18] sm:$0xff] }
 0x490   : > { %10353 = vmatprep.mubr.msk.bf16.mxu0 %vm3038_vm2, %v3029_v14  ;;  %10368 = vmatpush3.bf16.msra.mxu0 %v3236_v55 }
 0x491   : > { %10369 = vmatprep.subr.bf16.mxu0 %v3237_v61 }
 0x494   : > { %10370 = vmatpush3.bf16.msra.mxu0 %v3237_v61 }
 0x495   : > { %10391 = vmatprep.subr.bf16.mxu0 %v3559_v0 }
 0x497   : > { %10354 = vmatmul.mubr.msk.bf16.gmra.mrb[4].mxu0 %vm3038_vm2, %v3030_v17  ;;  %v2987_v17 = vld [vmem:[%s16231_s7 + $0x10] sm:$0xff]  ;;  %s16244_s7 = smov 8  }
 0x562   : > { %v10351_v25 = vpop.f32.mrb[0].mxu0 }
 0x563   : > { %v3101_v26 = vadd.f32 %v10351_v25, %v9864_v24  ;;  %v3092_v27 = vpop.f32.mrb[1].mxu0 }
 0x564   : > { %v3093_v28 = vadd.f32 %v9864_v24, %v3092_v27  ;;  %v10352_v29 = vpop.f32.mrb[2].mxu0 }
 0x565   : > { %v3104_v30 = vadd.f32 %v10352_v29, %v9864_v24  ;;  %v3095_v31 = vpop.f32.mrb[3].mxu0  ;;  %v3125_v33 = vmax.f32 %v3101_v26, 0.0  ;;  %v3025_v26 = vld [vmem:[%s14369_s6 + $0x38] sm:$0xff]  ;;  %v3022_v29 = vld [vmem:[%s14369_s6 + $0x20] sm:$0xff] }
 0x566   : > { %v3096_v32 = vadd.f32 %v9864_v24, %v3095_v31  ;;  %v3123_v35 = vmax.f32 %v3093_v28, 0.0  ;;  %v3023_v31 = vld [vmem:[%s14369_s6 + $0x28] sm:$0xff] }
 0x567   : > { %v3126_v34 = vmax.f32 %v3104_v30, 0.0 }
 0x568   : > { %v3124_v36 = vmax.f32 %v3096_v32, 0.0 }
 0x569   : > { %v3132_v37 = vpack.c.bf16 %v3126_v34, %v3125_v33  ;;  %v3024_v33 = vld [vmem:[%s14369_s6 + $0x30] sm:$0xff] }
 0x56a   : > { %v10355_v38 = vpop.f32.mrb[4].mxu0  ;;  %v3131_v39 = vpack.c.bf16 %v3124_v36, %v3123_v35 }
 0x56b   : > { %v3117_v40 = vadd.f32 %v10355_v38, %v9864_v24  ;;  %v3108_v41 = vpop.f32.mrb[5].mxu0 }
 0x56c   : > { %v3109_v42 = vadd.f32 %v9864_v24, %v3108_v41  ;;  %v10356_v43 = vpop.f32.mrb[6].mxu0  ;;  %10359 = vmatprep.mubr.msk.bf16.mxu1 %vm3142_vm4, %v3131_v39 }
 0x56d   : > { %v3120_v44 = vadd.f32 %v10356_v43, %v9864_v24  ;;  %v3111_v45 = vpop.f32.mrb[7].mxu0  ;;  %10360 = vmatmul.mubr.msk.bf16.vlgmr.msra.gmra.mrb[0].mxu1 %vm3142_vm4, %v3132_v37  ;;  %v3129_v47 = vmax.f32 %v3117_v40, 0.0 }
 0x56e   : > { %v3112_v46 = vadd.f32 %v9864_v24, %v3111_v45  ;;  %10380 = vmatpush3.bf16.msra.mxu1 %v3402_v23  ;;  %v3127_v49 = vmax.f32 %v3109_v42, 0.0  ;;  %v3560_v24 = vpack.c.bf16 %v2988_v18, %v2987_v17 }
 0x56f   : > { %v3130_v48 = vmax.f32 %v3120_v44, 0.0  ;;  %10381 = vmatprep.subr.bf16.mxu1 %v3403_v58 }
 0x570   : > { %v3128_v50 = vmax.f32 %v3112_v46, 0.0  ;;  %v9874_v46 = vld [vmem:[#allocation46] ss:$0 sm:$0xff] }
 0x571   : > { %v3134_v51 = vpack.c.bf16 %v3130_v48, %v3129_v47  ;;  %v9879_v48 = vld [vmem:[#allocation43] ss:$0 sm:$0xff] }
 0x572   : > { %v3133_v52 = vpack.c.bf16 %v3128_v50, %v3127_v49  ;;  %10382 = vmatpush3.bf16.msra.mxu1 %v3403_v58 }
 0x574   : > { %10363 = vmatprep.mubr.msk.bf16.mxu1 %vm3142_vm4, %v3133_v52 }
 0x575   : > { %10364 = vmatmul.mubr.msk.bf16.gmra.mrb[4].mxu1 %vm3142_vm4, %v3134_v51 }
 0x640   : > { %v10361_v2 = vpop.f32.mrb[0].mxu1 }
 0x641   : > { %v3193_v3 = vpop.f32.mrb[1].mxu1  ;;  %v14374_v7 = vadd.f32 %v10361_v2, %v9869_v1 }
 0x642   : > { %v14371_v4 = vadd.f32 %v9869_v1, %v3193_v3  ;;  %v10362_v6 = vpop.f32.mrb[2].mxu1 }
 0x643   : > { %v14377_v9 = vadd.f32 %v10362_v6, %v9869_v1  ;;  %v3196_v11 = vpop.f32.mrb[3].mxu1  ;;  %v3226_v19 = vadd.f32 %v14374_v7, %v3020_v12 }
 0x644   : > { %v14381_v13 = vadd.f32 %v9869_v1, %v3196_v11  ;;  %v3224_v15 = vadd.f32 %v14371_v4, %v3018_v8 }
 0x645   : > { %v3227_v14 = vadd.f32 %v14377_v9, %v3021_v5  ;;  %v3556_v42 = vpack.c.bf16 %v14377_v9, %v14374_v7 }
 0x646   : > { %v3225_v16 = vadd.f32 %v14381_v13, %v3019_v10  ;;  %v3555_v41 = vpack.c.bf16 %v14381_v13, %v14371_v4 }
 0x647   : > { %v3233_v22 = vpack.c.bf16 %v3227_v14, %v3226_v19 }
 0x648   : > { %v3232_v20 = vpack.c.bf16 %v3225_v16, %v3224_v15  ;;  %v10365_v21 = vpop.f32.mrb[4].mxu1 }
 0x649   : > { %v3209_v23 = vpop.f32.mrb[5].mxu1  ;;  %v14394_v28 = vadd.f32 %v10365_v21, %v9869_v1 }
 0x64a   : > { %v14389_v25 = vadd.f32 %v9869_v1, %v3209_v23  ;;  %v10366_v27 = vpop.f32.mrb[6].mxu1  ;;  %10371 = vmatprep.mubr.msk.bf16.mxu0 %vm3244_vm5, %v3232_v20  ;;  %10383 = vmatprep.mubr.msk.bf16.mxu1 %vm3244_vm5, %v3232_v20 }
 0x64b   : > { %v14397_v30 = vadd.f32 %v10366_v27, %v9869_v1  ;;  %v3212_v32 = vpop.f32.mrb[7].mxu1  ;;  %10372 = vmatmul.mubr.msk.bf16.vlgmr.msra.gmra.mrb[8].mxu0 %vm3244_vm5, %v3233_v22  ;;  %10384 = vmatmul.mubr.msk.bf16.vlgmr.msra.gmra.mrb[8].mxu1 %vm3244_vm5, %v3233_v22  ;;  %v3230_v38 = vadd.f32 %v14394_v28, %v3024_v33 }
 0x64c   : > { %v14403_v34 = vadd.f32 %v9869_v1, %v3212_v32  ;;  %10392 = vmatpush3.bf16.msra.mxu0 %v3559_v0  ;;  %v3228_v36 = vadd.f32 %v14389_v25, %v3022_v29 }
 0x64d   : > { %v3231_v35 = vadd.f32 %v14397_v30, %v3025_v26  ;;  %10393 = vmatprep.subr.bf16.mxu0 %v3560_v24  ;;  %v3558_v44 = vpack.c.bf16 %v14397_v30, %v14394_v28 }
 0x64e   : > { %v3229_v37 = vadd.f32 %v14403_v34, %v3023_v31  ;;  %v3557_v43 = vpack.c.bf16 %v14403_v34, %v14389_v25 }
 0x64f   : > { %v3235_v40 = vpack.c.bf16 %v3231_v35, %v3230_v38 }
 0x650   : > { %v3234_v39 = vpack.c.bf16 %v3229_v37, %v3228_v36  ;;  %10394 = vmatpush3.bf16.msra.mxu0 %v3560_v24 }
 0x652   : > { %10375 = vmatprep.mubr.msk.bf16.mxu0 %vm3244_vm5, %v3234_v39  ;;  %10387 = vmatprep.mubr.msk.bf16.mxu1 %vm3244_vm5, %v3234_v39 }
 0x653   : > { %10376 = vmatmul.mubr.msk.bf16.gmra.mrb[12].mxu0 %vm3244_vm5, %v3235_v40  ;;  %10388 = vmatmul.mubr.msk.bf16.gmra.mrb[12].mxu1 %vm3244_vm5, %v3235_v40  ;;  %v9884_v40 = vld [vmem:[#allocation48] ss:$0 sm:$0xff] }
 0x654   : > { %10395 = vmatprep.mubr.msk.bf16.mxu0 %vm3244_vm5, %v3555_v41 }
 0x65b   : > { %10396 = vmatmul.mubr.msk.bf16.vlgmr.msra.gmra.mrb[16].mxu0 %vm3244_vm5, %v3556_v42 }
 0x65c   : > { %10399 = vmatprep.mubr.msk.bf16.mxu0 %vm3244_vm5, %v3557_v43 }
 0x663   : > { %10400 = vmatmul.mubr.msk.bf16.gmra.mrb[20].mxu0 %vm3244_vm5, %v3558_v44 }
 0x71e   : > { %v10373_v45 = vpop.f32.mrb[8].mxu0  ;;  %v10385_v47 = vpop.f32.mrb[8].mxu1 }
 0x71f   : > { %v3291_v49 = vpop.f32.mrb[9].mxu0  ;;  %v3444_v50 = vpop.f32.mrb[9].mxu1  ;;  %v14425_v53 = vadd.f32 %v10373_v45, %v9874_v46  ;;  %v3453_v54 = vadd.f32 %v10385_v47, %v9879_v48 }
 0x720   : > { %v10374_v51 = vpop.f32.mrb[10].mxu0  ;;  %v10386_v52 = vpop.f32.mrb[10].mxu1  ;;  %v3292_v59 = vadd.f32 %v9874_v46, %v3291_v49  ;;  %v3445_v60 = vadd.f32 %v9879_v48, %v3444_v50 }
 0x721   : > { %v14427_v55 = vadd.f32 %v10374_v51, %v9874_v46  ;;  %v3456_v56 = vadd.f32 %v10386_v52, %v9879_v48  ;;  %v3294_v57 = vpop.f32.mrb[11].mxu0  ;;  %v3447_v58 = vpop.f32.mrb[11].mxu1 }
 0x722   : > { %v3295_v61 = vadd.f32 %v9874_v46, %v3294_v57  ;;  %v3448_v62 = vadd.f32 %v9879_v48, %v3447_v58 }
 0x723   : > { %v3725_v63 = vpack.c.bf16 %v14427_v55, %v14425_v53  ;;  %v3741_v0 = vpack.c.bf16 %v3456_v56, %v3453_v54  ;;  %v14431_v1 = vpack.i.bf16 %v3456_v56, %v3453_v54  ;;  %v14437_v8 = vpack.i.bf16 %v14427_v55, %v14425_v53 }
 0x724   : > { %v11432_v2 = vpack.i.bf16 %v3448_v62, %v3445_v60  ;;  %v3740_v3 = vpack.c.bf16 %v3448_v62, %v3445_v60  ;;  %v3724_v5 = vpack.c.bf16 %v3295_v61, %v3292_v59  ;;  %v14433_v6 = vpack.i.bf16 %v3295_v61, %v3292_v59 }
 0x725   : > { %v3772_v41 = vsel %vm3142_vm4, %v3741_v0, 0 }
 0x726   : > { %v10389_v10 = vpop.f32.mrb[12].mxu1  ;;  %11433 = vrot.lane.b32.xlu0 %v11432_v2, %s16094_s5  ;;  %v10377_v11 = vpop.f32.mrb[12].mxu0  ;;  %11052 = vmatprep.subr.msk.bf16.mxu1 %vm3142_vm4, %v3740_v3  ;;  %v3769_v12 = vsel %vm3142_vm4, %v3740_v3, 0 }
 0x727   : > { %10411 = vmatprep.mubr.msk.bf16.mxu1 %vm3142_vm4, %v3724_v5  ;;  %v3307_v14 = vpop.f32.mrb[13].mxu0  ;;  %v3460_v15 = vpop.f32.mrb[13].mxu1  ;;  %10404 = vmatpush3.bf16.xpose.msra.mxu1 %v3769_v12  ;;  %v3469_v18 = vadd.f32 %v10389_v10, %v9879_v48  ;;  %v14444_v19 = vadd.f32 %v10377_v11, %v9874_v46 }
 0x728   : > { %v10378_v16 = vpop.f32.mrb[14].mxu0  ;;  %v10390_v17 = vpop.f32.mrb[14].mxu1  ;;  %11053 = vmatprep.subr.msk.bf16.mxu1 %vm3142_vm4, %v3741_v0  ;;  %v14448_v24 = vadd.f32 %v9874_v46, %v3307_v14  ;;  %v3461_v26 = vadd.f32 %v9879_v48, %v3460_v15 }
 0x729   : > { %v14446_v20 = vadd.f32 %v10378_v16, %v9874_v46  ;;  %v3472_v21 = vadd.f32 %v10390_v17, %v9879_v48  ;;  %v3310_v22 = vpop.f32.mrb[15].mxu0  ;;  %v3463_v23 = vpop.f32.mrb[15].mxu1 }
 0x72a   : > { %v3311_v27 = vadd.f32 %v9874_v46, %v3310_v22  ;;  %v3464_v29 = vadd.f32 %v9879_v48, %v3463_v23  ;;  %11438 = vrot.lane.b32.xlu0 %v14431_v1, %s16094_s5 }
 0x72b   : > { %v11447_v31 = vpack.i.bf16 %v3472_v21, %v3469_v18  ;;  %v3743_v32 = vpack.c.bf16 %v3472_v21, %v3469_v18  ;;  %v14454_v33 = vpack.i.bf16 %v14446_v20, %v14444_v19  ;;  %v3727_v42 = vpack.c.bf16 %v14446_v20, %v14444_v19 }
 0x72c   : > { %v11442_v35 = vpack.i.bf16 %v3464_v29, %v3461_v26  ;;  %v3742_v36 = vpack.c.bf16 %v3464_v29, %v3461_v26  ;;  %v11507_v37 = vpack.i.bf16 %v3311_v27, %v14448_v24  ;;  %v3726_v38 = vpack.c.bf16 %v3311_v27, %v14448_v24 }
 0x72d   : > { %v3778_v12 = vsel %vm3142_vm4, %v3743_v32, 0 }
 0x72e   : > { %11443 = vrot.lane.b32.xlu1 %v11442_v35, %s16094_s5  ;;  %11453 = vrot.lane.b32.xlu0 %v11432_v2, %s16098_s2  ;;  %v10397_v39 = vpop.f32.mrb[16].mxu0  ;;  %v3775_v57 = vsel %vm3142_vm4, %v3742_v36, 0 }
 0x72f   : > { %v3613_v43 = vpop.f32.mrb[17].mxu0  ;;  %10406 = vmatpush3.bf16.xpose.msra.mxu1 %v3772_v41  ;;  %v3622_v45 = vadd.f32 %v10397_v39, %v9884_v40 }
 0x730   : > { %v10398_v44 = vpop.f32.mrb[18].mxu0  ;;  %11054 = vmatprep.subr.msk.bf16.mxu1 %vm3142_vm4, %v3742_v36  ;;  %v3614_v48 = vadd.f32 %v9884_v40, %v3613_v43 }
 0x731   : > { %v3625_v46 = vadd.f32 %v10398_v44, %v9884_v40  ;;  %v3616_v47 = vpop.f32.mrb[19].mxu0 }
 0x732   : > { %v3617_v49 = vadd.f32 %v9884_v40, %v3616_v47  ;;  %11448 = vrot.lane.b32.xlu1 %v11447_v31, %s16094_s5  ;;  %11463 = vrot.lane.b32.xlu0 %v11432_v2, %s16096_s3 }
 0x733   : > { %v11552_v50 = vpack.i.bf16 %v3625_v46, %v3622_v45  ;;  %v14466_v51 = vpack.c.bf16 %v3625_v46, %v3622_v45 }
 0x734   : > { %v11577_v52 = vpack.i.bf16 %v3617_v49, %v3614_v48  ;;  %v14468_v54 = vpack.c.bf16 %v3617_v49, %v3614_v48 }
 0x736   : > { %11473 = vrot.lane.b32.xlu0 %v14431_v1, %s16098_s2  ;;  %v10401_v56 = vpop.f32.mrb[20].mxu0  ;;  %11458 = vrot.lane.b32.xlu1 %v14433_v6, %s16094_s5 }
 0x737   : > { %v3629_v58 = vpop.f32.mrb[21].mxu0  ;;  %10408 = vmatpush3.bf16.xpose.msra.mxu1 %v3775_v57  ;;  %v3638_v60 = vadd.f32 %v10401_v56, %v9884_v40 }
 0x738   : > { %v10402_v59 = vpop.f32.mrb[22].mxu0  ;;  %11055 = vmatprep.subr.msk.bf16.mxu1 %vm3142_vm4, %v3743_v32  ;;  %v3630_v0 = vadd.f32 %v9884_v40, %v3629_v58 }
 0x739   : > { %v3641_v61 = vadd.f32 %v10402_v59, %v9884_v40  ;;  %v3632_v62 = vpop.f32.mrb[23].mxu0 }
 0x73a   : > { %v3633_v2 = vadd.f32 %v9884_v40, %v3632_v62  ;;  %11483 = vrot.lane.b32.xlu0 %v11442_v35, %s16098_s2  ;;  %11468 = vrot.lane.b32.xlu1 %v14437_v8, %s16094_s5 }
 0x73b   : > { %v14479_v3 = vpack.i.bf16 %v3641_v61, %v3638_v60  ;;  %v14481_v5 = vpack.c.bf16 %v3641_v61, %v3638_v60 }
 0x73c   : > { %v14483_v10 = vpack.i.bf16 %v3633_v2, %v3630_v0  ;;  %v14485_v11 = vpack.c.bf16 %v3633_v2, %v3630_v0 }
 0x73e   : > { %11498 = vrot.lane.b32.xlu0 %v14454_v33, %s16094_s5  ;;  %11478 = vrot.lane.b32.xlu1 %v14431_v1, %s16096_s3 }
 0x73f   : > { %10410 = vmatpush3.bf16.xpose.msra.mxu1 %v3778_v12 }
 0x742   : > { %11508 = vrot.lane.b32.xlu0 %v11507_v37, %s16094_s5  ;;  %11488 = vrot.lane.b32.xlu1 %v11442_v35, %s16096_s3 }
 0x746   : > { %11513 = vrot.lane.b32.xlu0 %v14433_v6, %s16098_s2  ;;  %11493 = vrot.lane.b32.xlu1 %v11447_v31, %s16098_s2 }
 0x747   : > { %10412 = vmatmul.mubr.msk.bf16.vlgmr.msra.gmra.mrb[16].mxu1 %vm3142_vm4, %v3725_v63 }
 0x748   : > { %10415 = vmatprep.mubr.msk.bf16.mxu1 %vm3142_vm4, %v3726_v38 }
 0x74a   : > { %11523 = vrot.lane.b32.xlu0 %v14433_v6, %s16096_s3  ;;  %11503 = vrot.lane.b32.xlu1 %v11447_v31, %s16096_s3 }
 0x74e   : > { %11538 = vrot.lane.b32.xlu0 %v11507_v37, %s16098_s2  ;;  %11518 = vrot.lane.b32.xlu1 %v14437_v8, %s16098_s2 }
 0x74f   : > { %10416 = vmatmul.mubr.msk.bf16.gmra.mrb[20].mxu1 %vm3142_vm4, %v3727_v42 }
 0x752   : > { %11543 = vrot.lane.b32.xlu0 %v11507_v37, %s16096_s3  ;;  %11528 = vrot.lane.b32.xlu1 %v14437_v8, %s16096_s3 }
 0x756   : > { %11553 = vrot.lane.b32.xlu0 %v11552_v50, %s16094_s5  ;;  %11533 = vrot.lane.b32.xlu1 %v14454_v33, %s16098_s2 }
 0x75a   : > { %11578 = vrot.lane.b32.xlu0 %v11577_v52, %s16096_s3  ;;  %11548 = vrot.lane.b32.xlu1 %v14454_v33, %s16096_s3 }
 0x75e   : > { %11583 = vrot.lane.b32.xlu0 %v14479_v3, %s16094_s5  ;;  %11558 = vrot.lane.b32.xlu1 %v11552_v50, %s16098_s2 }
 0x762   : > { %11563 = vrot.lane.b32.xlu1 %v11552_v50, %s16096_s3 }
 0x766   : > { %11568 = vrot.lane.b32.xlu1 %v11577_v52, %s16094_s5 }
 0x76a   : > { %11573 = vrot.lane.b32.xlu1 %v11577_v52, %s16098_s2 }
 0x76e   : > { %11588 = vrot.lane.b32.xlu1 %v14483_v10, %s16094_s5  ;;  %s14582_s5 = scalar_lea.vmem %s16233_s1, %s16273_s28  ;;  %s16234_s1 = sld [smem:[#allocation137_spill]] }
 0x798   : > { %v11434_v53 = vpop.permute.xlu0 %11433 }
 0x799   : > { %v11436_v55 = vunpack.i.h.bf16 %v11434_v53  ;;  %v11435_v63 = vunpack.i.l.bf16 %v11434_v53 }
 0x79b   : > { %v3744_v1 = vpack.c.bf16 %v11436_v55, %v11435_v63 }
 0x79c   : > { %v11439_v6 = vpop.permute.xlu0 %11438 }
 0x79d   : > { %v11441_v8 = vunpack.i.h.bf16 %v11439_v6  ;;  %v11440_v14 = vunpack.i.l.bf16 %v11439_v6  ;;  %11056 = vmatprep.subr.msk.bf16.mxu0 %vm3142_vm4, %v3744_v1  ;;  %v3858_v15 = vsel %vm3142_vm4, %v3744_v1, 0 }
 0x79e   : > { %10420 = vmatpush3.bf16.xpose.msra.mxu0 %v3858_v15 }
 0x79f   : > { %v3745_v16 = vpack.c.bf16 %v11441_v8, %v11440_v14 }
 0x7a0   : > { %v11444_v17 = vpop.permute.xlu1 %11443  ;;  %v11454_v18 = vpop.permute.xlu0 %11453 }
 0x7a1   : > { %v11446_v19 = vunpack.i.h.bf16 %v11444_v17  ;;  %v11445_v20 = vunpack.i.l.bf16 %v11444_v17  ;;  %v11456_v21 = vunpack.i.h.bf16 %v11454_v18  ;;  %v11455_v22 = vunpack.i.l.bf16 %v11454_v18  ;;  %11057 = vmatprep.subr.msk.bf16.mxu0 %vm3142_vm4, %v3745_v16 }
 0x7a2   : > { %v3861_v29 = vsel %vm3142_vm4, %v3745_v16, 0 }
 0x7a3   : > { %v3748_v23 = vpack.c.bf16 %v11456_v21, %v11455_v22  ;;  %v3746_v27 = vpack.c.bf16 %v11446_v19, %v11445_v20 }
 0x7a4   : > { %v11449_v24 = vpop.permute.xlu1 %11448  ;;  %v11464_v26 = vpop.permute.xlu0 %11463 }
 0x7a5   : > { %11060 = vmatprep.subr.msk.bf16.mxu1 %vm3142_vm4, %v3748_v23  ;;  %v3947_v31 = vsel %vm3142_vm4, %v3748_v23, 0  ;;  %v11451_v32 = vunpack.i.h.bf16 %v11449_v24  ;;  %v11450_v33 = vunpack.i.l.bf16 %v11449_v24  ;;  %v3864_v48 = vsel %vm3142_vm4, %v3746_v27, 0 }
 0x7a6   : > { %10422 = vmatpush3.bf16.xpose.msra.mxu0 %v3861_v29  ;;  %10436 = vmatpush3.bf16.xpose.msra.mxu1 %v3947_v31  ;;  %v11466_v57 = vunpack.i.h.bf16 %v11464_v26  ;;  %v11465_v58 = vunpack.i.l.bf16 %v11464_v26 }
 0x7a7   : > { %11058 = vmatprep.subr.msk.bf16.mxu0 %vm3142_vm4, %v3746_v27  ;;  %v3747_v45 = vpack.c.bf16 %v11451_v32, %v11450_v33 }
 0x7a8   : > { %v11474_v35 = vpop.permute.xlu0 %11473  ;;  %v11459_v36 = vpop.permute.xlu1 %11458  ;;  %v3752_v61 = vpack.c.bf16 %v11466_v57, %v11465_v58 }
 0x7a9   : > { %v11476_v37 = vunpack.i.h.bf16 %v11474_v35  ;;  %v11475_v38 = vunpack.i.l.bf16 %v11474_v35  ;;  %v11461_v39 = vunpack.i.h.bf16 %v11459_v36  ;;  %v11460_v40 = vunpack.i.l.bf16 %v11459_v36 }
 0x7aa   : > { %v3867_v62 = vsel %vm3142_vm4, %v3747_v45, 0  ;;  %v4036_v27 = vsel %vm3142_vm4, %v3752_v61, 0 }
 0x7ab   : > { %v3749_v41 = vpack.c.bf16 %v11476_v37, %v11475_v38  ;;  %v3728_v42 = vpack.c.bf16 %v11461_v39, %v11460_v40 }
 0x7ac   : > { %v11484_v43 = vpop.permute.xlu0 %11483  ;;  %v11469_v44 = vpop.permute.xlu1 %11468 }
 0x7ad   : > { %v11486_v46 = vunpack.i.h.bf16 %v11484_v43  ;;  %v11485_v47 = vunpack.i.l.bf16 %v11484_v43  ;;  %10427 = vmatprep.mubr.msk.bf16.mxu0 %vm3142_vm4, %v3728_v42  ;;  %11061 = vmatprep.subr.msk.bf16.mxu1 %vm3142_vm4, %v3749_v41  ;;  %v3950_v49 = vsel %vm3142_vm4, %v3749_v41, 0  ;;  %v11471_v2 = vunpack.i.h.bf16 %v11469_v44 }
 0x7ae   : > { %10424 = vmatpush3.bf16.xpose.msra.mxu0 %v3864_v48  ;;  %10438 = vmatpush3.bf16.xpose.msra.mxu1 %v3950_v49  ;;  %v11470_v12 = vunpack.i.l.bf16 %v11469_v44 }
 0x7af   : > { %v3750_v50 = vpack.c.bf16 %v11486_v46, %v11485_v47  ;;  %11059 = vmatprep.subr.msk.bf16.mxu0 %vm3142_vm4, %v3747_v45 }
 0x7b0   : > { %v11499_v52 = vpop.permute.xlu0 %11498  ;;  %v11479_v56 = vpop.permute.xlu1 %11478  ;;  %v3729_v18 = vpack.c.bf16 %v11471_v2, %v11470_v12 }
 0x7b1   : > { %11062 = vmatprep.subr.msk.bf16.mxu1 %vm3142_vm4, %v3750_v50  ;;  %v3953_v0 = vsel %vm3142_vm4, %v3750_v50, 0  ;;  %v11481_v16 = vunpack.i.h.bf16 %v11479_v56  ;;  %v11480_v17 = vunpack.i.l.bf16 %v11479_v56  ;;  %v11501_v29 = vunpack.i.h.bf16 %v11499_v52 }
 0x7b2   : > { %v11500_v31 = vunpack.i.l.bf16 %v11499_v52 }
 0x7b3   : > { %v3753_v24 = vpack.c.bf16 %v11481_v16, %v11480_v17 }
 0x7b4   : > { %v11509_v59 = vpop.permute.xlu0 %11508  ;;  %v11489_v60 = vpop.permute.xlu1 %11488  ;;  %v3731_v43 = vpack.c.bf16 %v11501_v29, %v11500_v31 }
 0x7b5   : > { %v11511_v53 = vunpack.i.h.bf16 %v11509_v59  ;;  %v11510_v55 = vunpack.i.l.bf16 %v11509_v59  ;;  %v11491_v41 = vunpack.i.h.bf16 %v11489_v60  ;;  %v11490_v42 = vunpack.i.l.bf16 %v11489_v60 }
 0x7b6   : > { %10426 = vmatpush3.bf16.xpose.msra.mxu0 %v3867_v62  ;;  %10440 = vmatpush3.bf16.xpose.msra.mxu1 %v3953_v0  ;;  %v4039_v49 = vsel %vm3142_vm4, %v3753_v24, 0 }
 0x7b7   : > { %11064 = vmatprep.subr.msk.bf16.mxu0 %vm3142_vm4, %v3752_v61  ;;  %v3730_v21 = vpack.c.bf16 %v11511_v53, %v11510_v55  ;;  %v3754_v48 = vpack.c.bf16 %v11491_v41, %v11490_v42  ;;  %v14585_v42 = vld [vmem:[%s14582_s5] ss:$0 sm:$0xff] }
 0x7b8   : > { %v11514_v63 = vpop.permute.xlu0 %11513  ;;  %v11494_v1 = vpop.permute.xlu1 %11493 }
 0x7b9   : > { %v11516_v6 = vunpack.i.h.bf16 %v11514_v63  ;;  %v11515_v8 = vunpack.i.l.bf16 %v11514_v63  ;;  %v11496_v14 = vunpack.i.h.bf16 %v11494_v1  ;;  %v11495_v15 = vunpack.i.l.bf16 %v11494_v1 }
 0x7bb   : > { %v3732_v19 = vpack.c.bf16 %v11516_v6, %v11515_v8  ;;  %v3751_v20 = vpack.c.bf16 %v11496_v14, %v11495_v15 }
 0x7bc   : > { %v11524_v22 = vpop.permute.xlu0 %11523  ;;  %v11504_v23 = vpop.permute.xlu1 %11503 }
 0x7bd   : > { %10428 = vmatmul.mubr.msk.bf16.vlgmr.msra.gmra.mrb[24].mxu0 %vm3142_vm4, %v3729_v18  ;;  %11063 = vmatprep.subr.msk.bf16.mxu1 %vm3142_vm4, %v3751_v20  ;;  %v3956_v26 = vsel %vm3142_vm4, %v3751_v20, 0  ;;  %v11526_v32 = vunpack.i.h.bf16 %v11524_v22  ;;  %v11525_v33 = vunpack.i.l.bf16 %v11524_v22  ;;  %v11506_v57 = vunpack.i.h.bf16 %v11504_v23 }
 0x7be   : > { %10443 = vmatprep.mubr.msk.bf16.mxu1 %vm3142_vm4, %v3732_v19  ;;  %10431 = vmatprep.mubr.msk.bf16.mxu0 %vm3142_vm4, %v3730_v21  ;;  %v11505_v58 = vunpack.i.l.bf16 %v11504_v23 }
 0x7bf   : > { %10442 = vmatpush3.bf16.xpose.msra.mxu1 %v3956_v26  ;;  %10452 = vmatpush3.bf16.xpose.msra.mxu0 %v4036_v27  ;;  %v3736_v46 = vpack.c.bf16 %v11526_v32, %v11525_v33 }
 0x7c0   : > { %11065 = vmatprep.subr.msk.bf16.mxu0 %vm3142_vm4, %v3753_v24  ;;  %10467 = vmatprep.subr.bf16.mxu1 %v14468_v54  ;;  %v11539_v35 = vpop.permute.xlu0 %11538  ;;  %v11519_v36 = vpop.permute.xlu1 %11518  ;;  %v3755_v62 = vpack.c.bf16 %v11506_v57, %v11505_v58 }
 0x7c1   : > { %v11541_v37 = vunpack.i.h.bf16 %v11539_v35  ;;  %v11540_v38 = vunpack.i.l.bf16 %v11539_v35  ;;  %v11521_v39 = vunpack.i.h.bf16 %v11519_v36  ;;  %v11520_v40 = vunpack.i.l.bf16 %v11519_v36 }
 0x7c2   : > { %v4045_v12 = vsel %vm3142_vm4, %v3755_v62, 0 }
 0x7c3   : > { %v3734_v44 = vpack.c.bf16 %v11541_v37, %v11540_v38  ;;  %v3733_v45 = vpack.c.bf16 %v11521_v39, %v11520_v40 }
 0x7c4   : > { %v11529_v47 = vpop.permute.xlu1 %11528  ;;  %v11544_v61 = vpop.permute.xlu0 %11543 }
 0x7c5   : > { %10432 = vmatmul.mubr.msk.bf16.gmra.mrb[28].mxu0 %vm3142_vm4, %v3731_v43  ;;  %v11531_v53 = vunpack.i.h.bf16 %v11529_v47  ;;  %v11530_v55 = vunpack.i.l.bf16 %v11529_v47  ;;  %v11546_v1 = vunpack.i.h.bf16 %v11544_v61  ;;  %v11545_v6 = vunpack.i.l.bf16 %v11544_v61 }
 0x7c6   : > { %10444 = vmatmul.mubr.msk.bf16.vlgmr.msra.gmra.mrb[24].mxu1 %vm3142_vm4, %v3733_v45  ;;  %10459 = vmatprep.mubr.msk.bf16.mxu0 %vm3142_vm4, %v3736_v46 }
 0x7c7   : > { %10447 = vmatprep.mubr.msk.bf16.mxu1 %vm3142_vm4, %v3734_v44  ;;  %10454 = vmatpush3.bf16.xpose.msra.mxu0 %v4039_v49  ;;  %v3737_v18 = vpack.c.bf16 %v11531_v53, %v11530_v55  ;;  %v3738_v20 = vpack.c.bf16 %v11546_v1, %v11545_v6 }
 0x7c8   : > { %10468 = vmatpush3.bf16.msra.mxu1 %v14468_v54  ;;  %11066 = vmatprep.subr.msk.bf16.mxu0 %vm3142_vm4, %v3754_v48  ;;  %v11534_v50 = vpop.permute.xlu1 %11533  ;;  %v4042_v54 = vsel %vm3142_vm4, %v3754_v48, 0  ;;  %v11554_v2 = vpop.permute.xlu0 %11553 }
 0x7c9   : > { %10469 = vmatprep.subr.bf16.mxu1 %v14466_v51  ;;  %v11536_v52 = vunpack.i.h.bf16 %v11534_v50  ;;  %v11535_v56 = vunpack.i.l.bf16 %v11534_v50  ;;  %v11556_v15 = vunpack.i.h.bf16 %v11554_v2  ;;  %v11555_v16 = vunpack.i.l.bf16 %v11554_v2 }
 0x7cb   : > { %v3735_v59 = vpack.c.bf16 %v11536_v52, %v11535_v56  ;;  %v4556_v22 = vpack.c.bf16 %v11556_v15, %v11555_v16 }
 0x7cc   : > { %10470 = vmatpush3.bf16.msra.mxu1 %v14466_v51  ;;  %v11549_v60 = vpop.permute.xlu1 %11548 }
 0x7cd   : > { %10471 = vmatprep.subr.bf16.mxu1 %v14485_v11  ;;  %v11551_v26 = vunpack.i.h.bf16 %v11549_v60  ;;  %v11550_v27 = vunpack.i.l.bf16 %v11549_v60 }
 0x7ce   : > { %10448 = vmatmul.mubr.msk.bf16.gmra.mrb[28].mxu1 %vm3142_vm4, %v3735_v59 }
 0x7cf   : > { %10456 = vmatpush3.bf16.xpose.msra.mxu0 %v4042_v54  ;;  %v3739_v37 = vpack.c.bf16 %v11551_v26, %v11550_v27 }
 0x7d0   : > { %10472 = vmatpush3.bf16.msra.mxu1 %v14485_v11  ;;  %11067 = vmatprep.subr.msk.bf16.mxu0 %vm3142_vm4, %v3755_v62  ;;  %v14564_v0 = vpop.permute.xlu1 %11558  ;;  %v11579_v11 = vpop.permute.xlu0 %11578 }
 0x7d1   : > { %10473 = vmatprep.subr.bf16.mxu1 %v14481_v5  ;;  %v11581_v38 = vunpack.i.h.bf16 %v11579_v11  ;;  %v11580_v39 = vunpack.i.l.bf16 %v11579_v11 }
 0x7d3   : > { %v14577_v41 = vpack.c.bf16 %v11581_v38, %v11580_v39 }
 0x7d4   : > { %10474 = vmatpush3.bf16.msra.mxu1 %v14481_v5  ;;  %v14568_v51 = vpop.permute.xlu1 %11563  ;;  %v11584_v23 = vpop.permute.xlu0 %11583 }
 0x7d5   : > { %v11586_v33 = vunpack.i.h.bf16 %v11584_v23  ;;  %v11585_v35 = vunpack.i.l.bf16 %v11584_v23 }
 0x7d7   : > { %10458 = vmatpush3.bf16.xpose.msra.mxu0 %v4045_v12  ;;  %v4558_v40 = vpack.c.bf16 %v11586_v33, %v11585_v35 }
 0x7d8   : > { %v11569_v63 = vpop.permute.xlu1 %11568 }
 0x7d9   : > { %v11571_v8 = vunpack.i.h.bf16 %v11569_v63  ;;  %v11570_v14 = vunpack.i.l.bf16 %v11569_v63 }
 0x7db   : > { %v4555_v17 = vpack.c.bf16 %v11571_v8, %v11570_v14 }
 0x7dc   : > { %v11574_v19 = vpop.permute.xlu1 %11573 }
 0x7dd   : > { %v11576_v5 = vunpack.i.h.bf16 %v11574_v19  ;;  %v11575_v21 = vunpack.i.l.bf16 %v11574_v19  ;;  %10483 = vmatprep.subr.bf16.mxu0 %v4555_v17 }
 0x7de   : > { %10460 = vmatmul.mubr.msk.bf16.vlgmr.msra.gmra.mrb[32].mxu0 %vm3142_vm4, %v3737_v18 }
 0x7df   : > { %10463 = vmatprep.mubr.msk.bf16.mxu0 %vm3142_vm4, %v3738_v20  ;;  %10484 = vmatpush3.bf16.msra.mxu0 %v4555_v17  ;;  %v14573_v24 = vpack.c.bf16 %v11576_v5, %v11575_v21 }
 0x7e0   : > { %10485 = vmatprep.subr.bf16.mxu0 %v4556_v22  ;;  %v11589_v29 = vpop.permute.xlu1 %11588 }
 0x7e1   : > { %v11591_v31 = vunpack.i.h.bf16 %v11589_v29  ;;  %v11590_v32 = vunpack.i.l.bf16 %v11589_v29  ;;  %10499 = vmatprep.subr.bf16.mxu1 %v14573_v24 }
 0x7e3   : > { %10486 = vmatpush3.bf16.msra.mxu0 %v4556_v22  ;;  %v4557_v36 = vpack.c.bf16 %v11591_v31, %v11590_v32 }
 0x7e5   : > { %10487 = vmatprep.subr.bf16.mxu0 %v4557_v36 }
 0x7e6   : > { %10464 = vmatmul.mubr.msk.bf16.gmra.mrb[36].mxu0 %vm3142_vm4, %v3739_v37 }
 0x7e7   : > { %10488 = vmatpush3.bf16.msra.mxu0 %v4557_v36 }
 0x7e8   : > { %10489 = vmatprep.subr.bf16.mxu0 %v4558_v40 }
 0x7eb   : > { %10490 = vmatpush3.bf16.msra.mxu0 %v4558_v40 }
 0x7ec   : > { %10515 = vmatprep.subr.bf16.mxu0 %v14577_v41 }
 0x81a   : > { %v10413_v43 = vpop.f32.mrb[16].mxu1 }
 0x81b   : > { %v4114_v44 = vmul.f32 0.35355338, %v10413_v43  ;;  %v3814_v45 = vpop.f32.mrb[17].mxu1 }
 0x81c   : > { %v4112_v46 = vmul.f32 0.35355338, %v3814_v45  ;;  %v10414_v47 = vpop.f32.mrb[18].mxu1 }
 0x81d   : > { %v3817_v48 = vpop.f32.mrb[19].mxu1  ;;  %v14588_v49 = vadd.f32 %v14585_v42, %v4114_v44  ;;  %v4115_v50 = vmul.f32 0.35355338, %v10414_v47 }
 0x81e   : > { %v4113_v52 = vmul.f32 0.35355338, %v3817_v48  ;;  %v14593_v57 = vadd.f32 %v14585_v42, %v4112_v46 }
 0x81f   : > { %v4189_v56 = vsel %vm4182_vm6, %v14588_v49, -inf  ;;  %v14601_v61 = vadd.f32 %v14585_v42, %v4115_v50 }
 0x820   : > { %4190 = vmax.xlane.f32.xlu0 %v4189_v56  ;;  %v14596_v58 = vadd.f32 %v14585_v42, %v4113_v52  ;;  %v4183_v2 = vsel %vm4182_vm6, %v14593_v57, -inf }
 0x821   : > { %v4192_v6 = vsel %vm4182_vm6, %v14601_v61, -inf }
 0x822   : > { %v10417_v59 = vpop.f32.mrb[20].mxu1  ;;  %v4186_v60 = vsel %vm4182_vm6, %v14596_v58, -inf }
 0x823   : > { %v4118_v62 = vmul.f32 0.35355338, %v10417_v59  ;;  %4187 = vmax.xlane.f32.xlu1 %v4186_v60  ;;  %v3830_v54 = vpop.f32.mrb[21].mxu1 }
 0x824   : > { %v4116_v12 = vmul.f32 0.35355338, %v3830_v54  ;;  %4184 = vmax.xlane.f32.xlu0 %v4183_v2  ;;  %v10418_v53 = vpop.f32.mrb[22].mxu1 }
 0x825   : > { %v4119_v55 = vmul.f32 0.35355338, %v10418_v53  ;;  %v3833_v63 = vpop.f32.mrb[23].mxu1  ;;  %v14606_v1 = vadd.f32 %v14585_v42, %v4118_v62 }
 0x826   : > { %v4117_v11 = vmul.f32 0.35355338, %v3833_v63  ;;  %v14613_v14 = vadd.f32 %v14585_v42, %v4116_v12 }
 0x827   : > { %v4201_v8 = vsel %vm4182_vm6, %v14606_v1, -inf  ;;  %v14616_v15 = vadd.f32 %v14585_v42, %v4119_v55 }
 0x828   : > { %4193 = vmax.xlane.f32.xlu0 %v4192_v6  ;;  %4202 = vmax.xlane.f32.xlu1 %v4201_v8  ;;  %v4195_v16 = vsel %vm4182_vm6, %v14613_v14, -inf  ;;  %v14623_v18 = vadd.f32 %v14585_v42, %v4117_v11 }
 0x829   : > { %v4204_v17 = vsel %vm4182_vm6, %v14616_v15, -inf }
 0x82a   : > { %v4198_v19 = vsel %vm4182_vm6, %v14623_v18, -inf }
 0x82c   : > { %4196 = vmax.xlane.f32.xlu1 %v4195_v16  ;;  %4205 = vmax.xlane.f32.xlu0 %v4204_v17 }
 0x830   : > { %4199 = vmax.xlane.f32.xlu0 %v4198_v19 }
 0x890   : > { %v10429_v20 = vpop.f32.mrb[24].mxu0 }
 0x891   : > { %v4122_v5 = vmul.f32 0.35355338, %v10429_v20  ;;  %v3903_v21 = vpop.f32.mrb[25].mxu0 }
 0x892   : > { %v10430_v22 = vpop.f32.mrb[26].mxu0  ;;  %v4120_v37 = vmul.f32 0.35355338, %v3903_v21 }
 0x893   : > { %v4123_v23 = vmul.f32 0.35355338, %v10430_v22  ;;  %v3906_v26 = vpop.f32.mrb[27].mxu0  ;;  %v14628_v27 = vadd.f32 %v14585_v42, %v4122_v5 }
 0x894   : > { %v4121_v45 = vmul.f32 0.35355338, %v3906_v26  ;;  %v14646_v59 = vadd.f32 %v14585_v42, %v4120_v37 }
 0x895   : > { %v4213_v29 = vsel %vm4182_vm6, %v14628_v27, -inf  ;;  %v14633_v31 = vadd.f32 %v14585_v42, %v4123_v23 }
 0x896   : > { %4214 = vmax.xlane.f32.xlu1 %v4213_v29  ;;  %v14651_v54 = vadd.f32 %v14585_v42, %v4121_v45  ;;  %v4207_v55 = vsel %vm4182_vm6, %v14646_v59, -inf }
 0x897   : > { %v4216_v32 = vsel %vm4182_vm6, %v14633_v31, -inf }
 0x898   : > { %v10433_v33 = vpop.f32.mrb[28].mxu0  ;;  %4217 = vmax.xlane.f32.xlu0 %v4216_v32  ;;  %v4210_v16 = vsel %vm4182_vm6, %v14651_v54, -inf }
 0x899   : > { %v10445_v35 = vpop.f32.mrb[24].mxu1  ;;  %v3919_v36 = vpop.f32.mrb[29].mxu0  ;;  %v4126_v12 = vmul.f32 0.35355338, %v10433_v33 }
 0x89a   : > { %v4130_v38 = vmul.f32 0.35355338, %v10445_v35  ;;  %v3992_v39 = vpop.f32.mrb[25].mxu1  ;;  %v10434_v40 = vpop.f32.mrb[30].mxu0  ;;  %v4124_v26 = vmul.f32 0.35355338, %v3919_v36 }
 0x89b   : > { %v10446_v43 = vpop.f32.mrb[26].mxu1  ;;  %v3922_v44 = vpop.f32.mrb[31].mxu0  ;;  %v4128_v50 = vmul.f32 0.35355338, %v3992_v39  ;;  %v4127_v11 = vmul.f32 0.35355338, %v10434_v40  ;;  %v14666_v5 = vadd.f32 %v14585_v42, %v4126_v12 }
 0x89c   : > { %v4131_v46 = vmul.f32 0.35355338, %v10446_v43  ;;  %v3995_v47 = vpop.f32.mrb[27].mxu1  ;;  %v14638_v48 = vadd.f32 %v14585_v42, %v4130_v38  ;;  %v4125_v33 = vmul.f32 0.35355338, %v3922_v44  ;;  %v14686_v36 = vadd.f32 %v14585_v42, %v4124_v26 }
 0x89d   : > { %v4129_v60 = vmul.f32 0.35355338, %v3995_v47  ;;  %v14656_v63 = vadd.f32 %v14585_v42, %v4128_v50  ;;  %v14671_v23 = vadd.f32 %v14585_v42, %v4127_v11  ;;  %v4225_v29 = vsel %vm4182_vm6, %v14666_v5, -inf }
 0x89e   : > { %v4237_v52 = vsel %vm4182_vm6, %v14638_v48, -inf  ;;  %v14643_v56 = vadd.f32 %v14585_v42, %v4131_v46  ;;  %v14691_v44 = vadd.f32 %v14585_v42, %v4125_v33  ;;  %v4219_v50 = vsel %vm4182_vm6, %v14686_v36, -inf }
 0x89f   : > { %4238 = vmax.xlane.f32.xlu1 %v4237_v52  ;;  %v14661_v17 = vadd.f32 %v14585_v42, %v4129_v60  ;;  %v4231_v20 = vsel %vm4182_vm6, %v14656_v63, -inf  ;;  %v4228_v35 = vsel %vm4182_vm6, %v14671_v23, -inf }
 0x8a0   : > { %v4240_v62 = vsel %vm4182_vm6, %v14643_v56, -inf  ;;  %v4222_v12 = vsel %vm4182_vm6, %v14691_v44, -inf }
 0x8a1   : > { %4241 = vmax.xlane.f32.xlu0 %v4240_v62  ;;  %v10449_v2 = vpop.f32.mrb[28].mxu1  ;;  %v4234_v22 = vsel %vm4182_vm6, %v14661_v17, -inf }
 0x8a2   : > { %v4008_v53 = vpop.f32.mrb[29].mxu1  ;;  %v4134_v19 = vmul.f32 0.35355338, %v10449_v2 }
 0x8a3   : > { %4208 = vmax.xlane.f32.xlu1 %v4207_v55  ;;  %v10450_v6 = vpop.f32.mrb[30].mxu1  ;;  %v4132_v38 = vmul.f32 0.35355338, %v4008_v53 }
 0x8a4   : > { %v4011_v8 = vpop.f32.mrb[31].mxu1  ;;  %v4135_v21 = vmul.f32 0.35355338, %v10450_v6  ;;  %v14676_v32 = vadd.f32 %v14585_v42, %v4134_v19 }
 0x8a5   : > { %4211 = vmax.xlane.f32.xlu0 %v4210_v16  ;;  %v4133_v40 = vmul.f32 0.35355338, %v4011_v8  ;;  %v14696_v52 = vadd.f32 %v14585_v42, %v4132_v38 }
 0x8a6   : > { %v14681_v37 = vadd.f32 %v14585_v42, %v4135_v21  ;;  %v4249_v39 = vsel %vm4182_vm6, %v14676_v32, -inf }
 0x8a7   : > { %4232 = vmax.xlane.f32.xlu1 %v4231_v20  ;;  %v14701_v53 = vadd.f32 %v14585_v42, %v4133_v40  ;;  %v4243_v6 = vsel %vm4182_vm6, %v14696_v52, -inf }
 0x8a8   : > { %v4252_v43 = vsel %vm4182_vm6, %v14681_v37, -inf }
 0x8a9   : > { %4235 = vmax.xlane.f32.xlu0 %v4234_v22  ;;  %v4246_v16 = vsel %vm4182_vm6, %v14701_v53, -inf }
 0x8ab   : > { %4226 = vmax.xlane.f32.xlu1 %v4225_v29 }
 0x8ad   : > { %4229 = vmax.xlane.f32.xlu0 %v4228_v35 }
 0x8af   : > { %4250 = vmax.xlane.f32.xlu1 %v4249_v39 }
 0x8b1   : > { %v10461_v45 = vpop.f32.mrb[32].mxu0  ;;  %4253 = vmax.xlane.f32.xlu0 %v4252_v43 }
 0x8b2   : > { %v4138_v46 = vmul.f32 0.35355338, %v10461_v45  ;;  %v4081_v47 = vpop.f32.mrb[33].mxu0 }
 0x8b3   : > { %v10462_v60 = vpop.f32.mrb[34].mxu0  ;;  %4220 = vmax.xlane.f32.xlu1 %v4219_v50  ;;  %v4136_v55 = vmul.f32 0.35355338, %v4081_v47 }
 0x8b4   : > { %v4139_v62 = vmul.f32 0.35355338, %v10462_v60  ;;  %v4084_v2 = vpop.f32.mrb[35].mxu0  ;;  %v14706_v11 = vadd.f32 %v14585_v42, %v4138_v46 }
 0x8b5   : > { %4223 = vmax.xlane.f32.xlu0 %v4222_v12  ;;  %v4137_v8 = vmul.f32 0.35355338, %v4084_v2  ;;  %v14716_v29 = vadd.f32 %v14585_v42, %v4136_v55 }
 0x8b6   : > { %v14711_v19 = vadd.f32 %v14585_v42, %v4139_v62  ;;  %v4261_v26 = vsel %vm4182_vm6, %v14706_v11, -inf }
 0x8b7   : > { %4244 = vmax.xlane.f32.xlu1 %v4243_v6  ;;  %v14721_v40 = vadd.f32 %v14585_v42, %v4137_v8  ;;  %v4255_v45 = vsel %vm4182_vm6, %v14716_v29, -inf }
 0x8b8   : > { %v4264_v39 = vsel %vm4182_vm6, %v14711_v19, -inf }
 0x8b9   : > { %v10465_v20 = vpop.f32.mrb[36].mxu0  ;;  %4247 = vmax.xlane.f32.xlu0 %v4246_v16  ;;  %v4258_v50 = vsel %vm4182_vm6, %v14721_v40, -inf  ;;  %v4191_v16 = vpop.xlane.xlu0 %4190 }
 0x8ba   : > { %v4142_v21 = vmul.f32 0.35355338, %v10465_v20  ;;  %v4097_v22 = vpop.f32.mrb[37].mxu0 }
 0x8bb   : > { %v10466_v33 = vpop.f32.mrb[38].mxu0  ;;  %4262 = vmax.xlane.f32.xlu1 %v4261_v26  ;;  %v4140_v43 = vmul.f32 0.35355338, %v4097_v22  ;;  %v4281_v22 = vsub.f32 %v14588_v49, %v4191_v16 }
 0x8bc   : > { %v4143_v35 = vmul.f32 0.35355338, %v10466_v33  ;;  %v4100_v38 = vpop.f32.mrb[39].mxu0  ;;  %v14726_v46 = vadd.f32 %v14585_v42, %v4142_v21  ;;  %v4188_v21 = vpop.xlane.xlu1 %4187 }
 0x8bd   : > { %4265 = vmax.xlane.f32.xlu0 %v4264_v39  ;;  %v4141_v47 = vmul.f32 0.35355338, %v4100_v38  ;;  %v14736_v2 = vadd.f32 %v14585_v42, %v4140_v43  ;;  %v4185_v20 = vpop.xlane.xlu0 %4184  ;;  %v4280_v43 = vsub.f32 %v14596_v58, %v4188_v21 }
 0x8be   : > { %v14731_v60 = vadd.f32 %v14585_v42, %v4143_v35  ;;  %v4273_v62 = vsel %vm4182_vm6, %v14726_v46, -inf  ;;  %v4315_v35 = vmul.f32 1.442695, %v4281_v22  ;;  %v4279_v38 = vsub.f32 %v14593_v57, %v4185_v20 }
 0x8bf   : > { %4256 = vmax.xlane.f32.xlu1 %v4255_v45  ;;  %v14741_v55 = vadd.f32 %v14585_v42, %v4141_v47  ;;  %v4267_v6 = vsel %vm4182_vm6, %v14736_v2, -inf }
 0x8c0   : > { %v4276_v12 = vsel %vm4182_vm6, %v14731_v60, -inf  ;;  %v4203_v33 = vpop.xlane.xlu1 %4202  ;;  %11912 = vpow2.f32 %v4315_v35  ;;  %v4311_v47 = vmul.f32 1.442695, %v4279_v38 }
 0x8c1   : > { %4259 = vmax.xlane.f32.xlu0 %v4258_v50  ;;  %v4270_v8 = vsel %vm4182_vm6, %v14741_v55, -inf  ;;  %v4194_v42 = vpop.xlane.xlu0 %4193  ;;  %v4285_v50 = vsub.f32 %v14606_v1, %v4203_v33 }
 0x8c2   : > { %v4282_v26 = vsub.f32 %v14601_v61, %v4194_v42 }
 0x8c3   : > { %4274 = vmax.xlane.f32.xlu1 %v4273_v62  ;;  %v4323_v61 = vmul.f32 1.442695, %v4285_v50 }
 0x8c4   : > { %v4317_v45 = vmul.f32 1.442695, %v4282_v26  ;;  %v4197_v62 = vpop.xlane.xlu1 %4196 }
 0x8c5   : > { %4277 = vmax.xlane.f32.xlu0 %v4276_v12  ;;  %v4206_v39 = vpop.xlane.xlu0 %4205 }
 0x8c6   : > { %11914 = vpow2.f32 %v4317_v45  ;;  %v4286_v12 = vsub.f32 %v14616_v15, %v4206_v39 }
 0x8c7   : > { %4268 = vmax.xlane.f32.xlu1 %v4267_v6  ;;  %11916 = vpow2.f32 %v4311_v47  ;;  %v4283_v6 = vsub.f32 %v14613_v14, %v4197_v62 }
 0x8c8   : > { %v4325_v57 = vmul.f32 1.442695, %v4286_v12 }
 0x8c9   : > { %4271 = vmax.xlane.f32.xlu0 %v4270_v8  ;;  %v4200_v49 = vpop.xlane.xlu0 %4199  ;;  %v4319_v58 = vmul.f32 1.442695, %v4283_v6 }
 0x8ca   : > { %v4284_v8 = vsub.f32 %v14623_v18, %v4200_v49  ;;  %v14759_v16 = vpop.eup %11912 }
 0x8cb   : > { %v4381_v15 = vsel %vm4182_vm6, %v14759_v16, 0.0 }
 0x8cc   : > { %v4321_v1 = vmul.f32 1.442695, %v4284_v8 }
 0x8d0   : > { %v14761_v20 = vpop.eup %11914 }
 0x8d1   : > { %v14765_v21 = vpop.eup %11916  ;;  %v4384_v14 = vsel %vm4182_vm6, %v14761_v20, 0.0 }
 0x8d2   : > { %v4375_v42 = vsel %vm4182_vm6, %v14765_v21, 0.0 }
 0x8d8   : > { %11598 = vrot.lane.b32.xlu1 %v14483_v10, %s16096_s3 }
 0x8df   : > { %11593 = vrot.lane.b32.xlu0 %v14483_v10, %s16098_s2  ;;  %v4313_v10 = vmul.f32 1.442695, %v4280_v43 }
 0x8e1   : > { %11918 = vpow2.f32 %v4313_v10 }
 0x8e2   : > { %11920 = vpow2.f32 %v4323_v61 }
 0x8e3   : > { %11922 = vpow2.f32 %v4325_v57 }
 0x8e4   : > { %11924 = vpow2.f32 %v4319_v58 }
 0x8e5   : > { %11926 = vpow2.f32 %v4321_v1 }
 0x8eb   : > { %v14769_v18 = vpop.eup %11918 }
 0x8ec   : > { %v14773_v22 = vpop.eup %11920  ;;  %v4378_v26 = vsel %vm4182_vm6, %v14769_v18, 0.0 }
 0x8ed   : > { %v14777_v33 = vpop.eup %11922  ;;  %v4393_v35 = vsel %vm4182_vm6, %v14773_v22, 0.0 }
 0x8ee   : > { %v14781_v38 = vpop.eup %11924  ;;  %v4396_v39 = vsel %vm4182_vm6, %v14777_v33, 0.0 }
 0x8ef   : > { %v14785_v43 = vpop.eup %11926  ;;  %v4387_v45 = vsel %vm4182_vm6, %v14781_v38, 0.0 }
 0x8f0   : > { %v4390_v47 = vsel %vm4182_vm6, %v14785_v43, 0.0 }
 0x8fc   : > { %4382 = vadd.xlane.f32.xlu1 %v4381_v15 }
 0x8fe   : > { %4385 = vadd.xlane.f32.xlu0 %v4384_v14 }
 0x900   : > { %4376 = vadd.xlane.f32.xlu1 %v4375_v42 }
 0x902   : > { %4379 = vadd.xlane.f32.xlu0 %v4378_v26 }
 0x904   : > { %4394 = vadd.xlane.f32.xlu1 %v4393_v35 }
 0x906   : > { %4397 = vadd.xlane.f32.xlu0 %v4396_v39 }
 0x908   : > { %4388 = vadd.xlane.f32.xlu1 %v4387_v45 }
 0x90a   : > { %4391 = vadd.xlane.f32.xlu0 %v4390_v47 }
 0x923   : > { %v4215_v50 = vpop.xlane.xlu1 %4214 }
 0x924   : > { %v4289_v62 = vsub.f32 %v14628_v27, %v4215_v50 }
 0x925   : > { %v4218_v12 = vpop.xlane.xlu0 %4217 }
 0x926   : > { %v4331_v10 = vmul.f32 1.442695, %v4289_v62  ;;  %v4290_v14 = vsub.f32 %v14633_v31, %v4218_v12 }
 0x928   : > { %11928 = vpow2.f32 %v4331_v10  ;;  %v4333_v39 = vmul.f32 1.442695, %v4290_v14 }
 0x92c   : > { %v4239_v49 = vpop.xlane.xlu1 %4238 }
 0x92d   : > { %v4297_v61 = vsub.f32 %v14638_v48, %v4239_v49 }
 0x92e   : > { %v4242_v6 = vpop.xlane.xlu0 %4241 }
 0x92f   : > { %v4347_v57 = vmul.f32 1.442695, %v4297_v61  ;;  %v4298_v45 = vsub.f32 %v14643_v56, %v4242_v6 }
 0x930   : > { %v4209_v8 = vpop.xlane.xlu1 %4208 }
 0x931   : > { %11930 = vpow2.f32 %v4347_v57  ;;  %v4287_v58 = vsub.f32 %v14646_v59, %v4209_v8  ;;  %v4349_v10 = vmul.f32 1.442695, %v4298_v45 }
 0x932   : > { %v14794_v1 = vpop.eup %11928  ;;  %v4212_v15 = vpop.xlane.xlu0 %4211 }
 0x933   : > { %v4327_v42 = vmul.f32 1.442695, %v4287_v58  ;;  %v4405_v27 = vsel %vm4182_vm6, %v14794_v1, 0.0  ;;  %v4288_v12 = vsub.f32 %v14651_v54, %v4212_v15 }
 0x934   : > { %v4233_v26 = vpop.xlane.xlu1 %4232  ;;  %4406 = vadd.xlane.f32.xlu1 %v4405_v27 }
 0x935   : > { %11932 = vpow2.f32 %v4327_v42  ;;  %v4295_v48 = vsub.f32 %v14656_v63, %v4233_v26 }
 0x936   : > { %v4236_v35 = vpop.xlane.xlu0 %4235 }
 0x937   : > { %v4343_v47 = vmul.f32 1.442695, %v4295_v48  ;;  %v4296_v8 = vsub.f32 %v14661_v17, %v4236_v35 }
 0x938   : > { %v4227_v59 = vpop.xlane.xlu1 %4226 }
 0x939   : > { %11934 = vpow2.f32 %v4343_v47  ;;  %v4293_v50 = vsub.f32 %v14666_v5, %v4227_v59  ;;  %v4329_v5 = vmul.f32 1.442695, %v4288_v12 }
 0x93a   : > { %v4230_v62 = vpop.xlane.xlu0 %4229  ;;  %11936 = vpow2.f32 %v4333_v39 }
 0x93b   : > { %v14802_v31 = vpop.eup %11930  ;;  %v4339_v49 = vmul.f32 1.442695, %v4293_v50 }
 0x93c   : > { %v4251_v61 = vpop.xlane.xlu1 %4250  ;;  %v4429_v63 = vsel %vm4182_vm6, %v14802_v31, 0.0 }
 0x93d   : > { %11938 = vpow2.f32 %v4339_v49  ;;  %v4301_v56 = vsub.f32 %v14676_v32, %v4251_v61  ;;  %4430 = vadd.xlane.f32.xlu1 %v4429_v63  ;;  %v4345_v32 = vmul.f32 1.442695, %v4296_v8 }
 0x93e   : > { %v4254_v6 = vpop.xlane.xlu0 %4253  ;;  %11940 = vpow2.f32 %v4349_v10 }
 0x93f   : > { %v14808_v57 = vpop.eup %11932  ;;  %v4355_v58 = vmul.f32 1.442695, %v4301_v56 }
 0x940   : > { %v4221_v14 = vpop.xlane.xlu1 %4220  ;;  %v4399_v54 = vsel %vm4182_vm6, %v14808_v57, 0.0 }
 0x941   : > { %11942 = vpow2.f32 %v4355_v58  ;;  %v4291_v15 = vsub.f32 %v14686_v36, %v4221_v14  ;;  %4400 = vadd.xlane.f32.xlu1 %v4399_v54  ;;  %v4294_v36 = vsub.f32 %v14671_v23, %v4230_v62 }
 0x942   : > { %v4224_v42 = vpop.xlane.xlu0 %4223  ;;  %11944 = vpow2.f32 %v4329_v5 }
 0x943   : > { %v14814_v27 = vpop.eup %11934  ;;  %v4335_v26 = vmul.f32 1.442695, %v4291_v15  ;;  %v4341_v23 = vmul.f32 1.442695, %v4294_v36 }
 0x944   : > { %v4245_v48 = vpop.xlane.xlu1 %4244  ;;  %v4423_v39 = vsel %vm4182_vm6, %v14814_v27, 0.0  ;;  %v14818_v17 = vpop.eup %11936 }
 0x945   : > { %11946 = vpow2.f32 %v4335_v26  ;;  %v4299_v35 = vsub.f32 %v14696_v52, %v4245_v48  ;;  %4424 = vadd.xlane.f32.xlu0 %v4423_v39  ;;  %v4408_v12 = vsel %vm4182_vm6, %v14818_v17, 0.0  ;;  %v4302_v52 = vsub.f32 %v14681_v37, %v4254_v6 }
 0x946   : > { %v4248_v45 = vpop.xlane.xlu0 %4247  ;;  %11948 = vpow2.f32 %v4345_v32  ;;  %v4292_v6 = vsub.f32 %v14691_v44, %v4224_v42 }
 0x947   : > { %v14821_v47 = vpop.eup %11938  ;;  %v4351_v59 = vmul.f32 1.442695, %v4299_v35  ;;  %v4357_v37 = vmul.f32 1.442695, %v4302_v52 }
 0x948   : > { %v4263_v50 = vpop.xlane.xlu1 %4262  ;;  %v4417_v10 = vsel %vm4182_vm6, %v14821_v47, 0.0  ;;  %v14828_v49 = vpop.eup %11940  ;;  %v4337_v42 = vmul.f32 1.442695, %v4292_v6 }
 0x949   : > { %v4305_v61 = vsub.f32 %v14706_v11, %v4263_v50  ;;  %4418 = vadd.xlane.f32.xlu1 %v4417_v10  ;;  %4409 = vadd.xlane.f32.xlu0 %v4408_v12  ;;  %11950 = vpow2.f32 %v4351_v59  ;;  %v4432_v58 = vsel %vm4182_vm6, %v14828_v49, 0.0  ;;  %v4300_v59 = vsub.f32 %v14701_v53, %v4248_v45 }
 0x94a   : > { %v4266_v63 = vpop.xlane.xlu0 %4265 }
 0x94b   : > { %v14832_v56 = vpop.eup %11942  ;;  %v4363_v62 = vmul.f32 1.442695, %v4305_v61 }
 0x94c   : > { %v4257_v5 = vpop.xlane.xlu1 %4256  ;;  %v4441_v8 = vsel %vm4182_vm6, %v14832_v56, 0.0  ;;  %v14838_v14 = vpop.eup %11944 }
 0x94d   : > { %11952 = vpow2.f32 %v4363_v62  ;;  %v4303_v11 = vsub.f32 %v14716_v29, %v4257_v5  ;;  %4442 = vadd.xlane.f32.xlu1 %v4441_v8  ;;  %4433 = vadd.xlane.f32.xlu0 %v4432_v58  ;;  %v4402_v35 = vsel %vm4182_vm6, %v14838_v14, 0.0 }
 0x94e   : > { %v4260_v54 = vpop.xlane.xlu0 %4259  ;;  %11954 = vpow2.f32 %v4341_v23  ;;  %v4306_v23 = vsub.f32 %v14711_v19, %v4266_v63 }
 0x94f   : > { %v14842_v15 = vpop.eup %11946  ;;  %v4359_v32 = vmul.f32 1.442695, %v4303_v11  ;;  %v4304_v26 = vsub.f32 %v14721_v40, %v4260_v54 }
 0x950   : > { %v4275_v48 = vpop.xlane.xlu1 %4274  ;;  %v4411_v39 = vsel %vm4182_vm6, %v14842_v15, 0.0  ;;  %v14849_v29 = vpop.eup %11948 }
 0x951   : > { %11956 = vpow2.f32 %v4359_v32  ;;  %v4361_v36 = vmul.f32 1.442695, %v4304_v26  ;;  %v4309_v44 = vsub.f32 %v14726_v46, %v4275_v48  ;;  %4412 = vadd.xlane.f32.xlu1 %v4411_v39  ;;  %4403 = vadd.xlane.f32.xlu0 %v4402_v35  ;;  %v4426_v12 = vsel %vm4182_vm6, %v14849_v29, 0.0 }
 0x952   : > { %11958 = vpow2.f32 %v4357_v37  ;;  %v4278_v40 = vpop.xlane.xlu0 %4277  ;;  %v4353_v46 = vmul.f32 1.442695, %v4300_v59 }
 0x953   : > { %11960 = vpow2.f32 %v4361_v36  ;;  %v4371_v50 = vmul.f32 1.442695, %v4309_v44  ;;  %v14855_v61 = vpop.eup %11950  ;;  %v4310_v63 = vsub.f32 %v14731_v60, %v4278_v40 }
 0x954   : > { %v4269_v10 = vpop.xlane.xlu1 %4268  ;;  %11962 = vpow2.f32 %v4337_v42  ;;  %v4435_v58 = vsel %vm4182_vm6, %v14855_v61, 0.0 }
 0x955   : > { %v4307_v52 = vsub.f32 %v14736_v2, %v4269_v10  ;;  %4427 = vadd.xlane.f32.xlu0 %v4426_v12  ;;  %11964 = vpow2.f32 %v4371_v50  ;;  %v4365_v2 = vmul.f32 1.442695, %v4306_v23  ;;  %v4373_v26 = vmul.f32 1.442695, %v4310_v63 }
 0x956   : > { %v4272_v62 = vpop.xlane.xlu0 %4271  ;;  %11966 = vpow2.f32 %v4353_v46 }
 0x957   : > { %v14859_v5 = vpop.eup %11952  ;;  %v4367_v53 = vmul.f32 1.442695, %v4307_v52  ;;  %v4308_v45 = vsub.f32 %v14741_v55, %v4272_v62 }
 0x958   : > { %v4453_v8 = vsel %vm4182_vm6, %v14859_v5, 0.0  ;;  %v14866_v11 = vpop.eup %11954 }
 0x959   : > { %4454 = vadd.xlane.f32.xlu1 %v4453_v8  ;;  %4436 = vadd.xlane.f32.xlu0 %v4435_v58  ;;  %11968 = vpow2.f32 %v4367_v53  ;;  %v4369_v37 = vmul.f32 1.442695, %v4308_v45  ;;  %v4420_v54 = vsel %vm4182_vm6, %v14866_v11, 0.0  ;;  %v14913_v53 = vpop.permute.xlu1 %11598 }
 0x95a   : > { %11970 = vpow2.f32 %v4365_v2  ;;  %v11594_v45 = vpop.permute.xlu0 %11593 }
 0x95b   : > { %v14868_v19 = vpop.eup %11956  ;;  %11972 = vpow2.f32 %v4369_v37 }
 0x95c   : > { %v14871_v6 = vpop.eup %11958  ;;  %v4447_v55 = vsel %vm4182_vm6, %v14868_v19, 0.0  ;;  %11974 = vpow2.f32 %v4373_v26 }
 0x95d   : > { %v14877_v32 = vpop.eup %11960  ;;  %4448 = vadd.xlane.f32.xlu1 %v4447_v55  ;;  %4421 = vadd.xlane.f32.xlu0 %v4420_v54  ;;  %v4444_v60 = vsel %vm4182_vm6, %v14871_v6, 0.0 }
 0x95e   : > { %v14879_v48 = vpop.eup %11962  ;;  %v4450_v39 = vsel %vm4182_vm6, %v14877_v32, 0.0 }
 0x95f   : > { %v14885_v35 = vpop.eup %11964  ;;  %v4414_v44 = vsel %vm4182_vm6, %v14879_v48, 0.0 }
 0x960   : > { %v14887_v36 = vpop.eup %11966  ;;  %v4465_v42 = vsel %vm4182_vm6, %v14885_v35, 0.0 }
 0x961   : > { %4445 = vadd.xlane.f32.xlu0 %v4444_v60  ;;  %4451 = vadd.xlane.f32.xlu1 %v4450_v39  ;;  %v4438_v50 = vsel %vm4182_vm6, %v14887_v36, 0.0 }
 0x963   : > { %v14893_v59 = vpop.eup %11968 }
 0x964   : > { %v14895_v40 = vpop.eup %11970  ;;  %v4459_v10 = vsel %vm4182_vm6, %v14893_v59, 0.0 }
 0x965   : > { %4415 = vadd.xlane.f32.xlu0 %v4414_v44  ;;  %4466 = vadd.xlane.f32.xlu1 %v4465_v42  ;;  %v14901_v12 = vpop.eup %11972  ;;  %v4456_v52 = vsel %vm4182_vm6, %v14895_v40, 0.0 }
 0x966   : > { %v4462_v46 = vsel %vm4182_vm6, %v14901_v12, 0.0  ;;  %v14907_v23 = vpop.eup %11974 }
 0x967   : > { %v4468_v62 = vsel %vm4182_vm6, %v14907_v23, 0.0 }
 0x969   : > { %4439 = vadd.xlane.f32.xlu0 %v4438_v50  ;;  %4460 = vadd.xlane.f32.xlu1 %v4459_v10 }
 0x96d   : > { %4457 = vadd.xlane.f32.xlu0 %v4456_v52  ;;  %4463 = vadd.xlane.f32.xlu1 %v4462_v46  ;;  %v11561_v52 = vunpack.i.h.bf16 %v14564_v0  ;;  %v11560_v46 = vunpack.i.l.bf16 %v14564_v0 }
 0x971   : > { %4469 = vadd.xlane.f32.xlu0 %v4468_v62 }
 0x97e   : > { %11608 = vrot.lane.b32.xlu1 %v14479_v3, %s16096_s3  ;;  %s16105_s3 = smov 8  }
 0x987   : > { %11603 = vrot.lane.b32.xlu0 %v14479_v3, %s16098_s2  ;;  %s16103_s2 = smov 16  }
 0x989   : > { %v4383_v8 = vpop.xlane.xlu1 %4382 }
 0x98b   : > { %v4386_v58 = vpop.xlane.xlu0 %4385 }
 0x98c   : > { %11976 = vrcp.f32 %v4386_v58 }
 0x98d   : > { %v4377_v2 = vpop.xlane.xlu1 %4376 }
 0x98e   : > { %11978 = vrcp.f32 %v4377_v2 }
 0x98f   : > { %11980 = vrcp.f32 %v4383_v8  ;;  %v4380_v63 = vpop.xlane.xlu0 %4379 }
 0x990   : > { %11982 = vrcp.f32 %v4380_v63 }
 0x991   : > { %v4395_v37 = vpop.xlane.xlu1 %4394 }
 0x993   : > { %v4398_v55 = vpop.xlane.xlu0 %4397 }
 0x994   : > { %11984 = vrcp.f32 %v4398_v55  ;;  %v11595_v55 = vunpack.i.l.bf16 %v11594_v45 }
 0x995   : > { %v4389_v54 = vpop.xlane.xlu1 %4388 }
 0x996   : > { %11986 = vrcp.f32 %v4389_v54  ;;  %v11977_v26 = vpop.eup %11976 }
 0x997   : > { %11988 = vrcp.f32 %v4395_v37  ;;  %v4392_v60 = vpop.xlane.xlu0 %4391  ;;  %v4506_v42 = vmul.f32 %v11977_v26, %v14761_v20  ;;  %v11596_v37 = vunpack.i.h.bf16 %v11594_v45  ;;  %v4560_v20 = vpack.c.bf16 %v11561_v52, %v11560_v46 }
 0x998   : > { %v11979_v39 = vpop.eup %11978  ;;  %11990 = vrcp.f32 %v4392_v60 }
 0x999   : > { %v11981_v44 = vpop.eup %11980  ;;  %v4503_v50 = vmul.f32 %v11979_v39, %v14765_v21  ;;  %v4561_v26 = vpack.c.bf16 %v11596_v37, %v11595_v55 }
 0x99a   : > { %v11983_v3 = vpop.eup %11982  ;;  %v4505_v62 = vmul.f32 %v11981_v44, %v14759_v16 }
 0x99b   : > { %v4504_v10 = vmul.f32 %v11983_v3, %v14769_v18 }
 0x99c   : > { %v4536_v58 = vpack.c.bf16 %v4506_v42, %v4505_v62 }
 0x99d   : > { %v4535_v8 = vpack.c.bf16 %v4504_v10, %v4503_v50 }
 0x99e   : > { %v11985_v2 = vpop.eup %11984 }
 0x99f   : > { %10475 = vmatprep.mubr.msk.bf16.mxu1 %vm4182_vm6, %v4535_v8  ;;  %v4510_v0 = vmul.f32 %v11985_v2, %v14777_v33 }
 0x9a0   : > { %v11987_v63 = vpop.eup %11986  ;;  %10476 = vmatmul.mubr.msk.bf16.vlgmr.msra.gmra.mrb[32].mxu1 %vm4182_vm6, %v4536_v58 }
 0x9a1   : > { %v11989_v21 = vpop.eup %11988  ;;  %10500 = vmatpush3.bf16.msra.mxu1 %v14573_v24  ;;  %v4507_v16 = vmul.f32 %v11987_v63, %v14781_v38 }
 0x9a2   : > { %v11991_v18 = vpop.eup %11990  ;;  %10501 = vmatprep.subr.bf16.mxu1 %v4560_v20  ;;  %v4509_v60 = vmul.f32 %v11989_v21, %v14773_v22 }
 0x9a3   : > { %v4508_v54 = vmul.f32 %v11991_v18, %v14785_v43  ;;  %v11566_v18 = vunpack.i.h.bf16 %v14568_v51 }
 0x9a4   : > { %v4538_v45 = vpack.c.bf16 %v4510_v0, %v4509_v60  ;;  %v11565_v0 = vunpack.i.l.bf16 %v14568_v51  ;;  %v11601_v51 = vunpack.i.h.bf16 %v14913_v53 }
 0x9a5   : > { %10502 = vmatpush3.bf16.msra.mxu1 %v4560_v20  ;;  %v4537_v39 = vpack.c.bf16 %v4508_v54, %v4507_v16 }
 0x9a6   : > { %10503 = vmatprep.subr.bf16.mxu1 %v4561_v26 }
 0x9a7   : > { %10479 = vmatprep.mubr.msk.bf16.mxu1 %vm4182_vm6, %v4537_v39 }
 0x9a8   : > { %10480 = vmatmul.mubr.msk.bf16.gmra.mrb[36].mxu1 %vm4182_vm6, %v4538_v45 }
 0x9a9   : > { %10504 = vmatpush3.bf16.msra.mxu1 %v4561_v26 }
 0x9c1   : > { %v4407_v24 = vpop.xlane.xlu1 %4406 }
 0x9ca   : > { %v4431_v44 = vpop.xlane.xlu1 %4430 }
 0x9ce   : > { %v4401_v3 = vpop.xlane.xlu1 %4400 }
 0x9d2   : > { %v4425_v33 = vpop.xlane.xlu0 %4424 }
 0x9d6   : > { %v4419_v42 = vpop.xlane.xlu1 %4418  ;;  %v4410_v38 = vpop.xlane.xlu0 %4409 }
 0x9d7   : > { %11992 = vrcp.f32 %v4410_v38  ;;  %v4564_v38 = vpack.c.bf16 %v11566_v18, %v11565_v0 }
 0x9d8   : > { %11994 = vrcp.f32 %v4401_v3 }
 0x9d9   : > { %11996 = vrcp.f32 %v4407_v24 }
 0x9da   : > { %v4434_v50 = vpop.xlane.xlu0 %4433  ;;  %v14932_v43 = vpop.xlane.xlu1 %4442 }
 0x9de   : > { %v4404_v22 = vpop.xlane.xlu0 %4403  ;;  %v4413_v10 = vpop.xlane.xlu1 %4412 }
 0x9df   : > { %11998 = vrcp.f32 %v4404_v22 }
 0x9e0   : > { %12000 = vrcp.f32 %v4425_v33 }
 0x9e1   : > { %v11993_v8 = vpop.eup %11992 }
 0x9e2   : > { %v4428_v52 = vpop.xlane.xlu0 %4427  ;;  %v11995_v58 = vpop.eup %11994  ;;  %v4514_v37 = vmul.f32 %v11993_v8, %v14818_v17 }
 0x9e3   : > { %12002 = vrcp.f32 %v4428_v52  ;;  %v11997_v2 = vpop.eup %11996  ;;  %v4511_v16 = vmul.f32 %v11995_v58, %v14808_v57  ;;  %v11600_v57 = vunpack.i.l.bf16 %v14913_v53 }
 0x9e4   : > { %v4513_v26 = vmul.f32 %v11997_v2, %v14794_v1  ;;  %12004 = vrcp.f32 %v4419_v42 }
 0x9e5   : > { %12006 = vrcp.f32 %v4413_v10 }
 0x9e6   : > { %v4455_v46 = vpop.xlane.xlu1 %4454  ;;  %v4437_v62 = vpop.xlane.xlu0 %4436  ;;  %v4540_v45 = vpack.c.bf16 %v4514_v37, %v4513_v26 }
 0x9e9   : > { %v11999_v63 = vpop.eup %11998 }
 0x9ea   : > { %v4449_v55 = vpop.xlane.xlu1 %4448  ;;  %v4422_v20 = vpop.xlane.xlu0 %4421  ;;  %v4512_v54 = vmul.f32 %v11999_v63, %v14838_v14 }
 0x9eb   : > { %v12001_v21 = vpop.eup %12000  ;;  %12008 = vrcp.f32 %v4422_v20 }
 0x9ec   : > { %v4539_v39 = vpack.c.bf16 %v4512_v54, %v4511_v16  ;;  %v4519_v17 = vmul.f32 %v12001_v21, %v14814_v27 }
 0x9ed   : > { %v12003_v60 = vpop.eup %12002 }
 0x9ee   : > { %v4452_v24 = vpop.xlane.xlu1 %4451  ;;  %v4446_v3 = vpop.xlane.xlu0 %4445  ;;  %v4520_v33 = vmul.f32 %v12003_v60, %v14849_v29  ;;  %10491 = vmatprep.mubr.msk.bf16.mxu0 %vm4182_vm6, %v4539_v39  ;;  %v4565_v29 = vpack.c.bf16 %v11601_v51, %v11600_v57 }
 0x9ef   : > { %10492 = vmatmul.mubr.msk.bf16.vlgmr.msra.gmra.mrb[40].mxu0 %vm4182_vm6, %v4540_v45  ;;  %12010 = vrcp.f32 %v4452_v24  ;;  %v12005_v22 = vpop.eup %12004 }
 0x9f0   : > { %v4543_v1 = vpack.c.bf16 %v4520_v33, %v4519_v17  ;;  %10516 = vmatpush3.bf16.msra.mxu0 %v14577_v41  ;;  %12012 = vrcp.f32 %v4449_v55  ;;  %v12007_v41 = vpop.eup %12006  ;;  %v4517_v16 = vmul.f32 %v12005_v22, %v14821_v47 }
 0x9f1   : > { %10517 = vmatprep.subr.bf16.mxu0 %v4564_v38  ;;  %v4515_v37 = vmul.f32 %v12007_v41, %v14842_v15 }
 0x9f2   : > { %v4467_v27 = vpop.xlane.xlu1 %4466  ;;  %10507 = vmatprep.mubr.msk.bf16.mxu1 %vm4182_vm6, %v4543_v1  ;;  %v4416_v14 = vpop.xlane.xlu0 %4415 }
 0x9f3   : > { %12014 = vrcp.f32 %v4416_v14 }
 0x9f4   : > { %12016 = vrcp.f32 %v4431_v44  ;;  %10518 = vmatpush3.bf16.msra.mxu0 %v4564_v38 }
 0x9f5   : > { %12018 = vrcp.f32 %v4434_v50  ;;  %10519 = vmatprep.subr.bf16.mxu0 %v4565_v29  ;;  %v12009_v8 = vpop.eup %12008 }
 0x9f6   : > { %v4461_v53 = vpop.xlane.xlu1 %4460  ;;  %v4440_v42 = vpop.xlane.xlu0 %4439  ;;  %12020 = vrcp.f32 %v4455_v46  ;;  %v4518_v46 = vmul.f32 %v12009_v8, %v14866_v11 }
 0x9f7   : > { %12022 = vrcp.f32 %v4437_v62 }
 0x9f8   : > { %12024 = vrcp.f32 %v4440_v42  ;;  %10520 = vmatpush3.bf16.msra.mxu0 %v4565_v29  ;;  %v4542_v45 = vpack.c.bf16 %v4518_v46, %v4517_v16 }
 0x9f9   : > { %12026 = vrcp.f32 %v4461_v53  ;;  %v12011_v58 = vpop.eup %12010 }
 0x9fa   : > { %v4464_v10 = vpop.xlane.xlu1 %4463  ;;  %v4458_v52 = vpop.xlane.xlu0 %4457  ;;  %v4528_v18 = vmul.f32 %v12011_v58, %v14877_v32 }
 0x9fb   : > { %12028 = vrcp.f32 %v4464_v10  ;;  %v12013_v2 = vpop.eup %12012 }
 0x9fc   : > { %12030 = vrcp.f32 %v4458_v52  ;;  %v4527_v39 = vmul.f32 %v12013_v2, %v14868_v19 }
 0x9fd   : > { %v12015_v44 = vpop.eup %12014  ;;  %12032 = vrcp.f32 %v4446_v3 }
 0x9fe   : > { %v11609_v63 = vpop.permute.xlu1 %11608  ;;  %v4470_v50 = vpop.xlane.xlu0 %4469  ;;  %v4516_v21 = vmul.f32 %v12015_v44, %v14879_v48  ;;  %v4547_v3 = vpack.c.bf16 %v4528_v18, %v4527_v39 }
 0x9ff   : > { %v12017_v62 = vpop.eup %12016  ;;  %v11611_v55 = vunpack.i.h.bf16 %v11609_v63  ;;  %v11610_v20 = vunpack.i.l.bf16 %v11609_v63  ;;  %12034 = vrcp.f32 %v4470_v50  ;;  %v2977_v63 = vld [vmem:[%s16234_s1] sm:$0xff]  ;;  %v2978_v50 = vld [vmem:[%s16234_s1 + $0x8] sm:$0xff] }
 0xa00   : > { %v12019_v0 = vpop.eup %12018  ;;  %v4541_v26 = vpack.c.bf16 %v4516_v21, %v4515_v37  ;;  %12036 = vrcp.f32 %v14932_v43  ;;  %v4521_v51 = vmul.f32 %v12017_v62, %v14802_v31  ;;  %v5001_v37 = vpack.c.bf16 %v2978_v50, %v2977_v63 }
 0xa01   : > { %v12021_v54 = vpop.eup %12020  ;;  %v4566_v60 = vpack.c.bf16 %v11611_v55, %v11610_v20  ;;  %12038 = vrcp.f32 %v4467_v27  ;;  %v4522_v33 = vmul.f32 %v12019_v0, %v14828_v49 }
 0xa02   : > { %v12023_v15 = vpop.eup %12022  ;;  %v11604_v11 = vpop.permute.xlu0 %11603  ;;  %10495 = vmatprep.mubr.msk.bf16.mxu0 %vm4182_vm6, %v4541_v26  ;;  %v4529_v57 = vmul.f32 %v12021_v54, %v14859_v5 }
 0xa03   : > { %v12025_v24 = vpop.eup %12024  ;;  %v11606_v32 = vunpack.i.h.bf16 %v11604_v11  ;;  %v11605_v48 = vunpack.i.l.bf16 %v11604_v11  ;;  %10521 = vmatprep.subr.bf16.mxu0 %v4566_v60  ;;  %10496 = vmatmul.mubr.msk.bf16.gmra.mrb[44].mxu0 %vm4182_vm6, %v4542_v45  ;;  %v4523_v14 = vmul.f32 %v12023_v15, %v14855_v61  ;;  %v4544_v49 = vpack.c.bf16 %v4522_v33, %v4521_v51  ;;  %v2979_v15 = vld [vmem:[%s16234_s1 + $0x10] sm:$0xff]  ;;  %v2980_v11 = vld [vmem:[%s16234_s1 + $0x18] sm:$0xff]  ;;  %s16101_s1 = smov 24  }
 0xa04   : > { %v12027_v47 = vpop.eup %12026  ;;  %10522 = vmatpush3.bf16.msra.mxu0 %v4566_v60  ;;  %10523 = vmatprep.mubr.msk.bf16.mxu0 %vm4182_vm6, %v4547_v3  ;;  %v4524_v38 = vmul.f32 %v12025_v24, %v14887_v36  ;;  %v5002_v24 = vpack.c.bf16 %v2980_v11, %v2979_v15 }
 0xa05   : > { %v12029_v17 = vpop.eup %12028  ;;  %v4562_v19 = vpack.c.bf16 %v11606_v32, %v11605_v48  ;;  %v4531_v53 = vmul.f32 %v12027_v47, %v14893_v59 }
 0xa06   : > { %v12031_v43 = vpop.eup %12030  ;;  %v4532_v27 = vmul.f32 %v12029_v17, %v14901_v12  ;;  %v4545_v22 = vpack.c.bf16 %v4524_v38, %v4523_v14 }
 0xa07   : > { %v4530_v1 = vmul.f32 %v12031_v43, %v14895_v40  ;;  %10505 = vmatprep.subr.bf16.mxu1 %v4562_v19  ;;  %v12033_v42 = vpop.eup %12032 }
 0xa08   : > { %10506 = vmatpush3.bf16.msra.mxu1 %v4562_v19  ;;  %v4549_v31 = vpack.c.bf16 %v4532_v27, %v4531_v53  ;;  %v4526_v61 = vmul.f32 %v12033_v42, %v14871_v6 }
 0xa09   : > { %v4548_v29 = vpack.c.bf16 %v4530_v1, %v4529_v57  ;;  %v12035_v41 = vpop.eup %12034  ;;  %10531 = vmatprep.subr.bf16.mxu1 %v5001_v37 }
 0xa0a   : > { %v12037_v36 = vpop.eup %12036  ;;  %v4534_v40 = vmul.f32 %v12035_v41, %v14907_v23 }
 0xa0b   : > { %10508 = vmatmul.mubr.msk.bf16.vlgmr.msra.gmra.mrb[40].mxu1 %vm4182_vm6, %v4544_v49  ;;  %10524 = vmatmul.mubr.msk.bf16.vlgmr.msra.gmra.mrb[48].mxu0 %vm4182_vm6, %v4548_v29  ;;  %v12039_v5 = vpop.eup %12038  ;;  %v4525_v59 = vmul.f32 %v12037_v36, %v14832_v56 }
 0xa0c   : > { %10511 = vmatprep.mubr.msk.bf16.mxu1 %vm4182_vm6, %v4545_v22  ;;  %10527 = vmatprep.mubr.msk.bf16.mxu0 %vm4182_vm6, %v4549_v31  ;;  %v4533_v12 = vmul.f32 %v12039_v5, %v14885_v35 }
 0xa0d   : > { %v4546_v10 = vpack.c.bf16 %v4526_v61, %v4525_v59  ;;  %10532 = vmatpush3.bf16.msra.mxu1 %v5001_v37 }
 0xa0e   : > { %v4550_v52 = vpack.c.bf16 %v4534_v40, %v4533_v12  ;;  %10533 = vmatprep.subr.bf16.mxu1 %v5002_v24 }
 0xa11   : > { %10534 = vmatpush3.bf16.msra.mxu1 %v5002_v24 }
 0xa13   : > { %10512 = vmatmul.mubr.msk.bf16.gmra.mrb[44].mxu1 %vm4182_vm6, %v4546_v10  ;;  %10528 = vmatmul.mubr.msk.bf16.gmra.mrb[52].mxu0 %vm4182_vm6, %v4550_v52 }
 0xa73   : > { %v14976_v8 = vpop.f32.mrb[32].mxu1 }
 0xa74   : > { %v14978_v58 = vpop.f32.mrb[33].mxu1 }
 0xa75   : > { %v14980_v2 = vpop.f32.mrb[34].mxu1 }
 0xa76   : > { %v14982_v6 = vpop.f32.mrb[35].mxu1 }
 0xa7b   : > { %v14984_v23 = vpop.f32.mrb[36].mxu1 }
 0xa7c   : > { %v14986_v44 = vpop.f32.mrb[37].mxu1 }
 0xa7d   : > { %v14988_v56 = vpop.f32.mrb[38].mxu1 }
 0xa7e   : > { %v14990_v35 = vpop.f32.mrb[39].mxu1 }
 0xac2   : > { %v10493_v46 = vpop.f32.mrb[40].mxu0 }
 0xac3   : > { %v4690_v62 = vpop.f32.mrb[41].mxu0 }
 0xac4   : > { %v10494_v55 = vpop.f32.mrb[42].mxu0 }
 0xac5   : > { %v11612_v20 = vpack.i.bf16 %v10494_v55, %v10493_v46  ;;  %v4693_v21 = vpop.f32.mrb[43].mxu0 }
 0xac6   : > { %v11622_v18 = vpack.i.bf16 %v4693_v21, %v4690_v62 }
 0xac7   : > { %11613 = vrot.lane.b32.xlu1 %v11612_v20, %s16105_s3 }
 0xac8   : > { %11623 = vrot.lane.b32.xlu0 %v11622_v18, %s16105_s3 }
 0xad6   : > { %v10497_v0 = vpop.f32.mrb[44].mxu0 }
 0xad7   : > { %v4706_v16 = vpop.f32.mrb[45].mxu0 }
 0xad8   : > { %v10498_v54 = vpop.f32.mrb[46].mxu0 }
 0xad9   : > { %v11632_v26 = vpack.i.bf16 %v10498_v54, %v10497_v0  ;;  %v4709_v60 = vpop.f32.mrb[47].mxu0 }
 0xada   : > { %v11637_v39 = vpack.i.bf16 %v4709_v60, %v4706_v16 }
 0xade   : > { %v10509_v45 = vpop.f32.mrb[40].mxu1  ;;  %v10525_v32 = vpop.f32.mrb[48].mxu0 }
 0xadf   : > { %v4767_v48 = vpop.f32.mrb[41].mxu1  ;;  %v4844_v3 = vpop.f32.mrb[49].mxu0 }
 0xae0   : > { %v10510_v47 = vpop.f32.mrb[42].mxu1  ;;  %v10526_v33 = vpop.f32.mrb[50].mxu0 }
 0xae1   : > { %v11617_v17 = vpack.i.bf16 %v10510_v47, %v10509_v45  ;;  %v4770_v19 = vpop.f32.mrb[43].mxu1  ;;  %v11642_v43 = vpack.i.bf16 %v10526_v33, %v10525_v32  ;;  %v4847_v51 = vpop.f32.mrb[51].mxu0 }
 0xae2   : > { %v11627_v38 = vpack.i.bf16 %v4770_v19, %v4767_v48  ;;  %v11647_v57 = vpack.i.bf16 %v4847_v51, %v4844_v3 }
 0xae3   : > { %11618 = vrot.lane.b32.xlu1 %v11617_v17, %s16103_s2 }
 0xae4   : > { %11628 = vrot.lane.b32.xlu0 %v11627_v38, %s16103_s2 }
 0xae6   : > { %v10513_v1 = vpop.f32.mrb[44].mxu1  ;;  %v10529_v27 = vpop.f32.mrb[52].mxu0 }
 0xae7   : > { %11633 = vrot.lane.b32.xlu1 %v11632_v26, %s16105_s3  ;;  %v4783_v14 = vpop.f32.mrb[45].mxu1  ;;  %v4860_v49 = vpop.f32.mrb[53].mxu0 }
 0xae8   : > { %11638 = vrot.lane.b32.xlu0 %v11637_v39, %s16105_s3  ;;  %v10514_v29 = vpop.f32.mrb[46].mxu1  ;;  %v10530_v53 = vpop.f32.mrb[54].mxu0  ;;  %s16237_s3 = sld [smem:[#allocation108_spill]] }
 0xae9   : > { %v11657_v42 = vpack.i.bf16 %v10514_v29, %v10513_v1  ;;  %v4786_v22 = vpop.f32.mrb[47].mxu1  ;;  %v11667_v41 = vpack.i.bf16 %v10530_v53, %v10529_v27  ;;  %v4863_v36 = vpop.f32.mrb[55].mxu0 }
 0xaea   : > { %v11652_v31 = vpack.i.bf16 %v4786_v22, %v4783_v14  ;;  %v11662_v5 = vpack.i.bf16 %v4863_v36, %v4860_v49 }
 0xaeb   : > { %11643 = vrot.lane.b32.xlu1 %v11642_v43, %s16101_s1 }
 0xaec   : > { %11648 = vrot.lane.b32.xlu0 %v11647_v57, %s16101_s1 }
 0xaef   : > { %11658 = vrot.lane.b32.xlu1 %v11657_v42, %s16103_s2 }
 0xaf0   : > { %11653 = vrot.lane.b32.xlu0 %v11652_v31, %s16103_s2  ;;  %s16236_s2 = sld [smem:[#allocation143_spill]] }
 0xaf3   : > { %11668 = vrot.lane.b32.xlu1 %v11667_v41, %s16101_s1 }
 0xaf4   : > { %11663 = vrot.lane.b32.xlu0 %v11662_v5, %s16101_s1  ;;  %s16235_s1 = sld [smem:[#allocation141_spill]] }
 0xb39   : > { %v11614_v61 = vpop.permute.xlu1 %11613 }
 0xb3a   : > { %v11624_v40 = vpop.permute.xlu0 %11623  ;;  %v11616_v10 = vunpack.i.h.bf16 %v11614_v61  ;;  %v11615_v52 = vunpack.i.l.bf16 %v11614_v61 }
 0xb3b   : > { %v11626_v63 = vunpack.i.h.bf16 %v11624_v40  ;;  %v11625_v37 = vunpack.i.l.bf16 %v11624_v40 }
 0xb3c   : > { %v4974_v18 = vsel %vm3142_vm4, %v14980_v2, %v11616_v10  ;;  %v4973_v0 = vsel %vm3142_vm4, %v14976_v8, %v11615_v52 }
 0xb3d   : > { %v4972_v16 = vsel %vm3142_vm4, %v14982_v6, %v11626_v63  ;;  %v4971_v26 = vsel %vm3142_vm4, %v14978_v58, %v11625_v37  ;;  %v9922_v37 = vld [vmem:[#allocation45] ss:$0 sm:$0xff] }
 0xb55   : > { %v11619_v59 = vpop.permute.xlu1 %11618 }
 0xb56   : > { %v11629_v12 = vpop.permute.xlu0 %11628  ;;  %v11621_v46 = vunpack.i.h.bf16 %v11619_v59  ;;  %v11620_v55 = vunpack.i.l.bf16 %v11619_v59 }
 0xb57   : > { %v11631_v20 = vunpack.i.h.bf16 %v11629_v12  ;;  %v11630_v21 = vunpack.i.l.bf16 %v11629_v12 }
 0xb58   : > { %v4983_v60 = vsel %vm4979_vm7, %v4974_v18, %v11621_v46  ;;  %v4982_v45 = vsel %vm4979_vm7, %v4973_v0, %v11620_v55 }
 0xb59   : > { %v11634_v50 = vpop.permute.xlu1 %11633  ;;  %v4981_v2 = vsel %vm4979_vm7, %v4972_v16, %v11631_v20  ;;  %v4980_v8 = vsel %vm4979_vm7, %v4971_v26, %v11630_v21 }
 0xb5a   : > { %v11639_v62 = vpop.permute.xlu0 %11638  ;;  %v11636_v48 = vunpack.i.h.bf16 %v11634_v50  ;;  %v11635_v47 = vunpack.i.l.bf16 %v11634_v50 }
 0xb5b   : > { %v11641_v43 = vunpack.i.h.bf16 %v11639_v62  ;;  %v11640_v38 = vunpack.i.l.bf16 %v11639_v62 }
 0xb5c   : > { %v4978_v29 = vsel %vm3142_vm4, %v14988_v56, %v11636_v48  ;;  %v4977_v53 = vsel %vm3142_vm4, %v14984_v23, %v11635_v47 }
 0xb5d   : > { %v11644_v54 = vpop.permute.xlu1 %11643  ;;  %v4976_v22 = vsel %vm3142_vm4, %v14990_v35, %v11641_v43  ;;  %v4975_v41 = vsel %vm3142_vm4, %v14986_v44, %v11640_v38 }
 0xb5e   : > { %v11646_v39 = vunpack.i.h.bf16 %v11644_v54  ;;  %v11645_v15 = vunpack.i.l.bf16 %v11644_v54  ;;  %v11649_v11 = vpop.permute.xlu0 %11648 }
 0xb5f   : > { %v11651_v24 = vunpack.i.h.bf16 %v11649_v11  ;;  %v11650_v32 = vunpack.i.l.bf16 %v11649_v11 }
 0xb60   : > { %v4991_v6 = vsel %vm4988_vm8, %v4982_v45, %v11645_v15  ;;  %v4992_v3 = vsel %vm4988_vm8, %v4983_v60, %v11646_v39 }
 0xb61   : > { %v4998_v58 = vpack.c.bf16 %v4992_v3, %v4991_v6  ;;  %v4989_v17 = vsel %vm4988_vm8, %v4980_v8, %v11650_v32  ;;  %v4990_v33 = vsel %vm4988_vm8, %v4981_v2, %v11651_v24  ;;  %v11659_v19 = vpop.permute.xlu1 %11658 }
 0xb62   : > { %v11654_v51 = vpop.permute.xlu0 %11653  ;;  %v4997_v57 = vpack.c.bf16 %v4990_v33, %v4989_v17  ;;  %v11661_v1 = vunpack.i.h.bf16 %v11659_v19  ;;  %v11660_v27 = vunpack.i.l.bf16 %v11659_v19 }
 0xb63   : > { %v11656_v14 = vunpack.i.h.bf16 %v11654_v51  ;;  %v11655_v49 = vunpack.i.l.bf16 %v11654_v51 }
 0xb64   : > { %10535 = vmatprep.mubr.msk.bf16.mxu1 %vm3244_vm5, %v4997_v57  ;;  %v4987_v61 = vsel %vm4979_vm7, %v4978_v29, %v11661_v1  ;;  %v4986_v40 = vsel %vm4979_vm7, %v4977_v53, %v11660_v27 }
 0xb65   : > { %10536 = vmatmul.mubr.msk.bf16.vlgmr.msra.gmra.mrb[48].mxu1 %vm3244_vm5, %v4998_v58  ;;  %v11669_v42 = vpop.permute.xlu1 %11668  ;;  %v4985_v23 = vsel %vm4979_vm7, %v4976_v22, %v11656_v14  ;;  %v4984_v12 = vsel %vm4979_vm7, %v4975_v41, %v11655_v49 }
 0xb66   : > { %v11671_v31 = vunpack.i.h.bf16 %v11669_v42  ;;  %v11670_v36 = vunpack.i.l.bf16 %v11669_v42  ;;  %v11664_v5 = vpop.permute.xlu0 %11663 }
 0xb67   : > { %v11666_v56 = vunpack.i.h.bf16 %v11664_v5  ;;  %v11665_v59 = vunpack.i.l.bf16 %v11664_v5 }
 0xb68   : > { %v4995_v10 = vsel %vm4988_vm8, %v4986_v40, %v11670_v36  ;;  %v4996_v35 = vsel %vm4988_vm8, %v4987_v61, %v11671_v31 }
 0xb69   : > { %v4993_v52 = vsel %vm4988_vm8, %v4984_v12, %v11665_v59  ;;  %v4994_v44 = vsel %vm4988_vm8, %v4985_v23, %v11666_v56  ;;  %v5000_v63 = vpack.c.bf16 %v4996_v35, %v4995_v10 }
 0xb6a   : > { %v4999_v50 = vpack.c.bf16 %v4994_v44, %v4993_v52 }
 0xb6c   : > { %10539 = vmatprep.mubr.msk.bf16.mxu1 %vm3244_vm5, %v4999_v50 }
 0xb6d   : > { %10540 = vmatmul.mubr.msk.bf16.gmra.mrb[52].mxu1 %vm3244_vm5, %v5000_v63 }
 0xc38   : > { %v10537_v46 = vpop.f32.mrb[48].mxu1 }
 0xc39   : > { %v5055_v62 = vpop.f32.mrb[49].mxu1  ;;  %v5064_v55 = vadd.f32 %v10537_v46, %v9922_v37 }
 0xc3a   : > { %v5056_v20 = vadd.f32 %v9922_v37, %v5055_v62  ;;  %v10538_v21 = vpop.f32.mrb[50].mxu1 }
 0xc3b   : > { %v5058_v18 = vpop.f32.mrb[51].mxu1  ;;  %v5067_v54 = vadd.f32 %v10538_v21, %v9922_v37  ;;  %v5088_v26 = vadd.f32 %v5064_v55, %v14374_v7 }
 0xc3c   : > { %v5086_v0 = vadd.f32 %v5056_v20, %v14371_v4  ;;  %v5059_v16 = vadd.f32 %v9922_v37, %v5058_v18 }
 0xc3d   : > { %v5089_v45 = vadd.f32 %v5067_v54, %v14377_v9  ;;  %v5100_v4 = vsel %vm3244_vm5, %v5088_v26, 0.0  ;;  %v2990_v54 = vld [vmem:[%s16235_s1] sm:$0xff] }
 0xc3e   : > { %v5087_v60 = vadd.f32 %v5059_v16, %v14381_v13  ;;  %v5094_v39 = vsel %vm3244_vm5, %v5086_v0, 0.0 }
 0xc3f   : > { %5095 = vadd.xlane.f32.xlu0 %v5094_v39  ;;  %v5103_v6 = vsel %vm3244_vm5, %v5089_v45, 0.0  ;;  %v2992_v39 = vld [vmem:[%s16235_s1 + $0x10] sm:$0xff] }
 0xc40   : > { %v10541_v15 = vpop.f32.mrb[52].mxu1  ;;  %v5097_v11 = vsel %vm3244_vm5, %v5087_v60, 0.0 }
 0xc41   : > { %v5071_v2 = vpop.f32.mrb[53].mxu1  ;;  %5098 = vadd.xlane.f32.xlu1 %v5097_v11  ;;  %v5080_v24 = vadd.f32 %v10541_v15, %v9922_v37  ;;  %v2993_v15 = vld [vmem:[%s16235_s1 + $0x18] sm:$0xff] }
 0xc42   : > { %v5072_v32 = vadd.f32 %v9922_v37, %v5071_v2  ;;  %v10542_v8 = vpop.f32.mrb[54].mxu1  ;;  %v5232_v11 = vpack.c.bf16 %v2993_v15, %v2992_v39  ;;  %v2996_v2 = vld [vmem:[%s16236_s2 + $0x8] sm:$0xff] }
 0xc43   : > { %v5074_v48 = vpop.f32.mrb[55].mxu1  ;;  %5101 = vadd.xlane.f32.xlu0 %v5100_v4  ;;  %v5092_v3 = vadd.f32 %v5080_v24, %v14394_v28  ;;  %v5083_v47 = vadd.f32 %v10542_v8, %v9922_v37  ;;  %v2997_v24 = vld [vmem:[%s16236_s2 + $0x10] sm:$0xff]  ;;  %v2998_v8 = vld [vmem:[%s16236_s2 + $0x18] sm:$0xff] }
 0xc44   : > { %v5090_v7 = vadd.f32 %v5072_v32, %v14389_v25  ;;  %v5075_v13 = vadd.f32 %v9922_v37, %v5074_v48  ;;  %v5329_v4 = vpack.c.bf16 %v2998_v8, %v2997_v24  ;;  %v2999_v8 = vld [vmem:[%s16236_s2 + $0x20] sm:$0xff] }
 0xc45   : > { %v5093_v17 = vadd.f32 %v5083_v47, %v14397_v30  ;;  %v5112_v33 = vsel %vm3244_vm5, %v5092_v3, 0.0 }
 0xc46   : > { %v5091_v58 = vadd.f32 %v5075_v13, %v14403_v34  ;;  %v5106_v9 = vsel %vm3244_vm5, %v5090_v7, 0.0 }
 0xc47   : > { %5107 = vadd.xlane.f32.xlu1 %v5106_v9  ;;  %5104 = vadd.xlane.f32.xlu0 %v5103_v6  ;;  %v5115_v25 = vsel %vm3244_vm5, %v5093_v17, 0.0 }
 0xc48   : > { %v5109_v19 = vsel %vm3244_vm5, %v5091_v58, 0.0 }
 0xc4b   : > { %5113 = vadd.xlane.f32.xlu1 %v5112_v33  ;;  %5110 = vadd.xlane.f32.xlu0 %v5109_v19 }
 0xc4f   : > { %5116 = vadd.xlane.f32.xlu0 %v5115_v25 }
 0xccc   : > { %v5096_v43 = vpop.xlane.xlu0 %5095 }
 0xccd   : > { %v5119_v28 = vmul.f32 0.03125, %v5096_v43 }
 0xcce   : > { %v5099_v38 = vpop.xlane.xlu1 %5098 }
 0xccf   : > { %v15060_v51 = vsub.f32 %v5086_v0, %v5119_v28  ;;  %v5120_v34 = vmul.f32 0.03125, %v5099_v38 }
 0xcd0   : > { %v5102_v57 = vpop.xlane.xlu0 %5101 }
 0xcd1   : > { %v15062_v1 = vsub.f32 %v5087_v60, %v5120_v34  ;;  %v5121_v27 = vmul.f32 0.03125, %v5102_v57  ;;  %v5135_v30 = vmul.f32 %v15060_v51, %v15060_v51 }
 0xcd3   : > { %v15066_v14 = vsub.f32 %v5088_v26, %v5121_v27  ;;  %v5143_v49 = vsel %vm3244_vm5, %v5135_v30, 0.0  ;;  %v5136_v29 = vmul.f32 %v15062_v1, %v15062_v1  ;;  %v2991_v26 = vld [vmem:[%s16235_s1 + $0x8] sm:$0xff]  ;;  %s16238_s1 = sld [smem:[#allocation106_spill]] }
 0xcd4   : > { %v5108_v53 = vpop.xlane.xlu1 %5107  ;;  %5144 = vadd.xlane.f32.xlu1 %v5143_v49  ;;  %v5105_v42 = vpop.xlane.xlu0 %5104  ;;  %v5231_v60 = vpack.c.bf16 %v2991_v26, %v2990_v54 }
 0xcd5   : > { %v5123_v22 = vmul.f32 0.03125, %v5108_v53  ;;  %v5122_v41 = vmul.f32 0.03125, %v5105_v42  ;;  %v5146_v31 = vsel %vm3244_vm5, %v5136_v29, 0.0  ;;  %v5137_v36 = vmul.f32 %v15066_v14, %v15066_v14  ;;  %v9927_v29 = vld [vmem:[#allocation54] ss:$0 sm:$0xff] }
 0xcd6   : > { %5147 = vadd.xlane.f32.xlu0 %v5146_v31  ;;  %10543 = vmatprep.subr.bf16.mxu0 %v5231_v60 }
 0xcd7   : > { %v15074_v5 = vsub.f32 %v5090_v7, %v5123_v22  ;;  %v15076_v61 = vsub.f32 %v5089_v45, %v5122_v41  ;;  %v5149_v40 = vsel %vm3244_vm5, %v5137_v36, 0.0  ;;  %10544 = vmatpush3.bf16.msra.mxu0 %v5231_v60  ;;  %v2995_v45 = vld [vmem:[%s16236_s2] sm:$0xff] }
 0xcd8   : > { %v5114_v56 = vpop.xlane.xlu1 %5113  ;;  %5150 = vadd.xlane.f32.xlu1 %v5149_v40  ;;  %v5111_v59 = vpop.xlane.xlu0 %5110  ;;  %10545 = vmatprep.subr.bf16.mxu0 %v5232_v11  ;;  %v5328_v32 = vpack.c.bf16 %v2996_v2, %v2995_v45 }
 0xcd9   : > { %v5125_v23 = vmul.f32 0.03125, %v5114_v56  ;;  %v5124_v12 = vmul.f32 0.03125, %v5111_v59  ;;  %v5139_v10 = vmul.f32 %v15074_v5, %v15074_v5  ;;  %v5138_v35 = vmul.f32 %v15076_v61, %v15076_v61 }
 0xcda   : > { %10555 = vmatprep.subr.bf16.mxu1 %v5328_v32 }
 0xcdb   : > { %v15083_v52 = vsub.f32 %v5092_v3, %v5125_v23  ;;  %v15085_v44 = vsub.f32 %v5091_v58, %v5124_v12  ;;  %v5155_v63 = vsel %vm3244_vm5, %v5139_v10, 0.0  ;;  %v5152_v50 = vsel %vm3244_vm5, %v5138_v35, 0.0  ;;  %10546 = vmatpush3.bf16.msra.mxu0 %v5232_v11  ;;  %10556 = vmatpush3.bf16.msra.mxu1 %v5328_v32  ;;  %v9928_v23 = vld [vmem:[#allocation52] ss:$0 sm:$0xff] }
 0xcdc   : > { %5156 = vadd.xlane.f32.xlu1 %v5155_v63  ;;  %5153 = vadd.xlane.f32.xlu0 %v5152_v50  ;;  %v5117_v37 = vpop.xlane.xlu0 %5116 }
 0xcdd   : > { %v5126_v46 = vmul.f32 0.03125, %v5117_v37  ;;  %v5141_v62 = vmul.f32 %v15083_v52, %v15083_v52  ;;  %v5140_v55 = vmul.f32 %v15085_v44, %v15085_v44  ;;  %10557 = vmatprep.subr.bf16.mxu1 %v5329_v4 }
 0xcdf   : > { %v15093_v20 = vsub.f32 %v5093_v17, %v5126_v46  ;;  %v5161_v21 = vsel %vm3244_vm5, %v5141_v62, 0.0  ;;  %v5158_v18 = vsel %vm3244_vm5, %v5140_v55, 0.0  ;;  %10558 = vmatpush3.bf16.msra.mxu1 %v5329_v4  ;;  %v3000_v4 = vld [vmem:[%s16236_s2 + $0x28] sm:$0xff] }
 0xce0   : > { %5162 = vadd.xlane.f32.xlu1 %v5161_v21  ;;  %5159 = vadd.xlane.f32.xlu0 %v5158_v18 }
 0xce1   : > { %v5142_v0 = vmul.f32 %v15093_v20, %v15093_v20 }
 0xce3   : > { %v5164_v16 = vsel %vm3244_vm5, %v5142_v0, 0.0 }
 0xce4   : > { %5165 = vadd.xlane.f32.xlu0 %v5164_v16 }
 0xd61   : > { %v5145_v48 = vpop.xlane.xlu1 %5144 }
 0xd62   : > { %v5167_v7 = vmul.f32 0.03125, %v5145_v48  ;;  %v5330_v48 = vpack.c.bf16 %v3000_v4, %v2999_v8 }
 0xd63   : > { %v5148_v13 = vpop.xlane.xlu0 %5147 }
 0xd64   : > { %v5175_v6 = vadd.f32 1e-05, %v5167_v7  ;;  %v5168_v3 = vmul.f32 0.03125, %v5148_v13  ;;  %10559 = vmatprep.subr.bf16.mxu1 %v5330_v48  ;;  %v3001_v7 = vld [vmem:[%s16236_s2 + $0x30] sm:$0xff]  ;;  %v3002_v13 = vld [vmem:[%s16236_s2 + $0x38] sm:$0xff]  ;;  %s16239_s2 = sld [smem:[#allocation109_spill]] }
 0xd65   : > { %v5151_v47 = vpop.xlane.xlu1 %5150  ;;  %10560 = vmatpush3.bf16.msra.mxu1 %v5330_v48 }
 0xd66   : > { %12040 = vrsqrt.f32 %v5175_v6  ;;  %v5176_v58 = vadd.f32 1e-05, %v5168_v3  ;;  %v5169_v9 = vmul.f32 0.03125, %v5151_v47  ;;  %v5331_v6 = vpack.c.bf16 %v3002_v13, %v3001_v7  ;;  %v2899_v3 = vld [vmem:[%s16237_s3] sm:$0xff] }
 0xd67   : > { %v13362_v47 = vmov 0.0   ;;  %v13364_v13 = vmov 0  }
 0xd68   : > { %12042 = vrsqrt.f32 %v5176_v58  ;;  %v5177_v17 = vadd.f32 1e-05, %v5169_v9  ;;  %10561 = vmatprep.subr.bf16.mxu1 %v5331_v6  ;;  %10571 = vmatprep.subr.bf16.mxu0 %v13362_v47  ;;  %v2900_v58 = vld [vmem:[%s16237_s3 + $0x8] sm:$0xff] }
 0xd69   : > { %v5157_v33 = vpop.xlane.xlu1 %5156  ;;  %v5154_v19 = vpop.xlane.xlu0 %5153  ;;  %10562 = vmatpush3.bf16.msra.mxu1 %v5331_v6  ;;  %v5557_v9 = vpack.c.bf16 %v2900_v58, %v2899_v3 }
 0xd6a   : > { %12044 = vrsqrt.f32 %v5177_v17  ;;  %v5171_v25 = vmul.f32 0.03125, %v5157_v33  ;;  %v5170_v43 = vmul.f32 0.03125, %v5154_v19  ;;  %10579 = vmatprep.subr.bf16.mxu1 %v13362_v47  ;;  %v2901_v17 = vld [vmem:[%s16237_s3 + $0x10] sm:$0xff]  ;;  %v2902_v33 = vld [vmem:[%s16237_s3 + $0x18] sm:$0xff]  ;;  %v15157_v19 = vld [vmem:[%s13768_s25] sm:$0xff]  ;;  %s16242_s3 = smov 104  }
 0xd6b   : > { %v2905_v8 = vld [vmem:[%s16239_s2 + $0x10] sm:$0xff]  ;;  %v2906_v48 = vld [vmem:[%s16239_s2 + $0x18] sm:$0xff] }
 0xd6c   : > { %v5179_v28 = vadd.f32 1e-05, %v5171_v25  ;;  %v5178_v38 = vadd.f32 1e-05, %v5170_v43  ;;  %v5558_v25 = vpack.c.bf16 %v2902_v33, %v2901_v17  ;;  %v5556_v43 = vpack.c.bf16 %v15157_v19, %v15157_v19 }
 0xd6d   : > { %v5163_v34 = vpop.xlane.xlu1 %5162  ;;  %v5160_v57 = vpop.xlane.xlu0 %5159  ;;  %v5677_v7 = vpack.c.bf16 %v2906_v48, %v2905_v8 }
 0xd6e   : > { %12046 = vrsqrt.f32 %v5179_v28  ;;  %v5173_v27 = vmul.f32 0.03125, %v5163_v34  ;;  %v5172_v30 = vmul.f32 0.03125, %v5160_v57  ;;  %v9929_v28 = vld [vmem:[#allocation49] ss:$0 sm:$0xff] }
 0xd6f   : > { %12048 = vrsqrt.f32 %v5178_v38 }
 0xd70   : > { %v12041_v49 = vpop.eup %12040  ;;  %v5181_v53 = vadd.f32 1e-05, %v5173_v27  ;;  %v5180_v42 = vadd.f32 1e-05, %v5172_v30 }
 0xd71   : > { %v5166_v22 = vpop.xlane.xlu0 %5165  ;;  %v5191_v41 = vmul.f32 %v12041_v49, %v15060_v51 }
 0xd72   : > { %v12043_v31 = vpop.eup %12042  ;;  %12050 = vrsqrt.f32 %v5181_v53  ;;  %v5174_v36 = vmul.f32 0.03125, %v5166_v22 }
 0xd73   : > { %12052 = vrsqrt.f32 %v5180_v42  ;;  %v5192_v40 = vmul.f32 %v12043_v31, %v15062_v1  ;;  %v5205_v56 = vmul.f32 %v9927_v29, %v5191_v41  ;;  %v2891_v41 = vld [vmem:[%s16238_s1] sm:$0xff]  ;;  %v2892_v31 = vld [vmem:[%s16238_s1 + $0x8] sm:$0xff] }
 0xd74   : > { %v12045_v59 = vpop.eup %12044  ;;  %v5182_v12 = vadd.f32 1e-05, %v5174_v36 }
 0xd75   : > { %v5206_v10 = vmul.f32 %v9927_v29, %v5192_v40  ;;  %v5193_v35 = vmul.f32 %v12045_v59, %v15066_v14  ;;  %v15111_v63 = vadd.f32 %v9928_v23, %v5205_v56 }
 0xd76   : > { %12054 = vrsqrt.f32 %v5182_v12  ;;  %v5618_v12 = vpack.c.bf16 %v2892_v31, %v2891_v41 }
 0xd77   : > { %v15113_v50 = vadd.f32 %v9928_v23, %v5206_v10  ;;  %v5207_v62 = vmul.f32 %v9927_v29, %v5193_v35 }
 0xd78   : > { %v12047_v37 = vpop.eup %12046 }
 0xd79   : > { %v12049_v51 = vpop.eup %12048  ;;  %v5227_v46 = vpack.c.bf16 %v15113_v50, %v15111_v63  ;;  %v5195_v55 = vmul.f32 %v12047_v37, %v15074_v5  ;;  %v15121_v16 = vadd.f32 %v9928_v23, %v5207_v62  ;;  %v2893_v37 = vld [vmem:[%s16238_s1 + $0x10] sm:$0xff] }
 0xd7a   : > { %v5194_v1 = vmul.f32 %v12049_v51, %v15076_v61  ;;  %v2894_v51 = vld [vmem:[%s16238_s1 + $0x18] sm:$0xff]  ;;  %s16240_s1 = smov 112  }
 0xd7b   : > { %10547 = vmatprep.mubr.msk.bf16.mxu0 %vm3244_vm5, %v5227_v46  ;;  %v5209_v60 = vmul.f32 %v9927_v29, %v5195_v55 }
 0xd7c   : > { %v12051_v21 = vpop.eup %12050  ;;  %v5208_v18 = vmul.f32 %v9927_v29, %v5194_v1 }
 0xd7d   : > { %v12053_v14 = vpop.eup %12052  ;;  %v5197_v0 = vmul.f32 %v12051_v21, %v15083_v52  ;;  %v15130_v52 = vadd.f32 %v9928_v23, %v5209_v60 }
 0xd7e   : > { %v15123_v54 = vadd.f32 %v9928_v23, %v5208_v18  ;;  %v5196_v26 = vmul.f32 %v12053_v14, %v15085_v44  ;;  %v5619_v18 = vpack.c.bf16 %v2894_v51, %v2893_v37 }
 0xd7f   : > { %v5211_v11 = vmul.f32 %v9927_v29, %v5197_v0 }
 0xd80   : > { %v12055_v39 = vpop.eup %12054  ;;  %v5228_v5 = vpack.c.bf16 %v15123_v54, %v15121_v16  ;;  %v5210_v61 = vmul.f32 %v9927_v29, %v5196_v26 }
 0xd81   : > { %v5198_v15 = vmul.f32 %v12055_v39, %v15093_v20  ;;  %v15136_v24 = vadd.f32 %v9928_v23, %v5211_v11 }
 0xd82   : > { %10548 = vmatmul.mubr.msk.bf16.vlgmr.msra.gmra.mrb[56].mxu0 %vm3244_vm5, %v5228_v5  ;;  %v15132_v45 = vadd.f32 %v9928_v23, %v5210_v61 }
 0xd83   : > { %v5212_v44 = vmul.f32 %v9927_v29, %v5198_v15  ;;  %10572 = vmatpush3.bf16.msra.mxu0 %v5557_v9 }
 0xd84   : > { %v5229_v2 = vpack.c.bf16 %v15132_v45, %v15130_v52  ;;  %10573 = vmatprep.subr.bf16.mxu0 %v13362_v47 }
 0xd85   : > { %v15138_v32 = vadd.f32 %v9928_v23, %v5212_v44 }
 0xd86   : > { %10551 = vmatprep.mubr.msk.bf16.mxu0 %vm3244_vm5, %v5229_v2  ;;  %v2903_v2 = vld [vmem:[%s16239_s2] sm:$0xff] }
 0xd87   : > { %v5230_v20 = vpack.c.bf16 %v15138_v32, %v15136_v24  ;;  %10574 = vmatpush3.bf16.msra.mxu0 %v5558_v25 }
 0xd88   : > { %10587 = vmatprep.subr.bf16.mxu0 %v13362_v47 }
 0xd8a   : > { %10552 = vmatmul.mubr.msk.bf16.gmra.mrb[60].mxu0 %vm3244_vm5, %v5230_v20  ;;  %v2904_v20 = vld [vmem:[%s16239_s2 + $0x8] sm:$0xff]  ;;  %s16241_s2 = smov 120  }
 0xd8b   : > { %10575 = vmatprep.mubr.msk.bf16.mxu0 %vm13363_vm9, %v13362_v47  ;;  %v5676_v4 = vpack.c.bf16 %v2904_v20, %v2903_v2 }
 0xd92   : > { %10576 = vmatmul.mubr.msk.bf16.vlgmr.msra.gmra.mrb[64].mxu0 %vm3244_vm5, %v5556_v43 }
 0xd93   : > { %10591 = vmatprep.mubr.msk.bf16.mxu0 %vm13363_vm9, %v13362_v47  ;;  %10588 = vmatpush3.bf16.msra.mxu0 %v5676_v4 }
 0xd94   : > { %10589 = vmatprep.subr.bf16.mxu0 %v13362_v47 }
 0xd97   : > { %10590 = vmatpush3.bf16.msra.mxu0 %v5677_v7 }
 0xd98   : > { %10601 = vmatprep.subr.bf16.mxu0 %v13362_v47 }
 0xd9a   : > { %10592 = vmatmul.mubr.bf16.vlgmr.msra.gmra.mrb[68].mxu0 %v13364_v13 }
 0xd9b   : > { %10603 = vmatprep.mubr.msk.bf16.mxu0 %vm13363_vm9, %v13362_v47 }
 0xe55   : > { %v10549_v38 = vpop.f32.mrb[56].mxu0 }
 0xe56   : > { %v5294_v34 = vadd.f32 %v10549_v38, %v9929_v28  ;;  %v5285_v57 = vpop.f32.mrb[57].mxu0 }
 0xe57   : > { %v5286_v27 = vadd.f32 %v9929_v28, %v5285_v57  ;;  %v10550_v30 = vpop.f32.mrb[58].mxu0 }
 0xe58   : > { %v5297_v49 = vadd.f32 %v10550_v30, %v9929_v28  ;;  %v5288_v29 = vpop.f32.mrb[59].mxu0  ;;  %v5318_v42 = vmax.f32 %v5294_v34, 0.0  ;;  %v9941_v34 = vld [vmem:[#allocation13] ss:$0 sm:$0xff] }
 0xe59   : > { %v5289_v53 = vadd.f32 %v9929_v28, %v5288_v29  ;;  %v5316_v36 = vmax.f32 %v5286_v27, 0.0 }
 0xe5a   : > { %v5319_v22 = vmax.f32 %v5297_v49, 0.0 }
 0xe5b   : > { %v5317_v40 = vmax.f32 %v5289_v53, 0.0 }
 0xe5c   : > { %v5325_v56 = vpack.c.bf16 %v5319_v22, %v5318_v42 }
 0xe5d   : > { %v5324_v59 = vpack.c.bf16 %v5317_v40, %v5316_v36  ;;  %v10553_v23 = vpop.f32.mrb[60].mxu0 }
 0xe5e   : > { %v5310_v10 = vadd.f32 %v10553_v23, %v9929_v28  ;;  %v5301_v35 = vpop.f32.mrb[61].mxu0 }
 0xe5f   : > { %v5302_v46 = vadd.f32 %v9929_v28, %v5301_v35  ;;  %v10554_v62 = vpop.f32.mrb[62].mxu0  ;;  %10563 = vmatprep.mubr.msk.bf16.mxu1 %vm4182_vm6, %v5324_v59 }
 0xe60   : > { %v5313_v1 = vadd.f32 %v10554_v62, %v9929_v28  ;;  %v5304_v55 = vpop.f32.mrb[63].mxu0  ;;  %10564 = vmatmul.mubr.msk.bf16.vlgmr.msra.gmra.mrb[56].mxu1 %vm4182_vm6, %v5325_v56  ;;  %v5322_v14 = vmax.f32 %v5310_v10, 0.0  ;;  %v9945_v56 = vld [vmem:[#allocation15] ss:$0 sm:$0xff] }
 0xe61   : > { %v5305_v21 = vadd.f32 %v9929_v28, %v5304_v55  ;;  %10580 = vmatpush3.bf16.msra.mxu1 %v5618_v12  ;;  %v5320_v26 = vmax.f32 %v5302_v46, 0.0  ;;  %v9943_v28 = vld [vmem:[#allocation10] ss:$0 sm:$0xff] }
 0xe62   : > { %v5323_v0 = vmax.f32 %v5313_v1, 0.0  ;;  %10581 = vmatprep.subr.bf16.mxu1 %v13362_v47 }
 0xe63   : > { %v5321_v60 = vmax.f32 %v5305_v21, 0.0 }
 0xe64   : > { %v5327_v39 = vpack.c.bf16 %v5323_v0, %v5322_v14 }
 0xe65   : > { %v5326_v5 = vpack.c.bf16 %v5321_v60, %v5320_v26  ;;  %10582 = vmatpush3.bf16.msra.mxu1 %v5619_v18  ;;  %v5602_v61 = vpop.f32.mrb[64].mxu0 }
 0xe66   : > { %10595 = vmatprep.subr.bf16.mxu1 %v13362_v47  ;;  %v10577_v15 = vpop.f32.mrb[65].mxu0  ;;  %v5603_v49 = vadd.f32 %v9941_v34, %v5602_v61 }
 0xe67   : > { %10567 = vmatprep.mubr.msk.bf16.mxu1 %vm4182_vm6, %v5326_v5  ;;  %v5605_v11 = vpop.f32.mrb[66].mxu0 }
 0xe68   : > { %10568 = vmatmul.mubr.msk.bf16.gmra.mrb[60].mxu1 %vm4182_vm6, %v5327_v39  ;;  %v10578_v44 = vpop.f32.mrb[67].mxu0  ;;  %v5737_v22 = vpack.c.bf16 %v5603_v49, %v5603_v49 }
 0xe69   : > { %10583 = vmatprep.mubr.msk.bf16.mxu1 %vm13363_vm9, %v13362_v47 }
 0xe6d   : > { %v5721_v41 = vpop.f32.mrb[68].mxu0 }
 0xe6e   : > { %v10593_v31 = vpop.f32.mrb[69].mxu0  ;;  %v15216_v35 = vadd.f32 %v9945_v56, %v5721_v41 }
 0xe6f   : > { %v5724_v36 = vpop.f32.mrb[70].mxu0 }
 0xe70   : > { %10584 = vmatmul.mubr.msk.bf16.vlgmr.msra.gmra.mrb[64].mxu1 %vm3244_vm5, %v5556_v43  ;;  %v10594_v40 = vpop.f32.mrb[71].mxu0  ;;  %v5981_v1 = vpack.c.bf16 %v15216_v35, %v15216_v35 }
 0xe71   : > { %10597 = vmatprep.mubr.msk.bf16.mxu1 %vm13363_vm9, %v13362_v47 }
 0xe72   : > { %v5989_v0 = vsel %vm3155_vm3, %v5981_v1, 0 }
 0xf33   : > { %v15189_v6 = vpop.f32.mrb[56].mxu1 }
 0xf34   : > { %v15191_v3 = vpop.f32.mrb[57].mxu1 }
 0xf35   : > { %v15193_v58 = vpop.f32.mrb[58].mxu1 }
 0xf36   : > { %v15195_v9 = vpop.f32.mrb[59].mxu1 }
 0xf3b   : > { %v15197_v17 = vpop.f32.mrb[60].mxu1 }
 0xf3c   : > { %v15199_v33 = vpop.f32.mrb[61].mxu1 }
 0xf3d   : > { %v15201_v25 = vpop.f32.mrb[62].mxu1 }
 0xf3e   : > { %v15203_v43 = vpop.f32.mrb[63].mxu1 }
 0xf43   : > { %v5660_v38 = vpop.f32.mrb[64].mxu1 }
 0xf44   : > { %v5661_v57 = vadd.f32 %v9943_v28, %v5660_v38  ;;  %v10585_v27 = vpop.f32.mrb[65].mxu1 }
 0xf45   : > { %v5663_v30 = vpop.f32.mrb[66].mxu1 }
 0xf46   : > { %5670 = vrot.lane.b32.xlu0 %v5661_v57, %s16240_s1  ;;  %5667 = vrot.lane.b32.xlu1 %v5661_v57, %s16241_s2  ;;  %v10586_v29 = vpop.f32.mrb[67].mxu1  ;;  %v5741_v53 = vpack.c.bf16 %v5661_v57, %v5661_v57 }
 0xf48   : > { %v5749_v42 = vsel %vm3142_vm4, %v5741_v53, 0 }
 0xf49   : > { %10596 = vmatpush3.bf16.xpose.msra.mxu1 %v5749_v42 }
 0xf4a   : > { %5612 = vrot.lane.b32.xlu0 %v5603_v49, %s16240_s1  ;;  %5609 = vrot.lane.b32.xlu1 %v5603_v49, %s16241_s2 }
 0xf4b   : > { %10607 = vmatprep.subr.bf16.mxu1 %v13362_v47 }
 0xf4e   : > { %5673 = vrot.lane.b32.xlu1 %v5661_v57, %s16242_s3 }
 0xf50   : > { %10598 = vmatmul.mubr.msk.bf16.vlgmr.msra.gmra.mrb[68].mxu1 %vm3142_vm4, %v5737_v22 }
 0xf51   : > { %10609 = vmatprep.mubr.msk.bf16.mxu1 %vm13363_vm9, %v13362_v47 }
 0xf52   : > { %5615 = vrot.lane.b32.xlu1 %v5603_v49, %s16242_s3 }
 0xfb8   : > { %v5671_v59 = vpop.permute.xlu0 %5670  ;;  %v5668_v23 = vpop.permute.xlu1 %5667 }
 0xfb9   : > { %v5743_v12 = vpack.c.bf16 %v5671_v59, %v5671_v59  ;;  %v5742_v10 = vpack.c.bf16 %v5668_v23, %v5668_v23 }
 0xfbb   : > { %v5795_v37 = vsel %vm3142_vm4, %v5742_v10, 0  ;;  %v5841_v51 = vsel %vm3142_vm4, %v5743_v12, 0 }
 0xfbc   : > { %10602 = vmatpush3.bf16.xpose.msra.mxu0 %v5795_v37  ;;  %v5610_v46 = vpop.permute.xlu1 %5609  ;;  %10608 = vmatpush3.bf16.xpose.msra.mxu1 %v5841_v51  ;;  %v5613_v62 = vpop.permute.xlu0 %5612 }
 0xfbd   : > { %10613 = vmatprep.subr.bf16.mxu0 %v13362_v47  ;;  %10619 = vmatprep.subr.bf16.mxu1 %v13362_v47  ;;  %v5739_v21 = vpack.c.bf16 %v5613_v62, %v5613_v62  ;;  %v5738_v18 = vpack.c.bf16 %v5610_v46, %v5610_v46 }
 0xfc0   : > { %v5674_v55 = vpop.permute.xlu1 %5673 }
 0xfc1   : > { %v5744_v14 = vpack.c.bf16 %v5674_v55, %v5674_v55 }
 0xfc3   : > { %10604 = vmatmul.mubr.msk.bf16.vlgmr.msra.gmra.mrb[72].mxu0 %vm3142_vm4, %v5738_v18  ;;  %10610 = vmatmul.mubr.msk.bf16.vlgmr.msra.gmra.mrb[72].mxu1 %vm3142_vm4, %v5739_v21  ;;  %v5887_v26 = vsel %vm3142_vm4, %v5744_v14, 0 }
 0xfc4   : > { %10614 = vmatpush3.bf16.xpose.msra.mxu0 %v5887_v26  ;;  %10615 = vmatprep.mubr.msk.bf16.mxu0 %vm13363_vm9, %v13362_v47  ;;  %v5616_v60 = vpop.permute.xlu1 %5615 }
 0xfc5   : > { %10620 = vmatpush3.bf16.msra.mxu1 %v5989_v0  ;;  %10625 = vmatprep.subr.bf16.mxu0 %v13362_v47  ;;  %v5740_v39 = vpack.c.bf16 %v5616_v60, %v5616_v60 }
 0xfc6   : > { %10621 = vmatprep.mubr.msk.bf16.mxu1 %vm13363_vm9, %v13362_v47  ;;  %10631 = vmatprep.subr.bf16.mxu1 %v13362_v47 }
 0xfcb   : > { %10616 = vmatmul.mubr.msk.bf16.vlgmr.msra.gmra.mrb[76].mxu0 %vm3142_vm4, %v5740_v39 }
 0xfcc   : > { %10627 = vmatprep.mubr.msk.bf16.mxu0 %vm13363_vm9, %v13362_v47 }
0x1023   : > { %v5785_v5 = vpop.f32.mrb[68].mxu1 }
0x1024   : > { %v5929_v61 = vmul.f32 0.35355338, %v5785_v5  ;;  %v10599_v15 = vpop.f32.mrb[69].mxu1 }
0x1025   : > { %v5788_v11 = vpop.f32.mrb[70].mxu1 }
0x1026   : > { %v10600_v44 = vpop.f32.mrb[71].mxu1  ;;  %v5933_v2 = vsel %vm3142_vm4, %v5929_v61, -inf }
0x1027   : > { %5934 = vmax.xlane.f32.xlu0 %v5933_v2 }
0x1096   : > { %v5831_v20 = vpop.f32.mrb[72].mxu0  ;;  %v5877_v8 = vpop.f32.mrb[72].mxu1 }
0x1097   : > { %v5930_v4 = vmul.f32 0.35355338, %v5831_v20  ;;  %v5931_v48 = vmul.f32 0.35355338, %v5877_v8  ;;  %v10605_v7 = vpop.f32.mrb[73].mxu0  ;;  %v10611_v13 = vpop.f32.mrb[73].mxu1 }
0x1098   : > { %v5834_v28 = vpop.f32.mrb[74].mxu0  ;;  %v5880_v38 = vpop.f32.mrb[74].mxu1 }
0x1099   : > { %v10606_v34 = vpop.f32.mrb[75].mxu0  ;;  %v10612_v57 = vpop.f32.mrb[75].mxu1  ;;  %v5936_v27 = vsel %vm3142_vm4, %v5930_v4, -inf  ;;  %v5939_v30 = vsel %vm3142_vm4, %v5931_v48, -inf }
0x109a   : > { %5937 = vmax.xlane.f32.xlu1 %v5936_v27  ;;  %5940 = vmax.xlane.f32.xlu0 %v5939_v30 }
0x109e   : > { %v5923_v49 = vpop.f32.mrb[76].mxu0 }
0x109f   : > { %v5932_v29 = vmul.f32 0.35355338, %v5923_v49  ;;  %v10617_v53 = vpop.f32.mrb[77].mxu0 }
0x10a0   : > { %v5926_v42 = vpop.f32.mrb[78].mxu0 }
0x10a1   : > { %v10618_v22 = vpop.f32.mrb[79].mxu0  ;;  %v5942_v41 = vsel %vm3142_vm4, %v5932_v29, -inf }
0x10a2   : > { %5943 = vmax.xlane.f32.xlu0 %v5942_v41 }
0x10ab   : > { %5728 = vrot.lane.b32.xlu1 %v15216_v35, %s16241_s2 }
0x10b4   : > { %v5935_v31 = vpop.xlane.xlu0 %5934 }
0x10b5   : > { %v5945_v36 = vsub.f32 %v5929_v61, %v5935_v31 }
0x10b7   : > { %v5949_v40 = vmul.f32 1.442695, %v5945_v36 }
0x10b9   : > { %12056 = vpow2.f32 %v5949_v40 }
0x10c3   : > { %v12057_v56 = vpop.eup %12056 }
0x10c4   : > { %v5957_v59 = vsel %vm3142_vm4, %v12057_v56, 0.0 }
0x10cf   : > { %5958 = vadd.xlane.f32.xlu1 %v5957_v59  ;;  %v2896_v59 = vld [vmem:[%s16243_s4 + $0x8] sm:$0xff] }
0x1127   : > { %v5938_v23 = vpop.xlane.xlu1 %5937  ;;  %v5941_v12 = vpop.xlane.xlu0 %5940 }
0x1128   : > { %v5946_v10 = vsub.f32 %v5930_v4, %v5938_v23  ;;  %v5947_v37 = vsub.f32 %v5931_v48, %v5941_v12  ;;  %v2897_v12 = vld [vmem:[%s16243_s4 + $0x10] sm:$0xff] }
0x112a   : > { %v5951_v51 = vmul.f32 1.442695, %v5946_v10  ;;  %v5953_v46 = vmul.f32 1.442695, %v5947_v37  ;;  %v2898_v10 = vld [vmem:[%s16243_s4 + $0x18] sm:$0xff] }
0x112b   : > { %v5729_v62 = vpop.permute.xlu1 %5728  ;;  %v6186_v37 = vpack.c.bf16 %v2898_v10, %v2897_v12 }
0x112c   : > { %12058 = vpow2.f32 %v5951_v51  ;;  %v5982_v1 = vpack.c.bf16 %v5729_v62, %v5729_v62 }
0x112d   : > { %12060 = vpow2.f32 %v5953_v46 }
0x112e   : > { %v6035_v55 = vsel %vm3155_vm3, %v5982_v1, 0 }
0x112f   : > { %10626 = vmatpush3.bf16.msra.mxu0 %v6035_v55  ;;  %v5944_v21 = vpop.xlane.xlu0 %5943 }
0x1130   : > { %v5948_v18 = vsub.f32 %v5932_v29, %v5944_v21  ;;  %10637 = vmatprep.subr.bf16.mxu0 %v13362_v47 }
0x1132   : > { %v5955_v14 = vmul.f32 1.442695, %v5948_v18 }
0x1134   : > { %12062 = vpow2.f32 %v5955_v14 }
0x1136   : > { %v12059_v0 = vpop.eup %12058 }
0x1137   : > { %v12061_v26 = vpop.eup %12060  ;;  %v5960_v60 = vsel %vm3142_vm4, %v12059_v0, 0.0 }
0x1138   : > { %5961 = vadd.xlane.f32.xlu0 %v5960_v60  ;;  %v5963_v39 = vsel %vm3142_vm4, %v12061_v26, 0.0 }
0x1139   : > { %5964 = vadd.xlane.f32.xlu1 %v5963_v39 }
0x113e   : > { %v12063_v5 = vpop.eup %12062 }
0x113f   : > { %v5966_v61 = vsel %vm3142_vm4, %v12063_v5, 0.0 }
0x1140   : > { %5967 = vadd.xlane.f32.xlu0 %v5966_v61 }
0x114a   : > { %5734 = vrot.lane.b32.xlu1 %v15216_v35, %s16242_s3 }
0x1156   : > { %5731 = vrot.lane.b32.xlu0 %v15216_v35, %s16240_s1 }
0x115c   : > { %v5959_v15 = vpop.xlane.xlu1 %5958 }
0x115d   : > { %12064 = vrcp.f32 %v5959_v15 }
0x1167   : > { %v12065_v11 = vpop.eup %12064 }
0x1168   : > { %v5973_v44 = vmul.f32 %v12065_v11, %v12057_v56  ;;  %v2895_v56 = vld [vmem:[%s16243_s4] sm:$0xff]  ;;  %s16247_s4 = sld [smem:[#allocation91_spill]] }
0x1169   : > { %v6185_v23 = vpack.c.bf16 %v2896_v59, %v2895_v56 }
0x116a   : > { %v5977_v2 = vpack.c.bf16 %v5973_v44, %v5973_v44 }
0x116c   : > { %10622 = vmatmul.mubr.msk.bf16.vlgmr.msra.gmra.mrb[76].mxu1 %vm3142_vm4, %v5977_v2 }
0x116d   : > { %10633 = vmatprep.mubr.msk.bf16.mxu1 %vm13363_vm9, %v13362_v47 }
0x11c5   : > { %v5962_v20 = vpop.xlane.xlu0 %5961 }
0x11c6   : > { %v5965_v8 = vpop.xlane.xlu1 %5964  ;;  %12066 = vrcp.f32 %v5962_v20 }
0x11c7   : > { %12068 = vrcp.f32 %v5965_v8 }
0x11ca   : > { %v5735_v48 = vpop.permute.xlu1 %5734 }
0x11cb   : > { %v5984_v35 = vpack.c.bf16 %v5735_v48, %v5735_v48 }
0x11cd   : > { %v5968_v4 = vpop.xlane.xlu0 %5967  ;;  %v6127_v49 = vsel %vm3155_vm3, %v5984_v35, 0 }
0x11ce   : > { %12070 = vrcp.f32 %v5968_v4 }
0x11d0   : > { %v12067_v7 = vpop.eup %12066 }
0x11d1   : > { %v12069_v13 = vpop.eup %12068  ;;  %v5732_v28 = vpop.permute.xlu0 %5731  ;;  %v5974_v38 = vmul.f32 %v12067_v7, %v12059_v0 }
0x11d2   : > { %v5983_v34 = vpack.c.bf16 %v5732_v28, %v5732_v28  ;;  %v5975_v57 = vmul.f32 %v12069_v13, %v12061_v26 }
0x11d3   : > { %v5978_v27 = vpack.c.bf16 %v5974_v38, %v5974_v38 }
0x11d4   : > { %v6081_v30 = vsel %vm3155_vm3, %v5983_v34, 0  ;;  %v5979_v29 = vpack.c.bf16 %v5975_v57, %v5975_v57 }
0x11d5   : > { %10628 = vmatmul.mubr.msk.bf16.vlgmr.msra.gmra.mrb[80].mxu0 %vm3142_vm4, %v5978_v27  ;;  %10632 = vmatpush3.bf16.msra.mxu1 %v6081_v30 }
0x11d6   : > { %10638 = vmatpush3.bf16.msra.mxu0 %v6127_v49  ;;  %10639 = vmatprep.mubr.msk.bf16.mxu0 %vm13363_vm9, %v13362_v47 }
0x11d7   : > { %10643 = vmatprep.subr.bf16.mxu1 %v13362_v47  ;;  %10651 = vmatprep.subr.bf16.mxu0 %v13362_v47 }
0x11d8   : > { %v12071_v53 = vpop.eup %12070  ;;  %10634 = vmatmul.mubr.msk.bf16.vlgmr.msra.gmra.mrb[80].mxu1 %vm3142_vm4, %v5979_v29 }
0x11d9   : > { %v5976_v42 = vmul.f32 %v12071_v53, %v12063_v5  ;;  %10647 = vmatprep.mubr.msk.bf16.mxu1 %vm13363_vm9, %v13362_v47  ;;  %10644 = vmatpush3.bf16.msra.mxu1 %v6185_v23  ;;  %v9934_v5 = vld [vmem:[#allocation51] ss:$0 sm:$0xff] }
0x11da   : > { %10645 = vmatprep.subr.bf16.mxu1 %v13362_v47  ;;  %v5385_v61 = vadd.f32 %v9934_v5, %v15191_v3  ;;  %v5393_v15 = vadd.f32 %v15189_v6, %v9934_v5  ;;  %v5396_v2 = vadd.f32 %v15193_v58, %v9934_v5  ;;  %v5388_v8 = vadd.f32 %v9934_v5, %v15195_v9 }
0x11db   : > { %v5980_v22 = vpack.c.bf16 %v5976_v42, %v5976_v42  ;;  %v5404_v48 = vadd.f32 %v9934_v5, %v15203_v43 }
0x11dc   : > { %v5415_v11 = vadd.f32 %v5385_v61, %v15111_v63  ;;  %v5417_v44 = vadd.f32 %v5393_v15, %v15121_v16  ;;  %v15287_v4 = vadd.f32 %v5396_v2, %v15123_v54  ;;  %v5416_v6 = vadd.f32 %v5388_v8, %v15113_v50 }
0x11dd   : > { %10640 = vmatmul.mubr.msk.bf16.vlgmr.msra.gmra.mrb[84].mxu0 %vm3142_vm4, %v5980_v22  ;;  %10646 = vmatpush3.bf16.msra.mxu1 %v6186_v37  ;;  %v5401_v63 = vadd.f32 %v9934_v5, %v15199_v33  ;;  %v5412_v16 = vadd.f32 %v15201_v25, %v9934_v5  ;;  %v15295_v58 = vadd.f32 %v5404_v48, %v15132_v45 }
0x11de   : > { %10655 = vmatprep.mubr.msk.bf16.mxu0 %vm13363_vm9, %v13362_v47  ;;  %v5423_v20 = vsel %vm3244_vm5, %v5415_v11, 0.0  ;;  %v5429_v3 = vsel %vm3244_vm5, %v5417_v44, 0.0  ;;  %v5432_v9 = vsel %vm3244_vm5, %v15287_v4, 0.0  ;;  %v5409_v54 = vadd.f32 %v15197_v17, %v9934_v5 }
0x11df   : > { %v5419_v43 = vadd.f32 %v5401_v63, %v15130_v52  ;;  %v5426_v7 = vsel %vm3244_vm5, %v5416_v6, 0.0  ;;  %v15303_v50 = vadd.f32 %v5412_v16, %v15138_v32  ;;  %v5438_v33 = vsel %vm3244_vm5, %v15295_v58, 0.0 }
0x11e0   : > { %v5421_v45 = vadd.f32 %v5409_v54, %v15136_v24 }
0x11e1   : > { %v5435_v25 = vsel %vm3244_vm5, %v5419_v43, 0.0  ;;  %v5444_v17 = vsel %vm3244_vm5, %v15303_v50, 0.0 }
0x11e2   : > { %v5441_v52 = vsel %vm3244_vm5, %v5421_v45, 0.0 }
0x123f   : > { %v15269_v41 = vpop.f32.mrb[76].mxu1 }
0x1240   : > { %v10623_v31 = vpop.f32.mrb[77].mxu1 }
0x1241   : > { %v6028_v36 = vpop.f32.mrb[78].mxu1 }
0x1242   : > { %v10624_v40 = vpop.f32.mrb[79].mxu1 }
0x12a8   : > { %v6071_v51 = vpop.f32.mrb[80].mxu0 }
0x12a9   : > { %6170 = vrot.lane.b32.xlu1 %v6071_v51, %s16244_s7  ;;  %v10629_v46 = vpop.f32.mrb[81].mxu0 }
0x12aa   : > { %v6074_v62 = vpop.f32.mrb[82].mxu0 }
0x12ab   : > { %v10630_v1 = vpop.f32.mrb[83].mxu0  ;;  %v6117_v55 = vpop.f32.mrb[80].mxu1 }
0x12ac   : > { %6174 = vrot.lane.b32.xlu0 %v6117_v55, %s16245_s8  ;;  %v10635_v21 = vpop.f32.mrb[81].mxu1 }
0x12ad   : > { %v6120_v18 = vpop.f32.mrb[82].mxu1 }
0x12ae   : > { %v10636_v14 = vpop.f32.mrb[83].mxu1  ;;  %v9954_v18 = vld [vmem:[#allocation12] ss:$0 sm:$0xff] }
0x12b0   : > { %v6163_v0 = vpop.f32.mrb[84].mxu0 }
0x12b1   : > { %6178 = vrot.lane.b32.xlu1 %v6163_v0, %s16246_s9  ;;  %v10641_v26 = vpop.f32.mrb[85].mxu0 }
0x12b2   : > { %v6166_v60 = vpop.f32.mrb[86].mxu0 }
0x12b3   : > { %v10642_v39 = vpop.f32.mrb[87].mxu0 }
0x12cb   : > { %5424 = vadd.xlane.f32.xlu0 %v5423_v20 }
0x12cf   : > { %5430 = vadd.xlane.f32.xlu0 %v5429_v3 }
0x12d3   : > { %5433 = vadd.xlane.f32.xlu0 %v5432_v9 }
0x12d5   : > { %5427 = vadd.xlane.f32.xlu1 %v5426_v7  ;;  %v2852_v7 = vld [vmem:[%s16247_s4 + $0x8] sm:$0xff] }
0x12d7   : > { %5439 = vadd.xlane.f32.xlu0 %v5438_v33 }
0x12d9   : > { %5436 = vadd.xlane.f32.xlu1 %v5435_v25 }
0x12db   : > { %5445 = vadd.xlane.f32.xlu0 %v5444_v17 }
0x12dd   : > { %5442 = vadd.xlane.f32.xlu1 %v5441_v52 }
0x131b   : > { %v6171_v13 = vpop.permute.xlu1 %6170 }
0x131c   : > { %v6181_v32 = vsel %vm3142_vm4, %v15269_v41, %v6171_v13 }
0x131e   : > { %v6175_v35 = vpop.permute.xlu0 %6174 }
0x131f   : > { %v6182_v28 = vsel %vm4979_vm7, %v6181_v32, %v6175_v35 }
0x1323   : > { %v6179_v38 = vpop.permute.xlu1 %6178 }
0x1324   : > { %v6183_v24 = vsel %vm4988_vm8, %v6182_v28, %v6179_v38 }
0x1325   : > { %v6184_v34 = vpack.c.bf16 %v6183_v24, %v6183_v24 }
0x1327   : > { %10648 = vmatmul.mubr.msk.bf16.vlgmr.msra.gmra.mrb[84].mxu1 %vm3244_vm5, %v6184_v34 }
0x1358   : > { %v5425_v57 = vpop.xlane.xlu0 %5424 }
0x1359   : > { %v5447_v27 = vmul.f32 0.03125, %v5425_v57 }
0x135b   : > { %v15317_v30 = vsub.f32 %v5415_v11, %v5447_v27 }
0x135c   : > { %v5431_v49 = vpop.xlane.xlu0 %5430 }
0x135d   : > { %v5449_v29 = vmul.f32 0.03125, %v5431_v49  ;;  %v5463_v53 = vmul.f32 %v15317_v30, %v15317_v30 }
0x135f   : > { %v15321_v42 = vsub.f32 %v5417_v44, %v5449_v29  ;;  %v5471_v22 = vsel %vm3244_vm5, %v5463_v53, 0.0 }
0x1360   : > { %5472 = vadd.xlane.f32.xlu0 %v5471_v22  ;;  %v5434_v1 = vpop.xlane.xlu0 %5433 }
0x1361   : > { %v5465_v41 = vmul.f32 %v15321_v42, %v15321_v42  ;;  %v5450_v14 = vmul.f32 0.03125, %v5434_v1 }
0x1362   : > { %v5428_v31 = vpop.xlane.xlu1 %5427 }
0x1363   : > { %v5477_v36 = vsel %vm3244_vm5, %v5465_v41, 0.0  ;;  %v5448_v55 = vmul.f32 0.03125, %v5428_v31  ;;  %v15340_v61 = vsub.f32 %v15287_v4, %v5450_v14 }
0x1364   : > { %5478 = vadd.xlane.f32.xlu0 %v5477_v36  ;;  %v5440_v21 = vpop.xlane.xlu0 %5439 }
0x1365   : > { %v15337_v0 = vsub.f32 %v5416_v6, %v5448_v55  ;;  %v5452_v15 = vmul.f32 0.03125, %v5440_v21  ;;  %v5466_v4 = vmul.f32 %v15340_v61, %v15340_v61  ;;  %v9939_v21 = vld [vmem:[#allocation57] ss:$0 sm:$0xff] }
0x1366   : > { %v5437_v40 = vpop.xlane.xlu1 %5436 }
0x1367   : > { %v5451_v56 = vmul.f32 0.03125, %v5437_v40  ;;  %v5464_v2 = vmul.f32 %v15337_v0, %v15337_v0  ;;  %v15346_v8 = vsub.f32 %v15295_v58, %v5452_v15  ;;  %v5480_v63 = vsel %vm3244_vm5, %v5466_v4, 0.0  ;;  %v9940_v15 = vld [vmem:[#allocation55] ss:$0 sm:$0xff] }
0x1368   : > { %v5446_v20 = vpop.xlane.xlu0 %5445 }
0x1369   : > { %v15327_v59 = vsub.f32 %v5419_v43, %v5451_v56  ;;  %v5454_v48 = vmul.f32 0.03125, %v5446_v20  ;;  %v5474_v3 = vsel %vm3244_vm5, %v5464_v2, 0.0  ;;  %v5468_v16 = vmul.f32 %v15346_v8, %v15346_v8  ;;  %v2851_v43 = vld [vmem:[%s16247_s4] sm:$0xff] }
0x136a   : > { %v5443_v23 = vpop.xlane.xlu1 %5442  ;;  %v6339_v33 = vpack.c.bf16 %v2852_v7, %v2851_v43  ;;  %v12151_v7 = vld [vmem:[%s14369_s6 + $0x8] sm:$0xff] }
0x136b   : > { %v5453_v12 = vmul.f32 0.03125, %v5443_v23  ;;  %v5467_v10 = vmul.f32 %v15327_v59, %v15327_v59  ;;  %v15352_v6 = vsub.f32 %v15303_v50, %v5454_v48  ;;  %v5486_v58 = vsel %vm3244_vm5, %v5468_v16, 0.0  ;;  %v2853_v50 = vld [vmem:[%s16247_s4 + $0x10] sm:$0xff] }
0x136c   : > { %10659 = vmatprep.subr.bf16.mxu1 %v6339_v33 }
0x136d   : > { %v15331_v37 = vsub.f32 %v5421_v45, %v5453_v12  ;;  %v5483_v51 = vsel %vm3244_vm5, %v5467_v10, 0.0  ;;  %v5470_v9 = vmul.f32 %v15352_v6, %v15352_v6  ;;  %10660 = vmatpush3.bf16.msra.mxu1 %v6339_v33  ;;  %v2854_v45 = vld [vmem:[%s16247_s4 + $0x18] sm:$0xff]  ;;  %s16248_s4 = sld [smem:[#allocation93_spill]] }
0x136e   : > { %5484 = vadd.xlane.f32.xlu0 %v5483_v51  ;;  %v6340_v25 = vpack.c.bf16 %v2854_v45, %v2853_v50 }
0x136f   : > { %v5469_v46 = vmul.f32 %v15331_v37, %v15331_v37  ;;  %v5492_v54 = vsel %vm3244_vm5, %v5470_v9, 0.0 }
0x1370   : > { %10661 = vmatprep.subr.bf16.mxu1 %v6340_v25 }
0x1371   : > { %v5489_v62 = vsel %vm3244_vm5, %v5469_v46, 0.0  ;;  %10662 = vmatpush3.bf16.msra.mxu1 %v6340_v25 }
0x1372   : > { %5490 = vadd.xlane.f32.xlu0 %v5489_v62  ;;  %10683 = vmatprep.subr.bf16.mxu1 %v13362_v47 }
0x13ed   : > { %v5473_v17 = vpop.xlane.xlu0 %5472 }
0x13ee   : > { %v5495_v13 = vmul.f32 0.03125, %v5473_v17  ;;  %v12152_v17 = vld [vmem:[%s14369_s6 + $0x10] sm:$0xff] }
0x13f0   : > { %v5503_v32 = vadd.f32 1e-05, %v5495_v13 }
0x13f1   : > { %v5479_v52 = vpop.xlane.xlu0 %5478 }
0x13f2   : > { %v5497_v28 = vmul.f32 0.03125, %v5479_v52  ;;  %12072 = vrsqrt.f32 %v5503_v32 }
0x13f4   : > { %v5505_v38 = vadd.f32 1e-05, %v5497_v28 }
0x13f6   : > { %12074 = vrsqrt.f32 %v5505_v38 }
0x13fa   : > { %v6230_v26 = vpop.f32.mrb[84].mxu1 }
0x13fb   : > { %v6231_v60 = vadd.f32 %v9954_v18, %v6230_v26  ;;  %v10649_v39 = vpop.f32.mrb[85].mxu1  ;;  %v5485_v35 = vpop.xlane.xlu0 %5484 }
0x13fc   : > { %v6233_v5 = vpop.f32.mrb[86].mxu1  ;;  %v5499_v24 = vmul.f32 0.03125, %v5485_v35  ;;  %v12073_v10 = vpop.eup %12072 }
0x13fd   : > { %v10650_v11 = vpop.f32.mrb[87].mxu1  ;;  %v6237_v44 = vsel %vm3244_vm5, %v6231_v60, 0.0  ;;  %v5519_v62 = vmul.f32 %v12073_v10, %v15317_v30  ;;  %v2860_v10 = vld [vmem:[%s16248_s4 + $0x8] sm:$0xff] }
0x13fe   : > { %6238 = vadd.xlane.f32.xlu1 %v6237_v44  ;;  %v5507_v29 = vadd.f32 1e-05, %v5499_v24 }
0x13ff   : > { %v5491_v57 = vpop.xlane.xlu0 %5490  ;;  %v5533_v39 = vmul.f32 %v9939_v21, %v5519_v62 }
0x1400   : > { %v5501_v53 = vmul.f32 0.03125, %v5491_v57  ;;  %12076 = vrsqrt.f32 %v5507_v29  ;;  %v12075_v55 = vpop.eup %12074  ;;  %v12154_v57 = vld [vmem:[%s14369_s6 + $0x20] sm:$0xff]  ;;  %v12155_v29 = vld [vmem:[%s14369_s6 + $0x28] sm:$0xff] }
0x1401   : > { %v5521_v26 = vmul.f32 %v12075_v55, %v15321_v42  ;;  %v15374_v20 = vadd.f32 %v9940_v15, %v5533_v39 }
0x1402   : > { %5475 = vadd.xlane.f32.xlu1 %v5474_v3  ;;  %v5509_v56 = vadd.f32 1e-05, %v5501_v53 }
0x1403   : > { %v5535_v30 = vmul.f32 %v9939_v21, %v5521_v26 }
0x1406   : > { %5481 = vadd.xlane.f32.xlu1 %v5480_v63 }
0x140a   : > { %5487 = vadd.xlane.f32.xlu1 %v5486_v58  ;;  %v12077_v5 = vpop.eup %12076  ;;  %v12150_v58 = vld [vmem:[%s14369_s6] sm:$0xff] }
0x140b   : > { %v5523_v3 = vmul.f32 %v12077_v5, %v15327_v59  ;;  %v6265_v9 = vadd.f32 %v12150_v58, %v15374_v20 }
0x140d   : > { %v5537_v59 = vmul.f32 %v9939_v21, %v5523_v3  ;;  %v2866_v3 = vld [vmem:[%s16249_s10 + $0x18] sm:$0xff] }
0x140e   : > { %5493 = vadd.xlane.f32.xlu1 %v5492_v54  ;;  %v15382_v54 = vadd.f32 %v9940_v15, %v5535_v30 }
0x140f   : > { %v5551_v32 = vadd.f32 %v9940_v15, %v5537_v59 }
0x1410   : > { %v6267_v52 = vadd.f32 %v12152_v17, %v15382_v54 }
0x148b   : > { %v6239_v34 = vpop.xlane.xlu1 %6238 }
0x148c   : > { %v6240_v27 = vmul.f32 0.03125, %v6239_v34 }
0x148e   : > { %v15366_v49 = vsub.f32 %v6231_v60, %v6240_v27  ;;  %v6269_v27 = vadd.f32 %v12154_v57, %v5551_v32 }
0x148f   : > { %v5476_v22 = vpop.xlane.xlu1 %5475 }
0x1490   : > { %v5496_v41 = vmul.f32 0.03125, %v5476_v22  ;;  %v6242_v31 = vmul.f32 %v15366_v49, %v15366_v49 }
0x1492   : > { %v5504_v36 = vadd.f32 1e-05, %v5496_v41  ;;  %v6243_v40 = vsel %vm3244_vm5, %v6242_v31, 0.0 }
0x1493   : > { %6244 = vadd.xlane.f32.xlu0 %v6243_v40  ;;  %v5482_v23 = vpop.xlane.xlu1 %5481 }
0x1494   : > { %12078 = vrsqrt.f32 %v5504_v36  ;;  %v5498_v12 = vmul.f32 0.03125, %v5482_v23 }
0x1495   : > { %12080 = vrsqrt.f32 %v5509_v56  ;;  %v12157_v56 = vld [vmem:[%s14369_s6 + $0x38] sm:$0xff] }
0x1496   : > { %v5506_v51 = vadd.f32 1e-05, %v5498_v12  ;;  %v2859_v12 = vld [vmem:[%s16248_s4] sm:$0xff] }
0x1497   : > { %v5488_v46 = vpop.xlane.xlu1 %5487  ;;  %v6274_v62 = vpack.c.bf16 %v2860_v10, %v2859_v12 }
0x1498   : > { %12082 = vrsqrt.f32 %v5506_v51  ;;  %v5500_v1 = vmul.f32 0.03125, %v5488_v46  ;;  %v2861_v51 = vld [vmem:[%s16248_s4 + $0x10] sm:$0xff] }
0x1499   : > { %10652 = vmatpush3.bf16.msra.mxu0 %v6274_v62 }
0x149a   : > { %v5508_v18 = vadd.f32 1e-05, %v5500_v1  ;;  %v2862_v1 = vld [vmem:[%s16248_s4 + $0x18] sm:$0xff]  ;;  %10653 = vmatprep.subr.bf16.mxu0 %v13362_v47  ;;  %s16256_s4 = sld [smem:[#allocation96_spill]] }
0x149b   : > { %v5494_v14 = vpop.xlane.xlu1 %5493  ;;  %v6275_v55 = vpack.c.bf16 %v2862_v1, %v2861_v51 }
0x149c   : > { %12084 = vrsqrt.f32 %v5508_v18  ;;  %v5502_v60 = vmul.f32 0.03125, %v5494_v14  ;;  %v2864_v18 = vld [vmem:[%s16249_s10 + $0x8] sm:$0xff] }
0x149d   : > { %10654 = vmatpush3.bf16.msra.mxu0 %v6275_v55 }
0x149e   : > { %v12079_v11 = vpop.eup %12078  ;;  %v5510_v44 = vadd.f32 1e-05, %v5502_v60 }
0x149f   : > { %v5520_v2 = vmul.f32 %v12079_v11, %v15337_v0  ;;  %v12081_v48 = vpop.eup %12080 }
0x14a0   : > { %12086 = vrsqrt.f32 %v5510_v44  ;;  %v5525_v0 = vmul.f32 %v12081_v48, %v15331_v37  ;;  %v12153_v37 = vld [vmem:[%s14369_s6 + $0x18] sm:$0xff]  ;;  %v9957_v44 = vld [vmem:[%s16250_s11] ss:$0 sm:$0xff]  ;;  %v2865_v48 = vld [vmem:[%s16249_s10 + $0x10] sm:$0xff]  ;;  %s16252_s11 = sld [smem:[#allocation89_spill]] }
0x14a1   : > { %v5534_v4 = vmul.f32 %v9939_v21, %v5520_v2 }
0x14a2   : > { %v12083_v42 = vpop.eup %12082  ;;  %v5539_v28 = vmul.f32 %v9939_v21, %v5525_v0 }
0x14a3   : > { %v5522_v63 = vmul.f32 %v12083_v42, %v15340_v61  ;;  %v15378_v16 = vadd.f32 %v9940_v15, %v5534_v4 }
0x14a4   : > { %v5553_v41 = vadd.f32 %v9940_v15, %v5539_v28 }
0x14a5   : > { %v5536_v43 = vmul.f32 %v9939_v21, %v5522_v63  ;;  %v6266_v33 = vadd.f32 %v12151_v7, %v15378_v16  ;;  %v6509_v63 = vpack.c.bf16 %v2866_v3, %v2865_v48  ;;  %v15434_v58 = vpack.c.bf16 %v15378_v16, %v15374_v20 }
0x14a6   : > { %v12085_v50 = vpop.eup %12084 }
0x14a7   : > { %v5524_v45 = vmul.f32 %v12085_v50, %v15346_v8  ;;  %v15388_v61 = vpack.c.bf16 %v6266_v33, %v6265_v9  ;;  %v15390_v25 = vadd.f32 %v9940_v15, %v5536_v43 }
0x14a9   : > { %10663 = vmatprep.mubr.msk.bf16.mxu1 %vm3244_vm5, %v15388_v61  ;;  %v6268_v13 = vadd.f32 %v12153_v37, %v15390_v25  ;;  %v5538_v35 = vmul.f32 %v9939_v21, %v5524_v45 }
0x14aa   : > { %v12087_v8 = vpop.eup %12086 }
0x14ab   : > { %v5526_v38 = vmul.f32 %v12087_v8, %v15352_v6  ;;  %v15399_v24 = vpack.c.bf16 %v6268_v13, %v6267_v52  ;;  %v5552_v34 = vadd.f32 %v9940_v15, %v5538_v35  ;;  %v12156_v6 = vld [vmem:[%s14369_s6 + $0x30] sm:$0xff]  ;;  %s16251_s6 = sld [smem:[#allocation87_spill]] }
0x14ac   : > { %v6271_v40 = vadd.f32 %v12156_v6, %v5553_v41 }
0x14ad   : > { %10664 = vmatmul.mubr.msk.bf16.vlgmr.msra.gmra.mrb[88].mxu1 %vm3244_vm5, %v15399_v24  ;;  %v6270_v53 = vadd.f32 %v12155_v29, %v5552_v34  ;;  %v5540_v22 = vmul.f32 %v9939_v21, %v5526_v38  ;;  %v2863_v21 = vld [vmem:[%s16249_s10] sm:$0xff]  ;;  %s16257_s10 = sld [smem:[#allocation98_spill]] }
0x14ae   : > { %v6508_v14 = vpack.c.bf16 %v2864_v18, %v2863_v21 }
0x14af   : > { %v15405_v31 = vpack.c.bf16 %v6270_v53, %v6269_v27  ;;  %v5554_v36 = vadd.f32 %v9940_v15, %v5540_v22  ;;  %v9956_v15 = vld [vmem:[#allocation2] ss:$0 sm:$0xff] }
0x14b0   : > { %10671 = vmatprep.subr.bf16.mxu0 %v6508_v14 }
0x14b1   : > { %10667 = vmatprep.mubr.msk.bf16.mxu1 %vm3244_vm5, %v15405_v31  ;;  %v6272_v23 = vadd.f32 %v12157_v56, %v5554_v36  ;;  %v15450_v20 = vpack.c.bf16 %v5554_v36, %v5553_v41  ;;  %v9960_v9 = vld [vmem:[%s16251_s6] ss:$0 sm:$0xff]  ;;  %s16253_s6 = sld [smem:[#allocation90_spill]] }
0x14b3   : > { %v15414_v46 = vpack.c.bf16 %v6272_v23, %v6271_v40 }
0x14b5   : > { %10668 = vmatmul.mubr.msk.bf16.gmra.mrb[92].mxu1 %vm3244_vm5, %v15414_v46 }
0x14b6   : > { %10691 = vmatprep.mubr.msk.bf16.mxu1 %vm13363_vm9, %v13362_v47 }
0x1520   : > { %v6245_v26 = vpop.xlane.xlu0 %6244 }
0x1521   : > { %v6246_v60 = vmul.f32 0.03125, %v6245_v26 }
0x1523   : > { %v6247_v39 = vadd.f32 1e-05, %v6246_v60 }
0x1525   : > { %12088 = vrsqrt.f32 %v6247_v39 }
0x152f   : > { %v12089_v5 = vpop.eup %12088 }
0x1530   : > { %v6249_v11 = vmul.f32 %v12089_v5, %v15366_v49  ;;  %v15441_v49 = vpack.c.bf16 %v15390_v25, %v15382_v54 }
0x1532   : > { %v6256_v2 = vmul.f32 %v9956_v15, %v6249_v11 }
0x1534   : > { %v15426_v30 = vadd.f32 %v9957_v44, %v6256_v2  ;;  %v9958_v44 = vld [vmem:[%s16252_s11] ss:$0 sm:$0xff]  ;;  %s16254_s11 = sld [smem:[#allocation92_spill]] }
0x1536   : > { %v6264_v4 = vadd.f32 %v15426_v30, %v15157_v19  ;;  %v15444_v19 = vpack.c.bf16 %v5552_v34, %v5551_v32 }
0x1538   : > { %v6273_v42 = vpack.c.bf16 %v6264_v4, %v6264_v4 }
0x153a   : > { %10656 = vmatmul.mubr.msk.bf16.vlgmr.msra.gmra.mrb[88].mxu0 %vm3244_vm5, %v6273_v42 }
0x153b   : > { %10672 = vmatpush3.bf16.msra.mxu0 %v6508_v14  ;;  %10675 = vmatprep.mubr.msk.bf16.mxu0 %vm3244_vm5, %v15434_v58 }
0x153c   : > { %10673 = vmatprep.subr.bf16.mxu0 %v6509_v63 }
0x153f   : > { %10674 = vmatpush3.bf16.msra.mxu0 %v6509_v63 }
0x1540   : > { %10695 = vmatprep.subr.bf16.mxu0 %v13362_v47 }
0x1542   : > { %10676 = vmatmul.mubr.msk.bf16.vlgmr.msra.gmra.mrb[92].mxu0 %vm3244_vm5, %v15441_v49 }
0x1543   : > { %10679 = vmatprep.mubr.msk.bf16.mxu0 %vm3244_vm5, %v15444_v19 }
0x154a   : > { %10680 = vmatmul.mubr.msk.bf16.gmra.mrb[96].mxu0 %vm3244_vm5, %v15450_v20 }
0x154b   : > { %10703 = vmatprep.mubr.msk.bf16.mxu0 %vm13363_vm9, %v13362_v47 }
0x1580   : > { %v10665_v16 = vpop.f32.mrb[88].mxu1 }
0x1581   : > { %v6393_v54 = vpop.f32.mrb[89].mxu1  ;;  %v6402_v43 = vadd.f32 %v10665_v16, %v9960_v9 }
0x1582   : > { %v10666_v0 = vpop.f32.mrb[90].mxu1  ;;  %v6394_v59 = vadd.f32 %v9960_v9, %v6393_v54 }
0x1583   : > { %v6405_v7 = vadd.f32 %v10666_v0, %v9960_v9  ;;  %v6396_v33 = vpop.f32.mrb[91].mxu1 }
0x1584   : > { %v6397_v50 = vadd.f32 %v9960_v9, %v6396_v33 }
0x1585   : > { %v15457_v45 = vpack.i.bf16 %v6405_v7, %v6402_v43  ;;  %v6678_v25 = vpack.c.bf16 %v6405_v7, %v6402_v43 }
0x1586   : > { %v11672_v17 = vpack.i.bf16 %v6397_v50, %v6394_v59  ;;  %v6677_v52 = vpack.c.bf16 %v6397_v50, %v6394_v59 }
0x1587   : > { %11678 = vrot.lane.b32.xlu0 %v15457_v45, %s16241_s2  ;;  %v6700_v41 = vsel %vm3142_vm4, %v6678_v25, 0 }
0x1588   : > { %11673 = vrot.lane.b32.xlu1 %v11672_v17, %s16241_s2  ;;  %v10669_v37 = vpop.f32.mrb[92].mxu1  ;;  %v6697_v13 = vsel %vm3142_vm4, %v6677_v52, 0 }
0x1589   : > { %v6409_v35 = vpop.f32.mrb[93].mxu1  ;;  %10684 = vmatpush3.bf16.xpose.msra.mxu1 %v6697_v13  ;;  %v6418_v28 = vadd.f32 %v10669_v37, %v9960_v9  ;;  %v9965_v37 = vld [vmem:[%s16253_s6] ss:$0 sm:$0xff]  ;;  %s16255_s6 = sld [smem:[#allocation88_spill]] }
0x158a   : > { %v10670_v32 = vpop.f32.mrb[94].mxu1  ;;  %10685 = vmatprep.subr.bf16.mxu1 %v13362_v47  ;;  %v6410_v34 = vadd.f32 %v9960_v9, %v6409_v35 }
0x158b   : > { %v6421_v8 = vadd.f32 %v10670_v32, %v9960_v9  ;;  %11693 = vrot.lane.b32.xlu0 %v11672_v17, %s16240_s1  ;;  %v6412_v38 = vpop.f32.mrb[95].mxu1 }
0x158c   : > { %v6413_v57 = vadd.f32 %v9960_v9, %v6412_v38 }
0x158d   : > { %v15465_v27 = vpack.i.bf16 %v6421_v8, %v6418_v28  ;;  %v6680_v29 = vpack.c.bf16 %v6421_v8, %v6418_v28 }
0x158e   : > { %v15467_v53 = vpack.i.bf16 %v6413_v57, %v6410_v34  ;;  %v6679_v22 = vpack.c.bf16 %v6413_v57, %v6410_v34 }
0x158f   : > { %v6706_v6 = vsel %vm3142_vm4, %v6680_v29, 0 }
0x1590   : > { %11683 = vrot.lane.b32.xlu1 %v15467_v53, %s16241_s2  ;;  %v6703_v36 = vsel %vm3142_vm4, %v6679_v22, 0 }
0x1591   : > { %10686 = vmatpush3.bf16.xpose.msra.mxu1 %v6700_v41 }
0x1592   : > { %10687 = vmatprep.subr.bf16.mxu1 %v13362_v47 }
0x1594   : > { %11688 = vrot.lane.b32.xlu1 %v15465_v27, %s16241_s2 }
0x1598   : > { %11698 = vrot.lane.b32.xlu1 %v11672_v17, %s16242_s3 }
0x1599   : > { %10688 = vmatpush3.bf16.xpose.msra.mxu1 %v6703_v36 }
0x159a   : > { %10689 = vmatprep.subr.bf16.mxu1 %v13362_v47 }
0x159c   : > { %11703 = vrot.lane.b32.xlu1 %v15457_v45, %s16240_s1 }
0x15a0   : > { %11713 = vrot.lane.b32.xlu1 %v15467_v53, %s16240_s1 }
0x15a1   : > { %10690 = vmatpush3.bf16.xpose.msra.mxu1 %v6706_v6 }
0x15a2   : > { %10707 = vmatprep.subr.bf16.mxu1 %v13362_v47 }
0x15a4   : > { %11723 = vrot.lane.b32.xlu1 %v15465_v27, %s16240_s1 }
0x15f9   : > { %v11679_v12 = vpop.permute.xlu0 %11678 }
0x15fa   : > { %v11674_v40 = vpop.permute.xlu1 %11673  ;;  %v11681_v51 = vunpack.i.h.bf16 %v11679_v12  ;;  %v11680_v62 = vunpack.i.l.bf16 %v11679_v12 }
0x15fb   : > { %v11676_v56 = vunpack.i.h.bf16 %v11674_v40  ;;  %v11675_v23 = vunpack.i.l.bf16 %v11674_v40 }
0x15fc   : > { %v6682_v21 = vpack.c.bf16 %v11681_v51, %v11680_v62 }
0x15fd   : > { %v6681_v10 = vpack.c.bf16 %v11676_v56, %v11675_v23  ;;  %v11694_v14 = vpop.permute.xlu0 %11693 }
0x15fe   : > { %v6755_v26 = vsel %vm3142_vm4, %v6682_v21, 0  ;;  %v11696_v5 = vunpack.i.h.bf16 %v11694_v14  ;;  %v11695_v15 = vunpack.i.l.bf16 %v11694_v14 }
0x15ff   : > { %v6752_v1 = vsel %vm3142_vm4, %v6681_v10, 0 }
0x1600   : > { %10696 = vmatpush3.bf16.xpose.msra.mxu0 %v6752_v1  ;;  %v6685_v63 = vpack.c.bf16 %v11696_v5, %v11695_v15 }
0x1601   : > { %10697 = vmatprep.subr.bf16.mxu0 %v13362_v47 }
0x1602   : > { %v11684_v55 = vpop.permute.xlu1 %11683  ;;  %v6807_v50 = vsel %vm3142_vm4, %v6685_v63, 0 }
0x1603   : > { %v11686_v60 = vunpack.i.h.bf16 %v11684_v55  ;;  %v11685_v39 = vunpack.i.l.bf16 %v11684_v55 }
0x1605   : > { %v6683_v2 = vpack.c.bf16 %v11686_v60, %v11685_v39 }
0x1606   : > { %v11689_v18 = vpop.permute.xlu1 %11688 }
0x1607   : > { %v11691_v9 = vunpack.i.h.bf16 %v11689_v18  ;;  %v11690_v54 = vunpack.i.l.bf16 %v11689_v18  ;;  %v6758_v7 = vsel %vm3142_vm4, %v6683_v2, 0 }
0x1608   : > { %10698 = vmatpush3.bf16.xpose.msra.mxu0 %v6755_v26 }
0x1609   : > { %10699 = vmatprep.subr.bf16.mxu0 %v13362_v47  ;;  %v6684_v25 = vpack.c.bf16 %v11691_v9, %v11690_v54 }
0x160a   : > { %v15490_v11 = vpop.permute.xlu1 %11698 }
0x160b   : > { %v6761_v57 = vsel %vm3142_vm4, %v6684_v25, 0 }
0x160d   : > { %v6319_v48 = vpop.f32.mrb[88].mxu0 }
0x160e   : > { %v6320_v3 = vadd.f32 %v9958_v44, %v6319_v48  ;;  %v10657_v4 = vpop.f32.mrb[89].mxu0  ;;  %v11704_v42 = vpop.permute.xlu1 %11703  ;;  %v11701_v48 = vunpack.i.h.bf16 %v15490_v11 }
0x160f   : > { %v6322_v16 = vpop.f32.mrb[90].mxu0  ;;  %v11706_v33 = vunpack.i.h.bf16 %v11704_v42  ;;  %v11705_v59 = vunpack.i.l.bf16 %v11704_v42 }
0x1610   : > { %v6673_v0 = vpack.c.bf16 %v6320_v3, %v6320_v3  ;;  %v10658_v43 = vpop.f32.mrb[91].mxu0  ;;  %6326 = vrot.lane.b32.xlu0 %v6320_v3, %s16241_s2  ;;  %6329 = vrot.lane.b32.xlu1 %v6320_v3, %s16240_s1 }
0x1611   : > { %10700 = vmatpush3.bf16.xpose.msra.mxu0 %v6758_v7  ;;  %v6686_v13 = vpack.c.bf16 %v11706_v33, %v11705_v59 }
0x1612   : > { %10692 = vmatmul.mubr.msk.bf16.vlgmr.msra.gmra.mrb[96].mxu1 %vm3142_vm4, %v6673_v0  ;;  %10701 = vmatprep.subr.bf16.mxu0 %v13362_v47  ;;  %v11714_v17 = vpop.permute.xlu1 %11713 }
0x1613   : > { %10708 = vmatpush3.bf16.xpose.msra.mxu1 %v6807_v50  ;;  %10715 = vmatprep.mubr.msk.bf16.mxu1 %vm13363_vm9, %v13362_v47  ;;  %v11716_v28 = vunpack.i.h.bf16 %v11714_v17  ;;  %v11715_v29 = vunpack.i.l.bf16 %v11714_v17  ;;  %v6810_v41 = vsel %vm3142_vm4, %v6686_v13, 0 }
0x1614   : > { %11708 = vrot.lane.b32.xlu0 %v15457_v45, %s16242_s3  ;;  %10709 = vmatprep.subr.bf16.mxu1 %v13362_v47 }
0x1615   : > { %v10677_v52 = vpop.f32.mrb[92].mxu0 }
0x1616   : > { %v6562_v35 = vpop.f32.mrb[93].mxu0  ;;  %v6571_v8 = vadd.f32 %v10677_v52, %v9965_v37  ;;  %v11724_v23 = vpop.permute.xlu1 %11723 }
0x1617   : > { %v10678_v32 = vpop.f32.mrb[94].mxu0  ;;  %v6563_v45 = vadd.f32 %v9965_v37, %v6562_v35  ;;  %v11726_v62 = vunpack.i.h.bf16 %v11724_v23  ;;  %v11725_v18 = vunpack.i.l.bf16 %v11724_v23 }
0x1618   : > { %v6574_v38 = vadd.f32 %v10678_v32, %v9965_v37  ;;  %v6565_v34 = vpop.f32.mrb[95].mxu0  ;;  %11718 = vrot.lane.b32.xlu0 %v15467_v53, %s16242_s3  ;;  %v6687_v53 = vpack.c.bf16 %v11716_v28, %v11715_v29 }
0x1619   : > { %v6566_v22 = vadd.f32 %v9965_v37, %v6565_v34  ;;  %10702 = vmatpush3.bf16.xpose.msra.mxu0 %v6761_v57  ;;  %v6688_v44 = vpack.c.bf16 %v11726_v62, %v11725_v18 }
0x161a   : > { %10719 = vmatprep.subr.bf16.mxu0 %v13362_v47  ;;  %v6970_v36 = vpack.c.bf16 %v6574_v38, %v6571_v8  ;;  %v15510_v6 = vpack.i.bf16 %v6574_v38, %v6571_v8  ;;  %v6813_v60 = vsel %vm3142_vm4, %v6687_v53, 0 }
0x161b   : > { %10710 = vmatpush3.bf16.xpose.msra.mxu1 %v6810_v41  ;;  %v6969_v40 = vpack.c.bf16 %v6566_v22, %v6563_v45  ;;  %v15512_v56 = vpack.i.bf16 %v6566_v22, %v6563_v45  ;;  %v6816_v2 = vsel %vm3142_vm4, %v6688_v44, 0  ;;  %v12158_v22 = vld [vmem:[%s14582_s5] ss:$0 sm:$0xff] }
0x161c   : > { %11728 = vrot.lane.b32.xlu0 %v15465_v27, %s16242_s3  ;;  %10711 = vmatprep.subr.bf16.mxu1 %v13362_v47 }
0x161d   : > { %v10681_v12 = vpop.f32.mrb[96].mxu0 }
0x161e   : > { %v6578_v10 = vpop.f32.mrb[97].mxu0  ;;  %v6587_v1 = vadd.f32 %v10681_v12, %v9965_v37 }
0x161f   : > { %v10682_v51 = vpop.f32.mrb[98].mxu0  ;;  %v6579_v14 = vadd.f32 %v9965_v37, %v6578_v10 }
0x1620   : > { %v6590_v55 = vadd.f32 %v10682_v51, %v9965_v37  ;;  %v6581_v21 = vpop.f32.mrb[99].mxu0  ;;  %6332 = vrot.lane.b32.xlu0 %v6320_v3, %s16242_s3  ;;  %v11700_v3 = vunpack.i.l.bf16 %v15490_v11 }
0x1621   : > { %v6582_v26 = vadd.f32 %v9965_v37, %v6581_v21 }
0x1622   : > { %v6972_v39 = vpack.c.bf16 %v6590_v55, %v6587_v1  ;;  %v15519_v27 = vpack.i.bf16 %v6590_v55, %v6587_v1  ;;  %v6689_v4 = vpack.c.bf16 %v11701_v48, %v11700_v3 }
0x1623   : > { %10712 = vmatpush3.bf16.xpose.msra.mxu1 %v6813_v60  ;;  %v6971_v5 = vpack.c.bf16 %v6582_v26, %v6579_v14  ;;  %v15521_v15 = vpack.i.bf16 %v6582_v26, %v6579_v14 }
0x1624   : > { %10713 = vmatprep.subr.bf16.mxu1 %v13362_v47  ;;  %v6862_v54 = vsel %vm3142_vm4, %v6689_v4, 0 }
0x162b   : > { %10714 = vmatpush3.bf16.xpose.msra.mxu1 %v6816_v2 }
0x162c   : > { %10731 = vmatprep.subr.bf16.mxu1 %v13362_v47 }
0x1682   : > { %v6327_v42 = vpop.permute.xlu0 %6326  ;;  %v6330_v63 = vpop.permute.xlu1 %6329 }
0x1683   : > { %v6674_v16 = vpack.c.bf16 %v6327_v42, %v6327_v42  ;;  %v6675_v9 = vpack.c.bf16 %v6330_v63, %v6330_v63 }
0x1685   : > { %10704 = vmatmul.mubr.msk.bf16.vlgmr.msra.gmra.mrb[100].mxu0 %vm3142_vm4, %v6674_v16  ;;  %10716 = vmatmul.mubr.msk.bf16.vlgmr.msra.gmra.mrb[100].mxu1 %vm3142_vm4, %v6675_v9 }
0x1686   : > { %10720 = vmatpush3.bf16.xpose.msra.mxu0 %v6862_v54  ;;  %10732 = vmatpush3.bf16.msra.mxu1 %v6969_v40  ;;  %v11709_v0 = vpop.permute.xlu0 %11708 }
0x1687   : > { %v11711_v43 = vunpack.i.h.bf16 %v11709_v0  ;;  %v11710_v7 = vunpack.i.l.bf16 %v11709_v0  ;;  %10733 = vmatprep.subr.bf16.mxu1 %v13362_v47  ;;  %10721 = vmatprep.subr.bf16.mxu0 %v13362_v47 }
0x1688   : > { %10727 = vmatprep.mubr.msk.bf16.mxu0 %vm13363_vm9, %v13362_v47  ;;  %10739 = vmatprep.mubr.msk.bf16.mxu1 %vm13363_vm9, %v13362_v47 }
0x1689   : > { %v6690_v11 = vpack.c.bf16 %v11711_v43, %v11710_v7 }
0x168a   : > { %10734 = vmatpush3.bf16.msra.mxu1 %v6970_v36  ;;  %v11719_v33 = vpop.permute.xlu0 %11718 }
0x168b   : > { %10735 = vmatprep.subr.bf16.mxu1 %v13362_v47  ;;  %v6865_v59 = vsel %vm3142_vm4, %v6690_v11, 0  ;;  %v11721_v50 = vunpack.i.h.bf16 %v11719_v33  ;;  %v11720_v25 = vunpack.i.l.bf16 %v11719_v33 }
0x168d   : > { %v6691_v17 = vpack.c.bf16 %v11721_v50, %v11720_v25 }
0x168e   : > { %10722 = vmatpush3.bf16.xpose.msra.mxu0 %v6865_v59  ;;  %10736 = vmatpush3.bf16.msra.mxu1 %v6971_v5  ;;  %v11729_v52 = vpop.permute.xlu0 %11728 }
0x168f   : > { %10737 = vmatprep.subr.bf16.mxu1 %v13362_v47  ;;  %10723 = vmatprep.subr.bf16.mxu0 %v13362_v47  ;;  %v11731_v37 = vunpack.i.h.bf16 %v11729_v52  ;;  %v11730_v13 = vunpack.i.l.bf16 %v11729_v52  ;;  %v6868_v35 = vsel %vm3142_vm4, %v6691_v17, 0 }
0x1691   : > { %v6692_v32 = vpack.c.bf16 %v11731_v37, %v11730_v13 }
0x1692   : > { %10738 = vmatpush3.bf16.msra.mxu1 %v6972_v39  ;;  %v6333_v8 = vpop.permute.xlu0 %6332 }
0x1693   : > { %10755 = vmatprep.subr.bf16.mxu1 %v13362_v47  ;;  %v6871_v28 = vsel %vm3142_vm4, %v6692_v32, 0  ;;  %v6676_v38 = vpack.c.bf16 %v6333_v8, %v6333_v8 }
0x1696   : > { %10724 = vmatpush3.bf16.xpose.msra.mxu0 %v6868_v35 }
0x1697   : > { %10725 = vmatprep.subr.bf16.mxu0 %v13362_v47 }
0x169e   : > { %10726 = vmatpush3.bf16.xpose.msra.mxu0 %v6871_v28 }
0x169f   : > { %10743 = vmatprep.subr.bf16.mxu0 %v13362_v47 }
0x16a5   : > { %10728 = vmatmul.mubr.msk.bf16.vlgmr.msra.gmra.mrb[104].mxu0 %vm3142_vm4, %v6676_v38 }
0x16a6   : > { %10751 = vmatprep.mubr.msk.bf16.mxu0 %vm13363_vm9, %v13362_v47 }
0x16e5   : > { %v6742_v34 = vpop.f32.mrb[96].mxu1 }
0x16e6   : > { %v6913_v57 = vmul.f32 0.35355338, %v6742_v34  ;;  %v10693_v29 = vpop.f32.mrb[97].mxu1 }
0x16e7   : > { %v6745_v45 = vpop.f32.mrb[98].mxu1 }
0x16e8   : > { %v6917_v41 = vadd.f32 %v12158_v22, %v6913_v57  ;;  %v10694_v36 = vpop.f32.mrb[99].mxu1 }
0x16ea   : > { %v6921_v40 = vsel %vm4182_vm6, %v6917_v41, -inf }
0x16eb   : > { %6922 = vmax.xlane.f32.xlu1 %v6921_v40 }
0x1758   : > { %v6797_v53 = vpop.f32.mrb[100].mxu0  ;;  %v6852_v23 = vpop.f32.mrb[100].mxu1 }
0x1759   : > { %v6914_v12 = vmul.f32 0.35355338, %v6797_v53  ;;  %v6915_v10 = vmul.f32 0.35355338, %v6852_v23  ;;  %v10705_v51 = vpop.f32.mrb[101].mxu0  ;;  %v10717_v62 = vpop.f32.mrb[101].mxu1 }
0x175a   : > { %v6800_v1 = vpop.f32.mrb[102].mxu0  ;;  %v6855_v55 = vpop.f32.mrb[102].mxu1 }
0x175b   : > { %v6918_v21 = vadd.f32 %v12158_v22, %v6914_v12  ;;  %v10706_v18 = vpop.f32.mrb[103].mxu0  ;;  %v10718_v14 = vpop.f32.mrb[103].mxu1  ;;  %v6919_v26 = vadd.f32 %v12158_v22, %v6915_v10 }
0x175d   : > { %v6924_v60 = vsel %vm4182_vm6, %v6918_v21, -inf  ;;  %v6927_v39 = vsel %vm4182_vm6, %v6919_v26, -inf }
0x175e   : > { %6925 = vmax.xlane.f32.xlu0 %v6924_v60 }
0x1762   : > { %6928 = vmax.xlane.f32.xlu0 %v6927_v39 }
0x1778   : > { %v6907_v5 = vpop.f32.mrb[104].mxu0  ;;  %v6923_v44 = vpop.xlane.xlu1 %6922 }
0x1779   : > { %v6916_v2 = vmul.f32 0.35355338, %v6907_v5  ;;  %v6933_v48 = vsub.f32 %v6917_v41, %v6923_v44  ;;  %v10729_v3 = vpop.f32.mrb[105].mxu0 }
0x177a   : > { %v6910_v4 = vpop.f32.mrb[106].mxu0 }
0x177b   : > { %v6920_v42 = vadd.f32 %v12158_v22, %v6916_v2  ;;  %v6937_v63 = vmul.f32 1.442695, %v6933_v48  ;;  %v10730_v16 = vpop.f32.mrb[107].mxu0 }
0x177d   : > { %12090 = vpow2.f32 %v6937_v63  ;;  %v6930_v9 = vsel %vm4182_vm6, %v6920_v42, -inf }
0x177e   : > { %6931 = vmax.xlane.f32.xlu1 %v6930_v9 }
0x1787   : > { %v12091_v54 = vpop.eup %12090 }
0x1788   : > { %v6945_v0 = vsel %vm4182_vm6, %v12091_v54, 0.0 }
0x1789   : > { %6946 = vadd.xlane.f32.xlu0 %v6945_v0 }
0x178f   : > { %11738 = vrot.lane.b32.xlu1 %v15510_v6, %s16241_s2 }
0x1793   : > { %11743 = vrot.lane.b32.xlu1 %v15521_v15, %s16241_s2 }
0x1797   : > { %11748 = vrot.lane.b32.xlu1 %v15519_v27, %s16241_s2 }
0x179b   : > { %11753 = vrot.lane.b32.xlu1 %v15512_v56, %s16240_s1 }
0x179f   : > { %11758 = vrot.lane.b32.xlu1 %v15512_v56, %s16242_s3  ;;  %11733 = vrot.lane.b32.xlu0 %v15512_v56, %s16241_s2 }
0x17a3   : > { %11763 = vrot.lane.b32.xlu1 %v15510_v6, %s16240_s1 }
0x17a7   : > { %11768 = vrot.lane.b32.xlu1 %v15510_v6, %s16242_s3 }
0x17ab   : > { %11773 = vrot.lane.b32.xlu1 %v15521_v15, %s16240_s1 }
0x17af   : > { %11778 = vrot.lane.b32.xlu1 %v15521_v15, %s16242_s3 }
0x17eb   : > { %v6926_v43 = vpop.xlane.xlu0 %6925 }
0x17ec   : > { %v6934_v7 = vsub.f32 %v6918_v21, %v6926_v43 }
0x17ee   : > { %v6939_v11 = vmul.f32 1.442695, %v6934_v7 }
0x17ef   : > { %v6929_v33 = vpop.xlane.xlu0 %6928 }
0x17f0   : > { %12092 = vpow2.f32 %v6939_v11  ;;  %v6935_v59 = vsub.f32 %v6919_v26, %v6929_v33 }
0x17f2   : > { %v6941_v50 = vmul.f32 1.442695, %v6935_v59 }
0x17f4   : > { %12094 = vpow2.f32 %v6941_v50 }
0x17fa   : > { %v15575_v56 = vpop.eup %12092 }
0x17fb   : > { %v6948_v25 = vsel %vm4182_vm6, %v15575_v56, 0.0 }
0x17fc   : > { %6949 = vadd.xlane.f32.xlu1 %v6948_v25 }
0x17fe   : > { %v15579_v6 = vpop.eup %12094 }
0x17ff   : > { %v6951_v17 = vsel %vm4182_vm6, %v15579_v6, 0.0 }
0x1800   : > { %6952 = vadd.xlane.f32.xlu1 %v6951_v17 }
0x180b   : > { %v6932_v15 = vpop.xlane.xlu1 %6931 }
0x180c   : > { %v6936_v52 = vsub.f32 %v6920_v42, %v6932_v15 }
0x180e   : > { %v6943_v37 = vmul.f32 1.442695, %v6936_v52 }
0x180f   : > { %v11739_v13 = vpop.permute.xlu1 %11738 }
0x1810   : > { %12096 = vpow2.f32 %v6943_v37  ;;  %v11741_v22 = vunpack.i.h.bf16 %v11739_v13  ;;  %v11740_v41 = vunpack.i.l.bf16 %v11739_v13 }
0x1811   : > { %11788 = vrot.lane.b32.xlu1 %v15519_v27, %s16242_s3 }
0x1812   : > { %v6974_v10 = vpack.c.bf16 %v11741_v22, %v11740_v41 }
0x1813   : > { %v11744_v35 = vpop.permute.xlu1 %11743 }
0x1814   : > { %v11746_v53 = vunpack.i.h.bf16 %v11744_v35  ;;  %v11745_v23 = vunpack.i.l.bf16 %v11744_v35 }
0x1816   : > { %v6947_v32 = vpop.xlane.xlu0 %6946  ;;  %v6975_v21 = vpack.c.bf16 %v11746_v53, %v11745_v23 }
0x1817   : > { %12098 = vrcp.f32 %v6947_v32  ;;  %v11749_v28 = vpop.permute.xlu1 %11748 }
0x1818   : > { %v11751_v18 = vunpack.i.h.bf16 %v11749_v28  ;;  %v11750_v26 = vunpack.i.l.bf16 %v11749_v28 }
0x181a   : > { %v15585_v8 = vpop.eup %12096  ;;  %v11734_v38 = vpop.permute.xlu0 %11733  ;;  %v6976_v2 = vpack.c.bf16 %v11751_v18, %v11750_v26  ;;  %v2857_v18 = vld [vmem:[%s16254_s11 + $0x10] sm:$0xff] }
0x181b   : > { %v11736_v34 = vunpack.i.h.bf16 %v11734_v38  ;;  %v11735_v57 = vunpack.i.l.bf16 %v11734_v38  ;;  %v11754_v29 = vpop.permute.xlu1 %11753  ;;  %v6954_v45 = vsel %vm4182_vm6, %v15585_v8, 0.0 }
0x181c   : > { %6955 = vadd.xlane.f32.xlu0 %v6954_v45  ;;  %v11756_v51 = vunpack.i.h.bf16 %v11754_v29  ;;  %v11755_v62 = vunpack.i.l.bf16 %v11754_v29 }
0x181d   : > { %v6973_v36 = vpack.c.bf16 %v11736_v34, %v11735_v57 }
0x181e   : > { %v6977_v60 = vpack.c.bf16 %v11756_v51, %v11755_v62 }
0x181f   : > { %v11759_v40 = vpop.permute.xlu1 %11758  ;;  %10744 = vmatpush3.bf16.msra.mxu0 %v6973_v36 }
0x1820   : > { %10745 = vmatprep.subr.bf16.mxu0 %v13362_v47  ;;  %v11761_v0 = vunpack.i.h.bf16 %v11759_v40  ;;  %v11760_v43 = vunpack.i.l.bf16 %v11759_v40 }
0x1821   : > { %v12099_v12 = vpop.eup %12098 }
0x1822   : > { %v6961_v1 = vmul.f32 %v12099_v12, %v12091_v54  ;;  %v6981_v59 = vpack.c.bf16 %v11761_v0, %v11760_v43 }
0x1823   : > { %v11764_v55 = vpop.permute.xlu1 %11763  ;;  %10746 = vmatpush3.bf16.msra.mxu0 %v6974_v10 }
0x1824   : > { %v6965_v14 = vpack.c.bf16 %v6961_v1, %v6961_v1  ;;  %10747 = vmatprep.subr.bf16.mxu0 %v13362_v47  ;;  %v11766_v39 = vunpack.i.h.bf16 %v11764_v55  ;;  %v11765_v5 = vunpack.i.l.bf16 %v11764_v55  ;;  %v2855_v1 = vld [vmem:[%s16254_s11] sm:$0xff]  ;;  %v2856_v55 = vld [vmem:[%s16254_s11 + $0x8] sm:$0xff] }
0x1826   : > { %10740 = vmatmul.mubr.msk.bf16.vlgmr.msra.gmra.mrb[104].mxu1 %vm4182_vm6, %v6965_v14  ;;  %v6978_v48 = vpack.c.bf16 %v11766_v39, %v11765_v5  ;;  %v2858_v14 = vld [vmem:[%s16254_s11 + $0x18] sm:$0xff]  ;;  %s16260_s11 = sld [smem:[#allocation130_spill]] }
0x1827   : > { %v11769_v44 = vpop.permute.xlu1 %11768  ;;  %10756 = vmatpush3.bf16.msra.mxu1 %v6977_v60  ;;  %10748 = vmatpush3.bf16.msra.mxu0 %v6975_v21  ;;  %v7173_v21 = vpack.c.bf16 %v2856_v55, %v2855_v1  ;;  %v7174_v26 = vpack.c.bf16 %v2858_v14, %v2857_v18  ;;  %v2877_v55 = vld [vmem:[%s16257_s10 + $0x20] sm:$0xff]  ;;  %v2879_v14 = vld [vmem:[%s16257_s10 + $0x30] sm:$0xff] }
0x1828   : > { %10757 = vmatprep.subr.bf16.mxu1 %v13362_v47  ;;  %10749 = vmatprep.subr.bf16.mxu0 %v13362_v47  ;;  %v11771_v50 = vunpack.i.h.bf16 %v11769_v44  ;;  %v11770_v25 = vunpack.i.l.bf16 %v11769_v44 }
0x1829   : > { %10763 = vmatprep.mubr.msk.bf16.mxu1 %vm13363_vm9, %v13362_v47 }
0x182b   : > { %v11774_v3 = vpop.permute.xlu1 %11773  ;;  %10758 = vmatpush3.bf16.msra.mxu1 %v6978_v48  ;;  %10750 = vmatpush3.bf16.msra.mxu0 %v6976_v2 }
0x182c   : > { %v11776_v4 = vunpack.i.h.bf16 %v11774_v3  ;;  %v11775_v42 = vunpack.i.l.bf16 %v11774_v3  ;;  %10759 = vmatprep.subr.bf16.mxu1 %v13362_v47  ;;  %10767 = vmatprep.subr.bf16.mxu0 %v13362_v47 }
0x182e   : > { %v6979_v63 = vpack.c.bf16 %v11776_v4, %v11775_v42 }
0x182f   : > { %v11779_v16 = vpop.permute.xlu1 %11778 }
0x1830   : > { %10760 = vmatpush3.bf16.msra.mxu1 %v6979_v63  ;;  %v11781_v17 = vunpack.i.h.bf16 %v11779_v16  ;;  %v11780_v15 = vunpack.i.l.bf16 %v11779_v16 }
0x1831   : > { %10761 = vmatprep.subr.bf16.mxu1 %v13362_v47 }
0x1832   : > { %11783 = vrot.lane.b32.xlu0 %v15519_v27, %s16240_s1  ;;  %v6982_v27 = vpack.c.bf16 %v11771_v50, %v11770_v25 }
0x1889   : > { %v6950_v9 = vpop.xlane.xlu1 %6949 }
0x188a   : > { %12100 = vrcp.f32 %v6950_v9 }
0x188d   : > { %v6953_v11 = vpop.xlane.xlu1 %6952 }
0x188e   : > { %12102 = vrcp.f32 %v6953_v11 }
0x1891   : > { %v11789_v52 = vpop.permute.xlu1 %11788 }
0x1892   : > { %v11791_v37 = vunpack.i.h.bf16 %v11789_v52  ;;  %v11790_v13 = vunpack.i.l.bf16 %v11789_v52 }
0x1894   : > { %v12101_v54 = vpop.eup %12100  ;;  %v6984_v35 = vpack.c.bf16 %v11791_v37, %v11790_v13 }
0x1895   : > { %v6962_v7 = vmul.f32 %v12101_v54, %v15575_v56  ;;  %v6983_v56 = vpack.c.bf16 %v11781_v17, %v11780_v15 }
0x1897   : > { %v6966_v33 = vpack.c.bf16 %v6962_v7, %v6962_v7  ;;  %v9978_v7 = vld [vmem:[%s16255_s6] ss:$0 sm:$0xff]  ;;  %s16258_s6 = sld [smem:[#allocation95_spill]] }
0x1898   : > { %v12103_v28 = vpop.eup %12102 }
0x1899   : > { %10752 = vmatmul.mubr.msk.bf16.vlgmr.msra.gmra.mrb[108].mxu0 %vm4182_vm6, %v6966_v33  ;;  %v6963_v29 = vmul.f32 %v12103_v28, %v15579_v6 }
0x189a   : > { %10768 = vmatpush3.bf16.msra.mxu0 %v6981_v59  ;;  %10775 = vmatprep.mubr.msk.bf16.mxu0 %vm13363_vm9, %v13362_v47 }
0x189b   : > { %10769 = vmatprep.subr.bf16.mxu0 %v13362_v47  ;;  %v6967_v22 = vpack.c.bf16 %v6963_v29, %v6963_v29  ;;  %v2874_v29 = vld [vmem:[%s16257_s10 + $0x8] sm:$0xff] }
0x189e   : > { %10770 = vmatpush3.bf16.msra.mxu0 %v6982_v27 }
0x189f   : > { %10771 = vmatprep.subr.bf16.mxu0 %v13362_v47 }
0x18a2   : > { %10772 = vmatpush3.bf16.msra.mxu0 %v6983_v56 }
0x18a3   : > { %10773 = vmatprep.subr.bf16.mxu0 %v13362_v47 }
0x18a6   : > { %10774 = vmatpush3.bf16.msra.mxu0 %v6984_v35  ;;  %v2868_v35 = vld [vmem:[%s16256_s4] sm:$0xff] }
0x18a7   : > { %10787 = vmatprep.subr.bf16.mxu0 %v13362_v47 }
0x18a9   : > { %v6956_v32 = vpop.xlane.xlu0 %6955 }
0x18aa   : > { %12104 = vrcp.f32 %v6956_v32  ;;  %v2869_v32 = vld [vmem:[%s16256_s4 + $0x8] sm:$0xff] }
0x18ab   : > { %v7253_v28 = vpack.c.bf16 %v2869_v32, %v2868_v35  ;;  %v2966_v32 = vld [vmem:[%s16260_s11 + $0x18] sm:$0xff] }
0x18ad   : > { %v11784_v38 = vpop.permute.xlu0 %11783 }
0x18ae   : > { %v11786_v34 = vunpack.i.h.bf16 %v11784_v38  ;;  %v11785_v57 = vunpack.i.l.bf16 %v11784_v38  ;;  %v2870_v38 = vld [vmem:[%s16256_s4 + $0x10] sm:$0xff] }
0x18b0   : > { %v6980_v45 = vpack.c.bf16 %v11786_v34, %v11785_v57  ;;  %v2873_v57 = vld [vmem:[%s16257_s10] sm:$0xff] }
0x18b2   : > { %10762 = vmatpush3.bf16.msra.mxu1 %v6980_v45  ;;  %v2875_v45 = vld [vmem:[%s16257_s10 + $0x10] sm:$0xff] }
0x18b3   : > { %10779 = vmatprep.subr.bf16.mxu1 %v13362_v47 }
0x18b4   : > { %v12105_v41 = vpop.eup %12104 }
0x18b5   : > { %v6964_v36 = vmul.f32 %v12105_v41, %v15585_v8  ;;  %10764 = vmatmul.mubr.msk.bf16.vlgmr.msra.gmra.mrb[108].mxu1 %vm4182_vm6, %v6967_v22  ;;  %v7306_v22 = vpack.c.bf16 %v2874_v29, %v2873_v57  ;;  %v2876_v41 = vld [vmem:[%s16257_s10 + $0x18] sm:$0xff] }
0x18b6   : > { %10783 = vmatprep.mubr.msk.bf16.mxu1 %vm13363_vm9, %v13362_v47  ;;  %10780 = vmatpush3.bf16.msra.mxu1 %v7173_v21  ;;  %v2878_v21 = vld [vmem:[%s16257_s10 + $0x28] sm:$0xff] }
0x18b7   : > { %v6968_v40 = vpack.c.bf16 %v6964_v36, %v6964_v36  ;;  %10781 = vmatprep.subr.bf16.mxu1 %v13362_v47  ;;  %v7307_v36 = vpack.c.bf16 %v2876_v41, %v2875_v45  ;;  %v7308_v18 = vpack.c.bf16 %v2878_v21, %v2877_v55  ;;  %v9986_v41 = vld [vmem:[#allocation9] ss:$0 sm:$0xff] }
0x18b9   : > { %10776 = vmatmul.mubr.msk.bf16.vlgmr.msra.gmra.mrb[112].mxu0 %vm4182_vm6, %v6968_v40 }
0x18ba   : > { %10791 = vmatprep.mubr.msk.bf16.mxu0 %vm13363_vm9, %v13362_v47  ;;  %10782 = vmatpush3.bf16.msra.mxu1 %v7174_v26  ;;  %v2880_v26 = vld [vmem:[%s16257_s10 + $0x38] sm:$0xff]  ;;  %s16261_s10 = sld [smem:[#allocation129_spill]] }
0x18bb   : > { %10795 = vmatprep.subr.bf16.mxu1 %v13362_v47  ;;  %10788 = vmatpush3.bf16.msra.mxu0 %v7253_v28 }
0x18bc   : > { %10789 = vmatprep.subr.bf16.mxu0 %v13362_v47 }
0x18c0   : > { %v2961_v28 = vld [vmem:[%s16261_s10 + $0x10] sm:$0xff] }
0x18f9   : > { %v7022_v6 = vpop.f32.mrb[104].mxu1 }
0x18fa   : > { %v10741_v53 = vpop.f32.mrb[105].mxu1 }
0x18fb   : > { %v7025_v23 = vpop.f32.mrb[106].mxu1 }
0x18fc   : > { %v10742_v12 = vpop.f32.mrb[107].mxu1 }
0x18fd   : > { %v9980_v12 = vld [vmem:[#allocation6] ss:$0 sm:$0xff] }
0x196c   : > { %v7065_v10 = vpop.f32.mrb[108].mxu0 }
0x196d   : > { %7158 = vrot.lane.b32.xlu1 %v7065_v10, %s16244_s7  ;;  %v10753_v8 = vpop.f32.mrb[109].mxu0 }
0x196e   : > { %v7068_v51 = vpop.f32.mrb[110].mxu0  ;;  %v9981_v8 = vld [vmem:[#allocation4] ss:$0 sm:$0xff] }
0x196f   : > { %v10754_v62 = vpop.f32.mrb[111].mxu0 }
0x1988   : > { %v7108_v60 = vpop.f32.mrb[108].mxu1 }
0x1989   : > { %v10765_v39 = vpop.f32.mrb[109].mxu1  ;;  %7162 = vrot.lane.b32.xlu1 %v7108_v60, %s16245_s8  ;;  %v7309_v60 = vpack.c.bf16 %v2880_v26, %v2879_v14  ;;  %v9988_v26 = vld [vmem:[#allocation37] ss:$0 sm:$0xff] }
0x198a   : > { %v7111_v5 = vpop.f32.mrb[110].mxu1  ;;  %v9982_v39 = vld [vmem:[%s16258_s6] ss:$0 sm:$0xff]  ;;  %s16263_s6 = sld [smem:[#allocation128_spill]] }
0x198b   : > { %v10766_v44 = vpop.f32.mrb[111].mxu1 }
0x198c   : > { %v7151_v2 = vpop.f32.mrb[112].mxu0 }
0x198d   : > { %7166 = vrot.lane.b32.xlu1 %v7151_v2, %s16246_s9  ;;  %v10777_v48 = vpop.f32.mrb[113].mxu0 }
0x198e   : > { %v7154_v3 = vpop.f32.mrb[114].mxu0 }
0x198f   : > { %v10778_v4 = vpop.f32.mrb[115].mxu0 }
0x19df   : > { %v7159_v42 = vpop.permute.xlu1 %7158 }
0x19e0   : > { %v7169_v16 = vsel %vm3142_vm4, %v7022_v6, %v7159_v42 }
0x19fb   : > { %v7163_v63 = vpop.permute.xlu1 %7162 }
0x19fc   : > { %v7170_v9 = vsel %vm4979_vm7, %v7169_v16, %v7163_v63 }
0x19ff   : > { %v7167_v54 = vpop.permute.xlu1 %7166 }
0x1a00   : > { %v7171_v0 = vsel %vm4988_vm8, %v7170_v9, %v7167_v54 }
0x1a01   : > { %v7172_v43 = vpack.c.bf16 %v7171_v0, %v7171_v0 }
0x1a03   : > { %10784 = vmatmul.mubr.msk.bf16.vlgmr.msra.gmra.mrb[112].mxu1 %vm3244_vm5, %v7172_v43 }
0x1a04   : > { %10803 = vmatprep.mubr.msk.bf16.mxu1 %vm13363_vm9, %v13362_v47  ;;  %10796 = vmatpush3.bf16.msra.mxu1 %v7306_v22 }
0x1a05   : > { %10797 = vmatprep.subr.bf16.mxu1 %v13362_v47 }
0x1a08   : > { %10798 = vmatpush3.bf16.msra.mxu1 %v7307_v36 }
0x1a09   : > { %10799 = vmatprep.subr.bf16.mxu1 %v13362_v47 }
0x1a0c   : > { %10800 = vmatpush3.bf16.msra.mxu1 %v7308_v18 }
0x1a0d   : > { %10801 = vmatprep.subr.bf16.mxu1 %v13362_v47 }
0x1a10   : > { %10802 = vmatpush3.bf16.msra.mxu1 %v7309_v60 }
0x1a11   : > { %10823 = vmatprep.subr.bf16.mxu1 %v13362_v47 }
0x1ad6   : > { %v7218_v11 = vpop.f32.mrb[112].mxu1 }
0x1ad7   : > { %v7219_v33 = vadd.f32 %v9978_v7, %v7218_v11  ;;  %v10785_v59 = vpop.f32.mrb[113].mxu1 }
0x1ad8   : > { %v7221_v50 = vpop.f32.mrb[114].mxu1 }
0x1ad9   : > { %v7224_v25 = vadd.f32 %v7219_v33, %v15426_v30  ;;  %v10786_v27 = vpop.f32.mrb[115].mxu1  ;;  %v2871_v30 = vld [vmem:[%s16256_s4 + $0x18] sm:$0xff]  ;;  %s16259_s4 = sld [smem:[#allocation97_spill]] }
0x1ada   : > { %v7254_v34 = vpack.c.bf16 %v2871_v30, %v2870_v38  ;;  %v2962_v38 = vld [vmem:[%s16261_s10 + $0x18] sm:$0xff] }
0x1adb   : > { %v7225_v17 = vsel %vm3244_vm5, %v7224_v25, 0.0 }
0x1adc   : > { %7226 = vadd.xlane.f32.xlu1 %v7225_v17  ;;  %10790 = vmatpush3.bf16.msra.mxu0 %v7254_v34  ;;  %v2963_v17 = vld [vmem:[%s16260_s11] sm:$0xff]  ;;  %v7390_v34 = vpack.c.bf16 %v2962_v38, %v2961_v28 }
0x1add   : > { %10807 = vmatprep.subr.bf16.mxu0 %v13362_v47 }
0x1adf   : > { %v9984_v63 = vld [vmem:[%s16259_s4] ss:$0 sm:$0xff]  ;;  %s16262_s4 = sld [smem:[#allocation127_spill]] }
0x1ae5   : > { %v2953_v55 = vld [vmem:[%s16262_s4 + $0x10] sm:$0xff]  ;;  %v2954_v21 = vld [vmem:[%s16262_s4 + $0x18] sm:$0xff] }
0x1ae6   : > { %v7451_v18 = vpack.c.bf16 %v2954_v21, %v2953_v55 }
0x1b69   : > { %v7227_v15 = vpop.xlane.xlu1 %7226 }
0x1b6a   : > { %v7228_v52 = vmul.f32 0.03125, %v7227_v15  ;;  %v2964_v15 = vld [vmem:[%s16260_s11 + $0x8] sm:$0xff] }
0x1b6c   : > { %v7229_v56 = vsub.f32 %v7224_v25, %v7228_v52  ;;  %v7509_v52 = vpack.c.bf16 %v2964_v15, %v2963_v17 }
0x1b6e   : > { %v7230_v37 = vmul.f32 %v7229_v56, %v7229_v56 }
0x1b70   : > { %v7231_v13 = vsel %vm3244_vm5, %v7230_v37, 0.0  ;;  %v2960_v37 = vld [vmem:[%s16261_s10 + $0x8] sm:$0xff] }
0x1b71   : > { %7232 = vadd.xlane.f32.xlu0 %v7231_v13  ;;  %v2965_v13 = vld [vmem:[%s16260_s11 + $0x10] sm:$0xff] }
0x1b72   : > { %v7510_v30 = vpack.c.bf16 %v2966_v32, %v2965_v13 }
0x1bfe   : > { %v7233_v40 = vpop.xlane.xlu0 %7232 }
0x1bff   : > { %v7234_v6 = vmul.f32 0.03125, %v7233_v40  ;;  %v9987_v40 = vld [vmem:[#allocation7] ss:$0 sm:$0xff] }
0x1c01   : > { %v7235_v53 = vadd.f32 1e-05, %v7234_v6 }
0x1c03   : > { %12106 = vrsqrt.f32 %v7235_v53 }
0x1c0d   : > { %v12107_v23 = vpop.eup %12106 }
0x1c0e   : > { %v7237_v10 = vmul.f32 %v12107_v23, %v7229_v56  ;;  %v2959_v56 = vld [vmem:[%s16261_s10] sm:$0xff] }
0x1c0f   : > { %v7389_v35 = vpack.c.bf16 %v2960_v37, %v2959_v56  ;;  %v2951_v23 = vld [vmem:[%s16262_s4] sm:$0xff] }
0x1c10   : > { %v7244_v51 = vmul.f32 %v9980_v12, %v7237_v10  ;;  %v2952_v12 = vld [vmem:[%s16262_s4 + $0x8] sm:$0xff]  ;;  %s16264_s4 = sld [smem:[#allocation113_spill]] }
0x1c12   : > { %v7251_v62 = vadd.f32 %v9981_v8, %v7244_v51  ;;  %v15684_v8 = vld [vmem:[%s13768_s25] sm:$0xff] }
0x1c14   : > { %v7252_v1 = vpack.c.bf16 %v7251_v62, %v7251_v62 }
0x1c16   : > { %10792 = vmatmul.mubr.msk.bf16.vlgmr.msra.gmra.mrb[116].mxu0 %vm3244_vm5, %v7252_v1 }
0x1c17   : > { %10811 = vmatprep.mubr.msk.bf16.mxu0 %vm13363_vm9, %v13362_v47  ;;  %10808 = vmatpush3.bf16.msra.mxu0 %v7389_v35 }
0x1c18   : > { %10809 = vmatprep.subr.bf16.mxu0 %v13362_v47 }
0x1c1b   : > { %10810 = vmatpush3.bf16.msra.mxu0 %v7390_v34 }
0x1c1c   : > { %10815 = vmatprep.subr.bf16.mxu0 %v13362_v47 }
0x1ce9   : > { %v7298_v5 = vpop.f32.mrb[116].mxu0 }
0x1cea   : > { %v7299_v44 = vadd.f32 %v9982_v39, %v7298_v5  ;;  %v10793_v2 = vpop.f32.mrb[117].mxu0 }
0x1ceb   : > { %v7301_v48 = vpop.f32.mrb[118].mxu0 }
0x1cec   : > { %v7304_v3 = vmax.f32 %v7299_v44, 0.0  ;;  %v10794_v4 = vpop.f32.mrb[119].mxu0 }
0x1cee   : > { %v7305_v42 = vpack.c.bf16 %v7304_v3, %v7304_v3 }
0x1cf0   : > { %10804 = vmatmul.mubr.msk.bf16.vlgmr.msra.gmra.mrb[116].mxu1 %vm4182_vm6, %v7305_v42  ;;  %v9990_v42 = vld [vmem:[#allocation34] ss:$0 sm:$0xff] }
0x1cf1   : > { %10827 = vmatprep.mubr.msk.bf16.mxu1 %vm13363_vm9, %v13362_v47  ;;  %10824 = vmatpush3.bf16.msra.mxu1 %v7509_v52 }
0x1cf2   : > { %10825 = vmatprep.subr.bf16.mxu1 %v13362_v47 }
0x1cf5   : > { %10826 = vmatpush3.bf16.msra.mxu1 %v7510_v30 }
0x1cf6   : > { %10837 = vmatprep.subr.bf16.mxu1 %v13362_v47 }
0x1dc3   : > { %v7353_v16 = vpop.f32.mrb[116].mxu1 }
0x1dc4   : > { %v7354_v9 = vadd.f32 %v9984_v63, %v7353_v16  ;;  %v10805_v54 = vpop.f32.mrb[117].mxu1 }
0x1dc5   : > { %v7356_v0 = vpop.f32.mrb[118].mxu1 }
0x1dc6   : > { %v7359_v43 = vadd.f32 %v7354_v9, %v7251_v62  ;;  %v10806_v7 = vpop.f32.mrb[119].mxu1  ;;  %v7450_v62 = vpack.c.bf16 %v2952_v12, %v2951_v23 }
0x1dc8   : > { %v7360_v11 = vsel %vm3244_vm5, %v7359_v43, 0.0 }
0x1dc9   : > { %7361 = vadd.xlane.f32.xlu0 %v7360_v11 }
0x1e56   : > { %v7362_v33 = vpop.xlane.xlu0 %7361 }
0x1e57   : > { %v7363_v59 = vmul.f32 0.03125, %v7362_v33 }
0x1e59   : > { %v7364_v50 = vsub.f32 %v7359_v43, %v7363_v59  ;;  %v9992_v59 = vld [vmem:[#allocation39] ss:$0 sm:$0xff] }
0x1e5b   : > { %v7365_v25 = vmul.f32 %v7364_v50, %v7364_v50 }
0x1e5d   : > { %v7366_v27 = vsel %vm3244_vm5, %v7365_v25, 0.0 }
0x1e5e   : > { %7367 = vadd.xlane.f32.xlu1 %v7366_v27 }
0x1eeb   : > { %v7368_v57 = vpop.xlane.xlu1 %7367 }
0x1eec   : > { %v7369_v29 = vmul.f32 0.03125, %v7368_v57 }
0x1eee   : > { %v7370_v45 = vadd.f32 1e-05, %v7369_v29 }
0x1ef0   : > { %12108 = vrsqrt.f32 %v7370_v45 }
0x1efa   : > { %v12109_v22 = vpop.eup %12108 }
0x1efb   : > { %v7372_v36 = vmul.f32 %v12109_v22, %v7364_v50 }
0x1efd   : > { %v7379_v6 = vmul.f32 %v9986_v41, %v7372_v36 }
0x1eff   : > { %v15677_v53 = vadd.f32 %v9987_v40, %v7379_v6 }
0x1f01   : > { %v7508_v10 = vpack.c.bf16 %v15677_v53, %v15677_v53  ;;  %v7387_v51 = vadd.f32 %v15684_v8, %v15677_v53 }
0x1f03   : > { %10828 = vmatmul.mubr.msk.bf16.vlgmr.msra.gmra.mrb[120].mxu1 %vm3244_vm5, %v7508_v10  ;;  %v7388_v1 = vpack.c.bf16 %v7387_v51, %v7387_v51 }
0x1f04   : > { %10839 = vmatprep.mubr.msk.bf16.mxu1 %vm13363_vm9, %v13362_v47 }
0x1f05   : > { %10812 = vmatmul.mubr.msk.bf16.vlgmr.msra.gmra.mrb[120].mxu0 %vm3244_vm5, %v7388_v1 }
0x1f06   : > { %10816 = vmatpush3.bf16.msra.mxu0 %v7450_v62  ;;  %10819 = vmatprep.mubr.msk.bf16.mxu0 %vm13363_vm9, %v13362_v47 }
0x1f07   : > { %10817 = vmatprep.subr.bf16.mxu0 %v13362_v47 }
0x1f0a   : > { %10818 = vmatpush3.bf16.msra.mxu0 %v7451_v18 }
0x1f0b   : > { %10831 = vmatprep.subr.bf16.mxu0 %v13362_v47 }
0x1f0d   : > { %10820 = vmatmul.mubr.msk.bf16.vlgmr.msra.gmra.mrb[124].mxu0 %vm3244_vm5, %v7388_v1 }
0x1f0e   : > { %10833 = vmatprep.mubr.msk.bf16.mxu0 %vm13363_vm9, %v13362_v47 }
0x1fd6   : > { %v7554_v14 = vpop.f32.mrb[120].mxu1 }
0x1fd7   : > { %v10829_v60 = vpop.f32.mrb[121].mxu1  ;;  %v15712_v15 = vadd.f32 %v9992_v59, %v7554_v14 }
0x1fd8   : > { %v7434_v39 = vpop.f32.mrb[120].mxu0  ;;  %v7557_v5 = vpop.f32.mrb[122].mxu1 }
0x1fd9   : > { %v7435_v44 = vadd.f32 %v9988_v26, %v7434_v39  ;;  %v10813_v2 = vpop.f32.mrb[121].mxu0  ;;  %v10830_v48 = vpop.f32.mrb[123].mxu1  ;;  %v7814_v32 = vpack.c.bf16 %v15712_v15, %v15712_v15 }
0x1fda   : > { %v7437_v3 = vpop.f32.mrb[122].mxu0 }
0x1fdb   : > { %7441 = vrot.lane.b32.xlu1 %v7435_v44, %s16241_s2  ;;  %v10814_v4 = vpop.f32.mrb[123].mxu0  ;;  %v7570_v11 = vpack.c.bf16 %v7435_v44, %v7435_v44  ;;  %v7822_v34 = vsel %vm3155_vm3, %v7814_v32, 0 }
0x1fe0   : > { %v7492_v63 = vpop.f32.mrb[124].mxu0 }
0x1fe1   : > { %v7493_v16 = vadd.f32 %v9990_v42, %v7492_v63  ;;  %v10821_v9 = vpop.f32.mrb[125].mxu0 }
0x1fe2   : > { %v7495_v54 = vpop.f32.mrb[126].mxu0 }
0x1fe3   : > { %7502 = vrot.lane.b32.xlu1 %v7493_v16, %s16240_s1  ;;  %7499 = vrot.lane.b32.xlu0 %v7493_v16, %s16241_s2  ;;  %v10822_v0 = vpop.f32.mrb[127].mxu0  ;;  %v7574_v43 = vpack.c.bf16 %v7493_v16, %v7493_v16 }
0x1fe5   : > { %v7582_v7 = vsel %vm3142_vm4, %v7574_v43, 0 }
0x1fe6   : > { %10832 = vmatpush3.bf16.xpose.msra.mxu0 %v7582_v7 }
0x1fe7   : > { %7505 = vrot.lane.b32.xlu1 %v7493_v16, %s16242_s3  ;;  %7444 = vrot.lane.b32.xlu0 %v7435_v44, %s16240_s1 }
0x1fe8   : > { %10843 = vmatprep.subr.bf16.mxu0 %v13362_v47 }
0x1feb   : > { %7447 = vrot.lane.b32.xlu1 %v7435_v44, %s16242_s3 }
0x1fed   : > { %10834 = vmatmul.mubr.msk.bf16.vlgmr.msra.gmra.mrb[128].mxu0 %vm3142_vm4, %v7570_v11 }
0x1fee   : > { %10845 = vmatprep.mubr.msk.bf16.mxu0 %vm13363_vm9, %v13362_v47 }
0x204d   : > { %v7442_v33 = vpop.permute.xlu1 %7441 }
0x204e   : > { %v7571_v28 = vpack.c.bf16 %v7442_v33, %v7442_v33 }
0x2055   : > { %v7503_v50 = vpop.permute.xlu1 %7502  ;;  %v7500_v25 = vpop.permute.xlu0 %7499 }
0x2056   : > { %v7576_v27 = vpack.c.bf16 %v7503_v50, %v7503_v50  ;;  %v7575_v17 = vpack.c.bf16 %v7500_v25, %v7500_v25 }
0x2058   : > { %v7674_v52 = vsel %vm3142_vm4, %v7576_v27, 0  ;;  %v7628_v56 = vsel %vm3142_vm4, %v7575_v17, 0 }
0x2059   : > { %v7506_v37 = vpop.permute.xlu1 %7505  ;;  %10838 = vmatpush3.bf16.xpose.msra.mxu1 %v7628_v56  ;;  %10844 = vmatpush3.bf16.xpose.msra.mxu0 %v7674_v52  ;;  %v7445_v13 = vpop.permute.xlu0 %7444 }
0x205a   : > { %10849 = vmatprep.subr.bf16.mxu1 %v13362_v47  ;;  %10855 = vmatprep.subr.bf16.mxu0 %v13362_v47  ;;  %v7577_v35 = vpack.c.bf16 %v7506_v37, %v7506_v37  ;;  %v7572_v38 = vpack.c.bf16 %v7445_v13, %v7445_v13 }
0x205c   : > { %v7720_v30 = vsel %vm3142_vm4, %v7577_v35, 0 }
0x205d   : > { %v7448_v57 = vpop.permute.xlu1 %7447 }
0x205e   : > { %v7573_v29 = vpack.c.bf16 %v7448_v57, %v7448_v57 }
0x2060   : > { %10840 = vmatmul.mubr.msk.bf16.vlgmr.msra.gmra.mrb[124].mxu1 %vm3142_vm4, %v7571_v28  ;;  %10846 = vmatmul.mubr.msk.bf16.vlgmr.msra.gmra.mrb[132].mxu0 %vm3142_vm4, %v7572_v38 }
0x2061   : > { %10850 = vmatpush3.bf16.xpose.msra.mxu1 %v7720_v30  ;;  %10856 = vmatpush3.bf16.msra.mxu0 %v7822_v34 }
0x2062   : > { %10851 = vmatprep.mubr.msk.bf16.mxu1 %vm13363_vm9, %v13362_v47  ;;  %10857 = vmatprep.mubr.msk.bf16.mxu0 %vm13363_vm9, %v13362_v47 }
0x2063   : > { %10861 = vmatprep.subr.bf16.mxu1 %v13362_v47  ;;  %10867 = vmatprep.subr.bf16.mxu0 %v13362_v47 }
0x2068   : > { %10852 = vmatmul.mubr.msk.bf16.vlgmr.msra.gmra.mrb[128].mxu1 %vm3142_vm4, %v7573_v29 }
0x2069   : > { %10863 = vmatprep.mubr.msk.bf16.mxu1 %vm13363_vm9, %v13362_v47 }
0x20c0   : > { %v7618_v45 = vpop.f32.mrb[128].mxu0 }
0x20c1   : > { %v7762_v22 = vmul.f32 0.35355338, %v7618_v45  ;;  %v10835_v41 = vpop.f32.mrb[129].mxu0 }
0x20c2   : > { %v7621_v36 = vpop.f32.mrb[130].mxu0 }
0x20c3   : > { %v10836_v40 = vpop.f32.mrb[131].mxu0  ;;  %v7766_v6 = vsel %vm3142_vm4, %v7762_v22, -inf }
0x20c4   : > { %7767 = vmax.xlane.f32.xlu0 %v7766_v6 }
0x2133   : > { %v7664_v23 = vpop.f32.mrb[124].mxu1  ;;  %v7710_v12 = vpop.f32.mrb[132].mxu0 }
0x2134   : > { %v7763_v10 = vmul.f32 0.35355338, %v7664_v23  ;;  %v7764_v51 = vmul.f32 0.35355338, %v7710_v12  ;;  %v10841_v62 = vpop.f32.mrb[125].mxu1  ;;  %v10847_v1 = vpop.f32.mrb[133].mxu0 }
0x2135   : > { %v7667_v55 = vpop.f32.mrb[126].mxu1  ;;  %v7713_v21 = vpop.f32.mrb[134].mxu0 }
0x2136   : > { %v10842_v18 = vpop.f32.mrb[127].mxu1  ;;  %v10848_v14 = vpop.f32.mrb[135].mxu0  ;;  %v7769_v26 = vsel %vm3142_vm4, %v7763_v10, -inf  ;;  %v7772_v60 = vsel %vm3142_vm4, %v7764_v51, -inf }
0x2137   : > { %7770 = vmax.xlane.f32.xlu1 %v7769_v26  ;;  %7773 = vmax.xlane.f32.xlu0 %v7772_v60 }
0x213b   : > { %v7756_v39 = vpop.f32.mrb[128].mxu1 }
0x213c   : > { %v7765_v5 = vmul.f32 0.35355338, %v7756_v39  ;;  %v10853_v44 = vpop.f32.mrb[129].mxu1 }
0x213d   : > { %v7759_v2 = vpop.f32.mrb[130].mxu1  ;;  %v2955_v44 = vld [vmem:[%s16263_s6] sm:$0xff] }
0x213e   : > { %v10854_v48 = vpop.f32.mrb[131].mxu1  ;;  %v7775_v3 = vsel %vm3142_vm4, %v7765_v5, -inf  ;;  %v2956_v2 = vld [vmem:[%s16263_s6 + $0x8] sm:$0xff] }
0x213f   : > { %7776 = vmax.xlane.f32.xlu0 %v7775_v3  ;;  %v8018_v48 = vpack.c.bf16 %v2956_v2, %v2955_v44 }
0x2151   : > { %v7768_v4 = vpop.xlane.xlu0 %7767 }
0x2152   : > { %v7778_v42 = vsub.f32 %v7762_v22, %v7768_v4 }
0x2154   : > { %v7782_v63 = vmul.f32 1.442695, %v7778_v42 }
0x2156   : > { %12110 = vpow2.f32 %v7782_v63 }
0x2160   : > { %v12111_v16 = vpop.eup %12110 }
0x2161   : > { %v7790_v9 = vsel %vm3142_vm4, %v12111_v16, 0.0 }
0x2162   : > { %7791 = vadd.xlane.f32.xlu0 %v7790_v9 }
0x21c4   : > { %v7771_v54 = vpop.xlane.xlu1 %7770  ;;  %v7774_v0 = vpop.xlane.xlu0 %7773 }
0x21c5   : > { %v7779_v43 = vsub.f32 %v7763_v10, %v7771_v54  ;;  %v7780_v7 = vsub.f32 %v7764_v51, %v7774_v0 }
0x21c7   : > { %v7784_v11 = vmul.f32 1.442695, %v7779_v43  ;;  %v7786_v33 = vmul.f32 1.442695, %v7780_v7  ;;  %v2957_v43 = vld [vmem:[%s16263_s6 + $0x10] sm:$0xff]  ;;  %v2958_v7 = vld [vmem:[%s16263_s6 + $0x18] sm:$0xff] }
0x21c8   : > { %s16266_s6 = sld [smem:[#allocation116_spill]] }
0x21c9   : > { %12112 = vpow2.f32 %v7784_v11  ;;  %v8019_v11 = vpack.c.bf16 %v2958_v7, %v2957_v43 }
0x21ca   : > { %12114 = vpow2.f32 %v7786_v33  ;;  %v2911_v33 = vld [vmem:[%s16264_s4] sm:$0xff] }
0x21cc   : > { %v7777_v17 = vpop.xlane.xlu0 %7776 }
0x21cd   : > { %v7781_v56 = vsub.f32 %v7765_v5, %v7777_v17 }
0x21cf   : > { %v7788_v37 = vmul.f32 1.442695, %v7781_v56 }
0x21d3   : > { %v12113_v59 = vpop.eup %12112 }
0x21d4   : > { %v12115_v50 = vpop.eup %12114  ;;  %v7793_v25 = vsel %vm3142_vm4, %v12113_v59, 0.0 }
0x21d5   : > { %7794 = vadd.xlane.f32.xlu1 %v7793_v25  ;;  %v7796_v27 = vsel %vm3142_vm4, %v12115_v50, 0.0 }
0x21d6   : > { %7797 = vadd.xlane.f32.xlu0 %v7796_v27 }
0x21e6   : > { %7564 = vrot.lane.b32.xlu1 %v15712_v15, %s16240_s1 }
0x21ec   : > { %7561 = vrot.lane.b32.xlu0 %v15712_v15, %s16241_s2 }
0x21ef   : > { %v7792_v52 = vpop.xlane.xlu0 %7791 }
0x21f0   : > { %12116 = vrcp.f32 %v7792_v52 }
0x21f1   : > { %12118 = vpow2.f32 %v7788_v37 }
0x21fa   : > { %v12117_v13 = vpop.eup %12116 }
0x21fb   : > { %v7806_v35 = vmul.f32 %v12117_v13, %v12111_v16  ;;  %v12119_v28 = vpop.eup %12118 }
0x21fc   : > { %v7799_v38 = vsel %vm3142_vm4, %v12119_v28, 0.0 }
0x21fd   : > { %v7810_v32 = vpack.c.bf16 %v7806_v35, %v7806_v35  ;;  %v2913_v35 = vld [vmem:[%s16264_s4 + $0x10] sm:$0xff] }
0x21ff   : > { %10858 = vmatmul.mubr.msk.bf16.vlgmr.msra.gmra.mrb[136].mxu0 %vm3142_vm4, %v7810_v32  ;;  %v2914_v32 = vld [vmem:[%s16264_s4 + $0x18] sm:$0xff] }
0x2200   : > { %10869 = vmatprep.mubr.msk.bf16.mxu0 %vm13363_vm9, %v13362_v47 }
0x220a   : > { %7800 = vadd.xlane.f32.xlu1 %v7799_v38 }
0x221b   : > { %7567 = vrot.lane.b32.xlu1 %v15712_v15, %s16242_s3 }
0x2262   : > { %v7795_v30 = vpop.xlane.xlu1 %7794 }
0x2263   : > { %12120 = vrcp.f32 %v7795_v30  ;;  %v7798_v34 = vpop.xlane.xlu0 %7797 }
0x2264   : > { %12122 = vrcp.f32 %v7798_v34 }
0x2266   : > { %v7565_v57 = vpop.permute.xlu1 %7564 }
0x2267   : > { %v7816_v29 = vpack.c.bf16 %v7565_v57, %v7565_v57  ;;  %v7562_v45 = vpop.permute.xlu0 %7561  ;;  %v8161_v57 = vpack.c.bf16 %v2914_v32, %v2913_v35 }
0x2268   : > { %v7815_v22 = vpack.c.bf16 %v7562_v45, %v7562_v45 }
0x2269   : > { %v7914_v41 = vsel %vm3155_vm3, %v7816_v29, 0  ;;  %v10002_v29 = vld [vmem:[#allocation36] ss:$0 sm:$0xff] }
0x226a   : > { %v7868_v36 = vsel %vm3155_vm3, %v7815_v22, 0  ;;  %10868 = vmatpush3.bf16.msra.mxu0 %v7914_v41 }
0x226b   : > { %10862 = vmatpush3.bf16.msra.mxu1 %v7868_v36  ;;  %10879 = vmatprep.subr.bf16.mxu0 %v13362_v47 }
0x226c   : > { %10873 = vmatprep.subr.bf16.mxu1 %v13362_v47 }
0x226d   : > { %v12121_v40 = vpop.eup %12120 }
0x226e   : > { %v12123_v15 = vpop.eup %12122  ;;  %v7807_v6 = vmul.f32 %v12121_v40, %v12113_v59  ;;  %v2912_v59 = vld [vmem:[%s16264_s4 + $0x8] sm:$0xff]  ;;  %s16265_s4 = sld [smem:[#allocation115_spill]] }
0x226f   : > { %v7808_v23 = vmul.f32 %v12123_v15, %v12115_v50  ;;  %v8160_v50 = vpack.c.bf16 %v2912_v59, %v2911_v33 }
0x2270   : > { %v7811_v12 = vpack.c.bf16 %v7807_v6, %v7807_v6  ;;  %v10008_v6 = vld [vmem:[#allocation16] ss:$0 sm:$0xff] }
0x2271   : > { %v7812_v10 = vpack.c.bf16 %v7808_v23, %v7808_v23 }
0x2272   : > { %10864 = vmatmul.mubr.msk.bf16.vlgmr.msra.gmra.mrb[132].mxu1 %vm3142_vm4, %v7811_v12 }
0x2273   : > { %10870 = vmatmul.mubr.msk.bf16.vlgmr.msra.gmra.mrb[140].mxu0 %vm3142_vm4, %v7812_v10  ;;  %10875 = vmatprep.mubr.msk.bf16.mxu1 %vm13363_vm9, %v13362_v47 }
0x2274   : > { %10883 = vmatprep.mubr.msk.bf16.mxu0 %vm13363_vm9, %v13362_v47  ;;  %10880 = vmatpush3.bf16.msra.mxu0 %v8018_v48  ;;  %v2919_v59 = vld [vmem:[%s16265_s4] sm:$0xff] }
0x2275   : > { %10881 = vmatprep.subr.bf16.mxu0 %v13362_v47 }
0x2278   : > { %10882 = vmatpush3.bf16.msra.mxu0 %v8019_v11 }
0x2279   : > { %10895 = vmatprep.subr.bf16.mxu0 %v8160_v50 }
0x2297   : > { %v7801_v51 = vpop.xlane.xlu1 %7800 }
0x2298   : > { %12124 = vrcp.f32 %v7801_v51 }
0x229b   : > { %v7568_v62 = vpop.permute.xlu1 %7567 }
0x229c   : > { %v7817_v1 = vpack.c.bf16 %v7568_v62, %v7568_v62 }
0x229e   : > { %v7960_v55 = vsel %vm3155_vm3, %v7817_v1, 0 }
0x229f   : > { %10874 = vmatpush3.bf16.msra.mxu1 %v7960_v55 }
0x22a0   : > { %10887 = vmatprep.subr.bf16.mxu1 %v13362_v47 }
0x22a2   : > { %v12125_v21 = vpop.eup %12124 }
0x22a3   : > { %v7809_v18 = vmul.f32 %v12125_v21, %v12119_v28 }
0x22a5   : > { %v7813_v14 = vpack.c.bf16 %v7809_v18, %v7809_v18 }
0x22a7   : > { %10876 = vmatmul.mubr.msk.bf16.vlgmr.msra.gmra.mrb[136].mxu1 %vm3142_vm4, %v7813_v14 }
0x22a8   : > { %10891 = vmatprep.mubr.msk.bf16.mxu1 %vm13363_vm9, %v13362_v47 }
0x22d2   : > { %v7858_v26 = vpop.f32.mrb[136].mxu0 }
0x22d3   : > { %v10859_v60 = vpop.f32.mrb[137].mxu0 }
0x22d4   : > { %v7861_v39 = vpop.f32.mrb[138].mxu0 }
0x22d5   : > { %v10860_v5 = vpop.f32.mrb[139].mxu0 }
0x2345   : > { %v7904_v3 = vpop.f32.mrb[132].mxu1 }
0x2346   : > { %v7950_v4 = vpop.f32.mrb[140].mxu0  ;;  %8003 = vrot.lane.b32.xlu1 %v7904_v3, %s16244_s7  ;;  %v10865_v42 = vpop.f32.mrb[133].mxu1 }
0x2347   : > { %8007 = vrot.lane.b32.xlu0 %v7950_v4, %s16245_s8  ;;  %v10871_v63 = vpop.f32.mrb[141].mxu0  ;;  %v7907_v16 = vpop.f32.mrb[134].mxu1 }
0x2348   : > { %v7953_v9 = vpop.f32.mrb[142].mxu0  ;;  %v10866_v54 = vpop.f32.mrb[135].mxu1 }
0x2349   : > { %v10872_v0 = vpop.f32.mrb[143].mxu0 }
0x237a   : > { %v7996_v25 = vpop.f32.mrb[136].mxu1 }
0x237b   : > { %8011 = vrot.lane.b32.xlu1 %v7996_v25, %s16246_s9  ;;  %v10877_v27 = vpop.f32.mrb[137].mxu1 }
0x237c   : > { %v7999_v17 = vpop.f32.mrb[138].mxu1  ;;  %v2921_v27 = vld [vmem:[%s16265_s4 + $0x10] sm:$0xff] }
0x237d   : > { %v10878_v52 = vpop.f32.mrb[139].mxu1  ;;  %v2922_v17 = vld [vmem:[%s16265_s4 + $0x18] sm:$0xff] }
0x237e   : > { %v8100_v52 = vpack.c.bf16 %v2922_v17, %v2921_v27 }
0x23b8   : > { %v8004_v56 = vpop.permute.xlu1 %8003 }
0x23b9   : > { %v8014_v37 = vsel %vm3142_vm4, %v7858_v26, %v8004_v56  ;;  %v8008_v13 = vpop.permute.xlu0 %8007  ;;  %v2923_v56 = vld [vmem:[%s16266_s6] sm:$0xff] }
0x23ba   : > { %v8015_v28 = vsel %vm4979_vm7, %v8014_v37, %v8008_v13  ;;  %v2924_v37 = vld [vmem:[%s16266_s6 + $0x8] sm:$0xff] }
0x23bb   : > { %v8313_v13 = vpack.c.bf16 %v2924_v37, %v2923_v56 }
0x23ed   : > { %v8012_v38 = vpop.permute.xlu1 %8011 }
0x23ee   : > { %v8016_v30 = vsel %vm4988_vm8, %v8015_v28, %v8012_v38 }
0x23ef   : > { %v8017_v34 = vpack.c.bf16 %v8016_v30, %v8016_v30  ;;  %v10004_v30 = vld [vmem:[#allocation27] ss:$0 sm:$0xff] }
0x23f1   : > { %10884 = vmatmul.mubr.msk.bf16.vlgmr.msra.gmra.mrb[144].mxu0 %vm3244_vm5, %v8017_v34 }
0x23f2   : > { %10896 = vmatpush3.bf16.msra.mxu0 %v8160_v50  ;;  %10899 = vmatprep.mubr.msk.bf16.mxu0 %vm3244_vm5, %v15388_v61  ;;  %v2920_v50 = vld [vmem:[%s16265_s4 + $0x8] sm:$0xff] }
0x23f3   : > { %10897 = vmatprep.subr.bf16.mxu0 %v8161_v57  ;;  %v8099_v25 = vpack.c.bf16 %v2920_v50, %v2919_v59 }
0x23f5   : > { %10888 = vmatpush3.bf16.msra.mxu1 %v8099_v25 }
0x23f6   : > { %10898 = vmatpush3.bf16.msra.mxu0 %v8161_v57  ;;  %10889 = vmatprep.subr.bf16.mxu1 %v13362_v47  ;;  %v10005_v57 = vld [vmem:[#allocation25] ss:$0 sm:$0xff] }
0x23f7   : > { %10919 = vmatprep.subr.bf16.mxu0 %v13362_v47 }
0x23f9   : > { %10900 = vmatmul.mubr.msk.bf16.vlgmr.msra.gmra.mrb[148].mxu0 %vm3244_vm5, %v15399_v24  ;;  %10890 = vmatpush3.bf16.msra.mxu1 %v8100_v52 }
0x23fa   : > { %10903 = vmatprep.mubr.msk.bf16.mxu0 %vm3244_vm5, %v15405_v31  ;;  %10907 = vmatprep.subr.bf16.mxu1 %v8313_v13 }
0x2401   : > { %10904 = vmatmul.mubr.msk.bf16.gmra.mrb[152].mxu0 %vm3244_vm5, %v15414_v46 }
0x2402   : > { %10927 = vmatprep.mubr.msk.bf16.mxu0 %vm13363_vm9, %v13362_v47 }
0x24c4   : > { %v8063_v45 = vpop.f32.mrb[144].mxu0 }
0x24c5   : > { %v8064_v22 = vadd.f32 %v10002_v29, %v8063_v45  ;;  %v10885_v61 = vpop.f32.mrb[145].mxu0 }
0x24c6   : > { %v8066_v41 = vpop.f32.mrb[146].mxu0  ;;  %v2926_v61 = vld [vmem:[%s16266_s6 + $0x18] sm:$0xff] }
0x24c7   : > { %v8069_v36 = vadd.f32 %v8064_v22, %v15677_v53  ;;  %v10886_v40 = vpop.f32.mrb[147].mxu0  ;;  %v2925_v22 = vld [vmem:[%s16266_s6 + $0x10] sm:$0xff] }
0x24c8   : > { %v8314_v40 = vpack.c.bf16 %v2926_v61, %v2925_v22 }
0x24c9   : > { %v8070_v15 = vsel %vm3244_vm5, %v8069_v36, 0.0 }
0x24ca   : > { %8071 = vadd.xlane.f32.xlu0 %v8070_v15 }
0x24cc   : > { %v10901_v24 = vpop.f32.mrb[148].mxu0 }
0x24cd   : > { %v8202_v31 = vpop.f32.mrb[149].mxu0  ;;  %v8211_v12 = vadd.f32 %v10901_v24, %v10008_v6 }
0x24ce   : > { %v10902_v23 = vpop.f32.mrb[150].mxu0  ;;  %v8203_v51 = vadd.f32 %v10008_v6, %v8202_v31 }
0x24cf   : > { %v8214_v46 = vadd.f32 %v10902_v23, %v10008_v6  ;;  %v8205_v10 = vpop.f32.mrb[151].mxu0 }
0x24d0   : > { %v8206_v62 = vadd.f32 %v10008_v6, %v8205_v10 }
0x24d1   : > { %v8471_v1 = vpack.c.bf16 %v8214_v46, %v8211_v12  ;;  %v15794_v55 = vpack.i.bf16 %v8214_v46, %v8211_v12 }
0x24d2   : > { %v8470_v21 = vpack.c.bf16 %v8206_v62, %v8203_v51  ;;  %v11792_v18 = vpack.i.bf16 %v8206_v62, %v8203_v51 }
0x24d3   : > { %v8493_v16 = vsel %vm3142_vm4, %v8471_v1, 0 }
0x24d4   : > { %v10905_v14 = vpop.f32.mrb[152].mxu0  ;;  %v8490_v53 = vsel %vm3142_vm4, %v8470_v21, 0 }
0x24d5   : > { %v8218_v26 = vpop.f32.mrb[153].mxu0  ;;  %10920 = vmatpush3.bf16.xpose.msra.mxu0 %v8490_v53  ;;  %v8227_v39 = vadd.f32 %v10905_v14, %v10008_v6 }
0x24d6   : > { %v10906_v60 = vpop.f32.mrb[154].mxu0  ;;  %10921 = vmatprep.subr.bf16.mxu0 %v13362_v47  ;;  %v8219_v2 = vadd.f32 %v10008_v6, %v8218_v26 }
0x24d7   : > { %v8230_v5 = vadd.f32 %v10906_v60, %v10008_v6  ;;  %v8221_v44 = vpop.f32.mrb[155].mxu0 }
0x24d8   : > { %v8222_v48 = vadd.f32 %v10008_v6, %v8221_v44  ;;  %v10006_v44 = vld [vmem:[#allocation19] ss:$0 sm:$0xff] }
0x24d9   : > { %v8473_v3 = vpack.c.bf16 %v8230_v5, %v8227_v39  ;;  %v15798_v4 = vpack.i.bf16 %v8230_v5, %v8227_v39 }
0x24da   : > { %v15800_v42 = vpack.i.bf16 %v8222_v48, %v8219_v2  ;;  %v8472_v63 = vpack.c.bf16 %v8222_v48, %v8219_v2 }
0x24db   : > { %v8499_v54 = vsel %vm3142_vm4, %v8473_v3, 0 }
0x24dc   : > { %v8496_v9 = vsel %vm3142_vm4, %v8472_v63, 0 }
0x24dd   : > { %10922 = vmatpush3.bf16.xpose.msra.mxu0 %v8493_v16 }
0x24de   : > { %10923 = vmatprep.subr.bf16.mxu0 %v13362_v47 }
0x24e0   : > { %11793 = vrot.lane.b32.xlu0 %v11792_v18, %s16241_s2 }
0x24e4   : > { %11803 = vrot.lane.b32.xlu0 %v15800_v42, %s16241_s2 }
0x24e5   : > { %10924 = vmatpush3.bf16.xpose.msra.mxu0 %v8496_v9 }
0x24e6   : > { %10925 = vmatprep.subr.bf16.mxu0 %v13362_v47 }
0x24e8   : > { %11813 = vrot.lane.b32.xlu0 %v11792_v18, %s16240_s1 }
0x24ed   : > { %10926 = vmatpush3.bf16.xpose.msra.mxu0 %v8499_v54 }
0x24ee   : > { %10943 = vmatprep.subr.bf16.mxu0 %v13362_v47 }
0x2557   : > { %v8072_v0 = vpop.xlane.xlu0 %8071 }
0x2558   : > { %v8073_v43 = vmul.f32 0.03125, %v8072_v0 }
0x255a   : > { %v8074_v7 = vsub.f32 %v8069_v36, %v8073_v43 }
0x255b   : > { %v11794_v15 = vpop.permute.xlu0 %11793 }
0x255c   : > { %v8075_v11 = vmul.f32 %v8074_v7, %v8074_v7  ;;  %v11796_v24 = vunpack.i.h.bf16 %v11794_v15  ;;  %v11795_v6 = vunpack.i.l.bf16 %v11794_v15 }
0x255e   : > { %v8076_v33 = vsel %vm3244_vm5, %v8075_v11, 0.0  ;;  %v8474_v31 = vpack.c.bf16 %v11796_v24, %v11795_v6 }
0x255f   : > { %8077 = vadd.xlane.f32.xlu1 %v8076_v33  ;;  %v10013_v33 = vld [vmem:[#allocation21] ss:$0 sm:$0xff] }
0x2560   : > { %v8545_v46 = vsel %vm3142_vm4, %v8474_v31, 0 }
0x2570   : > { %11798 = vrot.lane.b32.xlu1 %v15794_v55, %s16241_s2 }
0x2574   : > { %11808 = vrot.lane.b32.xlu1 %v15798_v4, %s16241_s2 }
0x2578   : > { %11818 = vrot.lane.b32.xlu1 %v11792_v18, %s16242_s3 }
0x257c   : > { %11823 = vrot.lane.b32.xlu1 %v15794_v55, %s16240_s1 }
0x2580   : > { %11833 = vrot.lane.b32.xlu1 %v15800_v42, %s16240_s1 }
0x2584   : > { %11843 = vrot.lane.b32.xlu1 %v15798_v4, %s16240_s1 }
0x25ec   : > { %v8078_v35 = vpop.xlane.xlu1 %8077 }
0x25ed   : > { %v8079_v32 = vmul.f32 0.03125, %v8078_v35 }
0x25ef   : > { %v8080_v28 = vadd.f32 1e-05, %v8079_v32 }
0x25f1   : > { %12126 = vrsqrt.f32 %v8080_v28 }
0x25fb   : > { %v12127_v38 = vpop.eup %12126 }
0x25fc   : > { %v8082_v34 = vmul.f32 %v12127_v38, %v8074_v7 }
0x25fe   : > { %v8089_v29 = vmul.f32 %v10004_v30, %v8082_v34 }
0x2600   : > { %v15831_v45 = vadd.f32 %v10005_v57, %v8089_v29 }
0x2602   : > { %v8097_v41 = vadd.f32 %v15684_v8, %v15831_v45  ;;  %v11799_v8 = vpop.permute.xlu1 %11798 }
0x2603   : > { %v11801_v23 = vunpack.i.h.bf16 %v11799_v8  ;;  %v11800_v12 = vunpack.i.l.bf16 %v11799_v8 }
0x2604   : > { %v8098_v36 = vpack.c.bf16 %v8097_v41, %v8097_v41 }
0x2606   : > { %10892 = vmatmul.mubr.msk.bf16.vlgmr.msra.gmra.mrb[140].mxu1 %vm3244_vm5, %v8098_v36  ;;  %v11809_v1 = vpop.permute.xlu1 %11808 }
0x2607   : > { %10908 = vmatpush3.bf16.msra.mxu1 %v8313_v13  ;;  %10911 = vmatprep.mubr.msk.bf16.mxu1 %vm3244_vm5, %v15434_v58  ;;  %v8475_v58 = vpack.c.bf16 %v11801_v23, %v11800_v12  ;;  %v11811_v21 = vunpack.i.h.bf16 %v11809_v1  ;;  %v11810_v18 = vunpack.i.l.bf16 %v11809_v1 }
0x2608   : > { %10909 = vmatprep.subr.bf16.mxu1 %v8314_v40 }
0x260a   : > { %v15857_v60 = vpop.permute.xlu1 %11818 }
0x260b   : > { %10910 = vmatpush3.bf16.msra.mxu1 %v8314_v40 }
0x260c   : > { %10931 = vmatprep.subr.bf16.mxu1 %v13362_v47 }
0x260e   : > { %10912 = vmatmul.mubr.msk.bf16.vlgmr.msra.gmra.mrb[144].mxu1 %vm3244_vm5, %v15441_v49  ;;  %v11804_v49 = vpop.permute.xlu0 %11803  ;;  %v11824_v3 = vpop.permute.xlu1 %11823 }
0x260f   : > { %10915 = vmatprep.mubr.msk.bf16.mxu1 %vm3244_vm5, %v15444_v19  ;;  %v11806_v10 = vunpack.i.h.bf16 %v11804_v49  ;;  %v11805_v51 = vunpack.i.l.bf16 %v11804_v49  ;;  %v8548_v19 = vsel %vm3142_vm4, %v8475_v58, 0  ;;  %v11826_v43 = vunpack.i.h.bf16 %v11824_v3 }
0x2610   : > { %v11825_v7 = vunpack.i.l.bf16 %v11824_v3 }
0x2611   : > { %v8476_v62 = vpack.c.bf16 %v11806_v10, %v11805_v51  ;;  %v11821_v51 = vunpack.i.h.bf16 %v15857_v60 }
0x2612   : > { %v11814_v26 = vpop.permute.xlu0 %11813  ;;  %v8479_v59 = vpack.c.bf16 %v11826_v43, %v11825_v7  ;;  %v11834_v25 = vpop.permute.xlu1 %11833 }
0x2613   : > { %v8551_v14 = vsel %vm3142_vm4, %v8476_v62, 0  ;;  %v11816_v39 = vunpack.i.h.bf16 %v11814_v26  ;;  %v11815_v5 = vunpack.i.l.bf16 %v11814_v26  ;;  %v11836_v35 = vunpack.i.h.bf16 %v11834_v25 }
0x2614   : > { %10932 = vmatpush3.bf16.xpose.msra.mxu1 %v8545_v46  ;;  %v11835_v32 = vunpack.i.l.bf16 %v11834_v25 }
0x2615   : > { %10933 = vmatprep.subr.bf16.mxu1 %v13362_v47  ;;  %v8478_v48 = vpack.c.bf16 %v11816_v39, %v11815_v5 }
0x2616   : > { %10916 = vmatmul.mubr.msk.bf16.gmra.mrb[148].mxu1 %vm3244_vm5, %v15450_v20  ;;  %v8477_v20 = vpack.c.bf16 %v11811_v21, %v11810_v18  ;;  %v8480_v29 = vpack.c.bf16 %v11836_v35, %v11835_v32 }
0x2617   : > { %10939 = vmatprep.mubr.msk.bf16.mxu1 %vm13363_vm9, %v13362_v47  ;;  %v8600_v11 = vsel %vm3142_vm4, %v8478_v48, 0 }
0x2618   : > { %v8554_v53 = vsel %vm3142_vm4, %v8477_v20, 0  ;;  %v8606_v23 = vsel %vm3142_vm4, %v8480_v29, 0 }
0x261c   : > { %10934 = vmatpush3.bf16.xpose.msra.mxu1 %v8548_v19  ;;  %v11820_v19 = vunpack.i.l.bf16 %v15857_v60 }
0x261d   : > { %10935 = vmatprep.subr.bf16.mxu1 %v13362_v47 }
0x261e   : > { %v8482_v62 = vpack.c.bf16 %v11821_v51, %v11820_v19 }
0x2620   : > { %v8655_v20 = vsel %vm3142_vm4, %v8482_v62, 0 }
0x2624   : > { %10936 = vmatpush3.bf16.xpose.msra.mxu1 %v8551_v14 }
0x2625   : > { %10937 = vmatprep.subr.bf16.mxu1 %v13362_v47 }
0x262c   : > { %10938 = vmatpush3.bf16.xpose.msra.mxu1 %v8554_v53 }
0x262d   : > { %10955 = vmatprep.subr.bf16.mxu1 %v13362_v47 }
0x26d9   : > { %v8144_v2 = vpop.f32.mrb[140].mxu1 }
0x26da   : > { %v8145_v63 = vadd.f32 %v10006_v44, %v8144_v2  ;;  %v10893_v16 = vpop.f32.mrb[141].mxu1 }
0x26db   : > { %v8147_v9 = vpop.f32.mrb[142].mxu1 }
0x26dc   : > { %v8466_v54 = vpack.c.bf16 %v8145_v63, %v8145_v63  ;;  %v10894_v0 = vpop.f32.mrb[143].mxu1  ;;  %8154 = vrot.lane.b32.xlu1 %v8145_v63, %s16240_s1  ;;  %8151 = vrot.lane.b32.xlu0 %v8145_v63, %s16241_s2 }
0x26de   : > { %10928 = vmatmul.mubr.msk.bf16.vlgmr.msra.gmra.mrb[156].mxu0 %vm3142_vm4, %v8466_v54 }
0x26df   : > { %10944 = vmatpush3.bf16.xpose.msra.mxu0 %v8600_v11  ;;  %10951 = vmatprep.mubr.msk.bf16.mxu0 %vm13363_vm9, %v13362_v47 }
0x26e0   : > { %11828 = vrot.lane.b32.xlu0 %v15794_v55, %s16242_s3  ;;  %10945 = vmatprep.subr.bf16.mxu0 %v13362_v47  ;;  %v8603_v55 = vsel %vm3142_vm4, %v8479_v59, 0 }
0x26e1   : > { %v10913_v50 = vpop.f32.mrb[144].mxu1 }
0x26e2   : > { %v8355_v27 = vpop.f32.mrb[145].mxu1  ;;  %v8364_v56 = vadd.f32 %v10913_v50, %v10013_v33 }
0x26e3   : > { %v8356_v17 = vadd.f32 %v10013_v33, %v8355_v27  ;;  %v10914_v52 = vpop.f32.mrb[146].mxu1  ;;  %v12160_v27 = vld [vmem:[%s14582_s5] ss:$0 sm:$0xff]  ;;  %s16267_s5 = sld [smem:[#allocation114_spill]] }
0x26e4   : > { %v8367_v37 = vadd.f32 %v10914_v52, %v10013_v33  ;;  %v8358_v13 = vpop.f32.mrb[147].mxu1  ;;  %11838 = vrot.lane.b32.xlu0 %v15800_v42, %s16242_s3  ;;  %v11844_v42 = vpop.permute.xlu1 %11843 }
0x26e5   : > { %v8359_v28 = vadd.f32 %v10013_v33, %v8358_v13  ;;  %v11846_v6 = vunpack.i.h.bf16 %v11844_v42  ;;  %v11845_v31 = vunpack.i.l.bf16 %v11844_v42 }
0x26e6   : > { %v15871_v38 = vpack.i.bf16 %v8367_v37, %v8364_v56  ;;  %v8763_v30 = vpack.c.bf16 %v8367_v37, %v8364_v56 }
0x26e7   : > { %10946 = vmatpush3.bf16.xpose.msra.mxu0 %v8603_v55  ;;  %v8762_v34 = vpack.c.bf16 %v8359_v28, %v8356_v17  ;;  %v15873_v57 = vpack.i.bf16 %v8359_v28, %v8356_v17  ;;  %v8481_v49 = vpack.c.bf16 %v11846_v6, %v11845_v31 }
0x26e8   : > { %11848 = vrot.lane.b32.xlu0 %v15798_v4, %s16242_s3  ;;  %10947 = vmatprep.subr.bf16.mxu0 %v13362_v47 }
0x26e9   : > { %v10917_v22 = vpop.f32.mrb[148].mxu1  ;;  %v8609_v10 = vsel %vm3142_vm4, %v8481_v49, 0 }
0x26ea   : > { %v8380_v61 = vadd.f32 %v10917_v22, %v10013_v33  ;;  %v8371_v41 = vpop.f32.mrb[149].mxu1 }
0x26eb   : > { %v8372_v36 = vadd.f32 %v10013_v33, %v8371_v41  ;;  %v10918_v40 = vpop.f32.mrb[150].mxu1 }
0x26ec   : > { %v8383_v15 = vadd.f32 %v10918_v40, %v10013_v33  ;;  %v8374_v24 = vpop.f32.mrb[151].mxu1  ;;  %8157 = vrot.lane.b32.xlu0 %v8145_v63, %s16242_s3 }
0x26ed   : > { %v8375_v8 = vadd.f32 %v10013_v33, %v8374_v24 }
0x26ee   : > { %v8765_v12 = vpack.c.bf16 %v8383_v15, %v8380_v61  ;;  %v15880_v4 = vpack.i.bf16 %v8383_v15, %v8380_v61 }
0x26ef   : > { %10948 = vmatpush3.bf16.xpose.msra.mxu0 %v8606_v23  ;;  %v8764_v46 = vpack.c.bf16 %v8375_v8, %v8372_v36  ;;  %v15882_v58 = vpack.i.bf16 %v8375_v8, %v8372_v36 }
0x26f0   : > { %11858 = vrot.lane.b32.xlu0 %v15871_v38, %s16241_s2  ;;  %10949 = vmatprep.subr.bf16.mxu0 %v13362_v47 }
0x26f7   : > { %10950 = vmatpush3.bf16.xpose.msra.mxu0 %v8609_v10 }
0x26f8   : > { %10967 = vmatprep.subr.bf16.mxu0 %v13362_v47 }
0x274e   : > { %v8155_v1 = vpop.permute.xlu1 %8154  ;;  %v8152_v21 = vpop.permute.xlu0 %8151 }
0x274f   : > { %v8468_v18 = vpack.c.bf16 %v8155_v1, %v8155_v1  ;;  %v8467_v14 = vpack.c.bf16 %v8152_v21, %v8152_v21 }
0x2751   : > { %10940 = vmatmul.mubr.msk.bf16.vlgmr.msra.gmra.mrb[152].mxu1 %vm3142_vm4, %v8467_v14  ;;  %10952 = vmatmul.mubr.msk.bf16.vlgmr.msra.gmra.mrb[160].mxu0 %vm3142_vm4, %v8468_v18 }
0x2752   : > { %10956 = vmatpush3.bf16.xpose.msra.mxu1 %v8655_v20  ;;  %10968 = vmatpush3.bf16.msra.mxu0 %v8762_v34  ;;  %v11829_v53 = vpop.permute.xlu0 %11828 }
0x2753   : > { %v11831_v26 = vunpack.i.h.bf16 %v11829_v53  ;;  %v11830_v39 = vunpack.i.l.bf16 %v11829_v53  ;;  %10969 = vmatprep.subr.bf16.mxu0 %v13362_v47  ;;  %10957 = vmatprep.subr.bf16.mxu1 %v13362_v47 }
0x2754   : > { %10963 = vmatprep.mubr.msk.bf16.mxu1 %vm13363_vm9, %v13362_v47  ;;  %10975 = vmatprep.mubr.msk.bf16.mxu0 %vm13363_vm9, %v13362_v47 }
0x2755   : > { %v8483_v60 = vpack.c.bf16 %v11831_v26, %v11830_v39 }
0x2756   : > { %10970 = vmatpush3.bf16.msra.mxu0 %v8763_v30  ;;  %v11839_v5 = vpop.permute.xlu0 %11838 }
0x2757   : > { %10971 = vmatprep.subr.bf16.mxu0 %v13362_v47  ;;  %v8658_v44 = vsel %vm3142_vm4, %v8483_v60, 0  ;;  %v11841_v2 = vunpack.i.h.bf16 %v11839_v5  ;;  %v11840_v48 = vunpack.i.l.bf16 %v11839_v5 }
0x2759   : > { %v8484_v3 = vpack.c.bf16 %v11841_v2, %v11840_v48 }
0x275a   : > { %10958 = vmatpush3.bf16.xpose.msra.mxu1 %v8658_v44  ;;  %10972 = vmatpush3.bf16.msra.mxu0 %v8764_v46  ;;  %v11849_v63 = vpop.permute.xlu0 %11848 }
0x275b   : > { %10973 = vmatprep.subr.bf16.mxu0 %v13362_v47  ;;  %10959 = vmatprep.subr.bf16.mxu1 %v13362_v47  ;;  %v11851_v16 = vunpack.i.h.bf16 %v11849_v63  ;;  %v11850_v9 = vunpack.i.l.bf16 %v11849_v63  ;;  %v8661_v54 = vsel %vm3142_vm4, %v8484_v3, 0 }
0x275d   : > { %v8485_v0 = vpack.c.bf16 %v11851_v16, %v11850_v9 }
0x275e   : > { %10974 = vmatpush3.bf16.msra.mxu0 %v8765_v12  ;;  %v8158_v7 = vpop.permute.xlu0 %8157 }
0x275f   : > { %10991 = vmatprep.subr.bf16.mxu0 %v13362_v47  ;;  %v8664_v43 = vsel %vm3142_vm4, %v8485_v0, 0  ;;  %v8469_v11 = vpack.c.bf16 %v8158_v7, %v8158_v7 }
0x2762   : > { %10960 = vmatpush3.bf16.xpose.msra.mxu1 %v8661_v54  ;;  %v11859_v31 = vpop.permute.xlu0 %11858 }
0x2763   : > { %10961 = vmatprep.subr.bf16.mxu1 %v13362_v47  ;;  %v11861_v46 = vunpack.i.h.bf16 %v11859_v31  ;;  %v11860_v49 = vunpack.i.l.bf16 %v11859_v31 }
0x2765   : > { %v8767_v51 = vpack.c.bf16 %v11861_v46, %v11860_v49 }
0x276a   : > { %10962 = vmatpush3.bf16.xpose.msra.mxu1 %v8664_v43 }
0x276b   : > { %10979 = vmatprep.subr.bf16.mxu1 %v13362_v47 }
0x2771   : > { %10964 = vmatmul.mubr.msk.bf16.vlgmr.msra.gmra.mrb[156].mxu1 %vm3142_vm4, %v8469_v11 }
0x2772   : > { %10987 = vmatprep.mubr.msk.bf16.mxu1 %vm13363_vm9, %v13362_v47 }
0x27b1   : > { %v8535_v33 = vpop.f32.mrb[156].mxu0 }
0x27b2   : > { %v8706_v59 = vmul.f32 0.35355338, %v8535_v33  ;;  %v10929_v50 = vpop.f32.mrb[157].mxu0 }
0x27b3   : > { %v8538_v25 = vpop.f32.mrb[158].mxu0 }
0x27b4   : > { %v8710_v17 = vadd.f32 %v12160_v27, %v8706_v59  ;;  %v10930_v52 = vpop.f32.mrb[159].mxu0 }
0x27b6   : > { %v8714_v56 = vsel %vm4182_vm6, %v8710_v17, -inf }
0x27b7   : > { %8715 = vmax.xlane.f32.xlu1 %v8714_v56 }
0x27c8   : > { %11853 = vrot.lane.b32.xlu1 %v15873_v57, %s16241_s2 }
0x2824   : > { %v8590_v37 = vpop.f32.mrb[152].mxu1  ;;  %v8645_v13 = vpop.f32.mrb[160].mxu0 }
0x2825   : > { %v8707_v35 = vmul.f32 0.35355338, %v8590_v37  ;;  %v10941_v32 = vpop.f32.mrb[153].mxu1  ;;  %v10953_v28 = vpop.f32.mrb[161].mxu0  ;;  %v8708_v1 = vmul.f32 0.35355338, %v8645_v13 }
0x2826   : > { %v8593_v55 = vpop.f32.mrb[154].mxu1  ;;  %v8648_v30 = vpop.f32.mrb[162].mxu0 }
0x2827   : > { %v8711_v34 = vadd.f32 %v12160_v27, %v8707_v35  ;;  %v10942_v29 = vpop.f32.mrb[155].mxu1  ;;  %v10954_v22 = vpop.f32.mrb[163].mxu0  ;;  %v8712_v21 = vadd.f32 %v12160_v27, %v8708_v1 }
0x2829   : > { %v8717_v42 = vsel %vm4182_vm6, %v8711_v34, -inf  ;;  %v8720_v20 = vsel %vm4182_vm6, %v8712_v21, -inf }
0x282a   : > { %8718 = vmax.xlane.f32.xlu0 %v8717_v42 }
0x2840   : > { %11863 = vrot.lane.b32.xlu0 %v15882_v58, %s16241_s2 }
0x2844   : > { %v8700_v61 = vpop.f32.mrb[156].mxu1  ;;  %v8716_v41 = vpop.xlane.xlu1 %8715 }
0x2845   : > { %v10965_v36 = vpop.f32.mrb[157].mxu1  ;;  %v8726_v40 = vsub.f32 %v8710_v17, %v8716_v41  ;;  %v8709_v18 = vmul.f32 0.35355338, %v8700_v61 }
0x2846   : > { %v8703_v15 = vpop.f32.mrb[158].mxu1 }
0x2847   : > { %v8730_v24 = vmul.f32 1.442695, %v8726_v40  ;;  %v10966_v6 = vpop.f32.mrb[159].mxu1  ;;  %v8713_v14 = vadd.f32 %v12160_v27, %v8709_v18 }
0x2848   : > { %v11854_v8 = vpop.permute.xlu1 %11853 }
0x2849   : > { %12128 = vpow2.f32 %v8730_v24  ;;  %v11856_v23 = vunpack.i.h.bf16 %v11854_v8  ;;  %v11855_v12 = vunpack.i.l.bf16 %v11854_v8  ;;  %v8723_v53 = vsel %vm4182_vm6, %v8713_v14, -inf }
0x284b   : > { %v8766_v10 = vpack.c.bf16 %v11856_v23, %v11855_v12 }
0x284d   : > { %10980 = vmatpush3.bf16.msra.mxu1 %v8766_v10 }
0x284e   : > { %10981 = vmatprep.subr.bf16.mxu1 %v13362_v47 }
0x2851   : > { %10982 = vmatpush3.bf16.msra.mxu1 %v8767_v51 }
0x2852   : > { %10983 = vmatprep.subr.bf16.mxu1 %v13362_v47 }
0x2853   : > { %v12129_v19 = vpop.eup %12128 }
0x2854   : > { %v8738_v62 = vsel %vm4182_vm6, %v12129_v19, 0.0 }
0x2855   : > { %8739 = vadd.xlane.f32.xlu1 %v8738_v62 }
0x285f   : > { %8721 = vmax.xlane.f32.xlu0 %v8720_v20 }
0x2863   : > { %8724 = vmax.xlane.f32.xlu0 %v8723_v53 }
0x2879   : > { %11868 = vrot.lane.b32.xlu0 %v15880_v4, %s16241_s2  ;;  %s16271_s2 = sld [smem:[#allocation85_spill]] }
0x287d   : > { %11873 = vrot.lane.b32.xlu0 %v15873_v57, %s16240_s1 }
0x2881   : > { %11878 = vrot.lane.b32.xlu0 %v15873_v57, %s16242_s3 }
0x2885   : > { %11883 = vrot.lane.b32.xlu0 %v15871_v38, %s16240_s1 }
0x2889   : > { %11888 = vrot.lane.b32.xlu0 %v15871_v38, %s16242_s3 }
0x28b7   : > { %v8719_v26 = vpop.xlane.xlu0 %8718 }
0x28b8   : > { %v8727_v39 = vsub.f32 %v8711_v34, %v8719_v26 }
0x28ba   : > { %v8732_v60 = vmul.f32 1.442695, %v8727_v39 }
0x28bb   : > { %v11864_v5 = vpop.permute.xlu0 %11863 }
0x28bc   : > { %12130 = vpow2.f32 %v8732_v60  ;;  %v11866_v44 = vunpack.i.h.bf16 %v11864_v5  ;;  %v11865_v2 = vunpack.i.l.bf16 %v11864_v5 }
0x28be   : > { %v8768_v48 = vpack.c.bf16 %v11866_v44, %v11865_v2 }
0x28c0   : > { %10984 = vmatpush3.bf16.msra.mxu1 %v8768_v48 }
0x28c1   : > { %10985 = vmatprep.subr.bf16.mxu1 %v13362_v47 }
0x28c6   : > { %v12131_v3 = vpop.eup %12130 }
0x28c7   : > { %v8741_v57 = vsel %vm4182_vm6, %v12131_v3, 0.0 }
0x28c8   : > { %8742 = vadd.xlane.f32.xlu0 %v8741_v57 }
0x28e2   : > { %v8740_v63 = vpop.xlane.xlu1 %8739 }
0x28e3   : > { %12132 = vrcp.f32 %v8740_v63 }
0x28ec   : > { %v8722_v16 = vpop.xlane.xlu0 %8721 }
0x28ed   : > { %v12133_v9 = vpop.eup %12132  ;;  %v8728_v38 = vsub.f32 %v8712_v21, %v8722_v16 }
0x28ee   : > { %v8754_v54 = vmul.f32 %v12133_v9, %v12129_v19 }
0x28ef   : > { %v8734_v0 = vmul.f32 1.442695, %v8728_v38 }
0x28f0   : > { %v8725_v43 = vpop.xlane.xlu0 %8724  ;;  %v8758_v7 = vpack.c.bf16 %v8754_v54, %v8754_v54  ;;  %v2915_v54 = vld [vmem:[%s16267_s5] sm:$0xff] }
0x28f1   : > { %12134 = vpow2.f32 %v8734_v0  ;;  %v8729_v11 = vsub.f32 %v8713_v14, %v8725_v43  ;;  %v2916_v0 = vld [vmem:[%s16267_s5 + $0x8] sm:$0xff] }
0x28f2   : > { %10976 = vmatmul.mubr.msk.bf16.vlgmr.msra.gmra.mrb[164].mxu0 %vm4182_vm6, %v8758_v7  ;;  %v8966_v43 = vpack.c.bf16 %v2916_v0, %v2915_v54 }
0x28f3   : > { %v8736_v33 = vmul.f32 1.442695, %v8729_v11  ;;  %10999 = vmatprep.mubr.msk.bf16.mxu0 %vm13363_vm9, %v13362_v47 }
0x28f4   : > { %v11869_v59 = vpop.permute.xlu0 %11868 }
0x28f5   : > { %12136 = vpow2.f32 %v8736_v33  ;;  %v11871_v50 = vunpack.i.h.bf16 %v11869_v59  ;;  %v11870_v25 = vunpack.i.l.bf16 %v11869_v59 }
0x28f7   : > { %v8769_v27 = vpack.c.bf16 %v11871_v50, %v11870_v25  ;;  %v2917_v50 = vld [vmem:[%s16267_s5 + $0x10] sm:$0xff]  ;;  %v2918_v25 = vld [vmem:[%s16267_s5 + $0x18] sm:$0xff] }
0x28f8   : > { %v11874_v17 = vpop.permute.xlu0 %11873 }
0x28f9   : > { %v11876_v52 = vunpack.i.h.bf16 %v11874_v17  ;;  %v11875_v56 = vunpack.i.l.bf16 %v11874_v17  ;;  %10986 = vmatpush3.bf16.msra.mxu1 %v8769_v27  ;;  %v8967_v27 = vpack.c.bf16 %v2918_v25, %v2917_v50 }
0x28fa   : > { %11003 = vmatprep.subr.bf16.mxu1 %v13362_v47 }
0x28fb   : > { %v12135_v37 = vpop.eup %12134  ;;  %v8770_v13 = vpack.c.bf16 %v11876_v52, %v11875_v56 }
0x28fc   : > { %v11879_v35 = vpop.permute.xlu0 %11878  ;;  %v8744_v32 = vsel %vm4182_vm6, %v12135_v37, 0.0 }
0x28fd   : > { %8745 = vadd.xlane.f32.xlu0 %v8744_v32  ;;  %10992 = vmatpush3.bf16.msra.mxu0 %v8770_v13  ;;  %v11881_v36 = vunpack.i.h.bf16 %v11879_v35  ;;  %v11880_v40 = vunpack.i.l.bf16 %v11879_v35 }
0x28fe   : > { %10993 = vmatprep.subr.bf16.mxu0 %v13362_v47 }
0x28ff   : > { %v12137_v28 = vpop.eup %12136  ;;  %v8774_v6 = vpack.c.bf16 %v11881_v36, %v11880_v40 }
0x2900   : > { %v11884_v55 = vpop.permute.xlu0 %11883  ;;  %v8747_v30 = vsel %vm4182_vm6, %v12137_v28, 0.0 }
0x2901   : > { %v11886_v34 = vunpack.i.h.bf16 %v11884_v55  ;;  %v11885_v29 = vunpack.i.l.bf16 %v11884_v55  ;;  %8748 = vadd.xlane.f32.xlu1 %v8747_v30 }
0x2903   : > { %v8771_v22 = vpack.c.bf16 %v11886_v34, %v11885_v29 }
0x2904   : > { %v11889_v42 = vpop.permute.xlu0 %11888 }
0x2905   : > { %10994 = vmatpush3.bf16.msra.mxu0 %v8771_v22  ;;  %v11891_v31 = vunpack.i.h.bf16 %v11889_v42  ;;  %v11890_v8 = vunpack.i.l.bf16 %v11889_v42 }
0x2906   : > { %10995 = vmatprep.subr.bf16.mxu0 %v13362_v47 }
0x2912   : > { %11893 = vrot.lane.b32.xlu1 %v15882_v58, %s16240_s1 }
0x2913   : > { %11898 = vrot.lane.b32.xlu0 %v15882_v58, %s16242_s3 }
0x2917   : > { %11903 = vrot.lane.b32.xlu0 %v15880_v4, %s16240_s1 }
0x291b   : > { %11908 = vrot.lane.b32.xlu0 %v15880_v4, %s16242_s3  ;;  %v8775_v4 = vpack.c.bf16 %v11891_v31, %v11890_v8  ;;  %s9863_s3 = sshll.u32 %s16273_s28, 3 }
0x291c   : > { %s2838_s1 = scalar_lea.vmem %s13773_s21, %s9863_s3 }
0x2955   : > { %v8743_v61 = vpop.xlane.xlu0 %8742 }
0x2956   : > { %12138 = vrcp.f32 %v8743_v61 }
0x2960   : > { %v12139_v41 = vpop.eup %12138 }
0x2961   : > { %v8755_v15 = vmul.f32 %v12139_v41, %v12131_v3  ;;  %v10026_v41 = vld [vmem:[#allocation18] ss:$0 sm:$0xff] }
0x2963   : > { %v8759_v24 = vpack.c.bf16 %v8755_v15, %v8755_v15 }
0x2965   : > { %10988 = vmatmul.mubr.msk.bf16.vlgmr.msra.gmra.mrb[160].mxu1 %vm4182_vm6, %v8759_v24 }
0x2966   : > { %11004 = vmatpush3.bf16.msra.mxu1 %v8774_v6  ;;  %11011 = vmatprep.mubr.msk.bf16.mxu1 %vm13363_vm9, %v13362_v47 }
0x2967   : > { %11005 = vmatprep.subr.bf16.mxu1 %v13362_v47 }
0x296a   : > { %11006 = vmatpush3.bf16.msra.mxu1 %v8775_v4 }
0x296b   : > { %11007 = vmatprep.subr.bf16.mxu1 %v13362_v47 }
0x298a   : > { %v8746_v58 = vpop.xlane.xlu0 %8745 }
0x298b   : > { %12140 = vrcp.f32 %v8746_v58 }
0x298e   : > { %v8749_v23 = vpop.xlane.xlu1 %8748  ;;  %v11899_v12 = vpop.permute.xlu0 %11898 }
0x298f   : > { %12142 = vrcp.f32 %v8749_v23  ;;  %v11901_v46 = vunpack.i.h.bf16 %v11899_v12  ;;  %v11900_v49 = vunpack.i.l.bf16 %v11899_v12 }
0x2991   : > { %v8776_v10 = vpack.c.bf16 %v11901_v46, %v11900_v49 }
0x2992   : > { %v11894_v51 = vpop.permute.xlu1 %11893  ;;  %v11904_v19 = vpop.permute.xlu0 %11903 }
0x2993   : > { %v11896_v62 = vunpack.i.h.bf16 %v11894_v51  ;;  %v11895_v1 = vunpack.i.l.bf16 %v11894_v51  ;;  %11008 = vmatpush3.bf16.msra.mxu1 %v8776_v10  ;;  %v11906_v14 = vunpack.i.h.bf16 %v11904_v19  ;;  %v11905_v20 = vunpack.i.l.bf16 %v11904_v19 }
0x2994   : > { %11009 = vmatprep.subr.bf16.mxu1 %v13362_v47 }
0x2995   : > { %v12141_v21 = vpop.eup %12140  ;;  %v8772_v18 = vpack.c.bf16 %v11896_v62, %v11895_v1  ;;  %v8773_v44 = vpack.c.bf16 %v11906_v14, %v11905_v20 }
0x2996   : > { %v11909_v53 = vpop.permute.xlu0 %11908  ;;  %v8756_v60 = vmul.f32 %v12141_v21, %v12135_v37 }
0x2997   : > { %v11911_v26 = vunpack.i.h.bf16 %v11909_v53  ;;  %v11910_v39 = vunpack.i.l.bf16 %v11909_v53  ;;  %10996 = vmatpush3.bf16.msra.mxu0 %v8772_v18 }
0x2998   : > { %10997 = vmatprep.subr.bf16.mxu0 %v13362_v47  ;;  %v8760_v3 = vpack.c.bf16 %v8756_v60, %v8756_v60 }
0x2999   : > { %v12143_v5 = vpop.eup %12142  ;;  %v8777_v2 = vpack.c.bf16 %v11911_v26, %v11910_v39 }
0x299a   : > { %v8757_v48 = vmul.f32 %v12143_v5, %v12137_v28 }
0x299b   : > { %10998 = vmatpush3.bf16.msra.mxu0 %v8773_v44  ;;  %11010 = vmatpush3.bf16.msra.mxu1 %v8777_v2  ;;  %v10028_v44 = vld [vmem:[#allocation30] ss:$0 sm:$0xff] }
0x299c   : > { %v8761_v57 = vpack.c.bf16 %v8757_v48, %v8757_v48  ;;  %11015 = vmatprep.subr.bf16.mxu0 %v13362_v47  ;;  %11023 = vmatprep.subr.bf16.mxu1 %v13362_v47  ;;  %v10029_v48 = vld [vmem:[#allocation28] ss:$0 sm:$0xff] }
0x299e   : > { %11000 = vmatmul.mubr.msk.bf16.vlgmr.msra.gmra.mrb[168].mxu0 %vm4182_vm6, %v8760_v3  ;;  %11012 = vmatmul.mubr.msk.bf16.vlgmr.msra.gmra.mrb[164].mxu1 %vm4182_vm6, %v8761_v57 }
0x299f   : > { %11019 = vmatprep.mubr.msk.bf16.mxu0 %vm13363_vm9, %v13362_v47  ;;  %11027 = vmatprep.mubr.msk.bf16.mxu1 %vm13363_vm9, %v13362_v47 }
0x29a0   : > { %11016 = vmatpush3.bf16.msra.mxu0 %v8966_v43 }
0x29a1   : > { %11017 = vmatprep.subr.bf16.mxu0 %v13362_v47 }
0x29a4   : > { %11018 = vmatpush3.bf16.msra.mxu0 %v8967_v27 }
0x29a5   : > { %11031 = vmatprep.subr.bf16.mxu0 %v13362_v47 }
0x29c5   : > { %v8815_v63 = vpop.f32.mrb[164].mxu0 }
0x29c6   : > { %v10977_v16 = vpop.f32.mrb[165].mxu0 }
0x29c7   : > { %v8818_v9 = vpop.f32.mrb[166].mxu0 }
0x29c8   : > { %v10978_v38 = vpop.f32.mrb[167].mxu0 }
0x2a38   : > { %v8858_v7 = vpop.f32.mrb[160].mxu1 }
0x2a39   : > { %8951 = vrot.lane.b32.xlu0 %v8858_v7, %s16244_s7  ;;  %v10989_v11 = vpop.f32.mrb[161].mxu1  ;;  %v10030_v7 = vld [vmem:[#allocation22] ss:$0 sm:$0xff]  ;;  %s16270_s7 = sld [smem:[#allocation86_spill]] }
0x2a3a   : > { %v8861_v33 = vpop.f32.mrb[162].mxu1 }
0x2a3b   : > { %v10990_v59 = vpop.f32.mrb[163].mxu1 }
0x2a71   : > { %v8901_v17 = vpop.f32.mrb[168].mxu0  ;;  %v8944_v52 = vpop.f32.mrb[164].mxu1 }
0x2a72   : > { %8959 = vrot.lane.b32.xlu1 %v8944_v52, %s16246_s9  ;;  %v11013_v56 = vpop.f32.mrb[165].mxu1  ;;  %8955 = vrot.lane.b32.xlu0 %v8901_v17, %s16245_s8  ;;  %v11001_v37 = vpop.f32.mrb[169].mxu0  ;;  %s16268_s9 = sld [smem:[#allocation117_spill]]  ;;  %s16269_s8 = sld [smem:[#allocation119_spill]]  ;;  %v10032_v52 = vld [vmem:[#allocation24] ss:$0 sm:$0xff] }
0x2a73   : > { %v8904_v13 = vpop.f32.mrb[170].mxu0  ;;  %v8947_v35 = vpop.f32.mrb[166].mxu1 }
0x2a74   : > { %v11002_v32 = vpop.f32.mrb[171].mxu0  ;;  %v11014_v28 = vpop.f32.mrb[167].mxu1 }
0x2a78   : > { %v2928_v49 = vld [vmem:[%s16268_s9] sm:$0xff]  ;;  %v2929_v10 = vld [vmem:[%s16268_s9 + $0x8] sm:$0xff]  ;;  %v2930_v19 = vld [vmem:[%s16268_s9 + $0x10] sm:$0xff] }
0x2a79   : > { %v9046_v51 = vpack.c.bf16 %v2929_v10, %v2928_v49  ;;  %v2933_v1 = vld [vmem:[%s16269_s8] sm:$0xff]  ;;  %v2934_v21 = vld [vmem:[%s16269_s8 + $0x8] sm:$0xff]  ;;  %v2935_v18 = vld [vmem:[%s16269_s8 + $0x10] sm:$0xff] }
0x2a7a   : > { %v9099_v14 = vpack.c.bf16 %v2934_v21, %v2933_v1  ;;  %v2936_v20 = vld [vmem:[%s16269_s8 + $0x18] sm:$0xff]  ;;  %v2937_v16 = vld [vmem:[%s16269_s8 + $0x20] sm:$0xff]  ;;  %v2938_v9 = vld [vmem:[%s16269_s8 + $0x28] sm:$0xff] }
0x2a7b   : > { %11024 = vmatpush3.bf16.msra.mxu1 %v9046_v51  ;;  %v9100_v53 = vpack.c.bf16 %v2936_v20, %v2935_v18  ;;  %v9101_v38 = vpack.c.bf16 %v2938_v9, %v2937_v16  ;;  %v2939_v54 = vld [vmem:[%s16269_s8 + $0x30] sm:$0xff]  ;;  %v2940_v0 = vld [vmem:[%s16269_s8 + $0x38] sm:$0xff]  ;;  %v2843_v10 = vld [vmem:[%s16270_s7] sm:$0xff] }
0x2a7c   : > { %11025 = vmatprep.subr.bf16.mxu1 %v13362_v47  ;;  %v9102_v43 = vpack.c.bf16 %v2940_v0, %v2939_v54  ;;  %v2844_v51 = vld [vmem:[%s16270_s7 + $0x8] sm:$0xff] }
0x2aab   : > { %v8952_v55 = vpop.permute.xlu0 %8951 }
0x2aac   : > { %v8962_v30 = vsel %vm3142_vm4, %v8815_v63, %v8952_v55 }
0x2ae4   : > { %v8960_v34 = vpop.permute.xlu1 %8959  ;;  %v8956_v29 = vpop.permute.xlu0 %8955 }
0x2ae5   : > { %v8963_v22 = vsel %vm4979_vm7, %v8962_v30, %v8956_v29 }
0x2ae6   : > { %v8964_v42 = vsel %vm4988_vm8, %v8963_v22, %v8960_v34 }
0x2ae7   : > { %v8965_v61 = vpack.c.bf16 %v8964_v42, %v8964_v42 }
0x2ae9   : > { %11020 = vmatmul.mubr.msk.bf16.vlgmr.msra.gmra.mrb[172].mxu0 %vm3244_vm5, %v8965_v61 }
0x2aea   : > { %11039 = vmatprep.mubr.msk.bf16.mxu0 %vm13363_vm9, %v13362_v47  ;;  %11032 = vmatpush3.bf16.msra.mxu0 %v9099_v14 }
0x2aeb   : > { %11033 = vmatprep.subr.bf16.mxu0 %v13362_v47 }
0x2aee   : > { %11034 = vmatpush3.bf16.msra.mxu0 %v9100_v53  ;;  %v10036_v53 = vld [vmem:[#allocation42] ss:$0 sm:$0xff] }
0x2aef   : > { %11035 = vmatprep.subr.bf16.mxu0 %v13362_v47 }
0x2af2   : > { %11036 = vmatpush3.bf16.msra.mxu0 %v9101_v38 }
0x2af3   : > { %11037 = vmatprep.subr.bf16.mxu0 %v13362_v47 }
0x2af6   : > { %11038 = vmatpush3.bf16.msra.mxu0 %v9102_v43 }
0x2bbc   : > { %v9011_v36 = vpop.f32.mrb[172].mxu0 }
0x2bbd   : > { %v9012_v40 = vadd.f32 %v10026_v41, %v9011_v36  ;;  %v11021_v15 = vpop.f32.mrb[173].mxu0 }
0x2bbe   : > { %v9014_v24 = vpop.f32.mrb[174].mxu0  ;;  %v10034_v15 = vld [vmem:[#allocation33] ss:$0 sm:$0xff] }
0x2bbf   : > { %v9017_v6 = vadd.f32 %v9012_v40, %v15831_v45  ;;  %v11022_v31 = vpop.f32.mrb[175].mxu0  ;;  %v2931_v45 = vld [vmem:[%s16268_s9 + $0x18] sm:$0xff] }
0x2bc0   : > { %v9047_v62 = vpack.c.bf16 %v2931_v45, %v2930_v19  ;;  %v9208_v19 = vpack.c.bf16 %v2844_v51, %v2843_v10  ;;  %v2845_v45 = vld [vmem:[%s16270_s7 + $0x10] sm:$0xff] }
0x2bc1   : > { %v9018_v8 = vsel %vm3244_vm5, %v9017_v6, 0.0 }
0x2bc2   : > { %9019 = vadd.xlane.f32.xlu0 %v9018_v8  ;;  %11026 = vmatpush3.bf16.msra.mxu1 %v9047_v62  ;;  %v2846_v62 = vld [vmem:[%s16270_s7 + $0x18] sm:$0xff] }
0x2bc3   : > { %11043 = vmatprep.subr.bf16.mxu1 %v13362_v47  ;;  %v9209_v1 = vpack.c.bf16 %v2846_v62, %v2845_v45 }
0x2c4f   : > { %v9020_v4 = vpop.xlane.xlu0 %9019 }
0x2c50   : > { %v9021_v58 = vmul.f32 0.03125, %v9020_v4 }
0x2c52   : > { %v9022_v23 = vsub.f32 %v9017_v6, %v9021_v58  ;;  %v10035_v6 = vld [vmem:[#allocation31] ss:$0 sm:$0xff] }
0x2c54   : > { %v9023_v12 = vmul.f32 %v9022_v23, %v9022_v23 }
0x2c56   : > { %v9024_v46 = vsel %vm3244_vm5, %v9023_v12, 0.0 }
0x2c57   : > { %9025 = vadd.xlane.f32.xlu1 %v9024_v46 }
0x2ce4   : > { %v9026_v26 = vpop.xlane.xlu1 %9025 }
0x2ce5   : > { %v9027_v39 = vmul.f32 0.03125, %v9026_v26 }
0x2ce7   : > { %v9028_v60 = vadd.f32 1e-05, %v9027_v39  ;;  %v10037_v39 = vld [vmem:[#allocation40] ss:$0 sm:$0xff] }
0x2ce9   : > { %12144 = vrsqrt.f32 %v9028_v60 }
0x2cf3   : > { %v12145_v5 = vpop.eup %12144 }
0x2cf4   : > { %v9030_v2 = vmul.f32 %v12145_v5, %v9022_v23 }
0x2cf6   : > { %v9037_v3 = vmul.f32 %v10028_v44, %v9030_v2  ;;  %v10038_v2 = vld [vmem:[%s16271_s2] ss:$0 sm:$0xff] }
0x2cf8   : > { %v9044_v57 = vadd.f32 %v10029_v48, %v9037_v3 }
0x2cfa   : > { %v9045_v63 = vpack.c.bf16 %v9044_v57, %v9044_v57 }
0x2cfc   : > { %11028 = vmatmul.mubr.msk.bf16.vlgmr.msra.gmra.mrb[168].mxu1 %vm3244_vm5, %v9045_v63 }
0x2cfd   : > { %11047 = vmatprep.mubr.msk.bf16.mxu1 %vm13363_vm9, %v13362_v47  ;;  %11044 = vmatpush3.bf16.msra.mxu1 %v9208_v19 }
0x2cfe   : > { %11045 = vmatprep.subr.bf16.mxu1 %v13362_v47 }
0x2d01   : > { %11046 = vmatpush3.bf16.msra.mxu1 %v9209_v1 }
0x2dcf   : > { %v9091_v11 = vpop.f32.mrb[168].mxu1 }
0x2dd0   : > { %v9092_v33 = vadd.f32 %v10030_v7, %v9091_v11  ;;  %v11029_v59 = vpop.f32.mrb[169].mxu1 }
0x2dd1   : > { %v9094_v50 = vpop.f32.mrb[170].mxu1 }
0x2dd2   : > { %v9097_v25 = vmax.f32 %v9092_v33, 0.0  ;;  %v11030_v27 = vpop.f32.mrb[171].mxu1 }
0x2dd4   : > { %v9098_v17 = vpack.c.bf16 %v9097_v25, %v9097_v25 }
0x2dd6   : > { %11040 = vmatmul.mubr.msk.bf16.vlgmr.msra.gmra.mrb[176].mxu0 %vm4182_vm6, %v9098_v17 }
0x2ea9   : > { %v9146_v56 = vpop.f32.mrb[176].mxu0 }
0x2eaa   : > { %v9147_v37 = vadd.f32 %v10032_v52, %v9146_v56  ;;  %v11041_v13 = vpop.f32.mrb[177].mxu0 }
0x2eab   : > { %v9149_v35 = vpop.f32.mrb[178].mxu0 }
0x2eac   : > { %v9152_v32 = vadd.f32 %v9147_v37, %v9044_v57  ;;  %v11042_v28 = vpop.f32.mrb[179].mxu0 }
0x2eae   : > { %v9153_v55 = vsel %vm3244_vm5, %v9152_v32, 0.0 }
0x2eaf   : > { %9154 = vadd.xlane.f32.xlu0 %v9153_v55 }
0x2f3c   : > { %v9155_v30 = vpop.xlane.xlu0 %9154 }
0x2f3d   : > { %v9156_v34 = vmul.f32 0.03125, %v9155_v30 }
0x2f3f   : > { %v9157_v29 = vsub.f32 %v9152_v32, %v9156_v34 }
0x2f41   : > { %v9158_v22 = vmul.f32 %v9157_v29, %v9157_v29 }
0x2f43   : > { %v9159_v42 = vsel %vm3244_vm5, %v9158_v22, 0.0 }
0x2f44   : > { %9160 = vadd.xlane.f32.xlu0 %v9159_v42 }
0x2fd1   : > { %v9161_v61 = vpop.xlane.xlu0 %9160 }
0x2fd2   : > { %v9162_v41 = vmul.f32 0.03125, %v9161_v61 }
0x2fd4   : > { %v9163_v36 = vadd.f32 1e-05, %v9162_v41 }
0x2fd6   : > { %12146 = vrsqrt.f32 %v9163_v36 }
0x2fe0   : > { %v12147_v40 = vpop.eup %12146 }
0x2fe1   : > { %v9165_v24 = vmul.f32 %v12147_v40, %v9157_v29 }
0x2fe3   : > { %v9172_v31 = vmul.f32 %v10034_v15, %v9165_v24 }
0x2fe5   : > { %v9179_v8 = vadd.f32 %v10035_v6, %v9172_v31 }
0x2fe7   : > { %v9180_v4 = vsel %vm3244_vm5, %v9179_v8, 0.0 }
0x2fe8   : > { %9181 = vadd.xlane.f32.xlu1 %v9180_v4 }
0x3075   : > { %v9182_v58 = vpop.xlane.xlu1 %9181 }
0x3076   : > { %v9183_v23 = vmul.f32 0.03125, %v9182_v58 }
0x3078   : > { %v9184_v12 = vsub.f32 %v9179_v8, %v9183_v23 }
0x307a   : > { %v9185_v46 = vmul.f32 %v9184_v12, %v9184_v12 }
0x307c   : > { %v9186_v49 = vsel %vm3244_vm5, %v9185_v46, 0.0 }
0x307d   : > { %9187 = vadd.xlane.f32.xlu0 %v9186_v49 }
0x310a   : > { %v9188_v21 = vpop.xlane.xlu0 %9187 }
0x310b   : > { %v9189_v18 = vmul.f32 0.03125, %v9188_v21 }
0x310d   : > { %v9190_v14 = vadd.f32 1e-05, %v9189_v18 }
0x310f   : > { %12148 = vrsqrt.f32 %v9190_v14 }
0x3119   : > { %v12149_v20 = vpop.eup %12148 }
0x311a   : > { %v9192_v26 = vmul.f32 %v12149_v20, %v9184_v12 }
0x311c   : > { %v9199_v60 = vmul.f32 %v10036_v53, %v9192_v26 }
0x311e   : > { %v9206_v5 = vadd.f32 %v10037_v39, %v9199_v60 }
0x3120   : > { %v9207_v44 = vpack.c.bf16 %v9206_v5, %v9206_v5 }
0x3122   : > { %11048 = vmatmul.mubr.msk.bf16.vlgmr.msra.gmra.mrb[172].mxu1 %vm3244_vm5, %v9207_v44 }
0x31f5   : > { %v9253_v48 = vpop.f32.mrb[172].mxu1 }
0x31f6   : > { %v9254_v47 = vadd.f32 %v10038_v2, %v9253_v48  ;;  %v11049_v3 = vpop.f32.mrb[173].mxu1 }
0x31f7   : > { %v9256_v57 = vpop.f32.mrb[174].mxu1 }
0x31f8   : > { %9259 = vst.msk [vmem:[%s2838_s1] sm:$0xff] %vm3038_vm2, %v9254_v47  ;;  %v11050_v63 = vpop.f32.mrb[175].mxu1 }
0x31f9 PF: > { %s191_s0 = sadd.s32 1, %s13235_s0  }
0x31fa   : > { %p188_p3 = scmp.ge.s32.totalorder %s191_s0, 4  }
0x31fc   :  { %190 = sbr.rel (!%p188_p3) target bundleno = 173 (0xad), region = 609 }
0x3203   :  { %9279 = vsyncpa [#allocation3], 1 }
0x3204   :  { %9281 = vsyncpa [#allocation3 + $0x1], 1 }
0x3205   :  { %9282 = vsyncpa [#allocation5], 1 }
0x3206   :  { %9283 = vsyncpa [#allocation8], 1 }
0x3207   :  { %9284 = vsyncpa [#allocation11], 1 }
0x3208   :  { %9285 = vsyncpa [#allocation14], 1 }
0x3209   :  { %9286 = vsyncpa [#allocation17], 1 }
0x320a   :  { %9287 = vsyncpa [#allocation20], 1 }
0x320b   :  { %9288 = vsyncpa [#allocation23], 1 }
0x320c   :  { %9289 = vsyncpa [#allocation26], 1 }
0x320d   :  { %9290 = vsyncpa [#allocation29], 1 }
0x320e   :  { %9291 = vsyncpa [#allocation32], 1 }
0x320f   :  { %9292 = vsyncpa [#allocation35], 1 }
0x3210   :  { %9293 = vsyncpa [#allocation38], 1 }
0x3211   :  { %9294 = vsyncpa [#allocation41], 1 }
0x3212   :  { %9295 = vsyncpa [#allocation44], 1 }
0x3213   :  { %9296 = vsyncpa [#allocation47], 1 }
0x3214   :  { %9297 = vsyncpa [#allocation50], 1 }
0x3215   :  { %9298 = vsyncpa [#allocation53], 1 }
0x3216   :  { %9299 = vsyncpa [#allocation56], 1 }
0x3217   :  { %9300 = vsyncpa [#allocation59], 1 }

</bundles_post_ra>
